<compile_context>
chip_gen: v6e
topology: v6e:2x2x1
jax: 0.10.0
libtpu: 0.0.40
codegen_flags: <defaults>
</compile_context>

<pallas_src>
import functools

import jax
import jax.numpy as jnp
import numpy as np
from jax.experimental import pallas as pl
from jax.experimental.pallas import tpu as pltpu

BF16 = jnp.bfloat16
F32 = jnp.float32
LANE = 128


# ----------------------------------------------------------------------------
# Small helpers
# ----------------------------------------------------------------------------
def _round_up(x, m):
    return (x + m - 1) // m * m


def _cparams(ndims, vmem_limit_bytes=None):
    return pltpu.CompilerParams(
        dimension_semantics=("parallel",) * ndims,
        vmem_limit_bytes=vmem_limit_bytes)


def _pick_rows(h_out, w_out, target_tokens):
    """Largest row block (multiple of 8, or the full extent) with <= target tokens."""
    cands = [d for d in range(8, h_out + 1, 8) if h_out % d == 0]
    fit = [d for d in cands if d * w_out <= target_tokens]
    if fit:
        return max(fit)
    if cands:
        return min(cands)
    return h_out


def _plan_tokens(mtot, target=512):
    """Token row-block size and (possibly padded) row count for the merge kernels."""
    for bm in (512, 256, 128, 64, 32, 16, 8):
        if bm <= target and mtot >= bm and mtot % bm == 0:
            return bm, mtot
    bm = min(target, _round_up(mtot, 8))
    return bm, _round_up(mtot, bm)


def _pad_rows(x, rows):
    if x.shape[0] == rows:
        return x
    return jnp.pad(x, ((0, rows - x.shape[0]), (0, 0)))


# ----------------------------------------------------------------------------
# Bilinear x2 (align_corners=True) separable factors
# ----------------------------------------------------------------------------
def _bilinear_src(j, n_in, n_out):
    if n_out <= 1 or n_in <= 1:
        return 0, 0.0
    src = j * (n_in - 1) / (n_out - 1)
    i0 = min(int(np.floor(src)), max(n_in - 2, 0))
    return i0, float(src - i0)


def _row_matrix(n_in):
    """(2*n_in, n_in) bilinear x2 align_corners=True row-interpolation matrix."""
    n_out = 2 * n_in
    m = np.zeros((n_out, n_in), np.float32)
    for j in range(n_out):
        i0, f = _bilinear_src(j, n_in, n_out)
        m[j, i0] += 1.0 - f
        m[j, min(i0 + 1, n_in - 1)] += f
    return m


def _col_taps(n_in):
    """Static (index, frac) 2-tap lerp per output column for bilinear x2."""
    n_out = 2 * n_in
    return tuple(_bilinear_src(j, n_in, n_out) for j in range(n_out))


# ----------------------------------------------------------------------------
# Pallas kernel bodies
# ----------------------------------------------------------------------------
def _conv3x3s2_kernel(p_ee, p_eo, p_oe, p_oo, w_ref, b_ref, o_ref):
    """3x3 / stride-2 / pad-1 conv, one output row-block of one image.

    p_xy : (1, Ho+1, Wo+1, cp) bf16 phase planes x[r::2, c::2] with one zero row/col
           prepended (covers the pad-1 halo; bottom/right pad is never read).
    w_ref: (9*cp, cp) bf16 -- the 9 taps K-stacked, each tap in (cin, cout) order.
    o_ref: (1, bho*Wo, cp) bf16 token block.
    """
    _, s_blk, cp = o_ref.shape
    wo = p_ee.shape[2] - 1
    bho = s_blk // wo
    r0 = pl.multiple_of(pl.program_id(1) * bho, bho)
    phase = ((p_ee, p_eo), (p_oe, p_oo))
    # kernel offset k in {0,1,2} -> (phase index, slice start in the padded plane)
    sel = ((1, 0), (0, 1), (1, 1))
    taps = []
    for kh in range(3):
        rph, rs = sel[kh]
        for kw in range(3):
            cph, cs = sel[kw]
            t = phase[rph][cph][0, pl.ds(r0 + rs, bho), pl.ds(cs, wo), :]
            taps.append(t.reshape(s_blk, cp))
    x9 = jnp.concatenate(taps, axis=-1)                       # (s_blk, 9*cp) bf16
    acc = jnp.dot(x9, w_ref[...], preferred_element_type=F32)  # one K=9*cp MXU dot
    o_ref[0] = (acc + b_ref[...]).astype(o_ref.dtype)


def _upsample2x_pair_kernel(x_ref, y_ref, uh_ref, ox_ref, oy_ref, *, col_taps, cp):
    """Separable bilinear x2 (align_corners=True) of two same-shape maps.

    x_ref/y_ref: (1, H_in, W_in*cp) bf16 image-major slabs (full per image).
    uh_ref     : (bh, H_in) bf16 row-interpolation block.
    ox/oy      : (1, bh, W_out*cp) bf16 output row blocks.
    Row stage = small MXU matmul; column stage = static 2-tap lerp over cp-wide
    lane blocks (VPU), so no dense (S_out, S_in) matrix is ever materialised.
    """
    uh = uh_ref[...]

    def up(img_ref, out_ref):
        rows = jnp.dot(uh, img_ref[0], preferred_element_type=F32)  # (bh, W_in*cp)
        cols = []
        for (k, f) in col_taps:
            left = rows[:, k * cp:(k + 1) * cp]
            if f == 0.0:
                cols.append(left)
            else:
                right = rows[:, (k + 1) * cp:(k + 2) * cp]
                cols.append(left + f * (right - left))
        out_ref[0] = jnp.concatenate(cols, axis=-1).astype(out_ref.dtype)

    up(x_ref, ox_ref)
    up(y_ref, oy_ref)


def _merge_l3_kernel(xm_ref, xc_ref, w1_ref, b1_ref, w2_ref, b2_ref, o_ref):
    """feat_l3 = fc_l3(cat([feat_m_l3, feat_co_l3])) -- concat fused as one K=2cp dot."""
    x = jnp.concatenate([xm_ref[...], xc_ref[...]], axis=-1)   # (bm, 2cp) bf16
    h = jnp.dot(x, w1_ref[...], preferred_element_type=F32) + b1_ref[...]
    h = jnp.maximum(h, 0.0).astype(BF16)
    y = jnp.dot(h, w2_ref[...], preferred_element_type=F32) + b2_ref[...]
    o_ref[...] = y.astype(o_ref.dtype)


def _merge_res_kernel(xm_ref, xc_ref, res_ref, w1_ref, b1_ref, w2_ref, b2_ref,
                      o_ref):
    """feat_lX = fc_lX(cat([up(feat_m), feat_co])) + up(feat_l{X+1}) (inputs pre-upsampled)."""
    x = jnp.concatenate([xm_ref[...], xc_ref[...]], axis=-1)
    h = jnp.dot(x, w1_ref[...], preferred_element_type=F32) + b1_ref[...]
    h = jnp.maximum(h, 0.0).astype(BF16)
    y = (jnp.dot(h, w2_ref[...], preferred_element_type=F32) + b2_ref[...]
         + res_ref[...].astype(F32))
    o_ref[...] = y.astype(o_ref.dtype)


def _merge_res_fc_kernel(xm_ref, xc_ref, res_ref, w1_ref, b1_ref, w2_ref, b2_ref,
                         fcw_ref, fcb_ref, o_ref):
    """feat_out = fc( fc_l1(cat([up(m_l2), co_l1])) + up(feat_l2) ), f32 output."""
    x = jnp.concatenate([xm_ref[...], xc_ref[...]], axis=-1)
    h = jnp.dot(x, w1_ref[...], preferred_element_type=F32) + b1_ref[...]
    h = jnp.maximum(h, 0.0).astype(BF16)
    l1 = (jnp.dot(h, w2_ref[...], preferred_element_type=F32) + b2_ref[...]
          + res_ref[...].astype(F32))
    y = (jnp.dot(l1.astype(BF16), fcw_ref[...], preferred_element_type=F32)
         + fcb_ref[...])
    o_ref[...] = y.astype(o_ref.dtype)


# ----------------------------------------------------------------------------
# Kernel wrappers
# ----------------------------------------------------------------------------
def conv3x3_s2(x, w9, bias):
    """x: (N, H, W, cp) bf16 -> (N, (H//2)*(W//2), cp) bf16 token layout."""
    n, h, w, cp = x.shape
    ho, wo = h // 2, w // 2
    # TODO(synk): stride-2 phase split + halo pad still happen in XLA (one extra bf16
    # pass over the conv input); in-kernel extraction needs strided VMEM slicing.
    planes = []
    for ph in range(2):
        for pw in range(2):
            p = x[:, ph::2, pw::2, :]
            planes.append(jnp.pad(p, ((0, 0), (1, 0), (1, 0), (0, 0))))
    bho = _pick_rows(ho, wo, target_tokens=1024)
    plane_spec = pl.BlockSpec((1, ho + 1, wo + 1, cp), lambda i, r: (i, 0, 0, 0))
    return pl.pallas_call(
        _conv3x3s2_kernel,
        out_shape=jax.ShapeDtypeStruct((n, ho * wo, cp), BF16),
        grid=(n, ho // bho),
        in_specs=[plane_spec, plane_spec, plane_spec, plane_spec,
                  pl.BlockSpec((9 * cp, cp), lambda i, r: (0, 0)),
                  pl.BlockSpec((1, cp), lambda i, r: (0, 0))],
        out_specs=pl.BlockSpec((1, bho * wo, cp), lambda i, r: (i, r, 0)),
        compiler_params=_cparams(2, vmem_limit_bytes=64 * 1024 * 1024),
    )(planes[0], planes[1], planes[2], planes[3], w9, bias)


def upsample2x_pair(x_img, y_img, uh, col_taps, cp):
    """Bilinear x2 (align_corners=True) of two maps in (N, H_in, W_in*cp) layout."""
    n, h_in, wincp = x_img.shape
    h_out = uh.shape[0]
    w_out = len(col_taps)
    bh = _pick_rows(h_out, w_out, target_tokens=2048)
    img_spec = pl.BlockSpec((1, h_in, wincp), lambda i, r: (i, 0, 0))
    out_spec = pl.BlockSpec((1, bh, w_out * cp), lambda i, r: (i, r, 0))
    kern = functools.partial(_upsample2x_pair_kernel, col_taps=col_taps, cp=cp)
    return pl.pallas_call(
        kern,
        out_shape=(jax.ShapeDtypeStruct((n, h_out, w_out * cp), BF16),
                   jax.ShapeDtypeStruct((n, h_out, w_out * cp), BF16)),
        grid=(n, h_out // bh),
        in_specs=[img_spec, img_spec,
                  pl.BlockSpec((bh, h_in), lambda i, r: (r, 0))],
        out_specs=(out_spec, out_spec),
        compiler_params=_cparams(2),
    )(x_img, y_img, uh)


def merge_l3(m3, co3, w1, b1, w2, b2):
    mtot, cp = m3.shape
    bm, mpad = _plan_tokens(mtot)
    tok = pl.BlockSpec((bm, cp), lambda i: (i, 0))
    y = pl.pallas_call(
        _merge_l3_kernel,
        out_shape=jax.ShapeDtypeStruct((mpad, cp), BF16),
        grid=(mpad // bm,),
        in_specs=[tok, tok,
                  pl.BlockSpec((2 * cp, cp), lambda i: (0, 0)),
                  pl.BlockSpec((1, cp), lambda i: (0, 0)),
                  pl.BlockSpec((cp, cp), lambda i: (0, 0)),
                  pl.BlockSpec((1, cp), lambda i: (0, 0))],
        out_specs=tok,
        compiler_params=_cparams(1),
    )(_pad_rows(m3, mpad), _pad_rows(co3, mpad), w1, b1, w2, b2)
    return y[:mtot]


def merge_l2(m2, co2, res, w1, b1, w2, b2):
    mtot, cp = m2.shape
    bm, mpad = _plan_tokens(mtot)
    tok = pl.BlockSpec((bm, cp), lambda i: (i, 0))
    y = pl.pallas_call(
        _merge_res_kernel,
        out_shape=jax.ShapeDtypeStruct((mpad, cp), BF16),
        grid=(mpad // bm,),
        in_specs=[tok, tok, tok,
                  pl.BlockSpec((2 * cp, cp), lambda i: (0, 0)),
                  pl.BlockSpec((1, cp), lambda i: (0, 0)),
                  pl.BlockSpec((cp, cp), lambda i: (0, 0)),
                  pl.BlockSpec((1, cp), lambda i: (0, 0))],
        out_specs=tok,
        compiler_params=_cparams(1),
    )(_pad_rows(m2, mpad), _pad_rows(co2, mpad), _pad_rows(res, mpad),
      w1, b1, w2, b2)
    return y[:mtot]


def merge_l1_fc(m1, co1, res, w1, b1, w2, b2, fcw, fcb):
    mtot, cp = m1.shape
    bm, mpad = _plan_tokens(mtot)
    tok = pl.BlockSpec((bm, cp), lambda i: (i, 0))
    y = pl.pallas_call(
        _merge_res_fc_kernel,
        out_shape=jax.ShapeDtypeStruct((mpad, cp), F32),
        grid=(mpad // bm,),
        in_specs=[tok, tok, tok,
                  pl.BlockSpec((2 * cp, cp), lambda i: (0, 0)),
                  pl.BlockSpec((1, cp), lambda i: (0, 0)),
                  pl.BlockSpec((cp, cp), lambda i: (0, 0)),
                  pl.BlockSpec((1, cp), lambda i: (0, 0)),
                  pl.BlockSpec((cp, cp), lambda i: (0, 0)),
                  pl.BlockSpec((1, cp), lambda i: (0, 0))],
        out_specs=tok,
        compiler_params=_cparams(1),
    )(_pad_rows(m1, mpad), _pad_rows(co1, mpad), _pad_rows(res, mpad),
      w1, b1, w2, b2, fcw, fcb)
    return y[:mtot]


# ----------------------------------------------------------------------------
# Parameters (PyTorch layouts) and one-time conversion to kernel layouts
# ----------------------------------------------------------------------------
def init_params(key, d_model):
    c = d_model
    ks = list(jax.random.split(key, 18))

    def nrm(k, shape, scale=0.1):
        return scale * jax.random.normal(k, shape, dtype=F32)

    return {
        "ds1_w": nrm(ks[0], (c, c, 3, 3)), "ds1_b": nrm(ks[1], (c,)),
        "ds2_w": nrm(ks[2], (c, c, 3, 3)), "ds2_b": nrm(ks[3], (c,)),
        "l1_w1": nrm(ks[4], (c, 2 * c, 1, 1)), "l1_b1": nrm(ks[5], (c,)),
        "l1_w2": nrm(ks[6], (c, c, 1, 1)), "l1_b2": nrm(ks[7], (c,)),
        "l2_w1": nrm(ks[8], (c, 2 * c, 1, 1)), "l2_b1": nrm(ks[9], (c,)),
        "l2_w2": nrm(ks[10], (c, c, 1, 1)), "l2_b2": nrm(ks[11], (c,)),
        "l3_w1": nrm(ks[12], (c, 2 * c, 1, 1)), "l3_b1": nrm(ks[13], (c,)),
        "l3_w2": nrm(ks[14], (c, c, 1, 1)), "l3_b2": nrm(ks[15], (c,)),
        "fc_w": nrm(ks[16], (c, c, 1, 1)), "fc_b": nrm(ks[17], (c,)),
    }


def _prep_conv3x3(w, b, cp):
    """PyTorch (Cout, Cin, 3, 3) -> K-stacked (9*cp, cp) bf16, tap-major, (cin,cout)."""
    cout, cin = w.shape[0], w.shape[1]
    wt = jnp.transpose(w, (2, 3, 1, 0)).reshape(9, cin, cout)
    wt = jnp.pad(wt, ((0, 0), (0, cp - cin), (0, cp - cout)))
    return (wt.reshape(9 * cp, cp).astype(BF16),
            jnp.pad(b, (0, cp - cout)).reshape(1, cp))


def _prep_1x1(w, b, cp):
    """PyTorch (Cout, Cin, 1, 1) -> (cp, cp) bf16 in (cin, cout) order."""
    cout, cin = w.shape[0], w.shape[1]
    wt = jnp.pad(jnp.transpose(w[:, :, 0, 0], (1, 0)),
                 ((0, cp - cin), (0, cp - cout)))
    return wt.astype(BF16), jnp.pad(b, (0, cp - cout)).reshape(1, cp)


def _prep_fc_block(w1, b1, w2, b2, c, cp):
    """Split the 2C->C 1x1 conv into the (feat_m, feat_co) halves, K-stacked (2cp, cp)."""
    w1t = jnp.transpose(w1[:, :, 0, 0], (1, 0))               # (2C, C)
    w1m = jnp.pad(w1t[:c], ((0, cp - c), (0, cp - c)))
    w1c = jnp.pad(w1t[c:], ((0, cp - c), (0, cp - c)))
    w1s = jnp.concatenate([w1m, w1c], axis=0).astype(BF16)    # (2cp, cp)
    b1p = jnp.pad(b1, (0, cp - c)).reshape(1, cp)
    w2p, b2p = _prep_1x1(w2, b2, cp)
    return w1s, b1p, w2p, b2p


def prepare_params(params, d_model, hm):
    """One-time weight re-layout + upsample row matrices (kept out of the jitted fwd)."""
    c = d_model
    cp = _round_up(c, LANE)
    out = {}
    out["ds1_w"], out["ds1_b"] = _prep_conv3x3(params["ds1_w"], params["ds1_b"], cp)
    out["ds2_w"], out["ds2_b"] = _prep_conv3x3(params["ds2_w"], params["ds2_b"], cp)
    for lvl in ("l1", "l2", "l3"):
        w1, b1, w2, b2 = _prep_fc_block(params[f"{lvl}_w1"], params[f"{lvl}_b1"],
                                        params[f"{lvl}_w2"], params[f"{lvl}_b2"],
                                        c, cp)
        out[f"{lvl}_w1"], out[f"{lvl}_b1"] = w1, b1
        out[f"{lvl}_w2"], out[f"{lvl}_b2"] = w2, b2
    out["fc_w"], out["fc_b"] = _prep_1x1(params["fc_w"], params["fc_b"], cp)
    out["uh32"] = jnp.asarray(_row_matrix(hm), dtype=BF16)        # level 3 -> 2 rows
    out["uh21"] = jnp.asarray(_row_matrix(2 * hm), dtype=BF16)    # level 2 -> 1 rows
    return out


# ----------------------------------------------------------------------------
# MergeModule forward (ds_diff_cm == 2)
# ----------------------------------------------------------------------------
@jax.jit
def merge_module_forward(prepped, feat_co, feat_m):
    """feat_co: (B, T, C, HC, WC) f32, feat_m: (B, T, C, HM, WM) f32, HC = 4*HM."""
    bsz, tlen, c, hc, wc = feat_co.shape
    hm, wm = feat_m.shape[3], feat_m.shape[4]
    assert hc == 4 * hm and wc == 4 * wm, "ds_diff_cm == 2 requires HC = 4 * HM"
    n = bsz * tlen
    cp = _round_up(c, LANE)
    s3, s2, s1 = hm * wm, 4 * hm * wm, hc * wc

    # one layout change at entry: NCHW -> NHWC, channel pad to cp, bf16 storage
    co_img = jnp.transpose(feat_co.reshape(n, c, hc, wc), (0, 2, 3, 1))
    m_img = jnp.transpose(feat_m.reshape(n, c, hm, wm), (0, 2, 3, 1))
    co_img = jnp.pad(co_img, ((0, 0), (0, 0), (0, 0), (0, cp - c))).astype(BF16)
    m_img = jnp.pad(m_img, ((0, 0), (0, 0), (0, 0), (0, cp - c))).astype(BF16)

    p = prepped
    taps_w2 = _col_taps(wm)        # static column lerp taps, level 3 -> 2
    taps_w1 = _col_taps(2 * wm)    # static column lerp taps, level 2 -> 1

    # feat_co branch: two stride-2 3x3 convs (Pallas, K-stacked taps, no HBM im2col)
    co1_tok = co_img.reshape(n * s1, cp)
    co2_tok = conv3x3_s2(co_img, p["ds1_w"], p["ds1_b"])                 # (n, s2, cp)
    co3_tok = conv3x3_s2(co2_tok.reshape(n, hc // 2, wc // 2, cp),
                         p["ds2_w"], p["ds2_b"])                          # (n, s3, cp)

    # level 3: fused concat + MLP
    m3_tok = m_img.reshape(n * s3, cp)
    l3_tok = merge_l3(m3_tok, co3_tok.reshape(n * s3, cp),
                      p["l3_w1"], p["l3_b1"], p["l3_w2"], p["l3_b2"])

    # separable bilinear x2 upsample, level 3 -> 2 (feat_m and feat_l3 together)
    m3_im = m_img.reshape(n, hm, wm * cp)
    l3_im = l3_tok.reshape(n, hm, wm * cp)
    m2_im, l3u_im = upsample2x_pair(m3_im, l3_im, p["uh32"], taps_w2, cp)

    # level 2: fused concat + MLP + residual
    l2_tok = merge_l2(m2_im.reshape(n * s2, cp), co2_tok.reshape(n * s2, cp),
                      l3u_im.reshape(n * s2, cp),
                      p["l2_w1"], p["l2_b1"], p["l2_w2"], p["l2_b2"])

    # separable bilinear x2 upsample, level 2 -> 1 (feat_m_l2 and feat_l2 together)
    l2_im = l2_tok.reshape(n, 2 * hm, 2 * wm * cp)
    m1_im, l2u_im = upsample2x_pair(m2_im, l2_im, p["uh21"], taps_w1, cp)

    # level 1: fused concat + MLP + residual + final 1x1 conv (f32 output)
    out_tok = merge_l1_fc(m1_im.reshape(n * s1, cp), co1_tok,
                          l2u_im.reshape(n * s1, cp),
                          p["l1_w1"], p["l1_b1"], p["l1_w2"], p["l1_b2"],
                          p["fc_w"], p["fc_b"])

    # one layout change at exit
    out = out_tok.reshape(n, hc, wc, cp)[..., :c]
    out = jnp.transpose(out, (0, 3, 1, 2)).reshape(bsz, tlen, c, hc, wc)
    return out


if __name__ == "__main__":
    B, T, C = 2, 2, 8
    HM = WM = 4
    HC = WC = 4 * HM  # ds_diff_cm == 2

    key = jax.random.PRNGKey(0)
    k_p, k_co, k_m = jax.random.split(key, 3)
    params = init_params(k_p, C)
    prepped = prepare_params(params, C, HM)
    feat_co = jax.random.normal(k_co, (B, T, C, HC, WC), dtype=jnp.float32)
    feat_m = jax.random.normal(k_m, (B, T, C, HM, WM), dtype=jnp.float32)

    out = merge_module_forward(prepped, feat_co, feat_m)
    jax.block_until_ready(out)
    assert out.shape == (B, T, C, HC, WC)
    print("KERNEL_OK")
</pallas_src>

<mosaic_0001>
module attributes {stable_mosaic.version = 11 : i64} {
  func.func @_conv3x3s2_kernel(%arg0: i32, %arg1: i32, %arg2: memref<1x9x9x128xbf16, #tpu.memory_space<vmem>>, %arg3: memref<1x9x9x128xbf16, #tpu.memory_space<vmem>>, %arg4: memref<1x9x9x128xbf16, #tpu.memory_space<vmem>>, %arg5: memref<1x9x9x128xbf16, #tpu.memory_space<vmem>>, %arg6: memref<1152x128xbf16, #tpu.memory_space<vmem>>, %arg7: memref<1x128xf32, #tpu.memory_space<vmem>>, %arg8: memref<1x64x128xbf16, #tpu.memory_space<vmem>>) attributes {dimension_semantics = [#tpu.dimension_semantics<parallel>, #tpu.dimension_semantics<parallel>], iteration_bounds = array<i64: 4, 1>, scalar_prefetch = 0 : i64, scratch_operands = 0 : i64, tpu.core_type = #tpu.core_type<tc>, window_params = [{transform_indices = @transform_0, window_bounds = array<i64: 1, 9, 9, 128>}, {transform_indices = @transform_1, window_bounds = array<i64: 1, 9, 9, 128>}, {transform_indices = @transform_2, window_bounds = array<i64: 1, 9, 9, 128>}, {transform_indices = @transform_3, window_bounds = array<i64: 1, 9, 9, 128>}, {pipeline_mode = #tpu.pipeline_mode<synchronous>, transform_indices = @transform_4, window_bounds = array<i64: 1152, 128>}, {pipeline_mode = #tpu.pipeline_mode<synchronous>, transform_indices = @transform_5, window_bounds = array<i64: 1, 128>}, {transform_indices = @transform_6, window_bounds = array<i64: 1, 64, 128>}]} {
    %c8_i32 = arith.constant 8 : i32
    %0 = arith.muli %arg1, %c8_i32 : i32
    %1 = tpu.assume_multiple %0, 8 : i32
    %c0_i32 = arith.constant 0 : i32
    %2 = arith.addi %1, %c0_i32 : i32
    %c0 = arith.constant 0 : index
    %3 = arith.index_cast %2 : i32 to index
    %c0_0 = arith.constant 0 : index
    %c0_1 = arith.constant 0 : index
    %4 = vector.load %arg5[%c0, %3, %c0_0, %c0_1] : memref<1x9x9x128xbf16, #tpu.memory_space<vmem>>, vector<1x8x8x128xbf16>
    %5 = vector.shape_cast %4 : vector<1x8x8x128xbf16> to vector<8x8x128xbf16>
    %6 = vector.shape_cast %5 : vector<8x8x128xbf16> to vector<64x128xbf16>
    %c0_i32_2 = arith.constant 0 : i32
    %7 = arith.addi %1, %c0_i32_2 : i32
    %c0_3 = arith.constant 0 : index
    %8 = arith.index_cast %7 : i32 to index
    %c1 = arith.constant 1 : index
    %c0_4 = arith.constant 0 : index
    %9 = vector.load %arg4[%c0_3, %8, %c1, %c0_4] : memref<1x9x9x128xbf16, #tpu.memory_space<vmem>>, vector<1x8x8x128xbf16>
    %10 = vector.shape_cast %9 : vector<1x8x8x128xbf16> to vector<8x8x128xbf16>
    %11 = vector.shape_cast %10 : vector<8x8x128xbf16> to vector<64x128xbf16>
    %c0_i32_5 = arith.constant 0 : i32
    %12 = arith.addi %1, %c0_i32_5 : i32
    %c0_6 = arith.constant 0 : index
    %13 = arith.index_cast %12 : i32 to index
    %c1_7 = arith.constant 1 : index
    %c0_8 = arith.constant 0 : index
    %14 = vector.load %arg5[%c0_6, %13, %c1_7, %c0_8] : memref<1x9x9x128xbf16, #tpu.memory_space<vmem>>, vector<1x8x8x128xbf16>
    %15 = vector.shape_cast %14 : vector<1x8x8x128xbf16> to vector<8x8x128xbf16>
    %16 = vector.shape_cast %15 : vector<8x8x128xbf16> to vector<64x128xbf16>
    %c1_i32 = arith.constant 1 : i32
    %17 = arith.addi %1, %c1_i32 : i32
    %c0_9 = arith.constant 0 : index
    %18 = arith.index_cast %17 : i32 to index
    %c0_10 = arith.constant 0 : index
    %c0_11 = arith.constant 0 : index
    %19 = vector.load %arg3[%c0_9, %18, %c0_10, %c0_11] : memref<1x9x9x128xbf16, #tpu.memory_space<vmem>>, vector<1x8x8x128xbf16>
    %20 = vector.shape_cast %19 : vector<1x8x8x128xbf16> to vector<8x8x128xbf16>
    %21 = vector.shape_cast %20 : vector<8x8x128xbf16> to vector<64x128xbf16>
    %c1_i32_12 = arith.constant 1 : i32
    %22 = arith.addi %1, %c1_i32_12 : i32
    %c0_13 = arith.constant 0 : index
    %23 = arith.index_cast %22 : i32 to index
    %c1_14 = arith.constant 1 : index
    %c0_15 = arith.constant 0 : index
    %24 = vector.load %arg2[%c0_13, %23, %c1_14, %c0_15] : memref<1x9x9x128xbf16, #tpu.memory_space<vmem>>, vector<1x8x8x128xbf16>
    %25 = vector.shape_cast %24 : vector<1x8x8x128xbf16> to vector<8x8x128xbf16>
    %26 = vector.shape_cast %25 : vector<8x8x128xbf16> to vector<64x128xbf16>
    %c1_i32_16 = arith.constant 1 : i32
    %27 = arith.addi %1, %c1_i32_16 : i32
    %c0_17 = arith.constant 0 : index
    %28 = arith.index_cast %27 : i32 to index
    %c1_18 = arith.constant 1 : index
    %c0_19 = arith.constant 0 : index
    %29 = vector.load %arg3[%c0_17, %28, %c1_18, %c0_19] : memref<1x9x9x128xbf16, #tpu.memory_space<vmem>>, vector<1x8x8x128xbf16>
    %30 = vector.shape_cast %29 : vector<1x8x8x128xbf16> to vector<8x8x128xbf16>
    %31 = vector.shape_cast %30 : vector<8x8x128xbf16> to vector<64x128xbf16>
    %c1_i32_20 = arith.constant 1 : i32
    %32 = arith.addi %1, %c1_i32_20 : i32
    %c0_21 = arith.constant 0 : index
    %33 = arith.index_cast %32 : i32 to index
    %c0_22 = arith.constant 0 : index
    %c0_23 = arith.constant 0 : index
    %34 = vector.load %arg5[%c0_21, %33, %c0_22, %c0_23] : memref<1x9x9x128xbf16, #tpu.memory_space<vmem>>, vector<1x8x8x128xbf16>
    %35 = vector.shape_cast %34 : vector<1x8x8x128xbf16> to vector<8x8x128xbf16>
    %36 = vector.shape_cast %35 : vector<8x8x128xbf16> to vector<64x128xbf16>
    %c1_i32_24 = arith.constant 1 : i32
    %37 = arith.addi %1, %c1_i32_24 : i32
    %c0_25 = arith.constant 0 : index
    %38 = arith.index_cast %37 : i32 to index
    %c1_26 = arith.constant 1 : index
    %c0_27 = arith.constant 0 : index
    %39 = vector.load %arg4[%c0_25, %38, %c1_26, %c0_27] : memref<1x9x9x128xbf16, #tpu.memory_space<vmem>>, vector<1x8x8x128xbf16>
    %40 = vector.shape_cast %39 : vector<1x8x8x128xbf16> to vector<8x8x128xbf16>
    %41 = vector.shape_cast %40 : vector<8x8x128xbf16> to vector<64x128xbf16>
    %c1_i32_28 = arith.constant 1 : i32
    %42 = arith.addi %1, %c1_i32_28 : i32
    %c0_29 = arith.constant 0 : index
    %43 = arith.index_cast %42 : i32 to index
    %c1_30 = arith.constant 1 : index
    %c0_31 = arith.constant 0 : index
    %44 = vector.load %arg5[%c0_29, %43, %c1_30, %c0_31] : memref<1x9x9x128xbf16, #tpu.memory_space<vmem>>, vector<1x8x8x128xbf16>
    %45 = vector.shape_cast %44 : vector<1x8x8x128xbf16> to vector<8x8x128xbf16>
    %46 = vector.shape_cast %45 : vector<8x8x128xbf16> to vector<64x128xbf16>
    %47 = tpu.concatenate %6, %11, %16, %21, %26, %31, %36, %41, %46 in 1 : vector<64x128xbf16>, vector<64x128xbf16>, vector<64x128xbf16>, vector<64x128xbf16>, vector<64x128xbf16>, vector<64x128xbf16>, vector<64x128xbf16>, vector<64x128xbf16>, vector<64x128xbf16> -> vector<64x1152xbf16>
    %c0_32 = arith.constant 0 : index
    %c0_33 = arith.constant 0 : index
    %48 = vector.load %arg6[%c0_32, %c0_33] : memref<1152x128xbf16, #tpu.memory_space<vmem>>, vector<1152x128xbf16>
    %cst = arith.constant dense<0.000000e+00> : vector<64x128xf32>
    %49 = tpu.matmul %47, %48, %cst {dimension_numbers = #tpu.dot_dimension_numbers<[1], [0], [0], [1], [0, 0, 1, 1], [], []>} : vector<64x1152xbf16>, vector<1152x128xbf16>, vector<64x128xf32> -> vector<64x128xf32>
    %c0_34 = arith.constant 0 : index
    %c0_35 = arith.constant 0 : index
    %50 = vector.load %arg7[%c0_34, %c0_35] : memref<1x128xf32, #tpu.memory_space<vmem>>, vector<1x128xf32>
    %51 = vector.broadcast %50 : vector<1x128xf32> to vector<64x128xf32>
    %52 = arith.addf %49, %51 : vector<64x128xf32>
    %53 = arith.truncf %52 : vector<64x128xf32> to vector<64x128xbf16>
    %c0_36 = arith.constant 0 : index
    %c0_37 = arith.constant 0 : index
    %c0_38 = arith.constant 0 : index
    %54 = vector.load %arg8[%c0_36, %c0_37, %c0_38] : memref<1x64x128xbf16, #tpu.memory_space<vmem>>, vector<1x64x128xbf16>
    %55 = vector.shape_cast %54 : vector<1x64x128xbf16> to vector<64x128xbf16>
    %56 = vector.shape_cast %53 : vector<64x128xbf16> to vector<1x64x128xbf16>
    tpu.vector_store %arg8[%c0_36, %c0_37, %c0_38], %56 {strides = array<i32>} : memref<1x64x128xbf16, #tpu.memory_space<vmem>>, vector<1x64x128xbf16>,
    return
  }
  func.func @transform_0(%arg0: i32, %arg1: i32) -> (i32, i32, i32, i32) {
    %c0_i32 = arith.constant 0 : i32
    %c0_i32_0 = arith.constant 0 : i32
    %c0_i32_1 = arith.constant 0 : i32
    %c0_i32_2 = arith.constant 0 : i32
    return %arg0, %c0_i32, %c0_i32_0, %c0_i32_1 : i32, i32, i32, i32
  }
  func.func @transform_1(%arg0: i32, %arg1: i32) -> (i32, i32, i32, i32) {
    %c0_i32 = arith.constant 0 : i32
    %c0_i32_0 = arith.constant 0 : i32
    %c0_i32_1 = arith.constant 0 : i32
    %c0_i32_2 = arith.constant 0 : i32
    return %arg0, %c0_i32, %c0_i32_0, %c0_i32_1 : i32, i32, i32, i32
  }
  func.func @transform_2(%arg0: i32, %arg1: i32) -> (i32, i32, i32, i32) {
    %c0_i32 = arith.constant 0 : i32
    %c0_i32_0 = arith.constant 0 : i32
    %c0_i32_1 = arith.constant 0 : i32
    %c0_i32_2 = arith.constant 0 : i32
    return %arg0, %c0_i32, %c0_i32_0, %c0_i32_1 : i32, i32, i32, i32
  }
  func.func @transform_3(%arg0: i32, %arg1: i32) -> (i32, i32, i32, i32) {
    %c0_i32 = arith.constant 0 : i32
    %c0_i32_0 = arith.constant 0 : i32
    %c0_i32_1 = arith.constant 0 : i32
    %c0_i32_2 = arith.constant 0 : i32
    return %arg0, %c0_i32, %c0_i32_0, %c0_i32_1 : i32, i32, i32, i32
  }
  func.func @transform_4(%arg0: i32, %arg1: i32) -> (i32, i32) {
    %c0_i32 = arith.constant 0 : i32
    %c0_i32_0 = arith.constant 0 : i32
    %c0_i32_1 = arith.constant 0 : i32
    return %c0_i32, %c0_i32_0 : i32, i32
  }
  func.func @transform_5(%arg0: i32, %arg1: i32) -> (i32, i32) {
    %c0_i32 = arith.constant 0 : i32
    %c0_i32_0 = arith.constant 0 : i32
    %c0_i32_1 = arith.constant 0 : i32
    return %c0_i32, %c0_i32_0 : i32, i32
  }
  func.func @transform_6(%arg0: i32, %arg1: i32) -> (i32, i32, i32) {
    %c0_i32 = arith.constant 0 : i32
    %c0_i32_0 = arith.constant 0 : i32
    return %arg0, %arg1, %c0_i32 : i32, i32, i32
  }
}

module attributes {stable_mosaic.version = 11 : i64} {
  func.func @_conv3x3s2_kernel(%arg0: i32, %arg1: i32, %arg2: memref<1x5x5x128xbf16, #tpu.memory_space<vmem>>, %arg3: memref<1x5x5x128xbf16, #tpu.memory_space<vmem>>, %arg4: memref<1x5x5x128xbf16, #tpu.memory_space<vmem>>, %arg5: memref<1x5x5x128xbf16, #tpu.memory_space<vmem>>, %arg6: memref<1152x128xbf16, #tpu.memory_space<vmem>>, %arg7: memref<1x128xf32, #tpu.memory_space<vmem>>, %arg8: memref<1x16x128xbf16, #tpu.memory_space<vmem>>) attributes {dimension_semantics = [#tpu.dimension_semantics<parallel>, #tpu.dimension_semantics<parallel>], iteration_bounds = array<i64: 4, 1>, scalar_prefetch = 0 : i64, scratch_operands = 0 : i64, tpu.core_type = #tpu.core_type<tc>, window_params = [{transform_indices = @transform_0, window_bounds = array<i64: 1, 5, 5, 128>}, {transform_indices = @transform_1, window_bounds = array<i64: 1, 5, 5, 128>}, {transform_indices = @transform_2, window_bounds = array<i64: 1, 5, 5, 128>}, {transform_indices = @transform_3, window_bounds = array<i64: 1, 5, 5, 128>}, {pipeline_mode = #tpu.pipeline_mode<synchronous>, transform_indices = @transform_4, window_bounds = array<i64: 1152, 128>}, {pipeline_mode = #tpu.pipeline_mode<synchronous>, transform_indices = @transform_5, window_bounds = array<i64: 1, 128>}, {transform_indices = @transform_6, window_bounds = array<i64: 1, 16, 128>}]} {
    %c4_i32 = arith.constant 4 : i32
    %0 = arith.muli %arg1, %c4_i32 : i32
    %1 = tpu.assume_multiple %0, 4 : i32
    %c0_i32 = arith.constant 0 : i32
    %2 = arith.addi %1, %c0_i32 : i32
    %c0 = arith.constant 0 : index
    %3 = arith.index_cast %2 : i32 to index
    %c0_0 = arith.constant 0 : index
    %c0_1 = arith.constant 0 : index
    %4 = vector.load %arg5[%c0, %3, %c0_0, %c0_1] : memref<1x5x5x128xbf16, #tpu.memory_space<vmem>>, vector<1x4x4x128xbf16>
    %5 = vector.shape_cast %4 : vector<1x4x4x128xbf16> to vector<4x4x128xbf16>
    %6 = vector.shape_cast %5 : vector<4x4x128xbf16> to vector<16x128xbf16>
    %c0_i32_2 = arith.constant 0 : i32
    %7 = arith.addi %1, %c0_i32_2 : i32
    %c0_3 = arith.constant 0 : index
    %8 = arith.index_cast %7 : i32 to index
    %c1 = arith.constant 1 : index
    %c0_4 = arith.constant 0 : index
    %9 = vector.load %arg4[%c0_3, %8, %c1, %c0_4] : memref<1x5x5x128xbf16, #tpu.memory_space<vmem>>, vector<1x4x4x128xbf16>
    %10 = vector.shape_cast %9 : vector<1x4x4x128xbf16> to vector<4x4x128xbf16>
    %11 = vector.shape_cast %10 : vector<4x4x128xbf16> to vector<16x128xbf16>
    %c0_i32_5 = arith.constant 0 : i32
    %12 = arith.addi %1, %c0_i32_5 : i32
    %c0_6 = arith.constant 0 : index
    %13 = arith.index_cast %12 : i32 to index
    %c1_7 = arith.constant 1 : index
    %c0_8 = arith.constant 0 : index
    %14 = vector.load %arg5[%c0_6, %13, %c1_7, %c0_8] : memref<1x5x5x128xbf16, #tpu.memory_space<vmem>>, vector<1x4x4x128xbf16>
    %15 = vector.shape_cast %14 : vector<1x4x4x128xbf16> to vector<4x4x128xbf16>
    %16 = vector.shape_cast %15 : vector<4x4x128xbf16> to vector<16x128xbf16>
    %c1_i32 = arith.constant 1 : i32
    %17 = arith.addi %1, %c1_i32 : i32
    %c0_9 = arith.constant 0 : index
    %18 = arith.index_cast %17 : i32 to index
    %c0_10 = arith.constant 0 : index
    %c0_11 = arith.constant 0 : index
    %19 = vector.load %arg3[%c0_9, %18, %c0_10, %c0_11] : memref<1x5x5x128xbf16, #tpu.memory_space<vmem>>, vector<1x4x4x128xbf16>
    %20 = vector.shape_cast %19 : vector<1x4x4x128xbf16> to vector<4x4x128xbf16>
    %21 = vector.shape_cast %20 : vector<4x4x128xbf16> to vector<16x128xbf16>
    %c1_i32_12 = arith.constant 1 : i32
    %22 = arith.addi %1, %c1_i32_12 : i32
    %c0_13 = arith.constant 0 : index
    %23 = arith.index_cast %22 : i32 to index
    %c1_14 = arith.constant 1 : index
    %c0_15 = arith.constant 0 : index
    %24 = vector.load %arg2[%c0_13, %23, %c1_14, %c0_15] : memref<1x5x5x128xbf16, #tpu.memory_space<vmem>>, vector<1x4x4x128xbf16>
    %25 = vector.shape_cast %24 : vector<1x4x4x128xbf16> to vector<4x4x128xbf16>
    %26 = vector.shape_cast %25 : vector<4x4x128xbf16> to vector<16x128xbf16>
    %c1_i32_16 = arith.constant 1 : i32
    %27 = arith.addi %1, %c1_i32_16 : i32
    %c0_17 = arith.constant 0 : index
    %28 = arith.index_cast %27 : i32 to index
    %c1_18 = arith.constant 1 : index
    %c0_19 = arith.constant 0 : index
    %29 = vector.load %arg3[%c0_17, %28, %c1_18, %c0_19] : memref<1x5x5x128xbf16, #tpu.memory_space<vmem>>, vector<1x4x4x128xbf16>
    %30 = vector.shape_cast %29 : vector<1x4x4x128xbf16> to vector<4x4x128xbf16>
    %31 = vector.shape_cast %30 : vector<4x4x128xbf16> to vector<16x128xbf16>
    %c1_i32_20 = arith.constant 1 : i32
    %32 = arith.addi %1, %c1_i32_20 : i32
    %c0_21 = arith.constant 0 : index
    %33 = arith.index_cast %32 : i32 to index
    %c0_22 = arith.constant 0 : index
    %c0_23 = arith.constant 0 : index
    %34 = vector.load %arg5[%c0_21, %33, %c0_22, %c0_23] : memref<1x5x5x128xbf16, #tpu.memory_space<vmem>>, vector<1x4x4x128xbf16>
    %35 = vector.shape_cast %34 : vector<1x4x4x128xbf16> to vector<4x4x128xbf16>
    %36 = vector.shape_cast %35 : vector<4x4x128xbf16> to vector<16x128xbf16>
    %c1_i32_24 = arith.constant 1 : i32
    %37 = arith.addi %1, %c1_i32_24 : i32
    %c0_25 = arith.constant 0 : index
    %38 = arith.index_cast %37 : i32 to index
    %c1_26 = arith.constant 1 : index
    %c0_27 = arith.constant 0 : index
    %39 = vector.load %arg4[%c0_25, %38, %c1_26, %c0_27] : memref<1x5x5x128xbf16, #tpu.memory_space<vmem>>, vector<1x4x4x128xbf16>
    %40 = vector.shape_cast %39 : vector<1x4x4x128xbf16> to vector<4x4x128xbf16>
    %41 = vector.shape_cast %40 : vector<4x4x128xbf16> to vector<16x128xbf16>
    %c1_i32_28 = arith.constant 1 : i32
    %42 = arith.addi %1, %c1_i32_28 : i32
    %c0_29 = arith.constant 0 : index
    %43 = arith.index_cast %42 : i32 to index
    %c1_30 = arith.constant 1 : index
    %c0_31 = arith.constant 0 : index
    %44 = vector.load %arg5[%c0_29, %43, %c1_30, %c0_31] : memref<1x5x5x128xbf16, #tpu.memory_space<vmem>>, vector<1x4x4x128xbf16>
    %45 = vector.shape_cast %44 : vector<1x4x4x128xbf16> to vector<4x4x128xbf16>
    %46 = vector.shape_cast %45 : vector<4x4x128xbf16> to vector<16x128xbf16>
    %47 = tpu.concatenate %6, %11, %16, %21, %26, %31, %36, %41, %46 in 1 : vector<16x128xbf16>, vector<16x128xbf16>, vector<16x128xbf16>, vector<16x128xbf16>, vector<16x128xbf16>, vector<16x128xbf16>, vector<16x128xbf16>, vector<16x128xbf16>, vector<16x128xbf16> -> vector<16x1152xbf16>
    %c0_32 = arith.constant 0 : index
    %c0_33 = arith.constant 0 : index
    %48 = vector.load %arg6[%c0_32, %c0_33] : memref<1152x128xbf16, #tpu.memory_space<vmem>>, vector<1152x128xbf16>
    %cst = arith.constant dense<0.000000e+00> : vector<16x128xf32>
    %49 = tpu.matmul %47, %48, %cst {dimension_numbers = #tpu.dot_dimension_numbers<[1], [0], [0], [1], [0, 0, 1, 1], [], []>} : vector<16x1152xbf16>, vector<1152x128xbf16>, vector<16x128xf32> -> vector<16x128xf32>
    %c0_34 = arith.constant 0 : index
    %c0_35 = arith.constant 0 : index
    %50 = vector.load %arg7[%c0_34, %c0_35] : memref<1x128xf32, #tpu.memory_space<vmem>>, vector<1x128xf32>
    %51 = vector.broadcast %50 : vector<1x128xf32> to vector<16x128xf32>
    %52 = arith.addf %49, %51 : vector<16x128xf32>
    %53 = arith.truncf %52 : vector<16x128xf32> to vector<16x128xbf16>
    %c0_36 = arith.constant 0 : index
    %c0_37 = arith.constant 0 : index
    %c0_38 = arith.constant 0 : index
    %54 = vector.load %arg8[%c0_36, %c0_37, %c0_38] : memref<1x16x128xbf16, #tpu.memory_space<vmem>>, vector<1x16x128xbf16>
    %55 = vector.shape_cast %54 : vector<1x16x128xbf16> to vector<16x128xbf16>
    %56 = vector.shape_cast %53 : vector<16x128xbf16> to vector<1x16x128xbf16>
    tpu.vector_store %arg8[%c0_36, %c0_37, %c0_38], %56 {strides = array<i32>} : memref<1x16x128xbf16, #tpu.memory_space<vmem>>, vector<1x16x128xbf16>,
    return
  }
  func.func @transform_0(%arg0: i32, %arg1: i32) -> (i32, i32, i32, i32) {
    %c0_i32 = arith.constant 0 : i32
    %c0_i32_0 = arith.constant 0 : i32
    %c0_i32_1 = arith.constant 0 : i32
    %c0_i32_2 = arith.constant 0 : i32
    return %arg0, %c0_i32, %c0_i32_0, %c0_i32_1 : i32, i32, i32, i32
  }
  func.func @transform_1(%arg0: i32, %arg1: i32) -> (i32, i32, i32, i32) {
    %c0_i32 = arith.constant 0 : i32
    %c0_i32_0 = arith.constant 0 : i32
    %c0_i32_1 = arith.constant 0 : i32
    %c0_i32_2 = arith.constant 0 : i32
    return %arg0, %c0_i32, %c0_i32_0, %c0_i32_1 : i32, i32, i32, i32
  }
  func.func @transform_2(%arg0: i32, %arg1: i32) -> (i32, i32, i32, i32) {
    %c0_i32 = arith.constant 0 : i32
    %c0_i32_0 = arith.constant 0 : i32
    %c0_i32_1 = arith.constant 0 : i32
    %c0_i32_2 = arith.constant 0 : i32
    return %arg0, %c0_i32, %c0_i32_0, %c0_i32_1 : i32, i32, i32, i32
  }
  func.func @transform_3(%arg0: i32, %arg1: i32) -> (i32, i32, i32, i32) {
    %c0_i32 = arith.constant 0 : i32
    %c0_i32_0 = arith.constant 0 : i32
    %c0_i32_1 = arith.constant 0 : i32
    %c0_i32_2 = arith.constant 0 : i32
    return %arg0, %c0_i32, %c0_i32_0, %c0_i32_1 : i32, i32, i32, i32
  }
  func.func @transform_4(%arg0: i32, %arg1: i32) -> (i32, i32) {
    %c0_i32 = arith.constant 0 : i32
    %c0_i32_0 = arith.constant 0 : i32
    %c0_i32_1 = arith.constant 0 : i32
    return %c0_i32, %c0_i32_0 : i32, i32
  }
  func.func @transform_5(%arg0: i32, %arg1: i32) -> (i32, i32) {
    %c0_i32 = arith.constant 0 : i32
    %c0_i32_0 = arith.constant 0 : i32
    %c0_i32_1 = arith.constant 0 : i32
    return %c0_i32, %c0_i32_0 : i32, i32
  }
  func.func @transform_6(%arg0: i32, %arg1: i32) -> (i32, i32, i32) {
    %c0_i32 = arith.constant 0 : i32
    %c0_i32_0 = arith.constant 0 : i32
    return %arg0, %arg1, %c0_i32 : i32, i32, i32
  }
}

module attributes {stable_mosaic.version = 11 : i64} {
  func.func @_merge_l3_kernel(%arg0: i32, %arg1: memref<64x128xbf16, #tpu.memory_space<vmem>>, %arg2: memref<64x128xbf16, #tpu.memory_space<vmem>>, %arg3: memref<256x128xbf16, #tpu.memory_space<vmem>>, %arg4: memref<1x128xf32, #tpu.memory_space<vmem>>, %arg5: memref<128x128xbf16, #tpu.memory_space<vmem>>, %arg6: memref<1x128xf32, #tpu.memory_space<vmem>>, %arg7: memref<64x128xbf16, #tpu.memory_space<vmem>>) attributes {dimension_semantics = [#tpu.dimension_semantics<parallel>], iteration_bounds = array<i64: 1>, scalar_prefetch = 0 : i64, scratch_operands = 0 : i64, tpu.core_type = #tpu.core_type<tc>, window_params = [{transform_indices = @transform_0, window_bounds = array<i64: 64, 128>}, {transform_indices = @transform_1, window_bounds = array<i64: 64, 128>}, {pipeline_mode = #tpu.pipeline_mode<synchronous>, transform_indices = @transform_2, window_bounds = array<i64: 256, 128>}, {pipeline_mode = #tpu.pipeline_mode<synchronous>, transform_indices = @transform_3, window_bounds = array<i64: 1, 128>}, {pipeline_mode = #tpu.pipeline_mode<synchronous>, transform_indices = @transform_4, window_bounds = array<i64: 128, 128>}, {pipeline_mode = #tpu.pipeline_mode<synchronous>, transform_indices = @transform_5, window_bounds = array<i64: 1, 128>}, {transform_indices = @transform_6, window_bounds = array<i64: 64, 128>}]} {
    %c0 = arith.constant 0 : index
    %c0_0 = arith.constant 0 : index
    %0 = vector.load %arg1[%c0, %c0_0] : memref<64x128xbf16, #tpu.memory_space<vmem>>, vector<64x128xbf16>
    %c0_1 = arith.constant 0 : index
    %c0_2 = arith.constant 0 : index
    %1 = vector.load %arg2[%c0_1, %c0_2] : memref<64x128xbf16, #tpu.memory_space<vmem>>, vector<64x128xbf16>
    %2 = tpu.concatenate %0, %1 in 1 : vector<64x128xbf16>, vector<64x128xbf16> -> vector<64x256xbf16>
    %c0_3 = arith.constant 0 : index
    %c0_4 = arith.constant 0 : index
    %3 = vector.load %arg3[%c0_3, %c0_4] : memref<256x128xbf16, #tpu.memory_space<vmem>>, vector<256x128xbf16>
    %cst = arith.constant dense<0.000000e+00> : vector<64x128xf32>
    %4 = tpu.matmul %2, %3, %cst {dimension_numbers = #tpu.dot_dimension_numbers<[1], [0], [0], [1], [0, 0, 1, 1], [], []>} : vector<64x256xbf16>, vector<256x128xbf16>, vector<64x128xf32> -> vector<64x128xf32>
    %c0_5 = arith.constant 0 : index
    %c0_6 = arith.constant 0 : index
    %5 = vector.load %arg4[%c0_5, %c0_6] : memref<1x128xf32, #tpu.memory_space<vmem>>, vector<1x128xf32>
    %6 = vector.broadcast %5 : vector<1x128xf32> to vector<64x128xf32>
    %7 = arith.addf %4, %6 : vector<64x128xf32>
    %cst_7 = arith.constant 0.000000e+00 : f32
    %8 = vector.broadcast %cst_7 : f32 to vector<64x128xf32>
    %9 = arith.maximumf %7, %8 : vector<64x128xf32>
    %10 = arith.truncf %9 : vector<64x128xf32> to vector<64x128xbf16>
    %c0_8 = arith.constant 0 : index
    %c0_9 = arith.constant 0 : index
    %11 = vector.load %arg5[%c0_8, %c0_9] : memref<128x128xbf16, #tpu.memory_space<vmem>>, vector<128x128xbf16>
    %cst_10 = arith.constant dense<0.000000e+00> : vector<64x128xf32>
    %12 = tpu.matmul %10, %11, %cst_10 {dimension_numbers = #tpu.dot_dimension_numbers<[1], [0], [0], [1], [0, 0, 1, 1], [], []>} : vector<64x128xbf16>, vector<128x128xbf16>, vector<64x128xf32> -> vector<64x128xf32>
    %c0_11 = arith.constant 0 : index
    %c0_12 = arith.constant 0 : index
    %13 = vector.load %arg6[%c0_11, %c0_12] : memref<1x128xf32, #tpu.memory_space<vmem>>, vector<1x128xf32>
    %14 = vector.broadcast %13 : vector<1x128xf32> to vector<64x128xf32>
    %15 = arith.addf %12, %14 : vector<64x128xf32>
    %16 = arith.truncf %15 : vector<64x128xf32> to vector<64x128xbf16>
    %c0_13 = arith.constant 0 : index
    %c0_14 = arith.constant 0 : index
    %17 = vector.load %arg7[%c0_13, %c0_14] : memref<64x128xbf16, #tpu.memory_space<vmem>>, vector<64x128xbf16>
    tpu.vector_store %arg7[%c0_13, %c0_14], %16 {strides = array<i32>} : memref<64x128xbf16, #tpu.memory_space<vmem>>, vector<64x128xbf16>,
    return
  }
  func.func @transform_0(%arg0: i32) -> (i32, i32) {
    %c0_i32 = arith.constant 0 : i32
    %c0_i32_0 = arith.constant 0 : i32
    return %arg0, %c0_i32 : i32, i32
  }
  func.func @transform_1(%arg0: i32) -> (i32, i32) {
    %c0_i32 = arith.constant 0 : i32
    %c0_i32_0 = arith.constant 0 : i32
    return %arg0, %c0_i32 : i32, i32
  }
  func.func @transform_2(%arg0: i32) -> (i32, i32) {
    %c0_i32 = arith.constant 0 : i32
    %c0_i32_0 = arith.constant 0 : i32
    %c0_i32_1 = arith.constant 0 : i32
    return %c0_i32, %c0_i32_0 : i32, i32
  }
  func.func @transform_3(%arg0: i32) -> (i32, i32) {
    %c0_i32 = arith.constant 0 : i32
    %c0_i32_0 = arith.constant 0 : i32
    %c0_i32_1 = arith.constant 0 : i32
    return %c0_i32, %c0_i32_0 : i32, i32
  }
  func.func @transform_4(%arg0: i32) -> (i32, i32) {
    %c0_i32 = arith.constant 0 : i32
    %c0_i32_0 = arith.constant 0 : i32
    %c0_i32_1 = arith.constant 0 : i32
    return %c0_i32, %c0_i32_0 : i32, i32
  }
  func.func @transform_5(%arg0: i32) -> (i32, i32) {
    %c0_i32 = arith.constant 0 : i32
    %c0_i32_0 = arith.constant 0 : i32
    %c0_i32_1 = arith.constant 0 : i32
    return %c0_i32, %c0_i32_0 : i32, i32
  }
  func.func @transform_6(%arg0: i32) -> (i32, i32) {
    %c0_i32 = arith.constant 0 : i32
    %c0_i32_0 = arith.constant 0 : i32
    return %arg0, %c0_i32 : i32, i32
  }
}

module attributes {stable_mosaic.version = 11 : i64} {
  func.func @_upsample2x_pair_kernel(%arg0: i32, %arg1: i32, %arg2: memref<1x4x512xbf16, #tpu.memory_space<vmem>>, %arg3: memref<1x4x512xbf16, #tpu.memory_space<vmem>>, %arg4: memref<8x4xbf16, #tpu.memory_space<vmem>>, %arg5: memref<1x8x1024xbf16, #tpu.memory_space<vmem>>, %arg6: memref<1x8x1024xbf16, #tpu.memory_space<vmem>>) attributes {dimension_semantics = [#tpu.dimension_semantics<parallel>, #tpu.dimension_semantics<parallel>], iteration_bounds = array<i64: 4, 1>, scalar_prefetch = 0 : i64, scratch_operands = 0 : i64, tpu.core_type = #tpu.core_type<tc>, window_params = [{transform_indices = @transform_0, window_bounds = array<i64: 1, 4, 512>}, {transform_indices = @transform_1, window_bounds = array<i64: 1, 4, 512>}, {transform_indices = @transform_2, window_bounds = array<i64: 8, 4>}, {transform_indices = @transform_3, window_bounds = array<i64: 1, 8, 1024>}, {transform_indices = @transform_4, window_bounds = array<i64: 1, 8, 1024>}]} {
    %c0 = arith.constant 0 : index
    %c0_0 = arith.constant 0 : index
    %0 = vector.load %arg4[%c0, %c0_0] : memref<8x4xbf16, #tpu.memory_space<vmem>>, vector<8x4xbf16>
    %c0_1 = arith.constant 0 : index
    %c0_2 = arith.constant 0 : index
    %c0_3 = arith.constant 0 : index
    %1 = vector.load %arg2[%c0_1, %c0_2, %c0_3] : memref<1x4x512xbf16, #tpu.memory_space<vmem>>, vector<1x4x512xbf16>
    %2 = vector.shape_cast %1 : vector<1x4x512xbf16> to vector<4x512xbf16>
    %cst = arith.constant dense<0.000000e+00> : vector<8x512xf32>
    %3 = tpu.matmul %0, %2, %cst {dimension_numbers = #tpu.dot_dimension_numbers<[1], [0], [0], [1], [0, 0, 1, 1], [], []>} : vector<8x4xbf16>, vector<4x512xbf16>, vector<8x512xf32> -> vector<8x512xf32>
    %4 = vector.extract_strided_slice %3 {offsets = [0, 0], sizes = [8, 128], strides = [1, 1]} : vector<8x512xf32> to vector<8x128xf32>
    %5 = vector.extract_strided_slice %3 {offsets = [0, 0], sizes = [8, 128], strides = [1, 1]} : vector<8x512xf32> to vector<8x128xf32>
    %6 = vector.extract_strided_slice %3 {offsets = [0, 128], sizes = [8, 128], strides = [1, 1]} : vector<8x512xf32> to vector<8x128xf32>
    %7 = arith.subf %6, %5 : vector<8x128xf32>
    %cst_4 = arith.constant 0.428571433 : f32
    %8 = vector.broadcast %cst_4 : f32 to vector<8x128xf32>
    %9 = arith.mulf %8, %7 : vector<8x128xf32>
    %10 = arith.addf %5, %9 : vector<8x128xf32>
    %11 = vector.extract_strided_slice %3 {offsets = [0, 0], sizes = [8, 128], strides = [1, 1]} : vector<8x512xf32> to vector<8x128xf32>
    %12 = vector.extract_strided_slice %3 {offsets = [0, 128], sizes = [8, 128], strides = [1, 1]} : vector<8x512xf32> to vector<8x128xf32>
    %13 = arith.subf %12, %11 : vector<8x128xf32>
    %cst_5 = arith.constant 0.857142865 : f32
    %14 = vector.broadcast %cst_5 : f32 to vector<8x128xf32>
    %15 = arith.mulf %14, %13 : vector<8x128xf32>
    %16 = arith.addf %11, %15 : vector<8x128xf32>
    %17 = vector.extract_strided_slice %3 {offsets = [0, 128], sizes = [8, 128], strides = [1, 1]} : vector<8x512xf32> to vector<8x128xf32>
    %18 = vector.extract_strided_slice %3 {offsets = [0, 256], sizes = [8, 128], strides = [1, 1]} : vector<8x512xf32> to vector<8x128xf32>
    %19 = arith.subf %18, %17 : vector<8x128xf32>
    %cst_6 = arith.constant 0.285714298 : f32
    %20 = vector.broadcast %cst_6 : f32 to vector<8x128xf32>
    %21 = arith.mulf %20, %19 : vector<8x128xf32>
    %22 = arith.addf %17, %21 : vector<8x128xf32>
    %23 = vector.extract_strided_slice %3 {offsets = [0, 128], sizes = [8, 128], strides = [1, 1]} : vector<8x512xf32> to vector<8x128xf32>
    %24 = vector.extract_strided_slice %3 {offsets = [0, 256], sizes = [8, 128], strides = [1, 1]} : vector<8x512xf32> to vector<8x128xf32>
    %25 = arith.subf %24, %23 : vector<8x128xf32>
    %cst_7 = arith.constant 0.714285731 : f32
    %26 = vector.broadcast %cst_7 : f32 to vector<8x128xf32>
    %27 = arith.mulf %26, %25 : vector<8x128xf32>
    %28 = arith.addf %23, %27 : vector<8x128xf32>
    %29 = vector.extract_strided_slice %3 {offsets = [0, 256], sizes = [8, 128], strides = [1, 1]} : vector<8x512xf32> to vector<8x128xf32>
    %30 = vector.extract_strided_slice %3 {offsets = [0, 384], sizes = [8, 128], strides = [1, 1]} : vector<8x512xf32> to vector<8x128xf32>
    %31 = arith.subf %30, %29 : vector<8x128xf32>
    %cst_8 = arith.constant 0.142857149 : f32
    %32 = vector.broadcast %cst_8 : f32 to vector<8x128xf32>
    %33 = arith.mulf %32, %31 : vector<8x128xf32>
    %34 = arith.addf %29, %33 : vector<8x128xf32>
    %35 = vector.extract_strided_slice %3 {offsets = [0, 256], sizes = [8, 128], strides = [1, 1]} : vector<8x512xf32> to vector<8x128xf32>
    %36 = vector.extract_strided_slice %3 {offsets = [0, 384], sizes = [8, 128], strides = [1, 1]} : vector<8x512xf32> to vector<8x128xf32>
    %37 = arith.subf %36, %35 : vector<8x128xf32>
    %cst_9 = arith.constant 0.571428597 : f32
    %38 = vector.broadcast %cst_9 : f32 to vector<8x128xf32>
    %39 = arith.mulf %38, %37 : vector<8x128xf32>
    %40 = arith.addf %35, %39 : vector<8x128xf32>
    %41 = vector.extract_strided_slice %3 {offsets = [0, 256], sizes = [8, 128], strides = [1, 1]} : vector<8x512xf32> to vector<8x128xf32>
    %42 = vector.extract_strided_slice %3 {offsets = [0, 384], sizes = [8, 128], strides = [1, 1]} : vector<8x512xf32> to vector<8x128xf32>
    %43 = arith.subf %42, %41 : vector<8x128xf32>
    %cst_10 = arith.constant 1.000000e+00 : f32
    %44 = vector.broadcast %cst_10 : f32 to vector<8x128xf32>
    %45 = arith.mulf %44, %43 : vector<8x128xf32>
    %46 = arith.addf %41, %45 : vector<8x128xf32>
    %47 = tpu.concatenate %4, %10, %16, %22, %28, %34, %40, %46 in 1 : vector<8x128xf32>, vector<8x128xf32>, vector<8x128xf32>, vector<8x128xf32>, vector<8x128xf32>, vector<8x128xf32>, vector<8x128xf32>, vector<8x128xf32> -> vector<8x1024xf32>
    %48 = arith.truncf %47 : vector<8x1024xf32> to vector<8x1024xbf16>
    %c0_11 = arith.constant 0 : index
    %c0_12 = arith.constant 0 : index
    %c0_13 = arith.constant 0 : index
    %49 = vector.load %arg5[%c0_11, %c0_12, %c0_13] : memref<1x8x1024xbf16, #tpu.memory_space<vmem>>, vector<1x8x1024xbf16>
    %50 = vector.shape_cast %49 : vector<1x8x1024xbf16> to vector<8x1024xbf16>
    %51 = vector.shape_cast %48 : vector<8x1024xbf16> to vector<1x8x1024xbf16>
    tpu.vector_store %arg5[%c0_11, %c0_12, %c0_13], %51 {strides = array<i32>} : memref<1x8x1024xbf16, #tpu.memory_space<vmem>>, vector<1x8x1024xbf16>,
    %c0_14 = arith.constant 0 : index
    %c0_15 = arith.constant 0 : index
    %c0_16 = arith.constant 0 : index
    %52 = vector.load %arg3[%c0_14, %c0_15, %c0_16] : memref<1x4x512xbf16, #tpu.memory_space<vmem>>, vector<1x4x512xbf16>
    %53 = vector.shape_cast %52 : vector<1x4x512xbf16> to vector<4x512xbf16>
    %cst_17 = arith.constant dense<0.000000e+00> : vector<8x512xf32>
    %54 = tpu.matmul %0, %53, %cst_17 {dimension_numbers = #tpu.dot_dimension_numbers<[1], [0], [0], [1], [0, 0, 1, 1], [], []>} : vector<8x4xbf16>, vector<4x512xbf16>, vector<8x512xf32> -> vector<8x512xf32>
    %55 = vector.extract_strided_slice %54 {offsets = [0, 0], sizes = [8, 128], strides = [1, 1]} : vector<8x512xf32> to vector<8x128xf32>
    %56 = vector.extract_strided_slice %54 {offsets = [0, 0], sizes = [8, 128], strides = [1, 1]} : vector<8x512xf32> to vector<8x128xf32>
    %57 = vector.extract_strided_slice %54 {offsets = [0, 128], sizes = [8, 128], strides = [1, 1]} : vector<8x512xf32> to vector<8x128xf32>
    %58 = arith.subf %57, %56 : vector<8x128xf32>
    %cst_18 = arith.constant 0.428571433 : f32
    %59 = vector.broadcast %cst_18 : f32 to vector<8x128xf32>
    %60 = arith.mulf %59, %58 : vector<8x128xf32>
    %61 = arith.addf %56, %60 : vector<8x128xf32>
    %62 = vector.extract_strided_slice %54 {offsets = [0, 0], sizes = [8, 128], strides = [1, 1]} : vector<8x512xf32> to vector<8x128xf32>
    %63 = vector.extract_strided_slice %54 {offsets = [0, 128], sizes = [8, 128], strides = [1, 1]} : vector<8x512xf32> to vector<8x128xf32>
    %64 = arith.subf %63, %62 : vector<8x128xf32>
    %cst_19 = arith.constant 0.857142865 : f32
    %65 = vector.broadcast %cst_19 : f32 to vector<8x128xf32>
    %66 = arith.mulf %65, %64 : vector<8x128xf32>
    %67 = arith.addf %62, %66 : vector<8x128xf32>
    %68 = vector.extract_strided_slice %54 {offsets = [0, 128], sizes = [8, 128], strides = [1, 1]} : vector<8x512xf32> to vector<8x128xf32>
    %69 = vector.extract_strided_slice %54 {offsets = [0, 256], sizes = [8, 128], strides = [1, 1]} : vector<8x512xf32> to vector<8x128xf32>
    %70 = arith.subf %69, %68 : vector<8x128xf32>
    %cst_20 = arith.constant 0.285714298 : f32
    %71 = vector.broadcast %cst_20 : f32 to vector<8x128xf32>
    %72 = arith.mulf %71, %70 : vector<8x128xf32>
    %73 = arith.addf %68, %72 : vector<8x128xf32>
    %74 = vector.extract_strided_slice %54 {offsets = [0, 128], sizes = [8, 128], strides = [1, 1]} : vector<8x512xf32> to vector<8x128xf32>
    %75 = vector.extract_strided_slice %54 {offsets = [0, 256], sizes = [8, 128], strides = [1, 1]} : vector<8x512xf32> to vector<8x128xf32>
    %76 = arith.subf %75, %74 : vector<8x128xf32>
    %cst_21 = arith.constant 0.714285731 : f32
    %77 = vector.broadcast %cst_21 : f32 to vector<8x128xf32>
    %78 = arith.mulf %77, %76 : vector<8x128xf32>
    %79 = arith.addf %74, %78 : vector<8x128xf32>
    %80 = vector.extract_strided_slice %54 {offsets = [0, 256], sizes = [8, 128], strides = [1, 1]} : vector<8x512xf32> to vector<8x128xf32>
    %81 = vector.extract_strided_slice %54 {offsets = [0, 384], sizes = [8, 128], strides = [1, 1]} : vector<8x512xf32> to vector<8x128xf32>
    %82 = arith.subf %81, %80 : vector<8x128xf32>
    %cst_22 = arith.constant 0.142857149 : f32
    %83 = vector.broadcast %cst_22 : f32 to vector<8x128xf32>
    %84 = arith.mulf %83, %82 : vector<8x128xf32>
    %85 = arith.addf %80, %84 : vector<8x128xf32>
    %86 = vector.extract_strided_slice %54 {offsets = [0, 256], sizes = [8, 128], strides = [1, 1]} : vector<8x512xf32> to vector<8x128xf32>
    %87 = vector.extract_strided_slice %54 {offsets = [0, 384], sizes = [8, 128], strides = [1, 1]} : vector<8x512xf32> to vector<8x128xf32>
    %88 = arith.subf %87, %86 : vector<8x128xf32>
    %cst_23 = arith.constant 0.571428597 : f32
    %89 = vector.broadcast %cst_23 : f32 to vector<8x128xf32>
    %90 = arith.mulf %89, %88 : vector<8x128xf32>
    %91 = arith.addf %86, %90 : vector<8x128xf32>
    %92 = vector.extract_strided_slice %54 {offsets = [0, 256], sizes = [8, 128], strides = [1, 1]} : vector<8x512xf32> to vector<8x128xf32>
    %93 = vector.extract_strided_slice %54 {offsets = [0, 384], sizes = [8, 128], strides = [1, 1]} : vector<8x512xf32> to vector<8x128xf32>
    %94 = arith.subf %93, %92 : vector<8x128xf32>
    %cst_24 = arith.constant 1.000000e+00 : f32
    %95 = vector.broadcast %cst_24 : f32 to vector<8x128xf32>
    %96 = arith.mulf %95, %94 : vector<8x128xf32>
    %97 = arith.addf %92, %96 : vector<8x128xf32>
    %98 = tpu.concatenate %55, %61, %67, %73, %79, %85, %91, %97 in 1 : vector<8x128xf32>, vector<8x128xf32>, vector<8x128xf32>, vector<8x128xf32>, vector<8x128xf32>, vector<8x128xf32>, vector<8x128xf32>, vector<8x128xf32> -> vector<8x1024xf32>
    %99 = arith.truncf %98 : vector<8x1024xf32> to vector<8x1024xbf16>
    %c0_25 = arith.constant 0 : index
    %c0_26 = arith.constant 0 : index
    %c0_27 = arith.constant 0 : index
    %100 = vector.load %arg6[%c0_25, %c0_26, %c0_27] : memref<1x8x1024xbf16, #tpu.memory_space<vmem>>, vector<1x8x1024xbf16>
    %101 = vector.shape_cast %100 : vector<1x8x1024xbf16> to vector<8x1024xbf16>
    %102 = vector.shape_cast %99 : vector<8x1024xbf16> to vector<1x8x1024xbf16>
    tpu.vector_store %arg6[%c0_25, %c0_26, %c0_27], %102 {strides = array<i32>} : memref<1x8x1024xbf16, #tpu.memory_space<vmem>>, vector<1x8x1024xbf16>,
    return
  }
  func.func @transform_0(%arg0: i32, %arg1: i32) -> (i32, i32, i32) {
    %c0_i32 = arith.constant 0 : i32
    %c0_i32_0 = arith.constant 0 : i32
    %c0_i32_1 = arith.constant 0 : i32
    return %arg0, %c0_i32, %c0_i32_0 : i32, i32, i32
  }
  func.func @transform_1(%arg0: i32, %arg1: i32) -> (i32, i32, i32) {
    %c0_i32 = arith.constant 0 : i32
    %c0_i32_0 = arith.constant 0 : i32
    %c0_i32_1 = arith.constant 0 : i32
    return %arg0, %c0_i32, %c0_i32_0 : i32, i32, i32
  }
  func.func @transform_2(%arg0: i32, %arg1: i32) -> (i32, i32) {
    %c0_i32 = arith.constant 0 : i32
    %c0_i32_0 = arith.constant 0 : i32
    return %arg1, %c0_i32 : i32, i32
  }
  func.func @transform_3(%arg0: i32, %arg1: i32) -> (i32, i32, i32) {
    %c0_i32 = arith.constant 0 : i32
    %c0_i32_0 = arith.constant 0 : i32
    return %arg0, %arg1, %c0_i32 : i32, i32, i32
  }
  func.func @transform_4(%arg0: i32, %arg1: i32) -> (i32, i32, i32) {
    %c0_i32 = arith.constant 0 : i32
    %c0_i32_0 = arith.constant 0 : i32
    return %arg0, %arg1, %c0_i32 : i32, i32, i32
  }
}

module attributes {stable_mosaic.version = 11 : i64} {
  func.func @_merge_res_kernel(%arg0: i32, %arg1: memref<256x128xbf16, #tpu.memory_space<vmem>>, %arg2: memref<256x128xbf16, #tpu.memory_space<vmem>>, %arg3: memref<256x128xbf16, #tpu.memory_space<vmem>>, %arg4: memref<256x128xbf16, #tpu.memory_space<vmem>>, %arg5: memref<1x128xf32, #tpu.memory_space<vmem>>, %arg6: memref<128x128xbf16, #tpu.memory_space<vmem>>, %arg7: memref<1x128xf32, #tpu.memory_space<vmem>>, %arg8: memref<256x128xbf16, #tpu.memory_space<vmem>>) attributes {dimension_semantics = [#tpu.dimension_semantics<parallel>], iteration_bounds = array<i64: 1>, scalar_prefetch = 0 : i64, scratch_operands = 0 : i64, tpu.core_type = #tpu.core_type<tc>, window_params = [{transform_indices = @transform_0, window_bounds = array<i64: 256, 128>}, {transform_indices = @transform_1, window_bounds = array<i64: 256, 128>}, {transform_indices = @transform_2, window_bounds = array<i64: 256, 128>}, {pipeline_mode = #tpu.pipeline_mode<synchronous>, transform_indices = @transform_3, window_bounds = array<i64: 256, 128>}, {pipeline_mode = #tpu.pipeline_mode<synchronous>, transform_indices = @transform_4, window_bounds = array<i64: 1, 128>}, {pipeline_mode = #tpu.pipeline_mode<synchronous>, transform_indices = @transform_5, window_bounds = array<i64: 128, 128>}, {pipeline_mode = #tpu.pipeline_mode<synchronous>, transform_indices = @transform_6, window_bounds = array<i64: 1, 128>}, {transform_indices = @transform_7, window_bounds = array<i64: 256, 128>}]} {
    %c0 = arith.constant 0 : index
    %c0_0 = arith.constant 0 : index
    %0 = vector.load %arg1[%c0, %c0_0] : memref<256x128xbf16, #tpu.memory_space<vmem>>, vector<256x128xbf16>
    %c0_1 = arith.constant 0 : index
    %c0_2 = arith.constant 0 : index
    %1 = vector.load %arg2[%c0_1, %c0_2] : memref<256x128xbf16, #tpu.memory_space<vmem>>, vector<256x128xbf16>
    %2 = tpu.concatenate %0, %1 in 1 : vector<256x128xbf16>, vector<256x128xbf16> -> vector<256x256xbf16>
    %c0_3 = arith.constant 0 : index
    %c0_4 = arith.constant 0 : index
    %3 = vector.load %arg4[%c0_3, %c0_4] : memref<256x128xbf16, #tpu.memory_space<vmem>>, vector<256x128xbf16>
    %cst = arith.constant dense<0.000000e+00> : vector<256x128xf32>
    %4 = tpu.matmul %2, %3, %cst {dimension_numbers = #tpu.dot_dimension_numbers<[1], [0], [0], [1], [0, 0, 1, 1], [], []>} : vector<256x256xbf16>, vector<256x128xbf16>, vector<256x128xf32> -> vector<256x128xf32>
    %c0_5 = arith.constant 0 : index
    %c0_6 = arith.constant 0 : index
    %5 = vector.load %arg5[%c0_5, %c0_6] : memref<1x128xf32, #tpu.memory_space<vmem>>, vector<1x128xf32>
    %6 = vector.broadcast %5 : vector<1x128xf32> to vector<256x128xf32>
    %7 = arith.addf %4, %6 : vector<256x128xf32>
    %cst_7 = arith.constant 0.000000e+00 : f32
    %8 = vector.broadcast %cst_7 : f32 to vector<256x128xf32>
    %9 = arith.maximumf %7, %8 : vector<256x128xf32>
    %10 = arith.truncf %9 : vector<256x128xf32> to vector<256x128xbf16>
    %c0_8 = arith.constant 0 : index
    %c0_9 = arith.constant 0 : index
    %11 = vector.load %arg6[%c0_8, %c0_9] : memref<128x128xbf16, #tpu.memory_space<vmem>>, vector<128x128xbf16>
    %cst_10 = arith.constant dense<0.000000e+00> : vector<256x128xf32>
    %12 = tpu.matmul %10, %11, %cst_10 {dimension_numbers = #tpu.dot_dimension_numbers<[1], [0], [0], [1], [0, 0, 1, 1], [], []>} : vector<256x128xbf16>, vector<128x128xbf16>, vector<256x128xf32> -> vector<256x128xf32>
    %c0_11 = arith.constant 0 : index
    %c0_12 = arith.constant 0 : index
    %13 = vector.load %arg7[%c0_11, %c0_12] : memref<1x128xf32, #tpu.memory_space<vmem>>, vector<1x128xf32>
    %14 = vector.broadcast %13 : vector<1x128xf32> to vector<256x128xf32>
    %15 = arith.addf %12, %14 : vector<256x128xf32>
    %c0_13 = arith.constant 0 : index
    %c0_14 = arith.constant 0 : index
    %16 = vector.load %arg3[%c0_13, %c0_14] : memref<256x128xbf16, #tpu.memory_space<vmem>>, vector<256x128xbf16>
    %17 = arith.extf %16 : vector<256x128xbf16> to vector<256x128xf32>
    %18 = arith.addf %15, %17 : vector<256x128xf32>
    %19 = arith.truncf %18 : vector<256x128xf32> to vector<256x128xbf16>
    %c0_15 = arith.constant 0 : index
    %c0_16 = arith.constant 0 : index
    %20 = vector.load %arg8[%c0_15, %c0_16] : memref<256x128xbf16, #tpu.memory_space<vmem>>, vector<256x128xbf16>
    tpu.vector_store %arg8[%c0_15, %c0_16], %19 {strides = array<i32>} : memref<256x128xbf16, #tpu.memory_space<vmem>>, vector<256x128xbf16>,
    return
  }
  func.func @transform_0(%arg0: i32) -> (i32, i32) {
    %c0_i32 = arith.constant 0 : i32
    %c0_i32_0 = arith.constant 0 : i32
    return %arg0, %c0_i32 : i32, i32
  }
  func.func @transform_1(%arg0: i32) -> (i32, i32) {
    %c0_i32 = arith.constant 0 : i32
    %c0_i32_0 = arith.constant 0 : i32
    return %arg0, %c0_i32 : i32, i32
  }
  func.func @transform_2(%arg0: i32) -> (i32, i32) {
    %c0_i32 = arith.constant 0 : i32
    %c0_i32_0 = arith.constant 0 : i32
    return %arg0, %c0_i32 : i32, i32
  }
  func.func @transform_3(%arg0: i32) -> (i32, i32) {
    %c0_i32 = arith.constant 0 : i32
    %c0_i32_0 = arith.constant 0 : i32
    %c0_i32_1 = arith.constant 0 : i32
    return %c0_i32, %c0_i32_0 : i32, i32
  }
  func.func @transform_4(%arg0: i32) -> (i32, i32) {
    %c0_i32 = arith.constant 0 : i32
    %c0_i32_0 = arith.constant 0 : i32
    %c0_i32_1 = arith.constant 0 : i32
    return %c0_i32, %c0_i32_0 : i32, i32
  }
  func.func @transform_5(%arg0: i32) -> (i32, i32) {
    %c0_i32 = arith.constant 0 : i32
    %c0_i32_0 = arith.constant 0 : i32
    %c0_i32_1 = arith.constant 0 : i32
    return %c0_i32, %c0_i32_0 : i32, i32
  }
  func.func @transform_6(%arg0: i32) -> (i32, i32) {
    %c0_i32 = arith.constant 0 : i32
    %c0_i32_0 = arith.constant 0 : i32
    %c0_i32_1 = arith.constant 0 : i32
    return %c0_i32, %c0_i32_0 : i32, i32
  }
  func.func @transform_7(%arg0: i32) -> (i32, i32) {
    %c0_i32 = arith.constant 0 : i32
    %c0_i32_0 = arith.constant 0 : i32
    return %arg0, %c0_i32 : i32, i32
  }
}

module attributes {stable_mosaic.version = 11 : i64} {
  func.func @_upsample2x_pair_kernel(%arg0: i32, %arg1: i32, %arg2: memref<1x8x1024xbf16, #tpu.memory_space<vmem>>, %arg3: memref<1x8x1024xbf16, #tpu.memory_space<vmem>>, %arg4: memref<16x8xbf16, #tpu.memory_space<vmem>>, %arg5: memref<1x16x2048xbf16, #tpu.memory_space<vmem>>, %arg6: memref<1x16x2048xbf16, #tpu.memory_space<vmem>>) attributes {dimension_semantics = [#tpu.dimension_semantics<parallel>, #tpu.dimension_semantics<parallel>], iteration_bounds = array<i64: 4, 1>, scalar_prefetch = 0 : i64, scratch_operands = 0 : i64, tpu.core_type = #tpu.core_type<tc>, window_params = [{transform_indices = @transform_0, window_bounds = array<i64: 1, 8, 1024>}, {transform_indices = @transform_1, window_bounds = array<i64: 1, 8, 1024>}, {transform_indices = @transform_2, window_bounds = array<i64: 16, 8>}, {transform_indices = @transform_3, window_bounds = array<i64: 1, 16, 2048>}, {transform_indices = @transform_4, window_bounds = array<i64: 1, 16, 2048>}]} {
    %c0 = arith.constant 0 : index
    %c0_0 = arith.constant 0 : index
    %0 = vector.load %arg4[%c0, %c0_0] : memref<16x8xbf16, #tpu.memory_space<vmem>>, vector<16x8xbf16>
    %c0_1 = arith.constant 0 : index
    %c0_2 = arith.constant 0 : index
    %c0_3 = arith.constant 0 : index
    %1 = vector.load %arg2[%c0_1, %c0_2, %c0_3] : memref<1x8x1024xbf16, #tpu.memory_space<vmem>>, vector<1x8x1024xbf16>
    %2 = vector.shape_cast %1 : vector<1x8x1024xbf16> to vector<8x1024xbf16>
    %cst = arith.constant dense<0.000000e+00> : vector<16x1024xf32>
    %3 = tpu.matmul %0, %2, %cst {dimension_numbers = #tpu.dot_dimension_numbers<[1], [0], [0], [1], [0, 0, 1, 1], [], []>} : vector<16x8xbf16>, vector<8x1024xbf16>, vector<16x1024xf32> -> vector<16x1024xf32>
    %4 = vector.extract_strided_slice %3 {offsets = [0, 0], sizes = [16, 128], strides = [1, 1]} : vector<16x1024xf32> to vector<16x128xf32>
    %5 = vector.extract_strided_slice %3 {offsets = [0, 0], sizes = [16, 128], strides = [1, 1]} : vector<16x1024xf32> to vector<16x128xf32>
    %6 = vector.extract_strided_slice %3 {offsets = [0, 128], sizes = [16, 128], strides = [1, 1]} : vector<16x1024xf32> to vector<16x128xf32>
    %7 = arith.subf %6, %5 : vector<16x128xf32>
    %cst_4 = arith.constant 0.466666669 : f32
    %8 = vector.broadcast %cst_4 : f32 to vector<16x128xf32>
    %9 = arith.mulf %8, %7 : vector<16x128xf32>
    %10 = arith.addf %5, %9 : vector<16x128xf32>
    %11 = vector.extract_strided_slice %3 {offsets = [0, 0], sizes = [16, 128], strides = [1, 1]} : vector<16x1024xf32> to vector<16x128xf32>
    %12 = vector.extract_strided_slice %3 {offsets = [0, 128], sizes = [16, 128], strides = [1, 1]} : vector<16x1024xf32> to vector<16x128xf32>
    %13 = arith.subf %12, %11 : vector<16x128xf32>
    %cst_5 = arith.constant 0.933333337 : f32
    %14 = vector.broadcast %cst_5 : f32 to vector<16x128xf32>
    %15 = arith.mulf %14, %13 : vector<16x128xf32>
    %16 = arith.addf %11, %15 : vector<16x128xf32>
    %17 = vector.extract_strided_slice %3 {offsets = [0, 128], sizes = [16, 128], strides = [1, 1]} : vector<16x1024xf32> to vector<16x128xf32>
    %18 = vector.extract_strided_slice %3 {offsets = [0, 256], sizes = [16, 128], strides = [1, 1]} : vector<16x1024xf32> to vector<16x128xf32>
    %19 = arith.subf %18, %17 : vector<16x128xf32>
    %cst_6 = arith.constant 4.000000e-01 : f32
    %20 = vector.broadcast %cst_6 : f32 to vector<16x128xf32>
    %21 = arith.mulf %20, %19 : vector<16x128xf32>
    %22 = arith.addf %17, %21 : vector<16x128xf32>
    %23 = vector.extract_strided_slice %3 {offsets = [0, 128], sizes = [16, 128], strides = [1, 1]} : vector<16x1024xf32> to vector<16x128xf32>
    %24 = vector.extract_strided_slice %3 {offsets = [0, 256], sizes = [16, 128], strides = [1, 1]} : vector<16x1024xf32> to vector<16x128xf32>
    %25 = arith.subf %24, %23 : vector<16x128xf32>
    %cst_7 = arith.constant 0.866666674 : f32
    %26 = vector.broadcast %cst_7 : f32 to vector<16x128xf32>
    %27 = arith.mulf %26, %25 : vector<16x128xf32>
    %28 = arith.addf %23, %27 : vector<16x128xf32>
    %29 = vector.extract_strided_slice %3 {offsets = [0, 256], sizes = [16, 128], strides = [1, 1]} : vector<16x1024xf32> to vector<16x128xf32>
    %30 = vector.extract_strided_slice %3 {offsets = [0, 384], sizes = [16, 128], strides = [1, 1]} : vector<16x1024xf32> to vector<16x128xf32>
    %31 = arith.subf %30, %29 : vector<16x128xf32>
    %cst_8 = arith.constant 0.333333343 : f32
    %32 = vector.broadcast %cst_8 : f32 to vector<16x128xf32>
    %33 = arith.mulf %32, %31 : vector<16x128xf32>
    %34 = arith.addf %29, %33 : vector<16x128xf32>
    %35 = vector.extract_strided_slice %3 {offsets = [0, 256], sizes = [16, 128], strides = [1, 1]} : vector<16x1024xf32> to vector<16x128xf32>
    %36 = vector.extract_strided_slice %3 {offsets = [0, 384], sizes = [16, 128], strides = [1, 1]} : vector<16x1024xf32> to vector<16x128xf32>
    %37 = arith.subf %36, %35 : vector<16x128xf32>
    %cst_9 = arith.constant 8.000000e-01 : f32
    %38 = vector.broadcast %cst_9 : f32 to vector<16x128xf32>
    %39 = arith.mulf %38, %37 : vector<16x128xf32>
    %40 = arith.addf %35, %39 : vector<16x128xf32>
    %41 = vector.extract_strided_slice %3 {offsets = [0, 384], sizes = [16, 128], strides = [1, 1]} : vector<16x1024xf32> to vector<16x128xf32>
    %42 = vector.extract_strided_slice %3 {offsets = [0, 512], sizes = [16, 128], strides = [1, 1]} : vector<16x1024xf32> to vector<16x128xf32>
    %43 = arith.subf %42, %41 : vector<16x128xf32>
    %cst_10 = arith.constant 0.266666681 : f32
    %44 = vector.broadcast %cst_10 : f32 to vector<16x128xf32>
    %45 = arith.mulf %44, %43 : vector<16x128xf32>
    %46 = arith.addf %41, %45 : vector<16x128xf32>
    %47 = vector.extract_strided_slice %3 {offsets = [0, 384], sizes = [16, 128], strides = [1, 1]} : vector<16x1024xf32> to vector<16x128xf32>
    %48 = vector.extract_strided_slice %3 {offsets = [0, 512], sizes = [16, 128], strides = [1, 1]} : vector<16x1024xf32> to vector<16x128xf32>
    %49 = arith.subf %48, %47 : vector<16x128xf32>
    %cst_11 = arith.constant 0.733333349 : f32
    %50 = vector.broadcast %cst_11 : f32 to vector<16x128xf32>
    %51 = arith.mulf %50, %49 : vector<16x128xf32>
    %52 = arith.addf %47, %51 : vector<16x128xf32>
    %53 = vector.extract_strided_slice %3 {offsets = [0, 512], sizes = [16, 128], strides = [1, 1]} : vector<16x1024xf32> to vector<16x128xf32>
    %54 = vector.extract_strided_slice %3 {offsets = [0, 640], sizes = [16, 128], strides = [1, 1]} : vector<16x1024xf32> to vector<16x128xf32>
    %55 = arith.subf %54, %53 : vector<16x128xf32>
    %cst_12 = arith.constant 2.000000e-01 : f32
    %56 = vector.broadcast %cst_12 : f32 to vector<16x128xf32>
    %57 = arith.mulf %56, %55 : vector<16x128xf32>
    %58 = arith.addf %53, %57 : vector<16x128xf32>
    %59 = vector.extract_strided_slice %3 {offsets = [0, 512], sizes = [16, 128], strides = [1, 1]} : vector<16x1024xf32> to vector<16x128xf32>
    %60 = vector.extract_strided_slice %3 {offsets = [0, 640], sizes = [16, 128], strides = [1, 1]} : vector<16x1024xf32> to vector<16x128xf32>
    %61 = arith.subf %60, %59 : vector<16x128xf32>
    %cst_13 = arith.constant 0.666666686 : f32
    %62 = vector.broadcast %cst_13 : f32 to vector<16x128xf32>
    %63 = arith.mulf %62, %61 : vector<16x128xf32>
    %64 = arith.addf %59, %63 : vector<16x128xf32>
    %65 = vector.extract_strided_slice %3 {offsets = [0, 640], sizes = [16, 128], strides = [1, 1]} : vector<16x1024xf32> to vector<16x128xf32>
    %66 = vector.extract_strided_slice %3 {offsets = [0, 768], sizes = [16, 128], strides = [1, 1]} : vector<16x1024xf32> to vector<16x128xf32>
    %67 = arith.subf %66, %65 : vector<16x128xf32>
    %cst_14 = arith.constant 0.13333334 : f32
    %68 = vector.broadcast %cst_14 : f32 to vector<16x128xf32>
    %69 = arith.mulf %68, %67 : vector<16x128xf32>
    %70 = arith.addf %65, %69 : vector<16x128xf32>
    %71 = vector.extract_strided_slice %3 {offsets = [0, 640], sizes = [16, 128], strides = [1, 1]} : vector<16x1024xf32> to vector<16x128xf32>
    %72 = vector.extract_strided_slice %3 {offsets = [0, 768], sizes = [16, 128], strides = [1, 1]} : vector<16x1024xf32> to vector<16x128xf32>
    %73 = arith.subf %72, %71 : vector<16x128xf32>
    %cst_15 = arith.constant 6.000000e-01 : f32
    %74 = vector.broadcast %cst_15 : f32 to vector<16x128xf32>
    %75 = arith.mulf %74, %73 : vector<16x128xf32>
    %76 = arith.addf %71, %75 : vector<16x128xf32>
    %77 = vector.extract_strided_slice %3 {offsets = [0, 768], sizes = [16, 128], strides = [1, 1]} : vector<16x1024xf32> to vector<16x128xf32>
    %78 = vector.extract_strided_slice %3 {offsets = [0, 896], sizes = [16, 128], strides = [1, 1]} : vector<16x1024xf32> to vector<16x128xf32>
    %79 = arith.subf %78, %77 : vector<16x128xf32>
    %cst_16 = arith.constant 0.0666666701 : f32
    %80 = vector.broadcast %cst_16 : f32 to vector<16x128xf32>
    %81 = arith.mulf %80, %79 : vector<16x128xf32>
    %82 = arith.addf %77, %81 : vector<16x128xf32>
    %83 = vector.extract_strided_slice %3 {offsets = [0, 768], sizes = [16, 128], strides = [1, 1]} : vector<16x1024xf32> to vector<16x128xf32>
    %84 = vector.extract_strided_slice %3 {offsets = [0, 896], sizes = [16, 128], strides = [1, 1]} : vector<16x1024xf32> to vector<16x128xf32>
    %85 = arith.subf %84, %83 : vector<16x128xf32>
    %cst_17 = arith.constant 0.533333361 : f32
    %86 = vector.broadcast %cst_17 : f32 to vector<16x128xf32>
    %87 = arith.mulf %86, %85 : vector<16x128xf32>
    %88 = arith.addf %83, %87 : vector<16x128xf32>
    %89 = vector.extract_strided_slice %3 {offsets = [0, 768], sizes = [16, 128], strides = [1, 1]} : vector<16x1024xf32> to vector<16x128xf32>
    %90 = vector.extract_strided_slice %3 {offsets = [0, 896], sizes = [16, 128], strides = [1, 1]} : vector<16x1024xf32> to vector<16x128xf32>
    %91 = arith.subf %90, %89 : vector<16x128xf32>
    %cst_18 = arith.constant 1.000000e+00 : f32
    %92 = vector.broadcast %cst_18 : f32 to vector<16x128xf32>
    %93 = arith.mulf %92, %91 : vector<16x128xf32>
    %94 = arith.addf %89, %93 : vector<16x128xf32>
    %95 = tpu.concatenate %4, %10, %16, %22, %28, %34, %40, %46, %52, %58, %64, %70, %76, %82, %88, %94 in 1 : vector<16x128xf32>, vector<16x128xf32>, vector<16x128xf32>, vector<16x128xf32>, vector<16x128xf32>, vector<16x128xf32>, vector<16x128xf32>, vector<16x128xf32>, vector<16x128xf32>, vector<16x128xf32>, vector<16x128xf32>, vector<16x128xf32>, vector<16x128xf32>, vector<16x128xf32>, vector<16x128xf32>, vector<16x128xf32> -> vector<16x2048xf32>
    %96 = arith.truncf %95 : vector<16x2048xf32> to vector<16x2048xbf16>
    %c0_19 = arith.constant 0 : index
    %c0_20 = arith.constant 0 : index
    %c0_21 = arith.constant 0 : index
    %97 = vector.load %arg5[%c0_19, %c0_20, %c0_21] : memref<1x16x2048xbf16, #tpu.memory_space<vmem>>, vector<1x16x2048xbf16>
    %98 = vector.shape_cast %97 : vector<1x16x2048xbf16> to vector<16x2048xbf16>
    %99 = vector.shape_cast %96 : vector<16x2048xbf16> to vector<1x16x2048xbf16>
    tpu.vector_store %arg5[%c0_19, %c0_20, %c0_21], %99 {strides = array<i32>} : memref<1x16x2048xbf16, #tpu.memory_space<vmem>>, vector<1x16x2048xbf16>,
    %c0_22 = arith.constant 0 : index
    %c0_23 = arith.constant 0 : index
    %c0_24 = arith.constant 0 : index
    %100 = vector.load %arg3[%c0_22, %c0_23, %c0_24] : memref<1x8x1024xbf16, #tpu.memory_space<vmem>>, vector<1x8x1024xbf16>
    %101 = vector.shape_cast %100 : vector<1x8x1024xbf16> to vector<8x1024xbf16>
    %cst_25 = arith.constant dense<0.000000e+00> : vector<16x1024xf32>
    %102 = tpu.matmul %0, %101, %cst_25 {dimension_numbers = #tpu.dot_dimension_numbers<[1], [0], [0], [1], [0, 0, 1, 1], [], []>} : vector<16x8xbf16>, vector<8x1024xbf16>, vector<16x1024xf32> -> vector<16x1024xf32>
    %103 = vector.extract_strided_slice %102 {offsets = [0, 0], sizes = [16, 128], strides = [1, 1]} : vector<16x1024xf32> to vector<16x128xf32>
    %104 = vector.extract_strided_slice %102 {offsets = [0, 0], sizes = [16, 128], strides = [1, 1]} : vector<16x1024xf32> to vector<16x128xf32>
    %105 = vector.extract_strided_slice %102 {offsets = [0, 128], sizes = [16, 128], strides = [1, 1]} : vector<16x1024xf32> to vector<16x128xf32>
    %106 = arith.subf %105, %104 : vector<16x128xf32>
    %cst_26 = arith.constant 0.466666669 : f32
    %107 = vector.broadcast %cst_26 : f32 to vector<16x128xf32>
    %108 = arith.mulf %107, %106 : vector<16x128xf32>
    %109 = arith.addf %104, %108 : vector<16x128xf32>
    %110 = vector.extract_strided_slice %102 {offsets = [0, 0], sizes = [16, 128], strides = [1, 1]} : vector<16x1024xf32> to vector<16x128xf32>
    %111 = vector.extract_strided_slice %102 {offsets = [0, 128], sizes = [16, 128], strides = [1, 1]} : vector<16x1024xf32> to vector<16x128xf32>
    %112 = arith.subf %111, %110 : vector<16x128xf32>
    %cst_27 = arith.constant 0.933333337 : f32
    %113 = vector.broadcast %cst_27 : f32 to vector<16x128xf32>
    %114 = arith.mulf %113, %112 : vector<16x128xf32>
    %115 = arith.addf %110, %114 : vector<16x128xf32>
    %116 = vector.extract_strided_slice %102 {offsets = [0, 128], sizes = [16, 128], strides = [1, 1]} : vector<16x1024xf32> to vector<16x128xf32>
    %117 = vector.extract_strided_slice %102 {offsets = [0, 256], sizes = [16, 128], strides = [1, 1]} : vector<16x1024xf32> to vector<16x128xf32>
    %118 = arith.subf %117, %116 : vector<16x128xf32>
    %cst_28 = arith.constant 4.000000e-01 : f32
    %119 = vector.broadcast %cst_28 : f32 to vector<16x128xf32>
    %120 = arith.mulf %119, %118 : vector<16x128xf32>
    %121 = arith.addf %116, %120 : vector<16x128xf32>
    %122 = vector.extract_strided_slice %102 {offsets = [0, 128], sizes = [16, 128], strides = [1, 1]} : vector<16x1024xf32> to vector<16x128xf32>
    %123 = vector.extract_strided_slice %102 {offsets = [0, 256], sizes = [16, 128], strides = [1, 1]} : vector<16x1024xf32> to vector<16x128xf32>
    %124 = arith.subf %123, %122 : vector<16x128xf32>
    %cst_29 = arith.constant 0.866666674 : f32
    %125 = vector.broadcast %cst_29 : f32 to vector<16x128xf32>
    %126 = arith.mulf %125, %124 : vector<16x128xf32>
    %127 = arith.addf %122, %126 : vector<16x128xf32>
    %128 = vector.extract_strided_slice %102 {offsets = [0, 256], sizes = [16, 128], strides = [1, 1]} : vector<16x1024xf32> to vector<16x128xf32>
    %129 = vector.extract_strided_slice %102 {offsets = [0, 384], sizes = [16, 128], strides = [1, 1]} : vector<16x1024xf32> to vector<16x128xf32>
    %130 = arith.subf %129, %128 : vector<16x128xf32>
    %cst_30 = arith.constant 0.333333343 : f32
    %131 = vector.broadcast %cst_30 : f32 to vector<16x128xf32>
    %132 = arith.mulf %131, %130 : vector<16x128xf32>
    %133 = arith.addf %128, %132 : vector<16x128xf32>
    %134 = vector.extract_strided_slice %102 {offsets = [0, 256], sizes = [16, 128], strides = [1, 1]} : vector<16x1024xf32> to vector<16x128xf32>
    %135 = vector.extract_strided_slice %102 {offsets = [0, 384], sizes = [16, 128], strides = [1, 1]} : vector<16x1024xf32> to vector<16x128xf32>
    %136 = arith.subf %135, %134 : vector<16x128xf32>
    %cst_31 = arith.constant 8.000000e-01 : f32
    %137 = vector.broadcast %cst_31 : f32 to vector<16x128xf32>
    %138 = arith.mulf %137, %136 : vector<16x128xf32>
    %139 = arith.addf %134, %138 : vector<16x128xf32>
    %140 = vector.extract_strided_slice %102 {offsets = [0, 384], sizes = [16, 128], strides = [1, 1]} : vector<16x1024xf32> to vector<16x128xf32>
    %141 = vector.extract_strided_slice %102 {offsets = [0, 512], sizes = [16, 128], strides = [1, 1]} : vector<16x1024xf32> to vector<16x128xf32>
    %142 = arith.subf %141, %140 : vector<16x128xf32>
    %cst_32 = arith.constant 0.266666681 : f32
    %143 = vector.broadcast %cst_32 : f32 to vector<16x128xf32>
    %144 = arith.mulf %143, %142 : vector<16x128xf32>
    %145 = arith.addf %140, %144 : vector<16x128xf32>
    %146 = vector.extract_strided_slice %102 {offsets = [0, 384], sizes = [16, 128], strides = [1, 1]} : vector<16x1024xf32> to vector<16x128xf32>
    %147 = vector.extract_strided_slice %102 {offsets = [0, 512], sizes = [16, 128], strides = [1, 1]} : vector<16x1024xf32> to vector<16x128xf32>
    %148 = arith.subf %147, %146 : vector<16x128xf32>
    %cst_33 = arith.constant 0.733333349 : f32
    %149 = vector.broadcast %cst_33 : f32 to vector<16x128xf32>
    %150 = arith.mulf %149, %148 : vector<16x128xf32>
    %151 = arith.addf %146, %150 : vector<16x128xf32>
    %152 = vector.extract_strided_slice %102 {offsets = [0, 512], sizes = [16, 128], strides = [1, 1]} : vector<16x1024xf32> to vector<16x128xf32>
    %153 = vector.extract_strided_slice %102 {offsets = [0, 640], sizes = [16, 128], strides = [1, 1]} : vector<16x1024xf32> to vector<16x128xf32>
    %154 = arith.subf %153, %152 : vector<16x128xf32>
    %cst_34 = arith.constant 2.000000e-01 : f32
    %155 = vector.broadcast %cst_34 : f32 to vector<16x128xf32>
    %156 = arith.mulf %155, %154 : vector<16x128xf32>
    %157 = arith.addf %152, %156 : vector<16x128xf32>
    %158 = vector.extract_strided_slice %102 {offsets = [0, 512], sizes = [16, 128], strides = [1, 1]} : vector<16x1024xf32> to vector<16x128xf32>
    %159 = vector.extract_strided_slice %102 {offsets = [0, 640], sizes = [16, 128], strides = [1, 1]} : vector<16x1024xf32> to vector<16x128xf32>
    %160 = arith.subf %159, %158 : vector<16x128xf32>
    %cst_35 = arith.constant 0.666666686 : f32
    %161 = vector.broadcast %cst_35 : f32 to vector<16x128xf32>
    %162 = arith.mulf %161, %160 : vector<16x128xf32>
    %163 = arith.addf %158, %162 : vector<16x128xf32>
    %164 = vector.extract_strided_slice %102 {offsets = [0, 640], sizes = [16, 128], strides = [1, 1]} : vector<16x1024xf32> to vector<16x128xf32>
    %165 = vector.extract_strided_slice %102 {offsets = [0, 768], sizes = [16, 128], strides = [1, 1]} : vector<16x1024xf32> to vector<16x128xf32>
    %166 = arith.subf %165, %164 : vector<16x128xf32>
    %cst_36 = arith.constant 0.13333334 : f32
    %167 = vector.broadcast %cst_36 : f32 to vector<16x128xf32>
    %168 = arith.mulf %167, %166 : vector<16x128xf32>
    %169 = arith.addf %164, %168 : vector<16x128xf32>
    %170 = vector.extract_strided_slice %102 {offsets = [0, 640], sizes = [16, 128], strides = [1, 1]} : vector<16x1024xf32> to vector<16x128xf32>
    %171 = vector.extract_strided_slice %102 {offsets = [0, 768], sizes = [16, 128], strides = [1, 1]} : vector<16x1024xf32> to vector<16x128xf32>
    %172 = arith.subf %171, %170 : vector<16x128xf32>
    %cst_37 = arith.constant 6.000000e-01 : f32
    %173 = vector.broadcast %cst_37 : f32 to vector<16x128xf32>
    %174 = arith.mulf %173, %172 : vector<16x128xf32>
    %175 = arith.addf %170, %174 : vector<16x128xf32>
    %176 = vector.extract_strided_slice %102 {offsets = [0, 768], sizes = [16, 128], strides = [1, 1]} : vector<16x1024xf32> to vector<16x128xf32>
    %177 = vector.extract_strided_slice %102 {offsets = [0, 896], sizes = [16, 128], strides = [1, 1]} : vector<16x1024xf32> to vector<16x128xf32>
    %178 = arith.subf %177, %176 : vector<16x128xf32>
    %cst_38 = arith.constant 0.0666666701 : f32
    %179 = vector.broadcast %cst_38 : f32 to vector<16x128xf32>
    %180 = arith.mulf %179, %178 : vector<16x128xf32>
    %181 = arith.addf %176, %180 : vector<16x128xf32>
    %182 = vector.extract_strided_slice %102 {offsets = [0, 768], sizes = [16, 128], strides = [1, 1]} : vector<16x1024xf32> to vector<16x128xf32>
    %183 = vector.extract_strided_slice %102 {offsets = [0, 896], sizes = [16, 128], strides = [1, 1]} : vector<16x1024xf32> to vector<16x128xf32>
    %184 = arith.subf %183, %182 : vector<16x128xf32>
    %cst_39 = arith.constant 0.533333361 : f32
    %185 = vector.broadcast %cst_39 : f32 to vector<16x128xf32>
    %186 = arith.mulf %185, %184 : vector<16x128xf32>
    %187 = arith.addf %182, %186 : vector<16x128xf32>
    %188 = vector.extract_strided_slice %102 {offsets = [0, 768], sizes = [16, 128], strides = [1, 1]} : vector<16x1024xf32> to vector<16x128xf32>
    %189 = vector.extract_strided_slice %102 {offsets = [0, 896], sizes = [16, 128], strides = [1, 1]} : vector<16x1024xf32> to vector<16x128xf32>
    %190 = arith.subf %189, %188 : vector<16x128xf32>
    %cst_40 = arith.constant 1.000000e+00 : f32
    %191 = vector.broadcast %cst_40 : f32 to vector<16x128xf32>
    %192 = arith.mulf %191, %190 : vector<16x128xf32>
    %193 = arith.addf %188, %192 : vector<16x128xf32>
    %194 = tpu.concatenate %103, %109, %115, %121, %127, %133, %139, %145, %151, %157, %163, %169, %175, %181, %187, %193 in 1 : vector<16x128xf32>, vector<16x128xf32>, vector<16x128xf32>, vector<16x128xf32>, vector<16x128xf32>, vector<16x128xf32>, vector<16x128xf32>, vector<16x128xf32>, vector<16x128xf32>, vector<16x128xf32>, vector<16x128xf32>, vector<16x128xf32>, vector<16x128xf32>, vector<16x128xf32>, vector<16x128xf32>, vector<16x128xf32> -> vector<16x2048xf32>
    %195 = arith.truncf %194 : vector<16x2048xf32> to vector<16x2048xbf16>
    %c0_41 = arith.constant 0 : index
    %c0_42 = arith.constant 0 : index
    %c0_43 = arith.constant 0 : index
    %196 = vector.load %arg6[%c0_41, %c0_42, %c0_43] : memref<1x16x2048xbf16, #tpu.memory_space<vmem>>, vector<1x16x2048xbf16>
    %197 = vector.shape_cast %196 : vector<1x16x2048xbf16> to vector<16x2048xbf16>
    %198 = vector.shape_cast %195 : vector<16x2048xbf16> to vector<1x16x2048xbf16>
    tpu.vector_store %arg6[%c0_41, %c0_42, %c0_43], %198 {strides = array<i32>} : memref<1x16x2048xbf16, #tpu.memory_space<vmem>>, vector<1x16x2048xbf16>,
    return
  }
  func.func @transform_0(%arg0: i32, %arg1: i32) -> (i32, i32, i32) {
    %c0_i32 = arith.constant 0 : i32
    %c0_i32_0 = arith.constant 0 : i32
    %c0_i32_1 = arith.constant 0 : i32
    return %arg0, %c0_i32, %c0_i32_0 : i32, i32, i32
  }
  func.func @transform_1(%arg0: i32, %arg1: i32) -> (i32, i32, i32) {
    %c0_i32 = arith.constant 0 : i32
    %c0_i32_0 = arith.constant 0 : i32
    %c0_i32_1 = arith.constant 0 : i32
    return %arg0, %c0_i32, %c0_i32_0 : i32, i32, i32
  }
  func.func @transform_2(%arg0: i32, %arg1: i32) -> (i32, i32) {
    %c0_i32 = arith.constant 0 : i32
    %c0_i32_0 = arith.constant 0 : i32
    return %arg1, %c0_i32 : i32, i32
  }
  func.func @transform_3(%arg0: i32, %arg1: i32) -> (i32, i32, i32) {
    %c0_i32 = arith.constant 0 : i32
    %c0_i32_0 = arith.constant 0 : i32
    return %arg0, %arg1, %c0_i32 : i32, i32, i32
  }
  func.func @transform_4(%arg0: i32, %arg1: i32) -> (i32, i32, i32) {
    %c0_i32 = arith.constant 0 : i32
    %c0_i32_0 = arith.constant 0 : i32
    return %arg0, %arg1, %c0_i32 : i32, i32, i32
  }
}

module attributes {stable_mosaic.version = 11 : i64} {
  func.func @_merge_res_fc_kernel(%arg0: i32, %arg1: memref<512x128xbf16, #tpu.memory_space<vmem>>, %arg2: memref<512x128xbf16, #tpu.memory_space<vmem>>, %arg3: memref<512x128xbf16, #tpu.memory_space<vmem>>, %arg4: memref<256x128xbf16, #tpu.memory_space<vmem>>, %arg5: memref<1x128xf32, #tpu.memory_space<vmem>>, %arg6: memref<128x128xbf16, #tpu.memory_space<vmem>>, %arg7: memref<1x128xf32, #tpu.memory_space<vmem>>, %arg8: memref<128x128xbf16, #tpu.memory_space<vmem>>, %arg9: memref<1x128xf32, #tpu.memory_space<vmem>>, %arg10: memref<512x128xf32, #tpu.memory_space<vmem>>) attributes {dimension_semantics = [#tpu.dimension_semantics<parallel>], iteration_bounds = array<i64: 2>, scalar_prefetch = 0 : i64, scratch_operands = 0 : i64, tpu.core_type = #tpu.core_type<tc>, window_params = [{transform_indices = @transform_0, window_bounds = array<i64: 512, 128>}, {transform_indices = @transform_1, window_bounds = array<i64: 512, 128>}, {transform_indices = @transform_2, window_bounds = array<i64: 512, 128>}, {pipeline_mode = #tpu.pipeline_mode<synchronous>, transform_indices = @transform_3, window_bounds = array<i64: 256, 128>}, {pipeline_mode = #tpu.pipeline_mode<synchronous>, transform_indices = @transform_4, window_bounds = array<i64: 1, 128>}, {pipeline_mode = #tpu.pipeline_mode<synchronous>, transform_indices = @transform_5, window_bounds = array<i64: 128, 128>}, {pipeline_mode = #tpu.pipeline_mode<synchronous>, transform_indices = @transform_6, window_bounds = array<i64: 1, 128>}, {pipeline_mode = #tpu.pipeline_mode<synchronous>, transform_indices = @transform_7, window_bounds = array<i64: 128, 128>}, {pipeline_mode = #tpu.pipeline_mode<synchronous>, transform_indices = @transform_8, window_bounds = array<i64: 1, 128>}, {transform_indices = @transform_9, window_bounds = array<i64: 512, 128>}]} {
    %c0 = arith.constant 0 : index
    %c0_0 = arith.constant 0 : index
    %0 = vector.load %arg1[%c0, %c0_0] : memref<512x128xbf16, #tpu.memory_space<vmem>>, vector<512x128xbf16>
    %c0_1 = arith.constant 0 : index
    %c0_2 = arith.constant 0 : index
    %1 = vector.load %arg2[%c0_1, %c0_2] : memref<512x128xbf16, #tpu.memory_space<vmem>>, vector<512x128xbf16>
    %2 = tpu.concatenate %0, %1 in 1 : vector<512x128xbf16>, vector<512x128xbf16> -> vector<512x256xbf16>
    %c0_3 = arith.constant 0 : index
    %c0_4 = arith.constant 0 : index
    %3 = vector.load %arg4[%c0_3, %c0_4] : memref<256x128xbf16, #tpu.memory_space<vmem>>, vector<256x128xbf16>
    %cst = arith.constant dense<0.000000e+00> : vector<512x128xf32>
    %4 = tpu.matmul %2, %3, %cst {dimension_numbers = #tpu.dot_dimension_numbers<[1], [0], [0], [1], [0, 0, 1, 1], [], []>} : vector<512x256xbf16>, vector<256x128xbf16>, vector<512x128xf32> -> vector<512x128xf32>
    %c0_5 = arith.constant 0 : index
    %c0_6 = arith.constant 0 : index
    %5 = vector.load %arg5[%c0_5, %c0_6] : memref<1x128xf32, #tpu.memory_space<vmem>>, vector<1x128xf32>
    %6 = vector.broadcast %5 : vector<1x128xf32> to vector<512x128xf32>
    %7 = arith.addf %4, %6 : vector<512x128xf32>
    %cst_7 = arith.constant 0.000000e+00 : f32
    %8 = vector.broadcast %cst_7 : f32 to vector<512x128xf32>
    %9 = arith.maximumf %7, %8 : vector<512x128xf32>
    %10 = arith.truncf %9 : vector<512x128xf32> to vector<512x128xbf16>
    %c0_8 = arith.constant 0 : index
    %c0_9 = arith.constant 0 : index
    %11 = vector.load %arg6[%c0_8, %c0_9] : memref<128x128xbf16, #tpu.memory_space<vmem>>, vector<128x128xbf16>
    %cst_10 = arith.constant dense<0.000000e+00> : vector<512x128xf32>
    %12 = tpu.matmul %10, %11, %cst_10 {dimension_numbers = #tpu.dot_dimension_numbers<[1], [0], [0], [1], [0, 0, 1, 1], [], []>} : vector<512x128xbf16>, vector<128x128xbf16>, vector<512x128xf32> -> vector<512x128xf32>
    %c0_11 = arith.constant 0 : index
    %c0_12 = arith.constant 0 : index
    %13 = vector.load %arg7[%c0_11, %c0_12] : memref<1x128xf32, #tpu.memory_space<vmem>>, vector<1x128xf32>
    %14 = vector.broadcast %13 : vector<1x128xf32> to vector<512x128xf32>
    %15 = arith.addf %12, %14 : vector<512x128xf32>
    %c0_13 = arith.constant 0 : index
    %c0_14 = arith.constant 0 : index
    %16 = vector.load %arg3[%c0_13, %c0_14] : memref<512x128xbf16, #tpu.memory_space<vmem>>, vector<512x128xbf16>
    %17 = arith.extf %16 : vector<512x128xbf16> to vector<512x128xf32>
    %18 = arith.addf %15, %17 : vector<512x128xf32>
    %19 = arith.truncf %18 : vector<512x128xf32> to vector<512x128xbf16>
    %c0_15 = arith.constant 0 : index
    %c0_16 = arith.constant 0 : index
    %20 = vector.load %arg8[%c0_15, %c0_16] : memref<128x128xbf16, #tpu.memory_space<vmem>>, vector<128x128xbf16>
    %cst_17 = arith.constant dense<0.000000e+00> : vector<512x128xf32>
    %21 = tpu.matmul %19, %20, %cst_17 {dimension_numbers = #tpu.dot_dimension_numbers<[1], [0], [0], [1], [0, 0, 1, 1], [], []>} : vector<512x128xbf16>, vector<128x128xbf16>, vector<512x128xf32> -> vector<512x128xf32>
    %c0_18 = arith.constant 0 : index
    %c0_19 = arith.constant 0 : index
    %22 = vector.load %arg9[%c0_18, %c0_19] : memref<1x128xf32, #tpu.memory_space<vmem>>, vector<1x128xf32>
    %23 = vector.broadcast %22 : vector<1x128xf32> to vector<512x128xf32>
    %24 = arith.addf %21, %23 : vector<512x128xf32>
    %c0_20 = arith.constant 0 : index
    %c0_21 = arith.constant 0 : index
    %25 = vector.load %arg10[%c0_20, %c0_21] : memref<512x128xf32, #tpu.memory_space<vmem>>, vector<512x128xf32>
    tpu.vector_store %arg10[%c0_20, %c0_21], %24 {strides = array<i32>} : memref<512x128xf32, #tpu.memory_space<vmem>>, vector<512x128xf32>,
    return
  }
  func.func @transform_0(%arg0: i32) -> (i32, i32) {
    %c0_i32 = arith.constant 0 : i32
    %c0_i32_0 = arith.constant 0 : i32
    return %arg0, %c0_i32 : i32, i32
  }
  func.func @transform_1(%arg0: i32) -> (i32, i32) {
    %c0_i32 = arith.constant 0 : i32
    %c0_i32_0 = arith.constant 0 : i32
    return %arg0, %c0_i32 : i32, i32
  }
  func.func @transform_2(%arg0: i32) -> (i32, i32) {
    %c0_i32 = arith.constant 0 : i32
    %c0_i32_0 = arith.constant 0 : i32
    return %arg0, %c0_i32 : i32, i32
  }
  func.func @transform_3(%arg0: i32) -> (i32, i32) {
    %c0_i32 = arith.constant 0 : i32
    %c0_i32_0 = arith.constant 0 : i32
    %c0_i32_1 = arith.constant 0 : i32
    return %c0_i32, %c0_i32_0 : i32, i32
  }
  func.func @transform_4(%arg0: i32) -> (i32, i32) {
    %c0_i32 = arith.constant 0 : i32
    %c0_i32_0 = arith.constant 0 : i32
    %c0_i32_1 = arith.constant 0 : i32
    return %c0_i32, %c0_i32_0 : i32, i32
  }
  func.func @transform_5(%arg0: i32) -> (i32, i32) {
    %c0_i32 = arith.constant 0 : i32
    %c0_i32_0 = arith.constant 0 : i32
    %c0_i32_1 = arith.constant 0 : i32
    return %c0_i32, %c0_i32_0 : i32, i32
  }
  func.func @transform_6(%arg0: i32) -> (i32, i32) {
    %c0_i32 = arith.constant 0 : i32
    %c0_i32_0 = arith.constant 0 : i32
    %c0_i32_1 = arith.constant 0 : i32
    return %c0_i32, %c0_i32_0 : i32, i32
  }
  func.func @transform_7(%arg0: i32) -> (i32, i32) {
    %c0_i32 = arith.constant 0 : i32
    %c0_i32_0 = arith.constant 0 : i32
    %c0_i32_1 = arith.constant 0 : i32
    return %c0_i32, %c0_i32_0 : i32, i32
  }
  func.func @transform_8(%arg0: i32) -> (i32, i32) {
    %c0_i32 = arith.constant 0 : i32
    %c0_i32_0 = arith.constant 0 : i32
    %c0_i32_1 = arith.constant 0 : i32
    return %c0_i32, %c0_i32_0 : i32, i32
  }
  func.func @transform_9(%arg0: i32) -> (i32, i32) {
    %c0_i32 = arith.constant 0 : i32
    %c0_i32_0 = arith.constant 0 : i32
    return %arg0, %c0_i32 : i32, i32
  }
}

</mosaic_0001>

<bundles_post_ra>
// kernel: merge_module_forward.9
= control target key start
LH: loop header
LB: loop body
LE: loop exit
PB: predicated region body
PF: predicated region fallthrough
CT: control target
= control target key end

     0   :  { %s810_s2 = inlined_call_operand.vmem [shape: bf16[256,128], index: 2, kind: input, shape index: {}]   ;;  %s811_s1 = inlined_call_operand.vmem [shape: bf16[64,128], index: 1, kind: input, shape index: {}]   ;;  %s812_s0 = inlined_call_operand.vmem [shape: bf16[64,128], index: 0, kind: input, shape index: {}]   ;;  %s813_s4 = inlined_call_operand.vmem [shape: bf16[128,128], index: 4, kind: input, shape index: {}]   ;;  %s814_s3 = inlined_call_operand.vmem [shape: f32[1,128], index: 3, kind: input, shape index: {}]   ;;  %s815_s5 = inlined_call_operand.vmem [shape: f32[1,128], index: 5, kind: input, shape index: {}]   ;;  %s816_s6 = inlined_call_operand.vmem [shape: bf16[64,128], index: 6, kind: output, shape index: {}]  }
   0x1   :  { %v629_v0 = vld [vmem:[%s810_s2 + $0x78] sm:$0xff]   ;;  %v631_v2 = vld [vmem:[%s810_s2 + $0x70] sm:$0xff]   ;;  %v633_v4 = vld [vmem:[%s810_s2 + $0x68] sm:$0xff]  }
   0x2   :  { %v630_v1 = vld [vmem:[%s810_s2 + $0x38] sm:$0xff]   ;;  %553 = vmatprep.subr.bf16.mxu0 %v629_v0  ;;  %v632_v3 = vld [vmem:[%s810_s2 + $0x30] sm:$0xff]   ;;  %v634_v5 = vld [vmem:[%s810_s2 + $0x28] sm:$0xff]  }
   0x3   :  { %554 = vmatpush3.bf16.msra.mxu0 %v630_v1  ;;  %v635_v6 = vld [vmem:[%s810_s2 + $0x60] sm:$0xff]   ;;  %v637_v8 = vld [vmem:[%s810_s2 + $0x58] sm:$0xff]   ;;  %v639_v10 = vld [vmem:[%s810_s2 + $0x50] sm:$0xff]  }
   0x4   :  { %555 = vmatprep.subr.bf16.mxu0 %v631_v2  ;;  %v636_v7 = vld [vmem:[%s810_s2 + $0x20] sm:$0xff]   ;;  %v638_v9 = vld [vmem:[%s810_s2 + $0x18] sm:$0xff]   ;;  %v640_v12 = vld [vmem:[%s810_s2 + $0x10] sm:$0xff]  }
   0x5   :  { %v645_v11 = vld [vmem:[%s811_s1] sm:$0xff]   ;;  %v641_v13 = vld [vmem:[%s810_s2 + $0x48] sm:$0xff]   ;;  %v653_v16 = vld [vmem:[%s813_s4 + $0x38] sm:$0xff]  }
   0x6   :  { %255 = vmatprep.mubr.bf16.mxu0 %v645_v11  ;;  %v642_v14 = vld [vmem:[%s810_s2 + $0x8] sm:$0xff]   ;;  %v643_v15 = vld [vmem:[%s810_s2 + $0x40] sm:$0xff]   ;;  %v654_v18 = vld [vmem:[%s813_s4 + $0x30] sm:$0xff]   ;;  %605 = vmatprep.subr.bf16.mxu1 %v653_v16 }
   0x7   :  { %556 = vmatpush3.bf16.msra.mxu0 %v632_v3  ;;  %v644_v17 = vld [vmem:[%s810_s2] sm:$0xff]   ;;  %v655_v19 = vld [vmem:[%s813_s4 + $0x28] sm:$0xff]   ;;  %606 = vmatpush3.bf16.msra.mxu1 %v653_v16  ;;  %v649_v23 = vld [vmem:[%s811_s1 + $0x10] sm:$0xff]  }
   0x8   :  { %557 = vmatprep.subr.bf16.mxu0 %v633_v4  ;;  %607 = vmatprep.subr.bf16.mxu1 %v654_v18  ;;  %v646_v20 = vld [vmem:[%s812_s0] sm:$0xff]   ;;  %v647_v21 = vld [vmem:[%s811_s1 + $0x8] sm:$0xff]   ;;  %v650_v24 = vld [vmem:[%s812_s0 + $0x10] sm:$0xff]  }
   0x9   :  { %v648_v22 = vld [vmem:[%s812_s0 + $0x8] sm:$0xff]   ;;  %v651_v25 = vld [vmem:[%s811_s1 + $0x18] sm:$0xff]   ;;  %v656_v27 = vld [vmem:[%s813_s4 + $0x20] sm:$0xff]  }
   0xa   :  { %v652_v26 = vld [vmem:[%s812_s0 + $0x18] sm:$0xff]   ;;  %v658_v29 = vld [vmem:[%s813_s4 + $0x10] sm:$0xff]   ;;  %v659_v30 = vld [vmem:[%s813_s4 + $0x8] sm:$0xff]  }
   0xb   :  { %558 = vmatpush3.bf16.msra.mxu0 %v634_v5  ;;  %608 = vmatpush3.bf16.msra.mxu1 %v654_v18  ;;  %v657_v28 = vld [vmem:[%s813_s4 + $0x18] sm:$0xff]   ;;  %v660_v31 = vld [vmem:[%s813_s4] sm:$0xff]  }
   0xc   :  { %559 = vmatprep.subr.bf16.mxu0 %v635_v6  ;;  %609 = vmatprep.subr.bf16.mxu1 %v655_v19  ;;  %v488_v36 = vld [vmem:[%s814_s3] ss:$0 sm:$0xff] }
   0xf   :  { %560 = vmatpush3.bf16.msra.mxu0 %v636_v7  ;;  %610 = vmatpush3.bf16.msra.mxu1 %v655_v19 }
  0x10   :  { %561 = vmatprep.subr.bf16.mxu0 %v637_v8  ;;  %611 = vmatprep.subr.bf16.mxu1 %v656_v27 }
  0x13   :  { %562 = vmatpush3.bf16.msra.mxu0 %v638_v9  ;;  %612 = vmatpush3.bf16.msra.mxu1 %v656_v27 }
  0x14   :  { %563 = vmatprep.subr.bf16.mxu0 %v639_v10  ;;  %613 = vmatprep.subr.bf16.mxu1 %v657_v28 }
  0x17   :  { %564 = vmatpush3.bf16.msra.mxu0 %v640_v12  ;;  %614 = vmatpush3.bf16.msra.mxu1 %v657_v28 }
  0x18   :  { %565 = vmatprep.subr.bf16.mxu0 %v641_v13  ;;  %615 = vmatprep.subr.bf16.mxu1 %v658_v29 }
  0x1b   :  { %566 = vmatpush3.bf16.msra.mxu0 %v642_v14  ;;  %616 = vmatpush3.bf16.msra.mxu1 %v658_v29  ;;  %v505_v14 = vld [vmem:[%s815_s5] ss:$0 sm:$0xff] }
  0x1c   :  { %567 = vmatprep.subr.bf16.mxu0 %v643_v15  ;;  %617 = vmatprep.subr.bf16.mxu1 %v659_v30 }
  0x1f   :  { %568 = vmatpush3.bf16.msra.mxu0 %v644_v17  ;;  %618 = vmatpush3.bf16.msra.mxu1 %v659_v30 }
  0x20   :  { %619 = vmatprep.subr.bf16.mxu1 %v660_v31 }
  0x22   :  { %256 = vmatmul.mubr.bf16.vlgmr.msra.gmra.mxu0 %v646_v20 }
  0x23   :  { %263 = vmatprep.mubr.bf16.mxu0 %v647_v21  ;;  %620 = vmatpush3.bf16.msra.mxu1 %v660_v31 }
  0x2a   :  { %264 = vmatmul.mubr.bf16.gmra.mxu0 %v648_v22 }
  0x2b   :  { %271 = vmatprep.mubr.bf16.mxu0 %v649_v23 }
  0x32   :  { %272 = vmatmul.mubr.bf16.gmra.mxu0 %v650_v24 }
  0x33   :  { %279 = vmatprep.mubr.bf16.mxu0 %v651_v25 }
  0x3a   :  { %280 = vmatmul.mubr.bf16.gmra.mxu0 %v652_v26 }
  0xe2   :  { %v569_v32 = vpop.f32.mrf.mxu0 }
  0xe4   :  { %v570_v33 = vpop.f32.mrf.mxu0 }
  0xe5   :  { %v571_v34 = vadd.f32 %v570_v33, %v569_v32 }
  0xe6   :  { %v572_v35 = vpop.f32.mrf.mxu0 }
  0xe7   :  { %v258_v39 = vadd.f32 %v571_v34, %v488_v36 }
  0xe8   :  { %v573_v37 = vpop.f32.mrf.mxu0 }
  0xe9   :  { %v574_v38 = vadd.f32 %v573_v37, %v572_v35  ;;  %v288_v44 = vmax.f32 %v258_v39, 0.0 }
  0xea   :  { %v575_v40 = vpop.f32.mrf.mxu0 }
  0xeb   :  { %v261_v41 = vadd.f32 %v574_v38, %v488_v36 }
  0xec   :  { %v576_v42 = vpop.f32.mrf.mxu0 }
  0xed   :  { %v577_v43 = vadd.f32 %v576_v42, %v575_v40  ;;  %v289_v45 = vmax.f32 %v261_v41, 0.0 }
  0xee   :  { %v578_v46 = vpop.f32.mrf.mxu0 }
  0xef   :  { %v296_v47 = vpack.c.bf16 %v289_v45, %v288_v44  ;;  %v266_v49 = vadd.f32 %v577_v43, %v488_v36 }
  0xf0   :  { %v579_v48 = vpop.f32.mrf.mxu0 }
  0xf1   :  { %v580_v50 = vadd.f32 %v579_v48, %v578_v46  ;;  %621 = vmatprep.mubr.bf16.mxu1 %v296_v47  ;;  %v290_v54 = vmax.f32 %v266_v49, 0.0 }
  0xf2   :  { %v581_v51 = vpop.f32.mrf.mxu0 }
  0xf3   :  { %v269_v52 = vadd.f32 %v580_v50, %v488_v36 }
  0xf4   :  { %v582_v53 = vpop.f32.mrf.mxu0 }
  0xf5   :  { %v291_v55 = vmax.f32 %v269_v52, 0.0  ;;  %v583_v56 = vadd.f32 %v582_v53, %v581_v51 }
  0xf6   :  { %v584_v57 = vpop.f32.mrf.mxu0 }
  0xf7   :  { %v297_v58 = vpack.c.bf16 %v291_v55, %v290_v54  ;;  %v274_v60 = vadd.f32 %v583_v56, %v488_v36 }
  0xf8   :  { %v585_v59 = vpop.f32.mrf.mxu0 }
  0xf9   :  { %v586_v61 = vadd.f32 %v585_v59, %v584_v57  ;;  %622 = vmatmul.mubr.bf16.vlgmr.msra.gmra.mxu1 %v297_v58  ;;  %v292_v1 = vmax.f32 %v274_v60, 0.0 }
  0xfa   :  { %v587_v62 = vpop.f32.mrf.mxu0 }
  0xfb   :  { %v277_v63 = vadd.f32 %v586_v61, %v488_v36 }
  0xfc   :  { %v588_v0 = vpop.f32.mrf.mxu0 }
  0xfd   :  { %v293_v2 = vmax.f32 %v277_v63, 0.0  ;;  %v589_v3 = vadd.f32 %v588_v0, %v587_v62 }
  0xfe   :  { %v590_v4 = vpop.f32.mrf.mxu0 }
  0xff   :  { %v298_v5 = vpack.c.bf16 %v293_v2, %v292_v1  ;;  %v282_v7 = vadd.f32 %v589_v3, %v488_v36 }
 0x100   :  { %v591_v6 = vpop.f32.mrf.mxu0 }
 0x101   :  { %v592_v8 = vadd.f32 %v591_v6, %v590_v4  ;;  %625 = vmatprep.mubr.bf16.mxu1 %v298_v5  ;;  %v294_v10 = vmax.f32 %v282_v7, 0.0 }
 0x103   :  { %v285_v9 = vadd.f32 %v592_v8, %v488_v36 }
 0x105   :  { %v295_v11 = vmax.f32 %v285_v9, 0.0 }
 0x107   :  { %v299_v12 = vpack.c.bf16 %v295_v11, %v294_v10 }
 0x109   :  { %626 = vmatmul.mubr.bf16.gmra.mxu1 %v299_v12 }
 0x1b9   :  { %v623_v13 = vpop.f32.mrf.mxu1 }
 0x1ba   :  { %v414_v17 = vadd.f32 %v623_v13, %v505_v14 }
 0x1bb   :  { %v405_v15 = vpop.f32.mrf.mxu1 }
 0x1bc   :  { %v406_v20 = vadd.f32 %v505_v14, %v405_v15 }
 0x1bd   :  { %v624_v16 = vpop.f32.mrf.mxu1 }
 0x1be   :  { %v417_v18 = vadd.f32 %v624_v16, %v505_v14 }
 0x1bf   :  { %v408_v19 = vpop.f32.mrf.mxu1 }
 0x1c0   :  { %v538_v21 = vpack.c.bf16 %v417_v18, %v414_v17  ;;  %v409_v22 = vadd.f32 %v505_v14, %v408_v19 }
 0x1c2   :  { %550 = vst [vmem:[%s816_s6 + $0x8] sm:$0xff] %v538_v21   ;;  %v533_v23 = vpack.c.bf16 %v409_v22, %v406_v20 }
 0x1c4   :  { %534 = vst [vmem:[%s816_s6] sm:$0xff] %v533_v23  }
 0x1c9   :  { %v627_v24 = vpop.f32.mrf.mxu1 }
 0x1ca   :  { %v430_v27 = vadd.f32 %v627_v24, %v505_v14 }
 0x1cb   :  { %v421_v25 = vpop.f32.mrf.mxu1 }
 0x1cc   :  { %v422_v30 = vadd.f32 %v505_v14, %v421_v25 }
 0x1cd   :  { %v628_v26 = vpop.f32.mrf.mxu1 }
 0x1ce   :  { %v433_v28 = vadd.f32 %v628_v26, %v505_v14 }
 0x1cf   :  { %v424_v29 = vpop.f32.mrf.mxu1 }
 0x1d0   :  { %v548_v31 = vpack.c.bf16 %v433_v28, %v430_v27  ;;  %v425_v32 = vadd.f32 %v505_v14, %v424_v29 }
 0x1d2   :  { %552 = vst [vmem:[%s816_s6 + $0x18] sm:$0xff] %v548_v31   ;;  %v543_v33 = vpack.c.bf16 %v425_v32, %v422_v30 }
 0x1d4   :  { %551 = vst [vmem:[%s816_s6 + $0x10] sm:$0xff] %v543_v33  }

// kernel: merge_module_forward.10
= control target key start
LH: loop header
LB: loop body
LE: loop exit
PB: predicated region body
PF: predicated region fallthrough
CT: control target
= control target key end

     0   :  { %s904_s15 = smov 0   ;;  %s906_s16 = smov 0   ;;  %s962_s0 = inlined_call_operand.vmem [shape: bf16[4,4,512], index: 0, kind: input, shape index: {}]   ;;  %s963_s1 = inlined_call_operand.vmem [shape: bf16[4,4,512], index: 1, kind: input, shape index: {}]   ;;  %s964_s2 = inlined_call_operand.vmem [shape: bf16[8,4], index: 2, kind: input, shape index: {}]   ;;  %s965_s3 = inlined_call_operand.vmem [shape: bf16[4,8,1024], index: 3, kind: output, shape index: {0}]   ;;  %s966_s4 = inlined_call_operand.vmem [shape: bf16[4,8,1024], index: 4, kind: output, shape index: {1}]  }
   0x1   :  { %s908_s17 = smov 0  }
   0x2 LB: > { %s27_s18 = sadd.s32 1, %s871_s16  ;;  %p786_p0 = scmp.ge.s32.totalorder %s875_s17, 1  ;;  %s875_s17 = sphi %s908_s17, %s15_s17   ;;  %s871_s16 = sphi %s906_s16, %s968_s16   ;;  %s867_s15 = sphi %s904_s15, %s967_s15  }
   0x3   : > { %p29_p1 = scmp.ge.s32.totalorder %s27_s18, 4  ;;  %p200_p2 = scmp.lt.s32.totalorder %s875_s17, 5 }
   0x5   : > { %s970_s18 = smov (%p29_p1, %s27_s18), 0  ;;  %p201_p3 = pnand %p786_p0, %p200_p2 }
   0x6   : > { %p248_p4 = scmp.lt.s32.totalorder (!%p201_p3), %s867_s15, 3 }
   0x7   : > { %204 = sbr.rel (%p201_p3) target bundleno = 240 (0xf0), region = 32 }
   0xc   : > { %v288_v0 = vlaneseq  ;;  %v877_v1 = vmov 1983009808   ;;  %v878_v3 = vmov 0   ;;  %s972_s15 = smov (!%p248_p4, %s867_s15), 3  ;;  %vm305_vm0 = vcmask 1041408  }
   0xd   : > { %v286_v2 = vunpack.c.l.s4 %v877_v1  ;;  %350 = vmatprep.mubr.bf16.mxu0 %v878_v3  ;;  %391 = vmatprep.mubr.bf16.mxu1 %v878_v3  ;;  %s813_s19 = sshll.u32 %s972_s15, 3  ;;  %v281_v20 = vld [vmem:[%s964_s2] sm:$0xf]  ;;  %vm301_vm1 = vcmask 31744   ;;  %s815_s28 = sshll.u32 %s972_s15, 5 }
   0xe   : > { %v289_v4 = vshrl.u32 %v288_v0, 7  ;;  %s252_s22 = scalar_lea.vmem %s962_s0, %s813_s19  ;;  %s257_s25 = scalar_lea.vmem %s963_s1, %s813_s19 }
   0xf   : > { %v287_v5 = vunpack.c.0.s8 %v286_v2  ;;  %v282_v7 = vld [vmem:[%s252_s22] sm:$0xff]  ;;  %s270_s5 = scalar_lea.vmem %s965_s3, %s815_s28  ;;  %s279_s8 = scalar_lea.vmem %s966_s4, %s815_s28 }
  0x10   : > { %v452_v8 = vld [vmem:[%s257_s25] sm:$0xff]  ;;  %v284_v12 = vcombine.high %v282_v7, %v282_v7 }
  0x11   : > { %v290_v6 = vsub.s32 %v287_v5, %v289_v4  ;;  %v454_v10 = vcombine.high %v452_v8, %v452_v8 }
  0x13   : > { %v291_v9 = vrot.slane %v282_v7, %v290_v6  ;;  %v461_v11 = vrot.slane %v452_v8, %v290_v6  ;;  %v298_v15 = vrot.slane %v284_v12, %v290_v6  ;;  %v468_v17 = vrot.slane %v454_v10, %v290_v6 }
  0x15   : > { %v299_v13 = vcombine.high %v291_v9, %v291_v9  ;;  %v307_v14 = vsel %vm305_vm0, %v291_v9, 0  ;;  %v469_v16 = vcombine.high %v461_v11, %v461_v11  ;;  %v300_v18 = vcombine.high %v298_v15, %v298_v15 }
  0x16   : > { %v313_v19 = vsel %vm305_vm0, %v298_v15, 0  ;;  %v470_v21 = vcombine.high %v468_v17, %v468_v17  ;;  %v472_v22 = vsel %vm305_vm0, %v461_v11, 0  ;;  %v478_v23 = vsel %vm305_vm0, %v468_v17, 0 }
  0x17   : > { %795 = vmatprep.subr.msk.bf16.mxu0 %vm305_vm0, %v299_v13  ;;  %797 = vmatprep.subr.msk.bf16.mxu1 %vm305_vm0, %v300_v18 }
  0x18   : > { %333 = vmatpush1.bf16.msra.mxu0 %v307_v14  ;;  %374 = vmatpush1.bf16.msra.mxu1 %v313_v19 }
  0x19   : > { %803 = vmatprep.subr.msk.bf16.mxu0 %vm305_vm0, %v469_v16  ;;  %805 = vmatprep.subr.msk.bf16.mxu1 %vm305_vm0, %v470_v21 }
  0x1b   : > { %796 = vmatmul.mubr.msk.bf16.vlgmr.msra.gmra.mxu0 %vm301_vm1, %v281_v20  ;;  %798 = vmatmul.mubr.msk.bf16.vlgmr.msra.gmra.mxu1 %vm301_vm1, %v281_v20 }
  0x1c   : > { %498 = vmatpush1.bf16.msra.mxu0 %v472_v22  ;;  %515 = vmatprep.mubr.bf16.mxu0 %v878_v3 }
  0x1d   : > { %539 = vmatpush1.bf16.msra.mxu1 %v478_v23  ;;  %556 = vmatprep.mubr.bf16.mxu1 %v878_v3 }
  0x23   : > { %804 = vmatmul.mubr.msk.bf16.vlgmr.msra.gmra.mxu0 %vm301_vm1, %v281_v20  ;;  %806 = vmatmul.mubr.msk.bf16.vlgmr.msra.gmra.mxu1 %vm301_vm1, %v281_v20 }
  0xdb   : > { %v352_v24 = vpop.f32.mrf.mxu0  ;;  %v393_v26 = vpop.f32.mrf.mxu1 }
  0xdd   : > { %v354_v25 = vpop.f32.mrf.mxu0  ;;  %v395_v30 = vpop.f32.mrf.mxu1 }
  0xde   : > { %v400_v27 = vsub.f32 %v354_v25, %v352_v24  ;;  %v405_v28 = vsub.f32 %v393_v26, %v354_v25  ;;  %v410_v34 = vsub.f32 %v395_v30, %v393_v26 }
  0xdf   : > { %v356_v29 = vpop.f32.mrf.mxu0  ;;  %v397_v37 = vpop.f32.mrf.mxu1 }
  0xe0   : > { %v401_v31 = vmul.f32 0.42857143, %v400_v27  ;;  %v403_v32 = vmul.f32 0.85714287, %v400_v27  ;;  %v406_v33 = vmul.f32 0.2857143, %v405_v28  ;;  %v415_v50 = vadd.f32 %v410_v34, %v393_v26 }
  0xe1   : > { %v408_v35 = vmul.f32 0.71428573, %v405_v28  ;;  %v357_v36 = vpop.f32.mrf.mxu0  ;;  %v411_v41 = vmul.f32 0.14285715, %v410_v34  ;;  %v413_v42 = vmul.f32 0.5714286, %v410_v34  ;;  %v398_v43 = vpop.f32.mrf.mxu1 }
  0xe2   : > { %v402_v38 = vadd.f32 %v401_v31, %v352_v24  ;;  %v404_v39 = vadd.f32 %v403_v32, %v352_v24  ;;  %v407_v40 = vadd.f32 %v406_v33, %v354_v25 }
  0xe3   : > { %v517_v44 = vpop.f32.mrf.mxu0  ;;  %v409_v47 = vadd.f32 %v408_v35, %v354_v25  ;;  %v412_v48 = vadd.f32 %v411_v41, %v393_v26  ;;  %v414_v49 = vadd.f32 %v413_v42, %v393_v26  ;;  %v558_v52 = vpop.f32.mrf.mxu1 }
  0xe4   : > { %v817_v45 = vpack.c.bf16 %v402_v38, %v352_v24  ;;  %v818_v46 = vpack.c.bf16 %v407_v40, %v404_v39 }
  0xe5   : > { %v519_v51 = vpop.f32.mrf.mxu0  ;;  %v819_v53 = vpack.c.bf16 %v412_v48, %v409_v47  ;;  %v820_v56 = vpack.c.bf16 %v415_v50, %v414_v49  ;;  %v560_v58 = vpop.f32.mrf.mxu1 }
  0xe6   : > { %448 = vst [vmem:[%s270_s5] sm:$0xff] %v817_v45  ;;  %449 = vst [vmem:[%s270_s5 + $0x8] sm:$0xff] %v818_v46  ;;  %v565_v54 = vsub.f32 %v519_v51, %v517_v44  ;;  %v570_v55 = vsub.f32 %v558_v52, %v519_v51  ;;  %v575_v62 = vsub.f32 %v560_v58, %v558_v52 }
  0xe7   : > { %v521_v57 = vpop.f32.mrf.mxu0  ;;  %450 = vst [vmem:[%s270_s5 + $0x10] sm:$0xff] %v819_v53  ;;  %451 = vst [vmem:[%s270_s5 + $0x18] sm:$0xff] %v820_v56  ;;  %v562_v1 = vpop.f32.mrf.mxu1 }
  0xe8   : > { %v566_v59 = vmul.f32 0.42857143, %v565_v54  ;;  %v568_v60 = vmul.f32 0.85714287, %v565_v54  ;;  %v571_v61 = vmul.f32 0.2857143, %v570_v55  ;;  %v580_v13 = vadd.f32 %v575_v62, %v558_v52 }
  0xe9   : > { %v573_v63 = vmul.f32 0.71428573, %v570_v55  ;;  %v522_v0 = vpop.f32.mrf.mxu0  ;;  %v576_v5 = vmul.f32 0.14285715, %v575_v62  ;;  %v578_v6 = vmul.f32 0.5714286, %v575_v62  ;;  %v563_v7 = vpop.f32.mrf.mxu1 }
  0xea   : > { %v567_v2 = vadd.f32 %v566_v59, %v517_v44  ;;  %v569_v3 = vadd.f32 %v568_v60, %v517_v44  ;;  %v572_v4 = vadd.f32 %v571_v61, %v519_v51 }
  0xeb   : > { %v574_v10 = vadd.f32 %v573_v63, %v519_v51  ;;  %v577_v11 = vadd.f32 %v576_v5, %v558_v52  ;;  %v579_v12 = vadd.f32 %v578_v6, %v558_v52 }
  0xec   : > { %v821_v8 = vpack.c.bf16 %v567_v2, %v517_v44  ;;  %v822_v9 = vpack.c.bf16 %v572_v4, %v569_v3 }
  0xed   : > { %v823_v14 = vpack.c.bf16 %v577_v11, %v574_v10  ;;  %v824_v15 = vpack.c.bf16 %v580_v13, %v579_v12 }
  0xee   : > { %613 = vst [vmem:[%s279_s8] sm:$0xff] %v821_v8  ;;  %614 = vst [vmem:[%s279_s8 + $0x8] sm:$0xff] %v822_v9 }
  0xef   : > { %615 = vst [vmem:[%s279_s8 + $0x10] sm:$0xff] %v823_v14  ;;  %616 = vst [vmem:[%s279_s8 + $0x18] sm:$0xff] %v824_v15 }
  0xf0 PF: > { %s15_s17 = sadd.s32 1, %s875_s17   ;;  %s967_s15 = smov %s871_s16 }
  0xf1   : > { %p12_p5 = scmp.ge.s32.totalorder %s15_s17, 6   ;;  %s968_s16 = smov %s970_s18 }
  0xf3   :  { %14 = sbr.rel (!%p12_p5) target bundleno = 2 (0x2), region = 80 }

// kernel: merge_module_forward.8
= control target key start
LH: loop header
LB: loop body
LE: loop exit
PB: predicated region body
PF: predicated region fallthrough
CT: control target
= control target key end

     0   :  { %s2489_s21 = smov 0   ;;  %s2491_s22 = smov 0   ;;  %s2894_s0 = inlined_call_operand.vmem [shape: bf16[4,5,5,128], index: 0, kind: input, shape index: {}]   ;;  %s2895_s1 = inlined_call_operand.vmem [shape: bf16[4,5,5,128], index: 1, kind: input, shape index: {}]   ;;  %s2896_s2 = inlined_call_operand.vmem [shape: bf16[4,5,5,128], index: 2, kind: input, shape index: {}]   ;;  %s2897_s3 = inlined_call_operand.vmem [shape: bf16[4,5,5,128], index: 3, kind: input, shape index: {}]   ;;  %s2898_s4 = inlined_call_operand.vmem [shape: bf16[1152,128], index: 4, kind: input, shape index: {}]   ;;  %s2899_s5 = inlined_call_operand.vmem [shape: f32[1,128], index: 5, kind: input, shape index: {}]   ;;  %s2900_s6 = inlined_call_operand.vmem [shape: bf16[4,16,128], index: 6, kind: output, shape index: {}]  }
   0x1   :  { %s2493_s23 = smov 0  }
   0x2 LB: > { %s28_s24 = sadd.s32 1, %s2445_s22  ;;  %p2058_p0 = scmp.ge.s32.totalorder %s2449_s23, 1  ;;  %s2449_s23 = sphi %s2493_s23, %s16_s23   ;;  %s2445_s22 = sphi %s2491_s22, %s2906_s22   ;;  %s2441_s21 = sphi %s2489_s21, %s2905_s21  }
   0x3   : > { %p30_p1 = scmp.ge.s32.totalorder %s28_s24, 4  ;;  %p256_p2 = scmp.lt.s32.totalorder %s2449_s23, 5 }
   0x5   : > { %s2908_s24 = smov (%p30_p1, %s28_s24), 0  ;;  %p257_p3 = pnand %p2058_p0, %p256_p2 }
   0x6   : > { %p305_p4 = scmp.lt.s32.totalorder (!%p257_p3), %s2441_s21, 3 }
   0x7   : > { %260 = sbr.rel (%p257_p3) target bundleno = 329 (0x149), region = 44 }
   0xc   : > { %v2343_v0 = vld [vmem:[%s2898_s4 + $0x78] sm:$0xff]   ;;  %v2347_v4 = vld [vmem:[%s2898_s4 + $0x70] sm:$0xff]   ;;  %v2351_v8 = vld [vmem:[%s2898_s4 + $0x68] sm:$0xff]   ;;  %s2910_s21 = smov (!%p305_p4, %s2441_s21), 3  ;;  %vm385_vm0 = vsmask.f32 1280  ;;  %v954_v38 = vlaneseq }
   0xd   : > { %v2344_v1 = vld [vmem:[%s2898_s4 + $0x38] sm:$0xff]   ;;  %2198 = vmatprep.subr.bf16.mxu0 %v2343_v0  ;;  %v2348_v5 = vld [vmem:[%s2898_s4 + $0x30] sm:$0xff]   ;;  %v2352_v9 = vld [vmem:[%s2898_s4 + $0x28] sm:$0xff]   ;;  %s2589_s11 = smul.u32 20, %s2910_s21  ;;  %vm386_vm1 = vsmask.f32 3336 }
   0xe   : > { %v2345_v2 = vld [vmem:[%s2898_s4 + $0xf8] sm:$0xff]   ;;  %2199 = vmatpush3.bf16.msra.mxu0 %v2344_v1  ;;  %v2349_v6 = vld [vmem:[%s2898_s4 + $0xf0] sm:$0xff]   ;;  %v2353_v10 = vld [vmem:[%s2898_s4 + $0xe8] sm:$0xff]   ;;  %vm388_vm2 = vsmask.f32 5392  ;;  %vm2453_vm7 = vmmov 0  }
   0xf   : > { %v2346_v3 = vld [vmem:[%s2898_s4 + $0xb8] sm:$0xff]   ;;  %2220 = vmatprep.subr.bf16.mxu1 %v2345_v2  ;;  %2200 = vmatprep.subr.bf16.mxu0 %v2347_v4  ;;  %v2350_v7 = vld [vmem:[%s2898_s4 + $0xb0] sm:$0xff]   ;;  %v2354_v11 = vld [vmem:[%s2898_s4 + $0xa8] sm:$0xff]   ;;  %s2607_s26 = scalar_lea.vmem %s2896_s2, %s2589_s11  ;;  %vm390_vm4 = vsmask.f32 7448  ;;  %s2626_s12 = scalar_lea.vmem %s2897_s3, %s2589_s11 }
  0x10   : > { %2221 = vmatpush3.bf16.msra.mxu1 %v2346_v3  ;;  %v2355_v12 = vld [vmem:[%s2898_s4 + $0x60] sm:$0xff]   ;;  %v2359_v16 = vld [vmem:[%s2898_s4 + $0x58] sm:$0xff]   ;;  %v2363_v20 = vld [vmem:[%s2898_s4 + $0x50] sm:$0xff]   ;;  %s2649_s17 = scalar_lea.vmem %s2895_s1, %s2589_s11  ;;  %s2789_s30 = scalar_lea.vmem %s2894_s0, %s2589_s11 }
  0x11   : > { %2222 = vmatprep.subr.bf16.mxu1 %v2349_v6  ;;  %v2356_v13 = vld [vmem:[%s2898_s4 + $0x20] sm:$0xff]   ;;  %v2360_v17 = vld [vmem:[%s2898_s4 + $0x18] sm:$0xff]   ;;  %v2364_v21 = vld [vmem:[%s2898_s4 + $0x10] sm:$0xff]   ;;  %s2190_s14 = sshll.u32 %s2910_s21, 3 }
  0x12   : > { %2201 = vmatpush3.bf16.msra.mxu0 %v2348_v5  ;;  %v2357_v14 = vld [vmem:[%s2898_s4 + $0xe0] sm:$0xff]   ;;  %v2361_v18 = vld [vmem:[%s2898_s4 + $0xd8] sm:$0xff]   ;;  %v2365_v22 = vld [vmem:[%s2898_s4 + $0xd0] sm:$0xff]   ;;  %v955_v5 = vshrl.u32 %v954_v38, 7 }
  0x13   : > { %2202 = vmatprep.subr.bf16.mxu0 %v2351_v8  ;;  %v2358_v15 = vld [vmem:[%s2898_s4 + $0xa0] sm:$0xff]   ;;  %v2362_v19 = vld [vmem:[%s2898_s4 + $0x98] sm:$0xff]   ;;  %v2366_v23 = vld [vmem:[%s2898_s4 + $0x90] sm:$0xff]  }
  0x14   : > { %2223 = vmatpush3.bf16.msra.mxu1 %v2350_v7  ;;  %v2367_v24 = vld [vmem:[%s2898_s4 + $0x48] sm:$0xff]   ;;  %v2371_v28 = vld [vmem:[%s2898_s4 + $0x40] sm:$0xff]   ;;  %vm387_vm3 = vmor %vm385_vm0, %vm386_vm1 }
  0x15   : > { %2224 = vmatprep.subr.bf16.mxu1 %v2353_v10  ;;  %v2368_v25 = vld [vmem:[%s2898_s4 + $0x8] sm:$0xff]   ;;  %v2372_v29 = vld [vmem:[%s2898_s4] sm:$0xff]   ;;  %vm2629_vm5 = vmor %vm387_vm3, %vm388_vm2 }
  0x16   : > { %2203 = vmatpush3.bf16.msra.mxu0 %v2352_v9  ;;  %v2369_v26 = vld [vmem:[%s2898_s4 + $0xc8] sm:$0xff]   ;;  %v2373_v30 = vld [vmem:[%s2898_s4 + $0xc0] sm:$0xff]   ;;  %v2377_v61 = vld [vmem:[%s2898_s4 + $0x178] sm:$0xff]   ;;  %v2451_v9 = vmov 1983009808  }
  0x17   : > { %2204 = vmatprep.subr.bf16.mxu0 %v2355_v12  ;;  %v2370_v27 = vld [vmem:[%s2898_s4 + $0x88] sm:$0xff]   ;;  %v2065_v31 = vld.sshfl [vmem:[%s2607_s26] sm:$0x13 pattern:$0x76325410]  ;;  %vm2639_vm6 = vmor %vm2629_vm5, %vm390_vm4  ;;  %v952_v10 = vunpack.c.l.s4 %v2451_v9 }
  0x18   : > { %2225 = vmatpush3.bf16.msra.mxu1 %v2354_v11  ;;  %v2066_v32 = vld.sshfl [vmem:[%s2607_s26 + $0x4] sm:$0x13 pattern:$0x76325410]  ;;  %v360_v33 = vcombine.high %v2065_v31, %v2065_v31  ;;  %v393_v40 = vshrl.u32 %v2065_v31, 16  ;;  %v396_v41 = vshll.u32 %v2065_v31, 16 }
  0x19   : > { %2226 = vmatprep.subr.bf16.mxu1 %v2357_v14  ;;  %v2067_v34 = vld.sshfl [vmem:[%s2607_s26 + $0x8] sm:$0x13 pattern:$0x76325410]  ;;  %v368_v35 = vcombine.high %v2066_v32, %v2066_v32  ;;  %v2374_v43 = vld [vmem:[%s2898_s4 + $0x80] sm:$0xff]   ;;  %v407_v44 = vshrl.u32 %v2066_v32, 16 }
  0x1a   : > { %2205 = vmatpush3.bf16.msra.mxu0 %v2356_v13  ;;  %v2068_v36 = vld.sshfl [vmem:[%s2607_s26 + $0xc] sm:$0x13 pattern:$0x76325410]  ;;  %v376_v37 = vcombine.high %v2067_v34, %v2067_v34  ;;  %v402_v42 = vshll.u32 %v360_v33, 16  ;;  %v410_v45 = vshll.u32 %v2066_v32, 16 }
  0x1b   : > { %2206 = vmatprep.subr.bf16.mxu0 %v2359_v16  ;;  %v384_v39 = vcombine.high %v2068_v36, %v2068_v36  ;;  %v416_v46 = vshll.u32 %v368_v35, 16  ;;  %v421_v47 = vshrl.u32 %v2067_v34, 16  ;;  %v395_v49 = vrot.slane %v393_v40, 6  ;;  %v2381_v13 = vld [vmem:[%s2898_s4 + $0x1f8] sm:$0xff]   ;;  %v2387_v9 = vld [vmem:[%s2898_s4 + $0x168] sm:$0xff]  }
  0x1c   : > { %2227 = vmatpush3.bf16.msra.mxu1 %v2358_v15  ;;  %v398_v50 = vrot.slane %v396_v41, 7  ;;  %v404_v51 = vrot.slane %v402_v42, 7  ;;  %v424_v52 = vshll.u32 %v2067_v34, 16  ;;  %v409_v53 = vrot.slane %v407_v44, 6  ;;  %v2380_v40 = vld [vmem:[%s2898_s4 + $0x138] sm:$0xff]  }
  0x1d   : > { %2228 = vmatprep.subr.bf16.mxu1 %v2361_v18  ;;  %v412_v54 = vrot.slane %v410_v45, 7  ;;  %v418_v55 = vrot.slane %v416_v46, 7  ;;  %v423_v56 = vrot.slane %v421_v47, 6  ;;  %v430_v59 = vshll.u32 %v376_v37, 16 }
  0x1e   : > { %2207 = vmatpush3.bf16.msra.mxu0 %v2360_v17  ;;  %v399_v57 = vor.u32 %v398_v50, %v395_v49  ;;  %v426_v58 = vrot.slane %v424_v52, 7  ;;  %v435_v60 = vshrl.u32 %v2068_v36, 16  ;;  %v438_v0 = vshll.u32 %v2068_v36, 16 }
  0x1f   : > { %2208 = vmatprep.subr.bf16.mxu0 %v2363_v20  ;;  %v413_v63 = vor.u32 %v412_v54, %v409_v53  ;;  %v444_v1 = vshll.u32 %v384_v39, 16  ;;  %v432_v7 = vrot.slane %v430_v59, 7  ;;  %v2421_v11 = vld.sshfl [vmem:[%s2626_s12] sm:$0xf pattern:$0x76325410] }
  0x20   : > { %2229 = vmatpush3.bf16.msra.mxu1 %v2362_v19  ;;  %v400_v2 = vrot.slane %v399_v57, 2  ;;  %v427_v3 = vor.u32 %v426_v58, %v423_v56  ;;  %v437_v4 = vrot.slane %v435_v60, 6  ;;  %v440_v8 = vrot.slane %v438_v0, 7 }
  0x21   : > { %2230 = vmatprep.subr.bf16.mxu1 %v2365_v22  ;;  %v414_v6 = vrot.slane %v413_v63, 2  ;;  %v2422_v12 = vld.sshfl [vmem:[%s2626_s12 + $0x8] sm:$0xf pattern:$0x76325410]  ;;  %v446_v16 = vrot.slane %v444_v1, 7  ;;  %v953_v19 = vunpack.c.0.s8 %v952_v10 }
  0x22   : > { %2209 = vmatpush3.bf16.msra.mxu0 %v2364_v21  ;;  %v405_v14 = vsel %vm2639_vm6, %v400_v2, %v404_v51  ;;  %v428_v15 = vrot.slane %v427_v3, 2  ;;  %v441_v18 = vor.u32 %v440_v8, %v437_v4  ;;  %v2423_v21 = vld.sshfl [vmem:[%s2649_s17 + $0x4] sm:$0xf pattern:$0x76325410]  ;;  %v965_v33 = vcombine.low %v2421_v11, %v2422_v12  ;;  %v2383_v51 = vld [vmem:[%s2898_s4 + $0x170] sm:$0xff]  }
  0x23   : > { %2210 = vmatprep.subr.bf16.mxu0 %v2367_v24  ;;  %v2658_v17 = vsel %vm2639_vm6, %v414_v6, %v418_v55  ;;  %v2424_v22 = vld.sshfl [vmem:[%s2649_s17 + $0xc] sm:$0xf pattern:$0x76325410] }
  0x24   : > { %2231 = vmatpush3.bf16.msra.mxu1 %v2366_v23  ;;  %v967_v20 = vcombine.low %v405_v14, %v2658_v17  ;;  %v2665_v23 = vsel %vm2639_vm6, %v428_v15, %v432_v7  ;;  %v442_v24 = vrot.slane %v441_v18, 2  ;;  %v2071_v31 = vld.sshfl [vmem:[%s2626_s12 + $0x8] sm:$0x13 pattern:$0x76325410]  ;;  %v1023_v39 = vcombine.low %v2423_v21, %v2424_v22  ;;  %v2384_v4 = vld [vmem:[%s2898_s4 + $0x130] sm:$0xff]  }
  0x25   : > { %2232 = vmatprep.subr.bf16.mxu1 %v2369_v26  ;;  %v2069_v26 = vld.sshfl [vmem:[%s2626_s12] sm:$0x13 pattern:$0x76325410]  ;;  %v479_v36 = vcombine.high %v2071_v31, %v2071_v31  ;;  %v517_v50 = vshrl.u32 %v2071_v31, 16  ;;  %v520_v55 = vshll.u32 %v2071_v31, 16 }
  0x26   : > { %2211 = vmatpush3.bf16.msra.mxu0 %v2368_v25  ;;  %v2667_v25 = vsub.s32 %v953_v19, %v955_v5  ;;  %v463_v32 = vcombine.high %v2069_v26, %v2069_v26  ;;  %v2072_v34 = vld.sshfl [vmem:[%s2626_s12 + $0xc] sm:$0x13 pattern:$0x76325410]  ;;  %v489_v37 = vshrl.u32 %v2069_v26, 16  ;;  %v492_v42 = vshll.u32 %v2069_v26, 16  ;;  %1775 = vmatprep.mubr.bf16.mxu1 %v1023_v39 }
  0x27   : > { %2212 = vmatprep.subr.bf16.mxu0 %v2371_v28  ;;  %v487_v41 = vcombine.high %v2072_v34, %v2072_v34  ;;  %v519_v58 = vrot.slane %v517_v50, 6  ;;  %v526_v59 = vshll.u32 %v479_v36, 16  ;;  %v531_v63 = vshrl.u32 %v2072_v34, 16  ;;  %v2388_v11 = vld [vmem:[%s2898_s4 + $0x128] sm:$0xff]   ;;  %v2382_v31 = vld [vmem:[%s2898_s4 + $0x1b8] sm:$0xff]   ;;  %v2386_v36 = vld [vmem:[%s2898_s4 + $0x1b0] sm:$0xff]  }
  0x28   : > { %2233 = vmatpush3.bf16.msra.mxu1 %v2370_v27  ;;  %v2672_v27 = vsel %vm2639_vm6, %v442_v24, %v446_v16  ;;  %v975_v28 = vrot.slane %v967_v20, %v2667_v25  ;;  %v498_v44 = vshll.u32 %v463_v32, 16  ;;  %v494_v48 = vrot.slane %v492_v42, 7  ;;  %v2391_v20 = vld [vmem:[%s2898_s4 + $0x160] sm:$0xff]   ;;  %v2385_v32 = vld [vmem:[%s2898_s4 + $0x1f0] sm:$0xff]   ;;  %v2403_v39 = vld [vmem:[%s2898_s4 + $0x148] sm:$0xff]  }
  0x29   : > { %2234 = vmatprep.subr.bf16.mxu1 %v2373_v30  ;;  %v968_v30 = vcombine.low %v2665_v23, %v2672_v27  ;;  %v534_v0 = vshll.u32 %v2072_v34, 16  ;;  %v528_v2 = vrot.slane %v526_v59, 7  ;;  %v540_v3 = vshll.u32 %v487_v41, 16  ;;  %v2396_v34 = vld [vmem:[%s2898_s4 + $0x118] sm:$0xff]   ;;  %v2393_v41 = vld [vmem:[%s2898_s4 + $0x1e0] sm:$0xff]   ;;  %v2404_v42 = vld [vmem:[%s2898_s4 + $0x108] sm:$0xff]  }
  0x2a   : > { %2213 = vmatpush3.bf16.msra.mxu0 %v2372_v29  ;;  %v2070_v29 = vld.sshfl [vmem:[%s2626_s12 + $0x4] sm:$0x13 pattern:$0x76325410]  ;;  %v500_v52 = vrot.slane %v498_v44, 7  ;;  %v533_v7 = vrot.slane %v531_v63, 6 }
  0x2b   : > { %2242 = vmatprep.subr.bf16.mxu0 %v2377_v61  ;;  %v471_v35 = vcombine.high %v2070_v29, %v2070_v29  ;;  %v982_v38 = vrot.slane %v968_v30, %v2667_v25  ;;  %v503_v45 = vshrl.u32 %v2070_v29, 16  ;;  %v506_v46 = vshll.u32 %v2070_v29, 16  ;;  %v2395_v29 = vld [vmem:[%s2898_s4 + $0x158] sm:$0xff]   ;;  %v2407_v44 = vld [vmem:[%s2898_s4 + $0x140] sm:$0xff]  }
  0x2c   : > { %2235 = vmatpush3.bf16.msra.mxu1 %v2374_v43  ;;  %v491_v43 = vrot.slane %v489_v37, 6  ;;  %v522_v61 = vrot.slane %v520_v55, 7  ;;  %v536_v8 = vrot.slane %v534_v0, 7  ;;  %v542_v15 = vrot.slane %v540_v3, 7  ;;  %v2389_v37 = vld [vmem:[%s2898_s4 + $0x1e8] sm:$0xff]  }
  0x2d   : > { %2264 = vmatprep.subr.bf16.mxu1 %v2381_v13  ;;  %v983_v47 = vcombine.low %v975_v28, %v982_v38  ;;  %v512_v49 = vshll.u32 %v471_v35, 16  ;;  %v505_v53 = vrot.slane %v503_v45, 6  ;;  %v508_v54 = vrot.slane %v506_v46, 7  ;;  %v2392_v28 = vld [vmem:[%s2898_s4 + $0x120] sm:$0xff]   ;;  %v2399_v35 = vld [vmem:[%s2898_s4 + $0x150] sm:$0xff]   ;;  %v2397_v45 = vld [vmem:[%s2898_s4 + $0x1d8] sm:$0xff]  }
  0x2e   : > { %v495_v56 = vor.u32 %v494_v48, %v491_v43  ;;  %v523_v6 = vor.u32 %v522_v61, %v519_v58  ;;  %v537_v14 = vor.u32 %v536_v8, %v533_v7  ;;  %v2400_v38 = vld [vmem:[%s2898_s4 + $0x110] sm:$0xff]   ;;  %v2394_v43 = vld [vmem:[%s2898_s4 + $0x1a0] sm:$0xff]   ;;  %v2398_v48 = vld [vmem:[%s2898_s4 + $0x198] sm:$0xff]   ;;  %v2452_v7 = vmov 0.0  }
  0x2f   : > { %1734 = vmatprep.mubr.bf16.mxu0 %v983_v47  ;;  %v514_v57 = vrot.slane %v512_v49, 7  ;;  %v509_v60 = vor.u32 %v508_v54, %v505_v53  ;;  %v2408_v46 = vld [vmem:[%s2898_s4 + $0x100] sm:$0xff]   ;;  %v2090_v49 = vld.sshfl [vmem:[%s2649_s17 + $0x8] sm:$0x13 pattern:$0x76325410] }
  0x30   : > { %1735 = vmatmul.mubr.bf16.vlgmr.msra.gmra.mxu0 %v965_v33  ;;  %v496_v1 = vrot.slane %v495_v56, 2  ;;  %v524_v13 = vrot.slane %v523_v6, 2  ;;  %v538_v19 = vrot.slane %v537_v14, 2  ;;  %v672_v54 = vcombine.high %v2090_v49, %v2090_v49  ;;  %v2401_v61 = vld [vmem:[%s2898_s4 + $0x1d0] sm:$0xff]  }
  0x31   : > { %2243 = vmatpush3.bf16.msra.mxu0 %v2380_v40  ;;  %v510_v5 = vrot.slane %v509_v60, 2  ;;  %v2390_v40 = vld [vmem:[%s2898_s4 + $0x1a8] sm:$0xff]   ;;  %v2089_v47 = vld.sshfl [vmem:[%s2649_s17 + $0x4] sm:$0x13 pattern:$0x76325410] }
  0x32   : > { %2244 = vmatprep.subr.bf16.mxu0 %v2383_v51  ;;  %v501_v10 = vsel %vm2639_vm6, %v496_v1, %v500_v52  ;;  %v2705_v18 = vsel %vm2639_vm6, %v524_v13, %v528_v2  ;;  %v2714_v22 = vsel %vm2639_vm6, %v538_v19, %v542_v15  ;;  %v664_v50 = vcombine.high %v2089_v47, %v2089_v47  ;;  %v2091_v53 = vld.sshfl [vmem:[%s2649_s17 + $0xc] sm:$0x13 pattern:$0x76325410]  ;;  %v2402_v8 = vld [vmem:[%s2898_s4 + $0x190] sm:$0xff]  }
  0x33   : > { %v2700_v12 = vsel %vm2639_vm6, %v510_v5, %v514_v57  ;;  %v986_v24 = vcombine.low %v2705_v18, %v2714_v22  ;;  %v690_v51 = vshrl.u32 %v2089_v47, 16  ;;  %v693_v52 = vshll.u32 %v2089_v47, 16  ;;  %v2092_v57 = vld.sshfl [vmem:[%s2649_s17 + $0x10] sm:$0x13 pattern:$0x76325410] }
  0x34   : > { %v985_v16 = vcombine.low %v501_v10, %v2700_v12  ;;  %v1101_v21 = vcombine.low %v2700_v12, %v2705_v18  ;;  %v704_v55 = vshrl.u32 %v2090_v49, 16  ;;  %v707_v56 = vshll.u32 %v2090_v49, 16  ;;  %v2084_v47 = vld.sshfl [vmem:[%s2789_s30 + $0x10] sm:$0x13 pattern:$0x76325410] }
  0x35   : > { %2245 = vmatpush3.bf16.msra.mxu0 %v2384_v4  ;;  %v1000_v30 = vrot.slane %v986_v24, %v2667_v25  ;;  %v680_v58 = vcombine.high %v2091_v53, %v2091_v53  ;;  %v692_v59 = vrot.slane %v690_v51, 6  ;;  %v695_v60 = vrot.slane %v693_v52, 7  ;;  %v2418_v12 = vld [vmem:[%s2898_s4 + $0x210] sm:$0xff]   ;;  %v2419_v18 = vld [vmem:[%s2898_s4 + $0x208] sm:$0xff]  }
  0x36   : > { %2246 = vmatprep.subr.bf16.mxu0 %v2387_v9  ;;  %v993_v26 = vrot.slane %v985_v16, %v2667_v25  ;;  %v688_v63 = vcombine.high %v2092_v57, %v2092_v57  ;;  %v699_v0 = vshll.u32 %v664_v50, 16  ;;  %v706_v1 = vrot.slane %v704_v55, 6 }
  0x37   : > { %v709_v2 = vrot.slane %v707_v56, 7  ;;  %v696_v3 = vor.u32 %v695_v60, %v692_v59  ;;  %v713_v4 = vshll.u32 %v672_v54, 16  ;;  %v718_v5 = vshrl.u32 %v2091_v53, 16  ;;  %v2410_v59 = vld [vmem:[%s2898_s4 + $0x180] sm:$0xff]  }
  0x38   : > { %v1001_v33 = vcombine.low %v993_v26, %v1000_v30  ;;  %v721_v6 = vshll.u32 %v2091_v53, 16  ;;  %v701_v9 = vrot.slane %v699_v0, 7  ;;  %v732_v13 = vshrl.u32 %v2092_v57, 16 }
  0x39   : > { %2247 = vmatpush3.bf16.msra.mxu0 %v2388_v11  ;;  %v710_v10 = vor.u32 %v709_v2, %v706_v1  ;;  %v727_v11 = vshll.u32 %v680_v58, 16  ;;  %v697_v14 = vrot.slane %v696_v3, 2  ;;  %v715_v15 = vrot.slane %v713_v4, 7 }
  0x3a   : > { %2248 = vmatprep.subr.bf16.mxu0 %v2391_v20  ;;  %1776 = vmatmul.mubr.bf16.vlgmr.msra.gmra.mxu1 %v1001_v33  ;;  %v720_v16 = vrot.slane %v718_v5, 6  ;;  %v723_v19 = vrot.slane %v721_v6, 7  ;;  %v2405_v20 = vld [vmem:[%s2898_s4 + $0x1c8] sm:$0xff]   ;;  %v734_v26 = vrot.slane %v732_v13, 6  ;;  %v741_v33 = vshll.u32 %v688_v63, 16 }
  0x3b   : > { %2265 = vmatpush3.bf16.msra.mxu1 %v2382_v31  ;;  %v711_v24 = vrot.slane %v710_v10, 2  ;;  %v702_v30 = vsel %vm2639_vm6, %v697_v14, %v701_v9  ;;  %v592_v53 = vcombine.high %v2084_v47, %v2084_v47  ;;  %v2104_v10 = vld.sshfl [vmem:[%s2607_s26 + $0x10] sm:$0x13 pattern:$0x76325410] }
  0x3c   : > { %2266 = vmatprep.subr.bf16.mxu1 %v2385_v32  ;;  %v724_v31 = vor.u32 %v723_v19, %v720_v16  ;;  %v729_v32 = vrot.slane %v727_v11, 7 }
  0x3d   : > { %2249 = vmatpush3.bf16.msra.mxu0 %v2392_v28  ;;  %v735_v28 = vshll.u32 %v2092_v57, 16 }
  0x3e   : > { %2250 = vmatprep.subr.bf16.mxu0 %v2395_v29  ;;  %v2406_v29 = vld [vmem:[%s2898_s4 + $0x188] sm:$0xff]  }
  0x3f   : > { %2267 = vmatpush3.bf16.msra.mxu1 %v2386_v36  ;;  %v716_v36 = vsel %vm2639_vm6, %v711_v24, %v715_v15  ;;  %v636_v15 = vshrl.u32 %v2084_v47, 16  ;;  %v645_v24 = vshll.u32 %v592_v53, 16 }
  0x40   : > { %2268 = vmatprep.subr.bf16.mxu1 %v2389_v37  ;;  %v737_v37 = vrot.slane %v735_v28, 7 }
  0x41   : > { %2251 = vmatpush3.bf16.msra.mxu0 %v2396_v34  ;;  %v2081_v34 = vld.sshfl [vmem:[%s2789_s30 + $0x4] sm:$0x13 pattern:$0x76325410] }
  0x42   : > { %2252 = vmatprep.subr.bf16.mxu0 %v2399_v35  ;;  %v2409_v35 = vld [vmem:[%s2898_s4 + $0x1c0] sm:$0xff]   ;;  %v597_v50 = vshll.u32 %v2081_v34, 16 }
  0x43   : > { %2269 = vmatpush3.bf16.msra.mxu1 %v2390_v40  ;;  %v594_v40 = vshrl.u32 %v2081_v34, 16 }
  0x44   : > { %2270 = vmatprep.subr.bf16.mxu1 %v2393_v41  ;;  %v725_v41 = vrot.slane %v724_v31, 2  ;;  %v599_v56 = vrot.slane %v597_v50, 7  ;;  %v1083_v50 = vcombine.low %v2658_v17, %v2665_v23 }
  0x45   : > { %2253 = vmatpush3.bf16.msra.mxu0 %v2400_v38  ;;  %v2082_v38 = vld.sshfl [vmem:[%s2789_s30 + $0x8] sm:$0x13 pattern:$0x76325410]  ;;  %v596_v49 = vrot.slane %v594_v40, 6 }
  0x46   : > { %2254 = vmatprep.subr.bf16.mxu0 %v2403_v39  ;;  %v568_v39 = vcombine.high %v2081_v34, %v2081_v34  ;;  %v730_v51 = vsel %vm2639_vm6, %v725_v41, %v729_v32  ;;  %v608_v57 = vshrl.u32 %v2082_v38, 16  ;;  %v611_v58 = vshll.u32 %v2082_v38, 16 }
  0x47   : > { %2271 = vmatpush3.bf16.msra.mxu1 %v2394_v43  ;;  %v1043_v43 = vcombine.low %v702_v30, %v716_v36  ;;  %v600_v2 = vor.u32 %v599_v56, %v596_v49  ;;  %v638_v30 = vrot.slane %v636_v15, 6  ;;  %v647_v34 = vrot.slane %v645_v24, 7  ;;  %v2415_v15 = vld [vmem:[%s2898_s4 + $0x228] sm:$0xff]  }
  0x48   : > { %2272 = vmatprep.subr.bf16.mxu1 %v2397_v45  ;;  %v576_v45 = vcombine.high %v2082_v38, %v2082_v38  ;;  %v603_v54 = vshll.u32 %v568_v39, 16  ;;  %v610_v3 = vrot.slane %v608_v57, 6  ;;  %v613_v4 = vrot.slane %v611_v58, 7 }
  0x49   : > { %2255 = vmatpush3.bf16.msra.mxu0 %v2404_v42  ;;  %v743_v42 = vrot.slane %v741_v33, 7  ;;  %v1051_v52 = vrot.slane %v1043_v43, %v2667_v25  ;;  %v601_v11 = vrot.slane %v600_v2, 2  ;;  %v792_v36 = vcombine.high %v2104_v10, %v2104_v10 }
  0x4a   : > { %2256 = vmatprep.subr.bf16.mxu0 %v2407_v44  ;;  %v2083_v44 = vld.sshfl [vmem:[%s2789_s30 + $0xc] sm:$0x13 pattern:$0x76325410]  ;;  %v605_v60 = vrot.slane %v603_v54, 7  ;;  %v614_v13 = vor.u32 %v613_v4, %v610_v3  ;;  %v839_v38 = vshll.u32 %v2104_v10, 16  ;;  %v1091_v23 = vrot.slane %v1083_v50, %v2667_v25 }
  0x4b   : > { %2273 = vmatpush3.bf16.msra.mxu1 %v2398_v48  ;;  %v584_v48 = vcombine.high %v2083_v44, %v2083_v44  ;;  %v622_v63 = vshrl.u32 %v2083_v44, 16  ;;  %v625_v0 = vshll.u32 %v2083_v44, 16  ;;  %v845_v43 = vshll.u32 %v792_v36, 16 }
  0x4c   : > { %2274 = vmatprep.subr.bf16.mxu1 %v2401_v61  ;;  %v617_v61 = vshll.u32 %v576_v45, 16  ;;  %v615_v28 = vrot.slane %v614_v13, 2  ;;  %v2425_v44 = vld.sshfl [vmem:[%s2626_s12 + $0x4] sm:$0xf pattern:$0x76325410]  ;;  %v1109_v13 = vrot.slane %v1101_v21, %v2667_v25 }
  0x4d   : > { %2257 = vmatpush3.bf16.msra.mxu0 %v2408_v46  ;;  %v738_v46 = vor.u32 %v737_v37, %v734_v26  ;;  %v627_v9 = vrot.slane %v625_v0, 7  ;;  %v631_v14 = vshll.u32 %v584_v48, 16  ;;  %v606_v26 = vsel %vm2639_vm6, %v601_v11, %v605_v60  ;;  %v2420_v21 = vld [vmem:[%s2898_s4 + $0x200] sm:$0xff]  }
  0x4e   : > { %2295 = vmatprep.subr.bf16.mxu0 %v2452_v7  ;;  %v619_v6 = vrot.slane %v617_v61, 7  ;;  %v836_v37 = vshrl.u32 %v2104_v10, 16  ;;  %v847_v49 = vrot.slane %v845_v43, 7 }
  0x4f   : > { %2275 = vmatpush3.bf16.msra.mxu1 %v2402_v8  ;;  %v739_v55 = vrot.slane %v738_v46, 2  ;;  %v624_v8 = vrot.slane %v622_v63, 6 }
  0x50   : > { %2276 = vmatprep.subr.bf16.mxu1 %v2405_v20  ;;  %v639_v20 = vshll.u32 %v2084_v47, 16  ;;  %v838_v41 = vrot.slane %v836_v37, 6  ;;  %v2426_v47 = vld.sshfl [vmem:[%s2626_s12 + $0xc] sm:$0xf pattern:$0x76325410] }
  0x51   : > { %v744_v1 = vsel %vm2639_vm6, %v739_v55, %v743_v42  ;;  %v628_v19 = vor.u32 %v627_v9, %v624_v8  ;;  %v841_v42 = vrot.slane %v839_v38, 7  ;;  %v1081_v8 = vcombine.low %v2425_v44, %v2426_v47 }
  0x52   : > { %v1044_v5 = vcombine.low %v730_v51, %v744_v1  ;;  %v641_v33 = vrot.slane %v639_v20, 7  ;;  %v2112_v51 = vld.sshfl [vmem:[%s2626_s12 + $0x10] sm:$0x13 pattern:$0x76325410]  ;;  %v2411_v1 = vld [vmem:[%s2898_s4 + $0x238] sm:$0xff]   ;;  %s333_s12 = scalar_lea.vmem %s2900_s6, %s2190_s14 }
  0x53   : > { %2277 = vmatpush3.bf16.msra.mxu1 %v2406_v29  ;;  %v633_v29 = vrot.slane %v631_v14, 7  ;;  %v629_v32 = vrot.slane %v628_v19, 2  ;;  %v842_v48 = vor.u32 %v841_v42, %v838_v41  ;;  %v888_v53 = vcombine.high %v2112_v51, %v2112_v51 }
  0x54   : > { %2278 = vmatprep.subr.bf16.mxu1 %v2409_v35  ;;  %v1058_v16 = vrot.slane %v1044_v5, %v2667_v25  ;;  %v620_v35 = vsel %vm2639_vm6, %v615_v28, %v619_v6  ;;  %v642_v39 = vor.u32 %v641_v33, %v638_v30  ;;  %v932_v54 = vshrl.u32 %v2112_v51, 16 }
  0x55   : > { %v1025_v40 = vcombine.low %v606_v26, %v620_v35  ;;  %v634_v45 = vsel %vm2639_vm6, %v629_v32, %v633_v29  ;;  %v935_v55 = vshll.u32 %v2112_v51, 16  ;;  %v843_v58 = vrot.slane %v842_v48, 2 }
  0x56   : > { %v1059_v31 = vcombine.low %v1051_v52, %v1058_v16  ;;  %v643_v46 = vrot.slane %v642_v39, 2  ;;  %v941_v61 = vshll.u32 %v888_v53, 16 }
  0x57   : > { %2279 = vmatpush3.bf16.msra.mxu1 %v2410_v59  ;;  %v1033_v57 = vrot.slane %v1025_v40, %v2667_v25  ;;  %v934_v59 = vrot.slane %v932_v54, 6  ;;  %v937_v60 = vrot.slane %v935_v55, 7  ;;  %v848_v0 = vsel %vm2639_vm6, %v843_v58, %v847_v49 }
  0x58   : > { %1816 = vmatprep.mubr.bf16.mxu0 %v1059_v31  ;;  %v648_v52 = vsel %vm2639_vm6, %v643_v46, %v647_v34  ;;  %v1084_v17 = vcombine.low %v2672_v27, %v848_v0  ;;  %v943_v3 = vrot.slane %v941_v61, 7  ;;  %v2414_v27 = vld [vmem:[%s2898_s4 + $0x230] sm:$0xff]  }
  0x59   : > { %v1026_v56 = vcombine.low %v634_v45, %v648_v52  ;;  %v938_v2 = vor.u32 %v937_v60, %v934_v59 }
  0x5a   : > { %v1098_v5 = vrot.slane %v1084_v17, %v2667_v25 }
  0x5b   : > { %v1040_v63 = vrot.slane %v1026_v56, %v2667_v25  ;;  %v939_v6 = vrot.slane %v938_v2, 2 }
  0x5c   : > { %v1099_v9 = vcombine.low %v1091_v23, %v1098_v5 }
  0x5d   : > { %v1041_v4 = vcombine.low %v1033_v57, %v1040_v63  ;;  %v944_v10 = vsel %vm2639_vm6, %v939_v6, %v943_v3 }
  0x5e   : > { %v1102_v11 = vcombine.low %v2714_v22, %v944_v10  ;;  %1857 = vmatprep.mubr.bf16.mxu1 %v1099_v9  ;;  %v2416_v22 = vld [vmem:[%s2898_s4 + $0x220] sm:$0xff]  }
  0x5f   : > { %1817 = vmatmul.mubr.bf16.vlgmr.msra.gmra.mxu0 %v1041_v4  ;;  %1858 = vmatmul.mubr.bf16.vlgmr.msra.gmra.mxu1 %v1081_v8 }
  0x60   : > { %2296 = vmatpush3.bf16.msra.mxu0 %v2411_v1  ;;  %2311 = vmatprep.mubr.msk.bf16.mxu0 %vm2453_vm7, %v2452_v7  ;;  %v1116_v14 = vrot.slane %v1102_v11, %v2667_v25  ;;  %v2417_v25 = vld [vmem:[%s2898_s4 + $0x218] sm:$0xff]  }
  0x61   : > { %2297 = vmatprep.subr.bf16.mxu0 %v2452_v7 }
  0x62   : > { %v1117_v62 = vcombine.low %v1109_v13, %v1116_v14 }
  0x64   : > { %2298 = vmatpush3.bf16.msra.mxu0 %v2414_v27 }
  0x65   : > { %2299 = vmatprep.subr.bf16.mxu0 %v2452_v7 }
  0x68   : > { %2300 = vmatpush3.bf16.msra.mxu0 %v2415_v15 }
  0x69   : > { %2301 = vmatprep.subr.bf16.mxu0 %v2452_v7 }
  0x6c   : > { %2302 = vmatpush3.bf16.msra.mxu0 %v2416_v22 }
  0x6d   : > { %2303 = vmatprep.subr.bf16.mxu0 %v2452_v7 }
  0x70   : > { %2304 = vmatpush3.bf16.msra.mxu0 %v2417_v25 }
  0x71   : > { %2305 = vmatprep.subr.bf16.mxu0 %v2452_v7 }
  0x74   : > { %2306 = vmatpush3.bf16.msra.mxu0 %v2418_v12 }
  0x75   : > { %2307 = vmatprep.subr.bf16.mxu0 %v2452_v7 }
  0x78   : > { %2308 = vmatpush3.bf16.msra.mxu0 %v2419_v18 }
  0x79   : > { %2309 = vmatprep.subr.bf16.mxu0 %v2452_v7  ;;  %v2113_v7 = vld [vmem:[%s2899_s5] ss:$0 sm:$0xff] }
  0x7c   : > { %2310 = vmatpush3.bf16.msra.mxu0 %v2420_v21 }
  0x7f   : > { %2312 = vmatmul.mubr.bf16.vlgmr.msra.gmra.mxu0 %v1117_v62 }
  0xf0   : > { %v2214_v16 = vpop.f32.mrf.mxu0 }
  0xf2   : > { %v2215_v19 = vpop.f32.mrf.mxu0 }
  0xf3   : > { %v2216_v36 = vadd.f32 %v2215_v19, %v2214_v16 }
  0xf4   : > { %v2217_v24 = vpop.f32.mrf.mxu0 }
  0xf5   : > { %v1737_v40 = vadd.f32 %v2216_v36, %v2113_v7 }
  0xf6   : > { %v2218_v28 = vpop.f32.mrf.mxu0 }
  0xf7   : > { %v2219_v37 = vadd.f32 %v2218_v28, %v2217_v24 }
  0xf9   : > { %v1740_v42 = vadd.f32 %v2219_v37, %v2113_v7 }
  0xfa   : > { %v2236_v20 = vpop.f32.mrf.mxu1 }
  0xfc   : > { %v2237_v26 = vpop.f32.mrf.mxu1 }
  0xfd   : > { %v2238_v41 = vadd.f32 %v2237_v26, %v2236_v20 }
  0xfe   : > { %v2239_v29 = vpop.f32.mrf.mxu1 }
  0xff   : > { %v1778_v47 = vadd.f32 %v2238_v41, %v1737_v40 }
 0x100   : > { %v2240_v31 = vpop.f32.mrf.mxu1 }
 0x101   : > { %v2241_v43 = vadd.f32 %v2240_v31, %v2239_v29 }
 0x103   : > { %v1781_v48 = vadd.f32 %v2241_v43, %v1740_v42 }
 0x11f   : > { %v2258_v30 = vpop.f32.mrf.mxu0  ;;  %v2280_v33 = vpop.f32.mrf.mxu1 }
 0x121   : > { %v2259_v32 = vpop.f32.mrf.mxu0  ;;  %v2281_v35 = vpop.f32.mrf.mxu1 }
 0x122   : > { %v2260_v44 = vadd.f32 %v2259_v32, %v2258_v30  ;;  %v2282_v50 = vadd.f32 %v2281_v35, %v2280_v33 }
 0x123   : > { %v2261_v34 = vpop.f32.mrf.mxu0  ;;  %v2283_v39 = vpop.f32.mrf.mxu1 }
 0x124   : > { %v1819_v49 = vadd.f32 %v2260_v44, %v1778_v47 }
 0x125   : > { %v2262_v38 = vpop.f32.mrf.mxu0  ;;  %v2284_v46 = vpop.f32.mrf.mxu1 }
 0x126   : > { %v2263_v45 = vadd.f32 %v2262_v38, %v2261_v34  ;;  %v2285_v52 = vadd.f32 %v2284_v46, %v2283_v39  ;;  %v1860_v55 = vadd.f32 %v2282_v50, %v1819_v49 }
 0x128   : > { %v1822_v51 = vadd.f32 %v2263_v45, %v1781_v48 }
 0x12a   : > { %v1863_v56 = vadd.f32 %v2285_v52, %v1822_v51 }
 0x13f   : > { %v1900_v53 = vpop.f32.mrf.mxu0 }
 0x140   : > { %v1901_v58 = vadd.f32 %v1900_v53, %v1860_v55 }
 0x141   : > { %v2313_v54 = vpop.f32.mrf.mxu0 }
 0x143   : > { %v1903_v57 = vpop.f32.mrf.mxu0 }
 0x144   : > { %v1904_v59 = vadd.f32 %v1903_v57, %v1863_v56 }
 0x145   : > { %v2314_v60 = vpop.f32.mrf.mxu0 }
 0x146   : > { %v2196_v61 = vpack.c.bf16 %v1904_v59, %v1901_v58 }
 0x148   : > { %2197 = vst [vmem:[%s333_s12] sm:$0xff] %v2196_v61  }
 0x149 PF: > { %s16_s23 = sadd.s32 1, %s2449_s23   ;;  %s2905_s21 = smov %s2445_s22 }
 0x14a   : > { %p13_p5 = scmp.ge.s32.totalorder %s16_s23, 6   ;;  %s2906_s22 = smov %s2908_s24 }
 0x14c   :  { %15 = sbr.rel (!%p13_p5) target bundleno = 2 (0x2), region = 89 }

// kernel: merge_module_forward.7
= control target key start
LH: loop header
LB: loop body
LE: loop exit
PB: predicated region body
PF: predicated region fallthrough
CT: control target
= control target key end

     0   :  { %s2982_s21 = smov 0   ;;  %s2984_s22 = smov 0   ;;  %s3623_s0 = inlined_call_operand.vmem [shape: bf16[4,9,9,128], index: 0, kind: input, shape index: {}]   ;;  %s3624_s1 = inlined_call_operand.vmem [shape: bf16[4,9,9,128], index: 1, kind: input, shape index: {}]   ;;  %s3625_s2 = inlined_call_operand.vmem [shape: bf16[4,9,9,128], index: 2, kind: input, shape index: {}]   ;;  %s3626_s3 = inlined_call_operand.vmem [shape: bf16[4,9,9,128], index: 3, kind: input, shape index: {}]   ;;  %s3627_s4 = inlined_call_operand.vmem [shape: bf16[1152,128], index: 4, kind: input, shape index: {}]   ;;  %s3628_s5 = inlined_call_operand.vmem [shape: f32[1,128], index: 5, kind: input, shape index: {}]   ;;  %s3629_s6 = inlined_call_operand.vmem [shape: bf16[4,64,128], index: 6, kind: output, shape index: {}]  }
   0x1   :  { %s2986_s23 = smov 0  }
   0x2 LB: > { %s28_s24 = sadd.s32 1, %s2941_s22  ;;  %p2380_p0 = scmp.ge.s32.totalorder %s2945_s23, 1  ;;  %s2945_s23 = sphi %s2986_s23, %s16_s23   ;;  %s2941_s22 = sphi %s2984_s22, %s3649_s22   ;;  %s2937_s21 = sphi %s2982_s21, %s3648_s21  }
   0x3   : > { %p30_p1 = scmp.ge.s32.totalorder %s28_s24, 4  ;;  %p256_p2 = scmp.lt.s32.totalorder %s2945_s23, 5 }
   0x5   : > { %s3651_s24 = smov (%p30_p1, %s28_s24), 0  ;;  %p257_p3 = pnand %p2380_p0, %p256_p2 }
   0x7   : > { %260 = sbr.rel (%p257_p3) target bundleno = 348 (0x15c), region = 44 }
   0xc   : > { %v2839_v0 = vld [vmem:[%s3627_s4 + $0x78] sm:$0xff]   ;;  %v2843_v4 = vld [vmem:[%s3627_s4 + $0x70] sm:$0xff]   ;;  %v2847_v8 = vld [vmem:[%s3627_s4 + $0x68] sm:$0xff]   ;;  %p305_p4 = scmp.lt.s32.totalorder %s2937_s21, 3  ;;  %vm366_vm0 = vsmask.f32 3328 }
   0xd   : > { %v2840_v1 = vld [vmem:[%s3627_s4 + $0xf8] sm:$0xff]   ;;  %2602 = vmatprep.subr.bf16.mxu0 %v2839_v0  ;;  %v2844_v5 = vld [vmem:[%s3627_s4 + $0xf0] sm:$0xff]   ;;  %v2848_v9 = vld [vmem:[%s3627_s4 + $0xe8] sm:$0xff]   ;;  %vm367_vm1 = vsmask.f32 7440 }
   0xe   : > { %v2841_v2 = vld [vmem:[%s3627_s4 + $0x38] sm:$0xff]   ;;  %2642 = vmatprep.subr.bf16.mxu1 %v2840_v1  ;;  %v2845_v6 = vld [vmem:[%s3627_s4 + $0x30] sm:$0xff]   ;;  %v2849_v10 = vld [vmem:[%s3627_s4 + $0x28] sm:$0xff]   ;;  %s3653_s21 = smov (!%p305_p4, %s2937_s21), 3 }
   0xf   : > { %v2842_v3 = vld [vmem:[%s3627_s4 + $0xb8] sm:$0xff]   ;;  %2603 = vmatpush3.bf16.msra.mxu0 %v2841_v2  ;;  %v2846_v7 = vld [vmem:[%s3627_s4 + $0xb0] sm:$0xff]   ;;  %v2850_v11 = vld [vmem:[%s3627_s4 + $0xa8] sm:$0xff]   ;;  %s3085_s13 = smul.u32 72, %s3653_s21 }
  0x10   : > { %2643 = vmatpush3.bf16.msra.mxu1 %v2842_v3  ;;  %2604 = vmatprep.subr.bf16.mxu0 %v2843_v4  ;;  %v2851_v12 = vld [vmem:[%s3627_s4 + $0x60] sm:$0xff]   ;;  %v2855_v16 = vld [vmem:[%s3627_s4 + $0x58] sm:$0xff]   ;;  %v2859_v20 = vld [vmem:[%s3627_s4 + $0x50] sm:$0xff]  }
  0x11   : > { %2644 = vmatprep.subr.bf16.mxu1 %v2844_v5  ;;  %v2852_v13 = vld [vmem:[%s3627_s4 + $0xe0] sm:$0xff]   ;;  %v2856_v17 = vld [vmem:[%s3627_s4 + $0xd8] sm:$0xff]   ;;  %v2860_v21 = vld [vmem:[%s3627_s4 + $0xd0] sm:$0xff]   ;;  %s3103_s28 = scalar_lea.vmem %s3625_s2, %s3085_s13  ;;  %s3115_s11 = scalar_lea.vmem %s3624_s1, %s3085_s13 }
  0x12   : > { %v2853_v14 = vld [vmem:[%s3627_s4 + $0x20] sm:$0xff]   ;;  %v2857_v18 = vld [vmem:[%s3627_s4 + $0x18] sm:$0xff]   ;;  %v2861_v22 = vld [vmem:[%s3627_s4 + $0x10] sm:$0xff]   ;;  %s3125_s15 = scalar_lea.vmem %s3626_s3, %s3085_s13  ;;  %s3324_s18 = scalar_lea.vmem %s3623_s0, %s3085_s13 }
  0x13   : > { %2605 = vmatpush3.bf16.msra.mxu0 %v2845_v6  ;;  %v2854_v15 = vld [vmem:[%s3627_s4 + $0xa0] sm:$0xff]   ;;  %v2858_v19 = vld [vmem:[%s3627_s4 + $0x98] sm:$0xff]   ;;  %v2862_v23 = vld [vmem:[%s3627_s4 + $0x90] sm:$0xff]  }
  0x14   : > { %2645 = vmatpush3.bf16.msra.mxu1 %v2846_v7  ;;  %2606 = vmatprep.subr.bf16.mxu0 %v2847_v8  ;;  %v2863_v24 = vld [vmem:[%s3627_s4 + $0x48] sm:$0xff]   ;;  %v2867_v28 = vld [vmem:[%s3627_s4 + $0x40] sm:$0xff]   ;;  %v2388_v43 = vld [vmem:[%s3115_s11 + $0x10] sm:$0xf] }
  0x15   : > { %2646 = vmatprep.subr.bf16.mxu1 %v2848_v9  ;;  %v2864_v25 = vld [vmem:[%s3627_s4 + $0xc8] sm:$0xff]   ;;  %v2868_v29 = vld [vmem:[%s3627_s4 + $0xc0] sm:$0xff]   ;;  %v766_v57 = vshrl.u32 %v2388_v43, 16  ;;  %v769_v58 = vshll.u32 %v2388_v43, 16  ;;  %vm3134_vm2 = vmor %vm366_vm0, %vm367_vm1 }
  0x16   : > { %v2865_v26 = vld [vmem:[%s3627_s4 + $0x8] sm:$0xff]   ;;  %v2869_v30 = vld [vmem:[%s3627_s4] sm:$0xff]   ;;  %v2873_v5 = vld [vmem:[%s3627_s4 + $0x178] sm:$0xff]  }
  0x17   : > { %2607 = vmatpush3.bf16.msra.mxu0 %v2849_v10  ;;  %v2866_v27 = vld [vmem:[%s3627_s4 + $0x88] sm:$0xff]   ;;  %v2870_v31 = vld [vmem:[%s3627_s4 + $0x80] sm:$0xff]   ;;  %v768_v3 = vrot.slane %v766_v57, 4  ;;  %v2874_v6 = vld [vmem:[%s3627_s4 + $0x1f8] sm:$0xff]   ;;  %v771_v8 = vrot.slane %v769_v58, 5 }
  0x18   : > { %2647 = vmatpush3.bf16.msra.mxu1 %v2850_v11  ;;  %2608 = vmatprep.subr.bf16.mxu0 %v2851_v12  ;;  %v350_v32 = vld [vmem:[%s3103_s28] sm:$0xf]  ;;  %v351_v33 = vld [vmem:[%s3103_s28 + $0x4] sm:$0x1]  ;;  %v352_v34 = vld [vmem:[%s3103_s28 + $0x8] sm:$0xf] }
  0x19   : > { %2648 = vmatprep.subr.bf16.mxu1 %v2852_v13  ;;  %v353_v35 = vld [vmem:[%s3103_s28 + $0xc] sm:$0x1]  ;;  %v370_v36 = vshrl.u32 %v350_v32, 16  ;;  %v373_v37 = vshll.u32 %v350_v32, 16  ;;  %v379_v38 = vshll.u32 %v351_v33, 16  ;;  %v384_v39 = vshrl.u32 %v352_v34, 16 }
  0x1a   : > { %v2387_v40 = vld [vmem:[%s3115_s11 + $0x8] sm:$0xf]  ;;  %v387_v41 = vshll.u32 %v352_v34, 16  ;;  %v393_v42 = vshll.u32 %v353_v35, 16  ;;  %v340_v50 = vld [vmem:[%s3125_s15] sm:$0xf] }
  0x1b   : > { %2609 = vmatpush3.bf16.msra.mxu0 %v2853_v14  ;;  %v752_v44 = vshrl.u32 %v2387_v40, 16  ;;  %v755_v45 = vshll.u32 %v2387_v40, 16  ;;  %v372_v46 = vrot.slane %v370_v36, 4  ;;  %v375_v47 = vrot.slane %v373_v37, 5  ;;  %v341_v55 = vld [vmem:[%s3125_s15 + $0x8] sm:$0xf] }
  0x1c   : > { %2649 = vmatpush3.bf16.msra.mxu1 %v2854_v15  ;;  %2610 = vmatprep.subr.bf16.mxu0 %v2855_v16  ;;  %v381_v48 = vrot.slane %v379_v38, 5  ;;  %v386_v49 = vrot.slane %v384_v39, 4  ;;  %v389_v51 = vrot.slane %v387_v41, 5  ;;  %v395_v52 = vrot.slane %v393_v42, 5  ;;  %v481_v60 = vld [vmem:[%s3125_s15 + $0x4] sm:$0x1] }
  0x1d   : > { %2650 = vmatprep.subr.bf16.mxu1 %v2856_v17  ;;  %v754_v53 = vrot.slane %v752_v44, 4  ;;  %v757_v54 = vrot.slane %v755_v45, 5  ;;  %v376_v56 = vor.u32 %v375_v47, %v372_v46  ;;  %v2463_v59 = vcombine.low %v2387_v40, %v2388_v43  ;;  %v482_v1 = vld [vmem:[%s3125_s15 + $0xc] sm:$0x1]  ;;  %v2876_v32 = vld [vmem:[%s3627_s4 + $0x1b8] sm:$0xff]   ;;  %v2879_v33 = vld [vmem:[%s3627_s4 + $0x130] sm:$0xff]  }
  0x1e   : > { %v390_v62 = vor.u32 %v389_v51, %v386_v49  ;;  %v490_v63 = vshrl.u32 %v340_v50, 16  ;;  %v493_v0 = vshll.u32 %v340_v50, 16  ;;  %v504_v4 = vshrl.u32 %v341_v55, 16  ;;  %v2878_v35 = vld [vmem:[%s3627_s4 + $0x1f0] sm:$0xff]   ;;  %v356_v39 = vld [vmem:[%s3103_s28 + $0x18] sm:$0xf] }
  0x1f   : > { %2611 = vmatpush3.bf16.msra.mxu0 %v2857_v18  ;;  %v377_v2 = vrot.slane %v376_v56, 4  ;;  %1971 = vmatprep.mubr.bf16.mxu1 %v2463_v59  ;;  %v758_v12 = vor.u32 %v757_v54, %v754_v53  ;;  %v507_v14 = vshll.u32 %v341_v55, 16  ;;  %v2451_v16 = vcombine.low %v340_v50, %v341_v55  ;;  %v354_v36 = vld [vmem:[%s3103_s28 + $0x10] sm:$0xf]  ;;  %v355_v37 = vld [vmem:[%s3103_s28 + $0x14] sm:$0x1] }
  0x20   : > { %2651 = vmatpush3.bf16.msra.mxu1 %v2858_v19  ;;  %2612 = vmatprep.subr.bf16.mxu0 %v2859_v20  ;;  %v391_v7 = vrot.slane %v390_v62, 4  ;;  %v492_v9 = vrot.slane %v490_v63, 4  ;;  %v495_v10 = vrot.slane %v493_v0, 5  ;;  %v506_v13 = vrot.slane %v504_v4, 4  ;;  %v357_v40 = vld [vmem:[%s3103_s28 + $0x1c] sm:$0x1] }
  0x21   : > { %2652 = vmatprep.subr.bf16.mxu1 %v2860_v21  ;;  %v382_v11 = vsel %vm3134_vm2, %v377_v2, %v381_v48  ;;  %v499_v18 = vshll.u32 %v481_v60, 16  ;;  %v509_v20 = vrot.slane %v507_v14, 5  ;;  %v513_v21 = vshll.u32 %v482_v1, 16  ;;  %v2389_v47 = vld [vmem:[%s3115_s11 + $0x18] sm:$0xf]  ;;  %v2883_v48 = vld [vmem:[%s3627_s4 + $0x168] sm:$0xff]  }
  0x22   : > { %v396_v15 = vsel %vm3134_vm2, %v391_v7, %v395_v52  ;;  %v496_v17 = vor.u32 %v495_v10, %v492_v9  ;;  %v398_v41 = vshrl.u32 %v354_v36, 16  ;;  %v401_v42 = vshll.u32 %v354_v36, 16  ;;  %v2880_v49 = vld [vmem:[%s3627_s4 + $0x1b0] sm:$0xff]   ;;  %v2390_v53 = vld [vmem:[%s3115_s11 + $0x20] sm:$0xf]  ;;  %v2884_v2 = vld [vmem:[%s3627_s4 + $0x1e8] sm:$0xff]  }
  0x23   : > { %2613 = vmatpush3.bf16.msra.mxu0 %v2861_v22  ;;  %v2455_v19 = vcombine.low %v382_v11, %v396_v15  ;;  %v2875_v22 = vld [vmem:[%s3627_s4 + $0x138] sm:$0xff]   ;;  %v407_v44 = vshll.u32 %v355_v37, 16  ;;  %v412_v45 = vshrl.u32 %v356_v39, 16  ;;  %v415_v46 = vshll.u32 %v356_v39, 16  ;;  %v342_v59 = vld [vmem:[%s3125_s15 + $0x10] sm:$0xf] }
  0x24   : > { %2653 = vmatpush3.bf16.msra.mxu1 %v2862_v23  ;;  %2614 = vmatprep.subr.bf16.mxu0 %v2863_v24  ;;  %v772_v23 = vor.u32 %v771_v8, %v768_v3  ;;  %v497_v24 = vrot.slane %v496_v17, 4  ;;  %v400_v50 = vrot.slane %v398_v41, 4  ;;  %v403_v51 = vrot.slane %v401_v42, 5  ;;  %v343_v1 = vld [vmem:[%s3125_s15 + $0x18] sm:$0xf]  ;;  %v2889_v42 = vld [vmem:[%s3627_s4 + $0x120] sm:$0xff]  }
  0x25   : > { %2654 = vmatprep.subr.bf16.mxu1 %v2864_v25  ;;  %v501_v25 = vrot.slane %v499_v18, 5  ;;  %1906 = vmatprep.mubr.bf16.mxu0 %v2455_v19  ;;  %v421_v52 = vshll.u32 %v357_v40, 16  ;;  %v780_v54 = vshrl.u32 %v2389_v47, 16  ;;  %v409_v55 = vrot.slane %v407_v44, 5  ;;  %v483_v7 = vld [vmem:[%s3125_s15 + $0x14] sm:$0x1] }
  0x26   : > { %v3165_v34 = vrot.slane %v772_v23, 4  ;;  %v414_v56 = vrot.slane %v412_v45, 4  ;;  %v417_v57 = vrot.slane %v415_v46, 5  ;;  %v783_v58 = vshll.u32 %v2389_v47, 16  ;;  %v484_v8 = vld [vmem:[%s3125_s15 + $0x1c] sm:$0x1] }
  0x27   : > { %2615 = vmatpush3.bf16.msra.mxu0 %v2865_v26  ;;  %v510_v26 = vor.u32 %v509_v20, %v506_v13  ;;  %v404_v60 = vor.u32 %v403_v51, %v400_v50  ;;  %v423_v62 = vrot.slane %v421_v52, 5  ;;  %v782_v63 = vrot.slane %v780_v54, 4  ;;  %v2888_v40 = vld [vmem:[%s3627_s4 + $0x1e0] sm:$0xff]   ;;  %v360_v50 = vld [vmem:[%s3103_s28 + $0x28] sm:$0xf] }
  0x28   : > { %2655 = vmatpush3.bf16.msra.mxu1 %v2866_v27  ;;  %2616 = vmatprep.subr.bf16.mxu0 %v2867_v28  ;;  %v515_v27 = vrot.slane %v513_v21, 5  ;;  %v2877_v28 = vld [vmem:[%s3627_s4 + $0x170] sm:$0xff]   ;;  %v794_v0 = vshrl.u32 %v2390_v53, 16  ;;  %v418_v3 = vor.u32 %v417_v57, %v414_v56  ;;  %v785_v4 = vrot.slane %v783_v58, 5  ;;  %v2890_v45 = vld [vmem:[%s3627_s4 + $0x1a0] sm:$0xff]  }
  0x29   : > { %2656 = vmatprep.subr.bf16.mxu1 %v2868_v29  ;;  %v3155_v29 = vrot.slane %v758_v12, 4  ;;  %v405_v9 = vrot.slane %v404_v60, 4  ;;  %v518_v11 = vshrl.u32 %v342_v59, 16  ;;  %v521_v12 = vshll.u32 %v342_v59, 16  ;;  %v358_v46 = vld [vmem:[%s3103_s28 + $0x20] sm:$0xf] }
  0x2a   : > { %v796_v10 = vrot.slane %v794_v0, 4  ;;  %v419_v13 = vrot.slane %v418_v3, 4  ;;  %v532_v15 = vshrl.u32 %v343_v1, 16  ;;  %v2452_v20 = vcombine.low %v342_v59, %v343_v1  ;;  %v361_v51 = vld [vmem:[%s3103_s28 + $0x2c] sm:$0x1] }
  0x2b   : > { %2617 = vmatpush3.bf16.msra.mxu0 %v2869_v30  ;;  %v502_v30 = vsel %vm3134_vm2, %v497_v24, %v501_v25  ;;  %v410_v17 = vsel %vm3134_vm2, %v405_v9, %v409_v55  ;;  %v520_v18 = vrot.slane %v518_v11, 4  ;;  %v523_v19 = vrot.slane %v521_v12, 5  ;;  %v2885_v25 = vld [vmem:[%s3627_s4 + $0x128] sm:$0xff]   ;;  %v2392_v59 = vld [vmem:[%s3115_s11 + $0x30] sm:$0xf] }
  0x2c   : > { %2657 = vmatpush3.bf16.msra.mxu1 %v2870_v31  ;;  %2682 = vmatprep.subr.bf16.mxu0 %v2873_v5  ;;  %v511_v31 = vrot.slane %v510_v26, 4  ;;  %v797_v5 = vshll.u32 %v2390_v53, 16  ;;  %v424_v21 = vsel %vm3134_vm2, %v419_v13, %v423_v62  ;;  %v527_v24 = vshll.u32 %v483_v7, 16  ;;  %v2391_v56 = vld [vmem:[%s3115_s11 + $0x28] sm:$0xf] }
  0x2d   : > { %2722 = vmatprep.subr.bf16.mxu1 %v2874_v6  ;;  %v2464_v6 = vcombine.low %v2389_v47, %v2390_v53  ;;  %v2456_v26 = vcombine.low %v410_v17, %v424_v21  ;;  %v426_v52 = vshrl.u32 %v358_v46, 16  ;;  %v429_v53 = vshll.u32 %v358_v46, 16  ;;  %v344_v3 = vld [vmem:[%s3125_s15 + $0x20] sm:$0xf]  ;;  %v485_v13 = vld [vmem:[%s3125_s15 + $0x24] sm:$0x1] }
  0x2e   : > { %1907 = vmatmul.mubr.bf16.vlgmr.msra.gmra.mxu0 %v2451_v16  ;;  %v516_v38 = vsel %vm3134_vm2, %v511_v31, %v515_v27  ;;  %v799_v14 = vrot.slane %v797_v5, 5  ;;  %v535_v16 = vshll.u32 %v343_v1, 16  ;;  %v524_v27 = vor.u32 %v523_v19, %v520_v18  ;;  %v2893_v19 = vld [vmem:[%s3627_s4 + $0x158] sm:$0xff]  }
  0x2f   : > { %2683 = vmatpush3.bf16.msra.mxu0 %v2875_v22  ;;  %v2459_v43 = vcombine.low %v502_v30, %v516_v38  ;;  %v534_v22 = vrot.slane %v532_v15, 4  ;;  %v2886_v30 = vld [vmem:[%s3627_s4 + $0x1a8] sm:$0xff]   ;;  %v786_v31 = vor.u32 %v785_v4, %v782_v63  ;;  %1914 = vmatprep.mubr.bf16.mxu0 %v2456_v26  ;;  %v440_v55 = vshrl.u32 %v360_v50, 16 }
  0x30   : > { %2684 = vmatprep.subr.bf16.mxu0 %v2877_v28  ;;  %v537_v23 = vrot.slane %v535_v16, 5  ;;  %v541_v28 = vshll.u32 %v484_v8, 16  ;;  %v800_v36 = vor.u32 %v799_v14, %v796_v10  ;;  %v525_v37 = vrot.slane %v524_v27, 4  ;;  %v345_v8 = vld [vmem:[%s3125_s15 + $0x28] sm:$0xf] }
  0x31   : > { %1972 = vmatmul.mubr.bf16.vlgmr.msra.gmra.mxu1 %v2459_v43  ;;  %v3212_v43 = vrot.slane %v786_v31, 4  ;;  %v443_v57 = vshll.u32 %v360_v50, 16  ;;  %v449_v58 = vshll.u32 %v361_v51, 16  ;;  %v808_v60 = vshrl.u32 %v2391_v56, 16  ;;  %v486_v14 = vld [vmem:[%s3125_s15 + $0x2c] sm:$0x1] }
  0x32   : > { %2723 = vmatpush3.bf16.msra.mxu1 %v2876_v32  ;;  %1979 = vmatprep.mubr.bf16.mxu1 %v2464_v6  ;;  %v529_v32 = vrot.slane %v527_v24, 5  ;;  %v543_v38 = vrot.slane %v541_v28, 5  ;;  %v3220_v47 = vrot.slane %v800_v36, 4  ;;  %v811_v62 = vshll.u32 %v2391_v56, 16  ;;  %v2898_v51 = vld [vmem:[%s3627_s4 + $0x1d0] sm:$0xff]  }
  0x33   : > { %2685 = vmatpush3.bf16.msra.mxu0 %v2879_v33  ;;  %2724 = vmatprep.subr.bf16.mxu1 %v2878_v35  ;;  %v538_v33 = vor.u32 %v537_v23, %v534_v22  ;;  %v2887_v35 = vld [vmem:[%s3627_s4 + $0x160] sm:$0xff]   ;;  %v428_v63 = vrot.slane %v426_v52, 4  ;;  %v431_v0 = vrot.slane %v429_v53, 5  ;;  %v445_v4 = vrot.slane %v443_v57, 5  ;;  %v2899_v53 = vld [vmem:[%s3627_s4 + $0x110] sm:$0xff]  }
  0x34   : > { %2686 = vmatprep.subr.bf16.mxu0 %v2883_v48  ;;  %v530_v41 = vsel %vm3134_vm2, %v525_v37, %v529_v32  ;;  %v451_v5 = vrot.slane %v449_v58, 5  ;;  %v810_v6 = vrot.slane %v808_v60, 4  ;;  %v813_v7 = vrot.slane %v811_v62, 5  ;;  %v363_v60 = vld [vmem:[%s3103_s28 + $0x34] sm:$0x1] }
  0x35   : > { %v539_v39 = vrot.slane %v538_v33, 4  ;;  %v432_v9 = vor.u32 %v431_v0, %v428_v63  ;;  %v822_v10 = vshrl.u32 %v2392_v59, 16  ;;  %v825_v11 = vshll.u32 %v2392_v59, 16  ;;  %v2894_v33 = vld [vmem:[%s3627_s4 + $0x1d8] sm:$0xff]  }
  0x36   : > { %2725 = vmatpush3.bf16.msra.mxu1 %v2880_v49  ;;  %1915 = vmatmul.mubr.bf16.gmra.mxu0 %v2452_v20  ;;  %v359_v49 = vld [vmem:[%s3103_s28 + $0x24] sm:$0x1]  ;;  %v2465_v12 = vcombine.low %v2391_v56, %v2392_v59  ;;  %v546_v16 = vshrl.u32 %v344_v3, 16  ;;  %v549_v17 = vshll.u32 %v344_v3, 16  ;;  %v560_v18 = vshrl.u32 %v345_v8, 16  ;;  %v2900_v56 = vld [vmem:[%s3627_s4 + $0x190] sm:$0xff]  }
  0x37   : > { %2726 = vmatprep.subr.bf16.mxu1 %v2884_v2  ;;  %2687 = vmatpush3.bf16.msra.mxu0 %v2885_v25  ;;  %v544_v44 = vsel %vm3134_vm2, %v539_v39, %v543_v38  ;;  %v435_v54 = vshll.u32 %v359_v49, 16  ;;  %v442_v2 = vrot.slane %v440_v55, 4  ;;  %v433_v20 = vrot.slane %v432_v9, 4  ;;  %v2896_v39 = vld [vmem:[%s3627_s4 + $0x198] sm:$0xff]   ;;  %v362_v59 = vld [vmem:[%s3103_s28 + $0x30] sm:$0xf] }
  0x38   : > { %2688 = vmatprep.subr.bf16.mxu0 %v2887_v35  ;;  %v2460_v48 = vcombine.low %v530_v41, %v544_v44  ;;  %v824_v21 = vrot.slane %v822_v10, 4  ;;  %v827_v22 = vrot.slane %v825_v11, 5  ;;  %v563_v23 = vshll.u32 %v345_v8, 16  ;;  %v2895_v35 = vld [vmem:[%s3627_s4 + $0x118] sm:$0xff]  }
  0x39   : > { %v437_v1 = vrot.slane %v435_v54, 5  ;;  %v446_v15 = vor.u32 %v445_v4, %v442_v2  ;;  %v548_v25 = vrot.slane %v546_v16, 4  ;;  %v551_v26 = vrot.slane %v549_v17, 5  ;;  %v364_v62 = vld [vmem:[%s3103_s28 + $0x38] sm:$0xf] }
  0x3a   : > { %2727 = vmatpush3.bf16.msra.mxu1 %v2886_v30  ;;  %v562_v27 = vrot.slane %v560_v18, 4  ;;  %v565_v30 = vrot.slane %v563_v23, 5  ;;  %v2453_v31 = vcombine.low %v344_v3, %v345_v8  ;;  %v555_v32 = vshll.u32 %v485_v13, 16  ;;  %v365_v63 = vld [vmem:[%s3103_s28 + $0x3c] sm:$0x1] }
  0x3b   : > { %2728 = vmatprep.subr.bf16.mxu1 %v2888_v40  ;;  %2689 = vmatpush3.bf16.msra.mxu0 %v2889_v42  ;;  %v447_v24 = vrot.slane %v446_v15, 4  ;;  %v438_v28 = vsel %vm3134_vm2, %v433_v20, %v437_v1  ;;  %v552_v37 = vor.u32 %v551_v26, %v548_v25  ;;  %v569_v38 = vshll.u32 %v486_v14, 16  ;;  %v347_v17 = vld [vmem:[%s3125_s15 + $0x38] sm:$0xf]  ;;  %v488_v23 = vld [vmem:[%s3125_s15 + $0x3c] sm:$0x1] }
  0x3c   : > { %1980 = vmatmul.mubr.bf16.gmra.mxu1 %v2460_v48  ;;  %2690 = vmatprep.subr.bf16.mxu0 %v2893_v19  ;;  %v814_v40 = vor.u32 %v813_v7, %v810_v6  ;;  %v557_v42 = vrot.slane %v555_v32, 5  ;;  %v566_v44 = vor.u32 %v565_v30, %v562_v27  ;;  %v828_v46 = vor.u32 %v827_v22, %v824_v21  ;;  %v2393_v6 = vld [vmem:[%s3115_s11 + $0x38] sm:$0xf]  ;;  %v2394_v7 = vld [vmem:[%s3115_s11 + $0x40] sm:$0xf] }
  0x3d   : > { %1987 = vmatprep.mubr.bf16.mxu1 %v2465_v12  ;;  %v452_v36 = vsel %vm3134_vm2, %v447_v24, %v451_v5  ;;  %v553_v48 = vrot.slane %v552_v37, 4  ;;  %v571_v49 = vrot.slane %v569_v38, 5  ;;  %v454_v0 = vshrl.u32 %v362_v59, 16  ;;  %v346_v12 = vld [vmem:[%s3125_s15 + $0x30] sm:$0xf] }
  0x3e   : > { %2729 = vmatpush3.bf16.msra.mxu1 %v2890_v45  ;;  %v2457_v41 = vcombine.low %v438_v28, %v452_v36  ;;  %v2897_v45 = vld [vmem:[%s3627_s4 + $0x150] sm:$0xff]   ;;  %v567_v50 = vrot.slane %v566_v44, 4  ;;  %v3258_v54 = vrot.slane %v814_v40, 4  ;;  %v3265_v57 = vrot.slane %v828_v46, 4  ;;  %v2903_v28 = vld [vmem:[%s3627_s4 + $0x148] sm:$0xff]  }
  0x3f   : > { %2730 = vmatprep.subr.bf16.mxu1 %v2894_v33  ;;  %2691 = vmatpush3.bf16.msra.mxu0 %v2895_v35  ;;  %v558_v52 = vsel %vm3134_vm2, %v553_v48, %v557_v42  ;;  %v457_v1 = vshll.u32 %v362_v59, 16  ;;  %v463_v2 = vshll.u32 %v363_v60, 16  ;;  %v468_v3 = vshrl.u32 %v364_v62, 16  ;;  %v487_v22 = vld [vmem:[%s3125_s15 + $0x34] sm:$0x1]  ;;  %v2904_v44 = vld [vmem:[%s3627_s4 + $0x1c8] sm:$0xff]  }
  0x40   : > { %1922 = vmatprep.mubr.bf16.mxu0 %v2457_v41  ;;  %2692 = vmatprep.subr.bf16.mxu0 %v2897_v45  ;;  %v572_v55 = vsel %vm3134_vm2, %v567_v50, %v571_v49  ;;  %v471_v4 = vshll.u32 %v364_v62, 16  ;;  %v477_v5 = vshll.u32 %v365_v63, 16  ;;  %v456_v8 = vrot.slane %v454_v0, 4  ;;  %v2905_v45 = vld [vmem:[%s3627_s4 + $0x108] sm:$0xff]   ;;  %v2908_v60 = vld [vmem:[%s3627_s4 + $0x1c0] sm:$0xff]  }
  0x41   : > { %1923 = vmatmul.mubr.bf16.gmra.mxu0 %v2453_v31  ;;  %v2461_v58 = vcombine.low %v558_v52, %v572_v55  ;;  %v459_v9 = vrot.slane %v457_v1, 5  ;;  %v465_v10 = vrot.slane %v463_v2, 5  ;;  %v470_v11 = vrot.slane %v468_v3, 4  ;;  %v2909_v63 = vld [vmem:[%s3627_s4 + $0x100] sm:$0xff]  }
  0x42   : > { %2731 = vmatpush3.bf16.msra.mxu1 %v2896_v39  ;;  %v473_v13 = vrot.slane %v471_v4, 5  ;;  %v479_v14 = vrot.slane %v477_v5, 5  ;;  %v836_v15 = vshrl.u32 %v2393_v6, 16  ;;  %v839_v16 = vshll.u32 %v2393_v6, 16  ;;  %v2910_v1 = vld [vmem:[%s3627_s4 + $0x180] sm:$0xff]  }
  0x43   : > { %2732 = vmatprep.subr.bf16.mxu1 %v2898_v51  ;;  %2693 = vmatpush3.bf16.msra.mxu0 %v2899_v53  ;;  %v460_v18 = vor.u32 %v459_v9, %v456_v8  ;;  %v850_v19 = vshrl.u32 %v2394_v7, 16  ;;  %v853_v20 = vshll.u32 %v2394_v7, 16  ;;  %v2466_v21 = vcombine.low %v2393_v6, %v2394_v7  ;;  %v2906_v51 = vld [vmem:[%s3627_s4 + $0x188] sm:$0xff]   ;;  %v2412_v5 = vld [vmem:[%s3115_s11 + $0x14] sm:$0x1] }
  0x44   : > { %1988 = vmatmul.mubr.bf16.gmra.mxu1 %v2461_v58  ;;  %v474_v24 = vor.u32 %v473_v13, %v470_v11  ;;  %v3277_v25 = vrot.slane %v836_v15, 4  ;;  %v3279_v26 = vrot.slane %v839_v16, 5  ;;  %v574_v27 = vshrl.u32 %v346_v12, 16  ;;  %2694 = vmatprep.subr.bf16.mxu0 %v2903_v28  ;;  %v2411_v4 = vld [vmem:[%s3115_s11 + $0xc] sm:$0x1] }
  0x45   : > { %v461_v30 = vrot.slane %v460_v18, 4  ;;  %v3284_v31 = vrot.slane %v850_v19, 4  ;;  %v3286_v32 = vrot.slane %v853_v20, 5  ;;  %1995 = vmatprep.mubr.bf16.mxu1 %v2466_v21  ;;  %v577_v33 = vshll.u32 %v346_v12, 16  ;;  %v2427_v6 = vld [vmem:[%s3103_s28 + $0x8] sm:$0xf] }
  0x46   : > { %2733 = vmatpush3.bf16.msra.mxu1 %v2900_v56  ;;  %v475_v35 = vrot.slane %v474_v24, 4  ;;  %v576_v36 = vrot.slane %v574_v27, 4  ;;  %v588_v37 = vshrl.u32 %v347_v17, 16  ;;  %v591_v38 = vshll.u32 %v347_v17, 16  ;;  %v2907_v56 = vld [vmem:[%s3627_s4 + $0x140] sm:$0xff]  }
  0x47   : > { %v466_v39 = vsel %vm3134_vm2, %v461_v30, %v465_v10  ;;  %v579_v40 = vrot.slane %v577_v33, 5  ;;  %v2454_v41 = vcombine.low %v346_v12, %v347_v17  ;;  %v583_v42 = vshll.u32 %v487_v22, 16  ;;  %2734 = vmatprep.subr.bf16.mxu1 %v2904_v44  ;;  %2695 = vmatpush3.bf16.msra.mxu0 %v2905_v45  ;;  %v2428_v10 = vld [vmem:[%s3103_s28 + $0xc] sm:$0x1]  ;;  %v2429_v11 = vld [vmem:[%s3103_s28 + $0x10] sm:$0xf] }
  0x48   : > { %v480_v46 = vsel %vm3134_vm2, %v475_v35, %v479_v14  ;;  %v590_v48 = vrot.slane %v588_v37, 4  ;;  %v593_v49 = vrot.slane %v591_v38, 5  ;;  %v597_v50 = vshll.u32 %v488_v23, 16  ;;  %2696 = vmatprep.subr.bf16.mxu0 %v2907_v56  ;;  %v2430_v12 = vld [vmem:[%s3103_s28 + $0x14] sm:$0x1] }
  0x49   : > { %v2458_v52 = vcombine.low %v466_v39, %v480_v46  ;;  %v580_v53 = vor.u32 %v579_v40, %v576_v36  ;;  %v585_v55 = vrot.slane %v583_v42, 5  ;;  %v761_v8 = vshll.u32 %v2411_v4, 16  ;;  %v2395_v21 = vld [vmem:[%s3324_s18 + $0x8] sm:$0xf]  ;;  %v2396_v28 = vld [vmem:[%s3324_s18 + $0xc] sm:$0x1] }
  0x4a   : > { %v594_v58 = vor.u32 %v593_v49, %v590_v48  ;;  %v599_v59 = vrot.slane %v597_v50, 5  ;;  %2735 = vmatpush3.bf16.msra.mxu1 %v2906_v51  ;;  %v775_v9 = vshll.u32 %v2412_v5, 16  ;;  %v892_v13 = vshrl.u32 %v2427_v6, 16  ;;  %v2397_v37 = vld [vmem:[%s3324_s18 + $0x10] sm:$0xf] }
  0x4b   : > { %1930 = vmatprep.mubr.bf16.mxu0 %v2458_v52  ;;  %v581_v62 = vrot.slane %v580_v53, 4  ;;  %2736 = vmatprep.subr.bf16.mxu1 %v2908_v60  ;;  %v895_v14 = vshll.u32 %v2427_v6, 16  ;;  %v901_v15 = vshll.u32 %v2428_v10, 16  ;;  %v906_v16 = vshrl.u32 %v2429_v11, 16  ;;  %v2398_v38 = vld [vmem:[%s3324_s18 + $0x14] sm:$0x1] }
  0x4c   : > { %1931 = vmatmul.mubr.bf16.gmra.mxu0 %v2454_v41  ;;  %v595_v0 = vrot.slane %v594_v58, 4  ;;  %v763_v17 = vrot.slane %v761_v8, 5  ;;  %v777_v18 = vrot.slane %v775_v9, 5  ;;  %v909_v19 = vshll.u32 %v2429_v11, 16  ;;  %v3340_v44 = vld [vmem:[%s3125_s15 + $0x8] sm:$0xf] }
  0x4d   : > { %v586_v2 = vsel %vm3134_vm2, %v581_v62, %v585_v55  ;;  %2697 = vmatpush3.bf16.msra.mxu0 %v2909_v63  ;;  %v915_v20 = vshll.u32 %v2430_v12, 16  ;;  %v894_v22 = vrot.slane %v892_v13, 4  ;;  %v897_v23 = vrot.slane %v895_v14, 5  ;;  %v3343_v45 = vld [vmem:[%s3125_s15 + $0x10] sm:$0xf] }
  0x4e   : > { %v600_v3 = vsel %vm3134_vm2, %v595_v0, %v599_v59  ;;  %2737 = vmatpush3.bf16.msra.mxu1 %v2910_v1  ;;  %v903_v24 = vrot.slane %v901_v15, 5  ;;  %v908_v27 = vrot.slane %v906_v16, 4  ;;  %v764_v30 = vsel %vm3134_vm2, %v3155_v29, %v763_v17  ;;  %v2413_v1 = vld [vmem:[%s3115_s11 + $0x1c] sm:$0x1]  ;;  %v3364_v5 = vld [vmem:[%s3627_s4 + $0x230] sm:$0xff]  }
  0x4f   : > { %v2462_v7 = vcombine.low %v586_v2, %v600_v3  ;;  %v778_v33 = vsel %vm3134_vm2, %v3165_v34, %v777_v18  ;;  %v911_v35 = vrot.slane %v909_v19, 5  ;;  %v917_v36 = vrot.slane %v915_v20, 5  ;;  %v3348_v34 = vld [vmem:[%s3627_s4 + $0x238] sm:$0xff]   ;;  %v2414_v6 = vld [vmem:[%s3115_s11 + $0x24] sm:$0x1] }
  0x50   : > { %v2471_v39 = vcombine.low %v764_v30, %v778_v33  ;;  %v898_v40 = vor.u32 %v897_v23, %v894_v22  ;;  %v632_v41 = vshrl.u32 %v2395_v21, 16  ;;  %v635_v42 = vshll.u32 %v2395_v21, 16  ;;  %2774 = vmatprep.subr.bf16.mxu0 %v3348_v34  ;;  %2798 = vmatprep.subr.bf16.mxu1 %v3348_v34  ;;  %v2431_v8 = vld [vmem:[%s3103_s28 + $0x18] sm:$0xf]  ;;  %v2432_v12 = vld [vmem:[%s3103_s28 + $0x1c] sm:$0x1] }
  0x51   : > { %1996 = vmatmul.mubr.bf16.gmra.mxu1 %v2462_v7  ;;  %v912_v46 = vor.u32 %v911_v35, %v908_v27  ;;  %v641_v48 = vshll.u32 %v2396_v28, 16  ;;  %v646_v49 = vshrl.u32 %v2397_v37, 16  ;;  %v649_v29 = vshll.u32 %v2397_v37, 16  ;;  %v2433_v13 = vld [vmem:[%s3103_s28 + $0x20] sm:$0xf] }
  0x52   : > { %2036 = vmatprep.mubr.bf16.mxu0 %v2471_v39  ;;  %v899_v50 = vrot.slane %v898_v40, 4  ;;  %v634_v51 = vrot.slane %v632_v41, 4  ;;  %v637_v52 = vrot.slane %v635_v42, 5  ;;  %v655_v53 = vshll.u32 %v2398_v38, 16  ;;  %v2434_v17 = vld [vmem:[%s3103_s28 + $0x24] sm:$0x1] }
  0x53   : > { %v913_v55 = vrot.slane %v912_v46, 4  ;;  %v648_v56 = vrot.slane %v646_v49, 4  ;;  %v651_v58 = vrot.slane %v649_v29, 5  ;;  %v842_v59 = vor.u32 %v3279_v26, %v3277_v25  ;;  %v2400_v35 = vld [vmem:[%s3324_s18 + $0x1c] sm:$0x1]  ;;  %v3390_v41 = vld [vmem:[%s3627_s4 + $0x228] sm:$0xff]  }
  0x54   : > { %v904_v60 = vsel %vm3134_vm2, %v899_v50, %v903_v24  ;;  %v638_v62 = vor.u32 %v637_v52, %v634_v51  ;;  %v643_v63 = vrot.slane %v641_v48, 5  ;;  %v657_v0 = vrot.slane %v655_v53, 5  ;;  %v2399_v24 = vld [vmem:[%s3324_s18 + $0x18] sm:$0xf]  ;;  %v2402_v49 = vld [vmem:[%s3324_s18 + $0x24] sm:$0x1] }
  0x55   : > { %v918_v2 = vsel %vm3134_vm2, %v913_v55, %v917_v36  ;;  %v652_v3 = vor.u32 %v651_v58, %v648_v56  ;;  %v2475_v4 = vcombine.low %v3340_v44, %v3343_v45  ;;  %v789_v7 = vshll.u32 %v2413_v1, 16  ;;  %v2401_v36 = vld [vmem:[%s3324_s18 + $0x20] sm:$0xf] }
  0x56   : > { %v2479_v9 = vcombine.low %v904_v60, %v918_v2  ;;  %v639_v10 = vrot.slane %v638_v62, 4  ;;  %v803_v11 = vshll.u32 %v2414_v6, 16  ;;  %v856_v14 = vor.u32 %v3286_v32, %v3284_v31  ;;  %v3398_v58 = vld [vmem:[%s3627_s4 + $0x220] sm:$0xff]  }
  0x57   : > { %v653_v15 = vrot.slane %v652_v3, 4  ;;  %v791_v16 = vrot.slane %v789_v7, 5  ;;  %v920_v18 = vshrl.u32 %v2431_v8, 16  ;;  %v923_v19 = vshll.u32 %v2431_v8, 16  ;;  %v2422_v6 = vld [vmem:[%s3125_s15 + $0x20] sm:$0xf] }
  0x58   : > { %2101 = vmatprep.mubr.bf16.mxu1 %v2479_v9  ;;  %v644_v20 = vsel %vm3134_vm2, %v639_v10, %v643_v63  ;;  %v805_v21 = vrot.slane %v803_v11, 5  ;;  %v929_v22 = vshll.u32 %v2432_v12, 16  ;;  %v934_v23 = vshrl.u32 %v2433_v13, 16  ;;  %v2415_v11 = vld [vmem:[%s3115_s11 + $0x2c] sm:$0x1] }
  0x59   : > { %v658_v27 = vsel %vm3134_vm2, %v653_v15, %v657_v0  ;;  %2102 = vmatmul.mubr.bf16.vlgmr.msra.gmra.mxu1 %v2475_v4  ;;  %v792_v28 = vsel %vm3134_vm2, %v3212_v43, %v791_v16  ;;  %v922_v30 = vrot.slane %v920_v18, 4  ;;  %v925_v33 = vrot.slane %v923_v19, 5  ;;  %v2421_v4 = vld [vmem:[%s3125_s15 + $0x18] sm:$0xf] }
  0x5a   : > { %v2467_v37 = vcombine.low %v644_v20, %v658_v27  ;;  %2806 = vmatpush3.bf16.msra.mxu1 %v3348_v34  ;;  %v806_v38 = vsel %vm3134_vm2, %v3220_v47, %v805_v21  ;;  %v931_v39 = vrot.slane %v929_v22, 5  ;;  %v936_v40 = vrot.slane %v934_v23, 4  ;;  %v2435_v22 = vld [vmem:[%s3103_s28 + $0x28] sm:$0xf] }
  0x5b   : > { %2799 = vmatprep.subr.bf16.mxu1 %v3364_v5  ;;  %v2472_v43 = vcombine.low %v792_v28, %v806_v38  ;;  %v926_v42 = vor.u32 %v925_v33, %v922_v30  ;;  %v937_v46 = vshll.u32 %v2433_v13, 16  ;;  %v943_v48 = vshll.u32 %v2434_v17, 16  ;;  %v2416_v17 = vld [vmem:[%s3115_s11 + $0x34] sm:$0x1]  ;;  %v2918_v38 = vld [vmem:[%s3627_s4 + $0x218] sm:$0xff]  }
  0x5c   : > { %2037 = vmatmul.mubr.bf16.vlgmr.msra.gmra.mxu0 %v2467_v37  ;;  %v660_v29 = vshrl.u32 %v2399_v24, 16  ;;  %v663_v50 = vshll.u32 %v2399_v24, 16  ;;  %v669_v51 = vshll.u32 %v2400_v35, 16  ;;  %v674_v52 = vshrl.u32 %v2401_v36, 16  ;;  %v2437_v37 = vld [vmem:[%s3103_s28 + $0x30] sm:$0xf] }
  0x5d   : > { %2775 = vmatpush3.bf16.msra.mxu0 %v3348_v34  ;;  %2044 = vmatprep.mubr.bf16.mxu0 %v2472_v43  ;;  %v927_v47 = vrot.slane %v926_v42, 4  ;;  %v939_v53 = vrot.slane %v937_v46, 5  ;;  %v945_v55 = vrot.slane %v943_v48, 5  ;;  %v677_v56 = vshll.u32 %v2401_v36, 16  ;;  %v2436_v36 = vld [vmem:[%s3103_s28 + $0x2c] sm:$0x1] }
  0x5e   : > { %2776 = vmatprep.subr.bf16.mxu0 %v3364_v5  ;;  %2807 = vmatpush3.bf16.msra.mxu1 %v3364_v5  ;;  %v662_v60 = vrot.slane %v660_v29, 4  ;;  %v665_v62 = vrot.slane %v663_v50, 5  ;;  %v671_v34 = vrot.slane %v669_v51, 5  ;;  %v676_v63 = vrot.slane %v674_v52, 4  ;;  %v2438_v42 = vld [vmem:[%s3103_s28 + $0x34] sm:$0x1] }
  0x5f   : > { %v932_v0 = vsel %vm3134_vm2, %v927_v47, %v931_v39  ;;  %v940_v1 = vor.u32 %v939_v53, %v936_v40  ;;  %v679_v2 = vrot.slane %v677_v56, 5  ;;  %v683_v3 = vshll.u32 %v2402_v49, 16  ;;  %2800 = vmatprep.subr.bf16.mxu1 %v3390_v41  ;;  %v2403_v48 = vld [vmem:[%s3324_s18 + $0x28] sm:$0xf]  ;;  %v2404_v52 = vld [vmem:[%s3324_s18 + $0x2c] sm:$0x1] }
  0x60   : > { %v666_v7 = vor.u32 %v665_v62, %v662_v60  ;;  %v1040_v8 = vshrl.u32 %v2421_v4, 16  ;;  %v1043_v9 = vshll.u32 %v2421_v4, 16  ;;  %v1054_v10 = vshrl.u32 %v2422_v6, 16  ;;  %v2405_v56 = vld [vmem:[%s3324_s18 + $0x30] sm:$0xf] }
  0x61   : > { %2777 = vmatpush3.bf16.msra.mxu0 %v3364_v5  ;;  %v941_v12 = vrot.slane %v940_v1, 4  ;;  %v680_v13 = vor.u32 %v679_v2, %v676_v63  ;;  %v685_v15 = vrot.slane %v683_v3, 5  ;;  %v1057_v16 = vshll.u32 %v2422_v6, 16 }
  0x62   : > { %v667_v18 = vrot.slane %v666_v7, 4  ;;  %v1042_v19 = vrot.slane %v1040_v8, 4  ;;  %v1045_v20 = vrot.slane %v1043_v9, 5  ;;  %v1056_v21 = vrot.slane %v1054_v10, 4  ;;  %2778 = vmatprep.subr.bf16.mxu0 %v3390_v41  ;;  %2808 = vmatpush3.bf16.msra.mxu1 %v3390_v41  ;;  %v2406_v9 = vld [vmem:[%s3324_s18 + $0x34] sm:$0x1] }
  0x63   : > { %v946_v23 = vsel %vm3134_vm2, %v941_v12, %v945_v55  ;;  %v681_v5 = vrot.slane %v680_v13, 4  ;;  %v1059_v24 = vrot.slane %v1057_v16, 5  ;;  %v2476_v27 = vcombine.low %v2421_v4, %v2422_v6  ;;  %2801 = vmatprep.subr.bf16.mxu1 %v3398_v58  ;;  %v2919_v4 = vld [vmem:[%s3627_s4 + $0x210] sm:$0xff]  }
  0x64   : > { %v2480_v28 = vcombine.low %v932_v0, %v946_v23  ;;  %v672_v30 = vsel %vm3134_vm2, %v667_v18, %v671_v34  ;;  %v1046_v33 = vor.u32 %v1045_v20, %v1042_v19  ;;  %v817_v35 = vshll.u32 %v2415_v11, 16 }
  0x65   : > { %v686_v39 = vsel %vm3134_vm2, %v681_v5, %v685_v15  ;;  %v1060_v40 = vor.u32 %v1059_v24, %v1056_v21  ;;  %2779 = vmatpush3.bf16.msra.mxu0 %v3390_v41  ;;  %v831_v43 = vshll.u32 %v2416_v17, 16  ;;  %v948_v46 = vshrl.u32 %v2435_v22, 16  ;;  %v2423_v17 = vld [vmem:[%s3125_s15 + $0x28] sm:$0xf] }
  0x66   : > { %2109 = vmatprep.mubr.bf16.mxu1 %v2480_v28  ;;  %v2468_v49 = vcombine.low %v672_v30, %v686_v39  ;;  %v3428_v29 = vrot.slane %v1046_v33, 4  ;;  %2780 = vmatprep.subr.bf16.mxu0 %v3398_v58  ;;  %v819_v50 = vrot.slane %v817_v35, 5  ;;  %v951_v51 = vshll.u32 %v2435_v22, 16  ;;  %v2921_v22 = vld [vmem:[%s3627_s4 + $0x208] sm:$0xff]   ;;  %v2424_v28 = vld [vmem:[%s3125_s15 + $0x30] sm:$0xf] }
  0x67   : > { %v3432_v47 = vrot.slane %v1060_v40, 4  ;;  %2110 = vmatmul.mubr.bf16.gmra.mxu1 %v2476_v27  ;;  %v833_v53 = vrot.slane %v831_v43, 5  ;;  %v950_v55 = vrot.slane %v948_v46, 4  ;;  %v957_v41 = vshll.u32 %v2436_v36, 16  ;;  %v2439_v46 = vld [vmem:[%s3103_s28 + $0x38] sm:$0xf] }
  0x68   : > { %2045 = vmatmul.mubr.bf16.gmra.mxu0 %v2468_v49  ;;  %2809 = vmatpush3.bf16.msra.mxu1 %v3398_v58  ;;  %v820_v60 = vsel %vm3134_vm2, %v3258_v54, %v819_v50  ;;  %v953_v62 = vrot.slane %v951_v51, 5  ;;  %v962_v34 = vshrl.u32 %v2437_v37, 16  ;;  %v965_v63 = vshll.u32 %v2437_v37, 16  ;;  %v2417_v37 = vld [vmem:[%s3115_s11 + $0x3c] sm:$0x1] }
  0x69   : > { %2781 = vmatpush3.bf16.msra.mxu0 %v3398_v58  ;;  %v834_v0 = vsel %vm3134_vm2, %v3265_v57, %v833_v53  ;;  %v959_v1 = vrot.slane %v957_v41, 5  ;;  %v971_v2 = vshll.u32 %v2438_v42, 16  ;;  %v688_v3 = vshrl.u32 %v2403_v48, 16  ;;  %2802 = vmatprep.subr.bf16.mxu1 %v2918_v38  ;;  %v2418_v42 = vld [vmem:[%s3115_s11 + $0x44] sm:$0x1] }
  0x6a   : > { %v2473_v6 = vcombine.low %v820_v60, %v834_v0  ;;  %v954_v54 = vor.u32 %v953_v62, %v950_v55  ;;  %v964_v7 = vrot.slane %v962_v34, 4  ;;  %v967_v8 = vrot.slane %v965_v63, 5  ;;  %2782 = vmatprep.subr.bf16.mxu0 %v2918_v38  ;;  %v2440_v53 = vld [vmem:[%s3103_s28 + $0x3c] sm:$0x1]  ;;  %v2441_v55 = vld [vmem:[%s3103_s28 + $0x40] sm:$0xf] }
  0x6b   : > { %v973_v58 = vrot.slane %v971_v2, 5  ;;  %v690_v10 = vrot.slane %v688_v3, 4  ;;  %v691_v11 = vshll.u32 %v2403_v48, 16  ;;  %v697_v12 = vshll.u32 %v2404_v52, 16  ;;  %v2922_v48 = vld [vmem:[%s3627_s4 + $0x200] sm:$0xff]  }
  0x6c   : > { %2052 = vmatprep.mubr.bf16.mxu0 %v2473_v6  ;;  %v955_v57 = vrot.slane %v954_v54, 4  ;;  %v968_v13 = vor.u32 %v967_v8, %v964_v7  ;;  %v702_v15 = vshrl.u32 %v2405_v56, 16  ;;  %v705_v16 = vshll.u32 %v2405_v56, 16  ;;  %2810 = vmatpush3.bf16.msra.mxu1 %v2918_v38  ;;  %v2442_v34 = vld [vmem:[%s3103_s28 + $0x44] sm:$0x1] }
  0x6d   : > { %v693_v18 = vrot.slane %v691_v11, 5  ;;  %v699_v19 = vrot.slane %v697_v12, 5  ;;  %v711_v20 = vshll.u32 %v2406_v9, 16  ;;  %v1068_v21 = vshrl.u32 %v2423_v17, 16  ;;  %2783 = vmatpush3.bf16.msra.mxu0 %v2918_v38  ;;  %2803 = vmatprep.subr.bf16.mxu1 %v2919_v4  ;;  %v2407_v3 = vld [vmem:[%s3324_s18 + $0x38] sm:$0xf] }
  0x6e   : > { %v960_v23 = vsel %vm3134_vm2, %v955_v57, %v959_v1  ;;  %v969_v5 = vrot.slane %v968_v13, 4  ;;  %v704_v24 = vrot.slane %v702_v15, 4  ;;  %v707_v27 = vrot.slane %v705_v16, 5  ;;  %2784 = vmatprep.subr.bf16.mxu0 %v2919_v4  ;;  %v2408_v6 = vld [vmem:[%s3324_s18 + $0x3c] sm:$0x1] }
  0x6f   : > { %v694_v30 = vor.u32 %v693_v18, %v690_v10  ;;  %v713_v33 = vrot.slane %v711_v20, 5  ;;  %v3454_v35 = vrot.slane %v1068_v21, 4  ;;  %v1071_v36 = vshll.u32 %v2423_v17, 16  ;;  %v2409_v54 = vld [vmem:[%s3324_s18 + $0x40] sm:$0xf] }
  0x70   : > { %v974_v38 = vsel %vm3134_vm2, %v969_v5, %v973_v58  ;;  %v708_v39 = vor.u32 %v707_v27, %v704_v24  ;;  %v1082_v40 = vshrl.u32 %v2424_v28, 16  ;;  %v1085_v43 = vshll.u32 %v2424_v28, 16  ;;  %2811 = vmatpush3.bf16.msra.mxu1 %v2919_v4  ;;  %v2410_v18 = vld [vmem:[%s3324_s18 + $0x44] sm:$0x1]  ;;  %v2425_v5 = vld [vmem:[%s3125_s15 + $0x38] sm:$0xf] }
  0x71   : > { %v2481_v49 = vcombine.low %v960_v23, %v974_v38  ;;  %v695_v50 = vrot.slane %v694_v30, 4  ;;  %v3464_v51 = vrot.slane %v1071_v36, 5  ;;  %v2477_v52 = vcombine.low %v2423_v17, %v2424_v28  ;;  %2785 = vmatpush3.bf16.msra.mxu0 %v2919_v4  ;;  %2804 = vmatprep.subr.bf16.mxu1 %v2921_v22 }
  0x72   : > { %v709_v41 = vrot.slane %v708_v39, 4  ;;  %v3468_v56 = vrot.slane %v1082_v40, 4  ;;  %v3470_v60 = vrot.slane %v1085_v43, 5  ;;  %v843_v62 = vrot.slane %v842_v59, 4  ;;  %2786 = vmatprep.subr.bf16.mxu0 %v2921_v22 }
  0x73   : > { %2117 = vmatprep.mubr.bf16.mxu1 %v2481_v49  ;;  %v700_v63 = vsel %vm3134_vm2, %v695_v50, %v699_v19  ;;  %v845_v0 = vshll.u32 %v2417_v37, 16  ;;  %v857_v1 = vrot.slane %v856_v14, 4  ;;  %v859_v2 = vshll.u32 %v2418_v42, 16 }
  0x74   : > { %v714_v4 = vsel %vm3134_vm2, %v709_v41, %v713_v33  ;;  %2118 = vmatmul.mubr.bf16.gmra.mxu1 %v2477_v52  ;;  %v976_v25 = vshrl.u32 %v2439_v46, 16  ;;  %v979_v26 = vshll.u32 %v2439_v46, 16  ;;  %v985_v59 = vshll.u32 %v2440_v53, 16  ;;  %v2426_v33 = vld [vmem:[%s3125_s15 + $0x40] sm:$0xf] }
  0x75   : > { %v2469_v7 = vcombine.low %v700_v63, %v714_v4  ;;  %v847_v8 = vrot.slane %v845_v0, 5  ;;  %v861_v9 = vrot.slane %v859_v2, 5  ;;  %v990_v58 = vshrl.u32 %v2441_v55, 16  ;;  %2787 = vmatpush3.bf16.msra.mxu0 %v2921_v22  ;;  %2812 = vmatpush3.bf16.msra.mxu1 %v2921_v22 }
  0x76   : > { %v978_v31 = vrot.slane %v976_v25, 4  ;;  %v981_v32 = vrot.slane %v979_v26, 5  ;;  %v987_v14 = vrot.slane %v985_v59, 5  ;;  %v993_v10 = vshll.u32 %v2441_v55, 16  ;;  %2788 = vmatprep.subr.bf16.mxu0 %v2922_v48  ;;  %2805 = vmatprep.subr.bf16.mxu1 %v2922_v48 }
  0x77   : > { %2053 = vmatmul.mubr.bf16.gmra.mxu0 %v2469_v7  ;;  %v848_v11 = vsel %vm3134_vm2, %v843_v62, %v847_v8  ;;  %v862_v12 = vsel %vm3134_vm2, %v857_v1, %v861_v9  ;;  %v992_v57 = vrot.slane %v990_v58, 4  ;;  %v999_v13 = vshll.u32 %v2442_v34, 16  ;;  %v2443_v34 = vld [vmem:[%s3125_s15 + $0xc] sm:$0x1] }
  0x78   : > { %v2474_v15 = vcombine.low %v848_v11, %v862_v12  ;;  %v982_v16 = vor.u32 %v981_v32, %v978_v31  ;;  %v995_v17 = vrot.slane %v993_v10, 5  ;;  %v716_v19 = vshrl.u32 %v2407_v3, 16  ;;  %v2448_v10 = vld [vmem:[%s3125_s15 + $0x34] sm:$0x1] }
  0x79   : > { %v1001_v20 = vrot.slane %v999_v13, 5  ;;  %v719_v21 = vshll.u32 %v2407_v3, 16  ;;  %v725_v22 = vshll.u32 %v2408_v6, 16  ;;  %v730_v23 = vshrl.u32 %v2409_v54, 16  ;;  %2789 = vmatpush3.bf16.msra.mxu0 %v2922_v48  ;;  %2813 = vmatpush3.bf16.msra.mxu1 %v2922_v48 }
  0x7a   : > { %2060 = vmatprep.mubr.bf16.mxu0 %v2474_v15  ;;  %v983_v24 = vrot.slane %v982_v16, 4  ;;  %v996_v27 = vor.u32 %v995_v17, %v992_v57  ;;  %v718_v28 = vrot.slane %v716_v19, 4  ;;  %v733_v30 = vshll.u32 %v2409_v54, 16  ;;  %v2444_v54 = vld [vmem:[%s3125_s15 + $0x14] sm:$0x1] }
  0x7b   : > { %v721_v36 = vrot.slane %v719_v21, 5  ;;  %v727_v37 = vrot.slane %v725_v22, 5  ;;  %v732_v38 = vrot.slane %v730_v23, 4  ;;  %v739_v39 = vshll.u32 %v2410_v18, 16  ;;  %v2445_v15 = vld [vmem:[%s3125_s15 + $0x1c] sm:$0x1] }
  0x7c   : > { %v988_v40 = vsel %vm3134_vm2, %v983_v24, %v987_v14  ;;  %v997_v43 = vrot.slane %v996_v27, 4  ;;  %v735_v42 = vrot.slane %v733_v30, 5  ;;  %v1096_v46 = vshrl.u32 %v2425_v5, 16  ;;  %v2447_v14 = vld [vmem:[%s3125_s15 + $0x2c] sm:$0x1] }
  0x7d   : > { %v722_v49 = vor.u32 %v721_v36, %v718_v28  ;;  %v741_v50 = vrot.slane %v739_v39, 5  ;;  %v1099_v48 = vshll.u32 %v2425_v5, 16  ;;  %v1110_v52 = vshrl.u32 %v2426_v33, 16  ;;  %v2446_v23 = vld [vmem:[%s3125_s15 + $0x24] sm:$0x1] }
  0x7e   : > { %v1002_v53 = vsel %vm3134_vm2, %v997_v43, %v1001_v20  ;;  %v736_v55 = vor.u32 %v735_v42, %v732_v38  ;;  %v1098_v41 = vrot.slane %v1096_v46, 4  ;;  %v1113_v62 = vshll.u32 %v2426_v33, 16 }
  0x7f   : > { %v2482_v63 = vcombine.low %v988_v40, %v1002_v53  ;;  %v723_v0 = vrot.slane %v722_v49, 4  ;;  %v1101_v1 = vrot.slane %v1099_v48, 5  ;;  %v1112_v2 = vrot.slane %v1110_v52, 4 }
  0x80   : > { %v737_v3 = vrot.slane %v736_v55, 4  ;;  %v1115_v4 = vrot.slane %v1113_v62, 5  ;;  %v2478_v25 = vcombine.low %v2425_v5, %v2426_v33  ;;  %v1012_v26 = vshrl.u32 %v3340_v44, 16  ;;  %v2449_v5 = vld [vmem:[%s3125_s15 + $0x3c] sm:$0x1] }
  0x81   : > { %2125 = vmatprep.mubr.bf16.mxu1 %v2482_v63  ;;  %v728_v59 = vsel %vm3134_vm2, %v723_v0, %v727_v37  ;;  %v1102_v6 = vor.u32 %v1101_v1, %v1098_v41  ;;  %v1015_v7 = vshll.u32 %v3340_v44, 16  ;;  %v1021_v8 = vshll.u32 %v2443_v34, 16  ;;  %v2450_v33 = vld [vmem:[%s3125_s15 + $0x44] sm:$0x1]  ;;  %s2570_s15 = sshll.u32 %s3653_s21, 5 }
  0x82   : > { %v742_v9 = vsel %vm3134_vm2, %v737_v3, %v741_v50  ;;  %v1116_v58 = vor.u32 %v1115_v4, %v1112_v2  ;;  %2126 = vmatmul.mubr.bf16.gmra.mxu1 %v2478_v25  ;;  %v1014_v31 = vrot.slane %v1012_v26, 4  ;;  %v1026_v32 = vshrl.u32 %v3343_v45, 16  ;;  %s333_s19 = scalar_lea.vmem %s3629_s6, %s2570_s15 }
  0x83   : > { %v2470_v11 = vcombine.low %v728_v59, %v742_v9  ;;  %v1103_v12 = vrot.slane %v1102_v6, 4  ;;  %v1017_v57 = vrot.slane %v1015_v7, 5  ;;  %v1023_v13 = vrot.slane %v1021_v8, 5 }
  0x84   : > { %v1117_v44 = vrot.slane %v1116_v58, 4  ;;  %v1028_v16 = vrot.slane %v1026_v32, 4  ;;  %v1029_v17 = vshll.u32 %v3343_v45, 16  ;;  %v1035_v18 = vshll.u32 %v2444_v54, 16 }
  0x85   : > { %2061 = vmatmul.mubr.bf16.gmra.mxu0 %v2470_v11  ;;  %v1018_v19 = vor.u32 %v1017_v57, %v1014_v31  ;;  %v1074_v20 = vor.u32 %v3464_v51, %v3454_v35  ;;  %v1077_v21 = vshll.u32 %v2447_v14, 16  ;;  %v1088_v22 = vor.u32 %v3470_v60, %v3468_v56 }
  0x86   : > { %v1031_v24 = vrot.slane %v1029_v17, 5  ;;  %v1037_v27 = vrot.slane %v1035_v18, 5  ;;  %v1091_v28 = vshll.u32 %v2448_v10, 16  ;;  %v1049_v30 = vshll.u32 %v2445_v15, 16 }
  0x87   : > { %v1019_v36 = vrot.slane %v1018_v19, 4  ;;  %v1075_v37 = vrot.slane %v1074_v20, 4  ;;  %v1079_v45 = vrot.slane %v1077_v21, 5  ;;  %v1089_v38 = vrot.slane %v1088_v22, 4 }
  0x88   : > { %v1032_v39 = vor.u32 %v1031_v24, %v1028_v16  ;;  %v1093_v40 = vrot.slane %v1091_v28, 5  ;;  %v1051_v43 = vrot.slane %v1049_v30, 5  ;;  %v1063_v42 = vshll.u32 %v2446_v23, 16 }
  0x89   : > { %v1024_v35 = vsel %vm3134_vm2, %v1019_v36, %v1023_v13  ;;  %v1080_v51 = vsel %vm3134_vm2, %v1075_v37, %v1079_v45  ;;  %v1105_v56 = vshll.u32 %v2449_v5, 16  ;;  %v1119_v60 = vshll.u32 %v2450_v33, 16 }
  0x8a   : > { %v1033_v46 = vrot.slane %v1032_v39, 4  ;;  %v1094_v49 = vsel %vm3134_vm2, %v1089_v38, %v1093_v40  ;;  %v1052_v50 = vsel %vm3134_vm2, %v3428_v29, %v1051_v43  ;;  %v1065_v48 = vrot.slane %v1063_v42, 5 }
  0x8b   : > { %v2485_v52 = vcombine.low %v1080_v51, %v1094_v49  ;;  %v1107_v53 = vrot.slane %v1105_v56, 5  ;;  %v1121_v55 = vrot.slane %v1119_v60, 5 }
  0x8c   : > { %v1038_v41 = vsel %vm3134_vm2, %v1033_v46, %v1037_v27  ;;  %v1066_v62 = vsel %vm3134_vm2, %v3432_v47, %v1065_v48 }
  0x8d   : > { %v2483_v34 = vcombine.low %v1024_v35, %v1038_v41  ;;  %2794 = vmatprep.mubr.bf16.mxu1 %v2485_v52  ;;  %v2484_v63 = vcombine.low %v1052_v50, %v1066_v62  ;;  %v1108_v0 = vsel %vm3134_vm2, %v1103_v12, %v1107_v53  ;;  %v1122_v29 = vsel %vm3134_vm2, %v1117_v44, %v1121_v55 }
  0x8e   : > { %v2486_v1 = vcombine.low %v1108_v0, %v1122_v29 }
  0x8f   : > { %2790 = vmatprep.mubr.bf16.mxu0 %v2483_v34  ;;  %v2487_v34 = vld [vmem:[%s3628_s5] ss:$0 sm:$0xff] }
  0x90   : > { %2791 = vmatmul.mubr.bf16.vlgmr.msra.gmra.mxu0 %v2484_v63  ;;  %2795 = vmatmul.mubr.bf16.vlgmr.msra.gmra.mxu1 %v2486_v1 }
  0xee   : > { %v2618_v2 = vpop.f32.mrf.mxu0 }
  0xf0   : > { %v2619_v4 = vpop.f32.mrf.mxu0 }
  0xf1   : > { %v3535_v3 = vpop.f32.mrf.mxu1  ;;  %v2620_v55 = vadd.f32 %v2619_v4, %v2618_v2 }
  0xf2   : > { %v2621_v47 = vpop.f32.mrf.mxu0 }
  0xf3   : > { %v3537_v25 = vpop.f32.mrf.mxu1 }
  0xf4   : > { %v2622_v59 = vpop.f32.mrf.mxu0 }
  0xf5   : > { %v3539_v26 = vpop.f32.mrf.mxu1  ;;  %v2623_v63 = vadd.f32 %v2622_v59, %v2621_v47 }
  0xf6   : > { %v2624_v54 = vpop.f32.mrf.mxu0 }
  0xf7   : > { %v3541_v6 = vpop.f32.mrf.mxu1  ;;  %v1912_v2 = vadd.f32 %v2623_v63, %v2487_v34 }
  0xf8   : > { %v2625_v61 = vpop.f32.mrf.mxu0  ;;  %v2663_v4 = vadd.f32 %v3541_v6, %v3539_v26 }
  0xf9   : > { %v2626_v29 = vadd.f32 %v2625_v61, %v2624_v54 }
  0xfa   : > { %v2627_v9 = vpop.f32.mrf.mxu0 }
  0xfc   : > { %v3543_v7 = vpop.f32.mrf.mxu1  ;;  %v2628_v31 = vpop.f32.mrf.mxu0 }
  0xfd   : > { %v2629_v1 = vadd.f32 %v2628_v31, %v2627_v9 }
  0xfe   : > { %v3545_v8 = vpop.f32.mrf.mxu1 }
  0xff   : > { %v2666_v47 = vadd.f32 %v3545_v8, %v3543_v7  ;;  %v1920_v59 = vadd.f32 %v2629_v1, %v2487_v34 }
 0x100   : > { %v3547_v58 = vpop.f32.mrf.mxu1 }
 0x101   : > { %v2630_v14 = vpop.f32.mrf.mxu0 }
 0x102   : > { %v3549_v32 = vpop.f32.mrf.mxu1 }
 0x103   : > { %v2631_v11 = vpop.f32.mrf.mxu0  ;;  %v2669_v9 = vadd.f32 %v3549_v32, %v3547_v58 }
 0x104   : > { %v3551_v10 = vpop.f32.mrf.mxu1 }
 0x105   : > { %v2633_v57 = vpop.f32.mrf.mxu0 }
 0x106   : > { %v3553_v12 = vpop.f32.mrf.mxu1 }
 0x107   : > { %v2634_v15 = vpop.f32.mrf.mxu0 }
 0x108   : > { %v3555_v13 = vpop.f32.mrf.mxu1 }
 0x10a   : > { %v3557_v44 = vpop.f32.mrf.mxu1 }
 0x10b   : > { %v2675_v6 = vadd.f32 %v3557_v44, %v3555_v13 }
 0x10c   : > { %v2636_v16 = vpop.f32.mrf.mxu0 }
 0x10e   : > { %v2637_v19 = vpop.f32.mrf.mxu0 }
 0x10f   : > { %v2638_v41 = vadd.f32 %v2637_v19, %v2636_v16 }
 0x110   : > { %v2639_v21 = vpop.f32.mrf.mxu0 }
 0x111   : > { %v2676_v17 = vpop.f32.mrf.mxu1 }
 0x112   : > { %v2640_v23 = vpop.f32.mrf.mxu0 }
 0x113   : > { %v2677_v18 = vpop.f32.mrf.mxu1  ;;  %v2641_v0 = vadd.f32 %v2640_v23, %v2639_v21 }
 0x114   : > { %v2678_v54 = vadd.f32 %v2677_v18, %v2676_v17 }
 0x115   : > { %v2679_v20 = vpop.f32.mrf.mxu1  ;;  %v1936_v16 = vadd.f32 %v2641_v0, %v2487_v34 }
 0x117   : > { %v2680_v22 = vpop.f32.mrf.mxu1 }
 0x119   : > { %v3559_v5 = vpop.f32.mrf.mxu1 }
 0x11a   : > { %3632 = vst [vmem:[#allocation2_spill] sm:$0xff] %v3559_v5  ;;  %v1917_v5 = vadd.f32 %v2626_v29, %v2487_v34 }
 0x11b   : > { %v3561_v24 = vpop.f32.mrf.mxu1 }
 0x11c   : > { %3633 = vst [vmem:[#allocation3_spill] sm:$0xff] %v3561_v24  ;;  %v2698_v27 = vpop.f32.mrf.mxu0  ;;  %v1933_v24 = vadd.f32 %v2638_v41, %v2487_v34 }
 0x11d   : > { %v3563_v30 = vpop.f32.mrf.mxu1 }
 0x11e   : > { %v2699_v28 = vpop.f32.mrf.mxu0  ;;  %3634 = vst [vmem:[#allocation4_spill] sm:$0xff] %v3563_v30  ;;  %v1909_v30 = vadd.f32 %v2620_v55, %v2487_v34 }
 0x11f   : > { %v3565_v36 = vpop.f32.mrf.mxu1  ;;  %v2700_v7 = vadd.f32 %v2699_v28, %v2698_v27 }
 0x120   : > { %v2701_v33 = vpop.f32.mrf.mxu0  ;;  %3635 = vst [vmem:[#allocation5_spill] sm:$0xff] %v3565_v36 }
 0x122   : > { %v2702_v37 = vpop.f32.mrf.mxu0 }
 0x123   : > { %v2703_v21 = vadd.f32 %v2702_v37, %v2701_v33 }
 0x127   : > { %v3567_v45 = vpop.f32.mrf.mxu1 }
 0x128   : > { %v2704_v38 = vpop.f32.mrf.mxu0 }
 0x129   : > { %v3569_v39 = vpop.f32.mrf.mxu1 }
 0x12a   : > { %v2705_v40 = vpop.f32.mrf.mxu0 }
 0x12b   : > { %v3571_v43 = vpop.f32.mrf.mxu1  ;;  %v2706_v8 = vadd.f32 %v2705_v40, %v2704_v38 }
 0x12c   : > { %v2707_v42 = vpop.f32.mrf.mxu0 }
 0x12d   : > { %v3573_v35 = vpop.f32.mrf.mxu1 }
 0x12e   : > { %v2708_v51 = vpop.f32.mrf.mxu0 }
 0x12f   : > { %v2709_v17 = vadd.f32 %v2708_v51, %v2707_v42 }
 0x134   : > { %v3575_v56 = vpop.f32.mrf.mxu1 }
 0x135   : > { %3636 = vst [vmem:[#allocation6_spill] sm:$0xff] %v3575_v56  ;;  %v2632_v56 = vadd.f32 %v2631_v11, %v2630_v14  ;;  %v2681_v14 = vadd.f32 %v2680_v22, %v2679_v20 }
 0x136   : > { %v3577_v60 = vpop.f32.mrf.mxu1 }
 0x137   : > { %3637 = vst [vmem:[#allocation7_spill] sm:$0xff] %v3577_v60  ;;  %v2710_v46 = vpop.f32.mrf.mxu0  ;;  %v1925_v31 = vadd.f32 %v2632_v56, %v2487_v34  ;;  %v1985_v56 = vadd.f32 %v2669_v9, %v1920_v59 }
 0x138   : > { %v3579_v50 = vpop.f32.mrf.mxu1 }
 0x139   : > { %v2711_v49 = vpop.f32.mrf.mxu0  ;;  %3638 = vst [vmem:[#allocation8_spill] sm:$0xff] %v3579_v50  ;;  %v2635_v50 = vadd.f32 %v2634_v15, %v2633_v57  ;;  %v1998_v57 = vadd.f32 %v2678_v54, %v1933_v24  ;;  %v2001_v15 = vadd.f32 %v2681_v14, %v1936_v16  ;;  %v2050_v44 = vadd.f32 %v2709_v17, %v1985_v56 }
 0x13a   : > { %v3581_v52 = vpop.f32.mrf.mxu1  ;;  %v2712_v23 = vadd.f32 %v2711_v49, %v2710_v46  ;;  %v3640_v49 = vld [vmem:[#allocation2_spill] sm:$0xff] }
 0x13b   : > { %v2713_v48 = vpop.f32.mrf.mxu0  ;;  %3639 = vst [vmem:[#allocation9_spill] sm:$0xff] %v3581_v52  ;;  %v2660_v52 = vadd.f32 %v3537_v25, %v3535_v3  ;;  %v2672_v25 = vadd.f32 %v3553_v12, %v3551_v10  ;;  %v1928_v26 = vadd.f32 %v2635_v50, %v2487_v34  ;;  %v1977_v10 = vadd.f32 %v2663_v4, %v1912_v2 }
 0x13c   : > { %v3644_v34 = vld [vmem:[#allocation6_spill] sm:$0xff] }
 0x13d   : > { %v2714_v53 = vpop.f32.mrf.mxu0  ;;  %v1974_v22 = vadd.f32 %v2660_v52, %v1909_v30  ;;  %v1990_v12 = vadd.f32 %v2672_v25, %v1925_v31  ;;  %v1993_v50 = vadd.f32 %v2675_v6, %v1928_v26  ;;  %v2042_v38 = vadd.f32 %v2703_v21, %v1977_v10 }
 0x13e   : > { %v2715_v58 = vadd.f32 %v2714_v53, %v2713_v48  ;;  %v2749_v30 = vadd.f32 %v3573_v35, %v3571_v43  ;;  %v3641_v48 = vld [vmem:[#allocation3_spill] sm:$0xff]  ;;  %v3643_v53 = vld [vmem:[#allocation5_spill] sm:$0xff] }
 0x13f   : > { %v2039_v28 = vadd.f32 %v2700_v7, %v1974_v22  ;;  %v2055_v33 = vadd.f32 %v2712_v23, %v1990_v12  ;;  %v2740_v52 = vadd.f32 %v3641_v48, %v3640_v49  ;;  %v3645_v63 = vld [vmem:[#allocation7_spill] sm:$0xff] }
 0x140   : > { %v2058_v37 = vadd.f32 %v2715_v58, %v1993_v50  ;;  %v2752_v0 = vadd.f32 %v3645_v63, %v3644_v34  ;;  %v3646_v29 = vld [vmem:[#allocation8_spill] sm:$0xff] }
 0x141   : > { %v2104_v43 = vadd.f32 %v2740_v52, %v2039_v28 }
 0x142   : > { %v2756_v62 = vpop.f32.mrf.mxu1  ;;  %v3647_v1 = vld [vmem:[#allocation9_spill] sm:$0xff]  ;;  %v2120_v35 = vadd.f32 %v2752_v0, %v2055_v33 }
 0x143   : > { %v2755_v2 = vadd.f32 %v3647_v1, %v3646_v29 }
 0x144   : > { %v2757_v60 = vpop.f32.mrf.mxu1 }
 0x145   : > { %v2716_v36 = vpop.f32.mrf.mxu0  ;;  %v2758_v24 = vadd.f32 %v2757_v60, %v2756_v62  ;;  %v3642_v60 = vld [vmem:[#allocation4_spill] sm:$0xff]  ;;  %v2123_v54 = vadd.f32 %v2755_v2, %v2058_v37 }
 0x146   : > { %v2759_v61 = vpop.f32.mrf.mxu1  ;;  %v2743_v62 = vadd.f32 %v3643_v53, %v3642_v60 }
 0x147   : > { %v2717_v19 = vpop.f32.mrf.mxu0 }
 0x148   : > { %v2718_v11 = vadd.f32 %v2717_v19, %v2716_v36  ;;  %v2760_v20 = vpop.f32.mrf.mxu1  ;;  %v1982_v36 = vadd.f32 %v2666_v47, %v1917_v5  ;;  %v2746_v5 = vadd.f32 %v3569_v39, %v3567_v45  ;;  %v2115_v39 = vadd.f32 %v2749_v30, %v2050_v44 }
 0x149   : > { %v2719_v3 = vpop.f32.mrf.mxu0  ;;  %v2761_v27 = vadd.f32 %v2760_v20, %v2759_v61  ;;  %v2107_v59 = vadd.f32 %v2743_v62, %v2042_v38 }
 0x14a   : > { %v2063_v55 = vadd.f32 %v2718_v11, %v1998_v57  ;;  %v2047_v13 = vadd.f32 %v2706_v8, %v1982_v36 }
 0x14b   : > { %v2720_v18 = vpop.f32.mrf.mxu0 }
 0x14c   : > { %v2721_v32 = vadd.f32 %v2720_v18, %v2719_v3  ;;  %v2128_v51 = vadd.f32 %v2758_v24, %v2063_v55  ;;  %v2112_v45 = vadd.f32 %v2746_v5, %v2047_v13 }
 0x14e   : > { %v2066_v41 = vadd.f32 %v2721_v32, %v2001_v15 }
 0x150   : > { %v2792_v40 = vpop.f32.mrf.mxu0  ;;  %v2796_v42 = vpop.f32.mrf.mxu1  ;;  %v2131_v46 = vadd.f32 %v2761_v27, %v2066_v41 }
 0x151   : > { %v2177_v61 = vadd.f32 %v2792_v40, %v2112_v45  ;;  %v2193_v9 = vadd.f32 %v2796_v42, %v2128_v51 }
 0x152   : > { %v2168_v4 = vpop.f32.mrf.mxu0  ;;  %v2184_v16 = vpop.f32.mrf.mxu1 }
 0x153   : > { %v2169_v11 = vadd.f32 %v2168_v4, %v2104_v43  ;;  %v2185_v3 = vadd.f32 %v2184_v16, %v2120_v35 }
 0x154   : > { %v2793_v19 = vpop.f32.mrf.mxu0  ;;  %v2797_v47 = vpop.f32.mrf.mxu1 }
 0x155   : > { %v2180_v31 = vadd.f32 %v2793_v19, %v2115_v39  ;;  %v2196_v14 = vadd.f32 %v2797_v47, %v2131_v46 }
 0x156   : > { %v2171_v25 = vpop.f32.mrf.mxu0  ;;  %v2187_v26 = vpop.f32.mrf.mxu1 }
 0x157   : > { %v2587_v6 = vpack.c.bf16 %v2180_v31, %v2177_v61  ;;  %v2597_v57 = vpack.c.bf16 %v2196_v14, %v2193_v9  ;;  %v2172_v15 = vadd.f32 %v2171_v25, %v2107_v59  ;;  %v2188_v7 = vadd.f32 %v2187_v26, %v2123_v54 }
 0x159   : > { %2599 = vst [vmem:[%s333_s19 + $0x8] sm:$0xff] %v2587_v6   ;;  %2601 = vst [vmem:[%s333_s19 + $0x18] sm:$0xff] %v2597_v57   ;;  %v2582_v8 = vpack.c.bf16 %v2172_v15, %v2169_v11  ;;  %v2592_v17 = vpack.c.bf16 %v2188_v7, %v2185_v3 }
 0x15b   : > { %2583 = vst [vmem:[%s333_s19] sm:$0xff] %v2582_v8   ;;  %2600 = vst [vmem:[%s333_s19 + $0x10] sm:$0xff] %v2592_v17  }
 0x15c PF: > { %s16_s23 = sadd.s32 1, %s2945_s23   ;;  %s3648_s21 = smov %s2941_s22 }
 0x15d   : > { %p13_p5 = scmp.ge.s32.totalorder %s16_s23, 6   ;;  %s3649_s22 = smov %s3651_s24 }
 0x15f   :  { %15 = sbr.rel (!%p13_p5) target bundleno = 2 (0x2), region = 89 }

// kernel: merge_module_forward.11
= control target key start
LH: loop header
LB: loop body
LE: loop exit
PB: predicated region body
PF: predicated region fallthrough
CT: control target
= control target key end

     0   :  { %s2067_s3 = inlined_call_operand.vmem [shape: bf16[256,128], index: 3, kind: input, shape index: {}]   ;;  %s2068_s1 = inlined_call_operand.vmem [shape: bf16[256,128], index: 1, kind: input, shape index: {}]   ;;  %s2069_s0 = inlined_call_operand.vmem [shape: bf16[256,128], index: 0, kind: input, shape index: {}]   ;;  %s2070_s5 = inlined_call_operand.vmem [shape: bf16[128,128], index: 5, kind: input, shape index: {}]   ;;  %s2071_s4 = inlined_call_operand.vmem [shape: f32[1,128], index: 4, kind: input, shape index: {}]   ;;  %s2072_s2 = inlined_call_operand.vmem [shape: bf16[256,128], index: 2, kind: input, shape index: {}]   ;;  %s2073_s6 = inlined_call_operand.vmem [shape: f32[1,128], index: 6, kind: input, shape index: {}]   ;;  %s2074_s7 = inlined_call_operand.vmem [shape: bf16[256,128], index: 7, kind: output, shape index: {}]  }
   0x1   :  { %v1615_v0 = vld [vmem:[%s2067_s3 + $0x78] sm:$0xff]   ;;  %v1617_v2 = vld [vmem:[%s2067_s3 + $0x70] sm:$0xff]   ;;  %v1619_v4 = vld [vmem:[%s2067_s3 + $0x68] sm:$0xff]  }
   0x2   :  { %v1616_v1 = vld [vmem:[%s2067_s3 + $0x38] sm:$0xff]   ;;  %1415 = vmatprep.subr.bf16.mxu0 %v1615_v0  ;;  %1599 = vmatprep.subr.bf16.mxu1 %v1615_v0  ;;  %v1618_v3 = vld [vmem:[%s2067_s3 + $0x30] sm:$0xff]   ;;  %v1620_v5 = vld [vmem:[%s2067_s3 + $0x28] sm:$0xff]  }
   0x3   :  { %1416 = vmatpush3.bf16.msra.mxu0 %v1616_v1  ;;  %1607 = vmatpush3.bf16.msra.mxu1 %v1616_v1  ;;  %v1621_v6 = vld [vmem:[%s2067_s3 + $0x60] sm:$0xff]   ;;  %v1623_v8 = vld [vmem:[%s2067_s3 + $0x58] sm:$0xff]   ;;  %v1625_v10 = vld [vmem:[%s2067_s3 + $0x50] sm:$0xff]  }
   0x4   :  { %1417 = vmatprep.subr.bf16.mxu0 %v1617_v2  ;;  %1600 = vmatprep.subr.bf16.mxu1 %v1617_v2  ;;  %v1622_v7 = vld [vmem:[%s2067_s3 + $0x20] sm:$0xff]   ;;  %v1624_v9 = vld [vmem:[%s2067_s3 + $0x18] sm:$0xff]   ;;  %v1626_v12 = vld [vmem:[%s2067_s3 + $0x10] sm:$0xff]  }
   0x5   :  { %v1631_v11 = vld [vmem:[%s2068_s1] sm:$0xff]   ;;  %v1627_v13 = vld [vmem:[%s2067_s3 + $0x48] sm:$0xff]   ;;  %v1635_v22 = vld [vmem:[%s2068_s1 + $0x10] sm:$0xff]  }
   0x6   :  { %450 = vmatprep.mubr.bf16.mxu0 %v1631_v11  ;;  %v1628_v14 = vld [vmem:[%s2067_s3 + $0x8] sm:$0xff]   ;;  %v1629_v15 = vld [vmem:[%s2067_s3 + $0x40] sm:$0xff]   ;;  %v1659_v25 = vld [vmem:[%s2068_s1 + $0x70] sm:$0xff]  }
   0x7   :  { %1418 = vmatpush3.bf16.msra.mxu0 %v1618_v3  ;;  %1608 = vmatpush3.bf16.msra.mxu1 %v1618_v3  ;;  %v1630_v16 = vld [vmem:[%s2067_s3] sm:$0xff]   ;;  %v1633_v18 = vld [vmem:[%s2068_s1 + $0x8] sm:$0xff]   ;;  %v1636_v26 = vld [vmem:[%s2069_s0 + $0x10] sm:$0xff]  }
   0x8   :  { %1419 = vmatprep.subr.bf16.mxu0 %v1619_v4  ;;  %1601 = vmatprep.subr.bf16.mxu1 %v1619_v4  ;;  %v1632_v17 = vld [vmem:[%s2069_s0] sm:$0xff]   ;;  %v1634_v21 = vld [vmem:[%s2069_s0 + $0x8] sm:$0xff]   ;;  %v1637_v27 = vld [vmem:[%s2068_s1 + $0x18] sm:$0xff]  }
   0x9   :  { %v1651_v19 = vld [vmem:[%s2068_s1 + $0x60] sm:$0xff]   ;;  %v1655_v23 = vld [vmem:[%s2068_s1 + $0x68] sm:$0xff]   ;;  %v1663_v28 = vld [vmem:[%s2070_s5 + $0x38] sm:$0xff]  }
   0xa   :  { %v1652_v20 = vld [vmem:[%s2069_s0 + $0x60] sm:$0xff]   ;;  %546 = vmatprep.mubr.bf16.mxu1 %v1651_v19  ;;  %v1656_v24 = vld [vmem:[%s2069_s0 + $0x68] sm:$0xff]   ;;  %v1660_v29 = vld [vmem:[%s2069_s0 + $0x70] sm:$0xff]  }
   0xb   :  { %1420 = vmatpush3.bf16.msra.mxu0 %v1620_v5  ;;  %1609 = vmatpush3.bf16.msra.mxu1 %v1620_v5  ;;  %v1664_v30 = vld [vmem:[%s2070_s5 + $0x30] sm:$0xff]   ;;  %v1661_v31 = vld [vmem:[%s2068_s1 + $0x78] sm:$0xff]   ;;  %v1665_v32 = vld [vmem:[%s2070_s5 + $0x28] sm:$0xff]  }
   0xc   :  { %1421 = vmatprep.subr.bf16.mxu0 %v1621_v6  ;;  %1602 = vmatprep.subr.bf16.mxu1 %v1621_v6  ;;  %v1638_v33 = vld [vmem:[%s2069_s0 + $0x18] sm:$0xff]   ;;  %v1639_v34 = vld [vmem:[%s2068_s1 + $0x20] sm:$0xff]   ;;  %v1641_v37 = vld [vmem:[%s2068_s1 + $0x28] sm:$0xff]  }
   0xd   :  { %v1662_v35 = vld [vmem:[%s2069_s0 + $0x78] sm:$0xff]   ;;  %v1640_v36 = vld [vmem:[%s2069_s0 + $0x20] sm:$0xff]   ;;  %v1642_v38 = vld [vmem:[%s2069_s0 + $0x28] sm:$0xff]  }
   0xe   :  { %v1643_v39 = vld [vmem:[%s2068_s1 + $0x30] sm:$0xff]   ;;  %v1645_v41 = vld [vmem:[%s2068_s1 + $0x38] sm:$0xff]   ;;  %v1647_v43 = vld [vmem:[%s2068_s1 + $0x40] sm:$0xff]  }
   0xf   :  { %1422 = vmatpush3.bf16.msra.mxu0 %v1622_v7  ;;  %1610 = vmatpush3.bf16.msra.mxu1 %v1622_v7  ;;  %v1644_v40 = vld [vmem:[%s2069_s0 + $0x30] sm:$0xff]   ;;  %v1646_v42 = vld [vmem:[%s2069_s0 + $0x38] sm:$0xff]   ;;  %v1648_v44 = vld [vmem:[%s2069_s0 + $0x40] sm:$0xff]  }
  0x10   :  { %1423 = vmatprep.subr.bf16.mxu0 %v1623_v8  ;;  %1603 = vmatprep.subr.bf16.mxu1 %v1623_v8  ;;  %v1649_v45 = vld [vmem:[%s2068_s1 + $0x48] sm:$0xff]   ;;  %v1666_v46 = vld [vmem:[%s2070_s5 + $0x20] sm:$0xff]   ;;  %v1653_v48 = vld [vmem:[%s2068_s1 + $0x50] sm:$0xff]  }
  0x11   :  { %v1650_v47 = vld [vmem:[%s2069_s0 + $0x48] sm:$0xff]   ;;  %v1667_v49 = vld [vmem:[%s2070_s5 + $0x18] sm:$0xff]   ;;  %v1668_v50 = vld [vmem:[%s2070_s5 + $0x10] sm:$0xff]  }
  0x12   :  { %v1654_v51 = vld [vmem:[%s2069_s0 + $0x50] sm:$0xff]   ;;  %v1657_v52 = vld [vmem:[%s2068_s1 + $0x58] sm:$0xff]   ;;  %v1669_v53 = vld [vmem:[%s2070_s5 + $0x8] sm:$0xff]  }
  0x13   :  { %1424 = vmatpush3.bf16.msra.mxu0 %v1624_v9  ;;  %1611 = vmatpush3.bf16.msra.mxu1 %v1624_v9  ;;  %v1670_v54 = vld [vmem:[%s2070_s5] sm:$0xff]   ;;  %v1658_v55 = vld [vmem:[%s2069_s0 + $0x58] sm:$0xff]  }
  0x14   :  { %1425 = vmatprep.subr.bf16.mxu0 %v1625_v10  ;;  %1604 = vmatprep.subr.bf16.mxu1 %v1625_v10  ;;  %v1882_v59 = vld [vmem:[%s2071_s4] ss:$0 sm:$0xff] }
  0x17   :  { %1426 = vmatpush3.bf16.msra.mxu0 %v1626_v12  ;;  %1612 = vmatpush3.bf16.msra.mxu1 %v1626_v12 }
  0x18   :  { %1427 = vmatprep.subr.bf16.mxu0 %v1627_v13  ;;  %1605 = vmatprep.subr.bf16.mxu1 %v1627_v13 }
  0x1b   :  { %1428 = vmatpush3.bf16.msra.mxu0 %v1628_v14  ;;  %1613 = vmatpush3.bf16.msra.mxu1 %v1628_v14 }
  0x1c   :  { %1429 = vmatprep.subr.bf16.mxu0 %v1629_v15  ;;  %1606 = vmatprep.subr.bf16.mxu1 %v1629_v15 }
  0x1f   :  { %1430 = vmatpush3.bf16.msra.mxu0 %v1630_v16  ;;  %1614 = vmatpush3.bf16.msra.mxu1 %v1630_v16 }
  0x20   :  { %1551 = vmatprep.subr.bf16.mxu1 %v1663_v28 }
  0x22   :  { %451 = vmatmul.mubr.bf16.vlgmr.msra.gmra.mxu0 %v1632_v17  ;;  %547 = vmatmul.mubr.bf16.vlgmr.msra.gmra.mxu1 %v1652_v20 }
  0x23   :  { %458 = vmatprep.mubr.bf16.mxu0 %v1633_v18  ;;  %554 = vmatprep.mubr.bf16.mxu1 %v1655_v23 }
  0x24   :  { %1552 = vmatpush3.bf16.msra.mxu1 %v1663_v28 }
  0x25   :  { %1553 = vmatprep.subr.bf16.mxu1 %v1664_v30 }
  0x28   :  { %1554 = vmatpush3.bf16.msra.mxu1 %v1664_v30 }
  0x29   :  { %1555 = vmatprep.subr.bf16.mxu1 %v1665_v32 }
  0x2a   :  { %459 = vmatmul.mubr.bf16.gmra.mxu0 %v1634_v21  ;;  %555 = vmatmul.mubr.bf16.gmra.mxu1 %v1656_v24 }
  0x2b   :  { %466 = vmatprep.mubr.bf16.mxu0 %v1635_v22  ;;  %562 = vmatprep.mubr.bf16.mxu1 %v1659_v25 }
  0x2c   :  { %1556 = vmatpush3.bf16.msra.mxu1 %v1665_v32 }
  0x2d   :  { %1557 = vmatprep.subr.bf16.mxu1 %v1666_v46 }
  0x30   :  { %1558 = vmatpush3.bf16.msra.mxu1 %v1666_v46 }
  0x31   :  { %1559 = vmatprep.subr.bf16.mxu1 %v1667_v49 }
  0x32   :  { %467 = vmatmul.mubr.bf16.gmra.mxu0 %v1636_v26  ;;  %563 = vmatmul.mubr.bf16.gmra.mxu1 %v1660_v29 }
  0x33   :  { %474 = vmatprep.mubr.bf16.mxu0 %v1637_v27  ;;  %570 = vmatprep.mubr.bf16.mxu1 %v1661_v31 }
  0x34   :  { %1560 = vmatpush3.bf16.msra.mxu1 %v1667_v49 }
  0x35   :  { %1561 = vmatprep.subr.bf16.mxu1 %v1668_v50 }
  0x38   :  { %1562 = vmatpush3.bf16.msra.mxu1 %v1668_v50 }
  0x39   :  { %1563 = vmatprep.subr.bf16.mxu1 %v1669_v53 }
  0x3a   :  { %475 = vmatmul.mubr.bf16.gmra.mxu0 %v1638_v33  ;;  %571 = vmatmul.mubr.bf16.gmra.mxu1 %v1662_v35 }
  0x3b   :  { %482 = vmatprep.mubr.bf16.mxu0 %v1639_v34 }
  0x3c   :  { %1564 = vmatpush3.bf16.msra.mxu1 %v1669_v53 }
  0x3d   :  { %1565 = vmatprep.subr.bf16.mxu1 %v1670_v54 }
  0x40   :  { %1566 = vmatpush3.bf16.msra.mxu1 %v1670_v54 }
  0x42   :  { %483 = vmatmul.mubr.bf16.gmra.mxu0 %v1640_v36 }
  0x43   :  { %490 = vmatprep.mubr.bf16.mxu0 %v1641_v37 }
  0x4a   :  { %491 = vmatmul.mubr.bf16.gmra.mxu0 %v1642_v38 }
  0x4b   :  { %498 = vmatprep.mubr.bf16.mxu0 %v1643_v39 }
  0x52   :  { %499 = vmatmul.mubr.bf16.gmra.mxu0 %v1644_v40 }
  0x53   :  { %506 = vmatprep.mubr.bf16.mxu0 %v1645_v41 }
  0x5a   :  { %507 = vmatmul.mubr.bf16.gmra.mxu0 %v1646_v42 }
  0x5b   :  { %514 = vmatprep.mubr.bf16.mxu0 %v1647_v43 }
  0x62   :  { %515 = vmatmul.mubr.bf16.gmra.mxu0 %v1648_v44 }
  0x63   :  { %522 = vmatprep.mubr.bf16.mxu0 %v1649_v45 }
  0x6a   :  { %523 = vmatmul.mubr.bf16.gmra.mxu0 %v1650_v47 }
  0x6b   :  { %530 = vmatprep.mubr.bf16.mxu0 %v1653_v48 }
  0x72   :  { %531 = vmatmul.mubr.bf16.gmra.mxu0 %v1654_v51 }
  0x73   :  { %538 = vmatprep.mubr.bf16.mxu0 %v1657_v52 }
  0x7a   :  { %539 = vmatmul.mubr.bf16.gmra.mxu0 %v1658_v55 }
  0xe2   :  { %v1431_v56 = vpop.f32.mrf.mxu0  ;;  %v1894_v47 = vpop.f32.mrf.mxu1 }
  0xe4   :  { %v1432_v57 = vpop.f32.mrf.mxu0  ;;  %v1896_v54 = vpop.f32.mrf.mxu1 }
  0xe5   :  { %v1433_v58 = vadd.f32 %v1432_v57, %v1431_v56 }
  0xe6   :  { %v1434_v60 = vpop.f32.mrf.mxu0 }
  0xe7   :  { %v453_v62 = vadd.f32 %v1433_v58, %v1882_v59 }
  0xe8   :  { %v1435_v61 = vpop.f32.mrf.mxu0 }
  0xe9   :  { %v1436_v63 = vadd.f32 %v1435_v61, %v1434_v60  ;;  %v579_v3 = vmax.f32 %v453_v62, 0.0  ;;  %v1900_v61 = vpop.f32.mrf.mxu1 }
  0xea   :  { %v1437_v0 = vpop.f32.mrf.mxu0 }
  0xeb   :  { %v456_v1 = vadd.f32 %v1436_v63, %v1882_v59 }
  0xec   :  { %v1438_v2 = vpop.f32.mrf.mxu0 }
  0xed   :  { %v580_v4 = vmax.f32 %v456_v1, 0.0  ;;  %v1439_v5 = vadd.f32 %v1438_v2, %v1437_v0 }
  0xee   :  { %v1440_v6 = vpop.f32.mrf.mxu0 }
  0xef   :  { %v611_v7 = vpack.c.bf16 %v580_v4, %v579_v3  ;;  %v461_v9 = vadd.f32 %v1439_v5, %v1882_v59  ;;  %v1902_v4 = vpop.f32.mrf.mxu1 }
  0xf0   :  { %v1441_v8 = vpop.f32.mrf.mxu0 }
  0xf1   :  { %v1442_v10 = vadd.f32 %v1441_v8, %v1440_v6  ;;  %1567 = vmatprep.mubr.bf16.mxu1 %v611_v7  ;;  %v581_v14 = vmax.f32 %v461_v9, 0.0 }
  0xf2   :  { %v1443_v11 = vpop.f32.mrf.mxu0 }
  0xf3   :  { %v464_v12 = vadd.f32 %v1442_v10, %v1882_v59  ;;  %v1906_v10 = vpop.f32.mrf.mxu1 }
  0xf4   :  { %v1444_v13 = vpop.f32.mrf.mxu0 }
  0xf5   :  { %v582_v15 = vmax.f32 %v464_v12, 0.0  ;;  %v1445_v16 = vadd.f32 %v1444_v13, %v1443_v11 }
  0xf6   :  { %v1446_v17 = vpop.f32.mrf.mxu0 }
  0xf7   :  { %v612_v18 = vpack.c.bf16 %v582_v15, %v581_v14  ;;  %v469_v20 = vadd.f32 %v1445_v16, %v1882_v59 }
  0xf8   :  { %v1447_v19 = vpop.f32.mrf.mxu0 }
  0xf9   :  { %v1448_v21 = vadd.f32 %v1447_v19, %v1446_v17  ;;  %1568 = vmatmul.mubr.bf16.vlgmr.msra.gmra.mxu1 %v612_v18  ;;  %v583_v25 = vmax.f32 %v469_v20, 0.0  ;;  %v1908_v17 = vpop.f32.mrf.mxu1 }
  0xfa   :  { %v1449_v22 = vpop.f32.mrf.mxu0 }
  0xfb   :  { %v472_v23 = vadd.f32 %v1448_v21, %v1882_v59 }
  0xfc   :  { %v1450_v24 = vpop.f32.mrf.mxu0 }
  0xfd   :  { %v584_v26 = vmax.f32 %v472_v23, 0.0  ;;  %v1451_v27 = vadd.f32 %v1450_v24, %v1449_v22  ;;  %v1512_v23 = vpop.f32.mrf.mxu1 }
  0xfe   :  { %v1452_v28 = vpop.f32.mrf.mxu0 }
  0xff   :  { %v613_v29 = vpack.c.bf16 %v584_v26, %v583_v25  ;;  %v477_v31 = vadd.f32 %v1451_v27, %v1882_v59 }
 0x100   :  { %v1453_v30 = vpop.f32.mrf.mxu0 }
 0x101   :  { %v1454_v32 = vadd.f32 %v1453_v30, %v1452_v28  ;;  %1571 = vmatprep.mubr.bf16.mxu1 %v613_v29  ;;  %v585_v36 = vmax.f32 %v477_v31, 0.0  ;;  %v1513_v30 = vpop.f32.mrf.mxu1 }
 0x102   :  { %v1455_v33 = vpop.f32.mrf.mxu0 }
 0x103   :  { %v480_v34 = vadd.f32 %v1454_v32, %v1882_v59 }
 0x104   :  { %v1456_v35 = vpop.f32.mrf.mxu0 }
 0x105   :  { %v586_v37 = vmax.f32 %v480_v34, 0.0  ;;  %v1457_v38 = vadd.f32 %v1456_v35, %v1455_v33 }
 0x106   :  { %v1458_v39 = vpop.f32.mrf.mxu0 }
 0x107   :  { %v614_v40 = vpack.c.bf16 %v586_v37, %v585_v36  ;;  %v485_v42 = vadd.f32 %v1457_v38, %v1882_v59  ;;  %v1515_v36 = vpop.f32.mrf.mxu1 }
 0x108   :  { %v1459_v41 = vpop.f32.mrf.mxu0 }
 0x109   :  { %v1460_v43 = vadd.f32 %v1459_v41, %v1458_v39  ;;  %1572 = vmatmul.mubr.bf16.gmra.mxu1 %v614_v40  ;;  %v587_v48 = vmax.f32 %v485_v42, 0.0 }
 0x10a   :  { %v1461_v44 = vpop.f32.mrf.mxu0 }
 0x10b   :  { %v488_v45 = vadd.f32 %v1460_v43, %v1882_v59  ;;  %v1516_v43 = vpop.f32.mrf.mxu1 }
 0x10c   :  { %v1462_v46 = vpop.f32.mrf.mxu0 }
 0x10d   :  { %v588_v49 = vmax.f32 %v488_v45, 0.0  ;;  %v1463_v50 = vadd.f32 %v1462_v46, %v1461_v44 }
 0x10e   :  { %v1464_v51 = vpop.f32.mrf.mxu0 }
 0x10f   :  { %v615_v52 = vpack.c.bf16 %v588_v49, %v587_v48  ;;  %v493_v55 = vadd.f32 %v1463_v50, %v1882_v59  ;;  %v1518_v50 = vpop.f32.mrf.mxu1 }
 0x110   :  { %v1465_v53 = vpop.f32.mrf.mxu0 }
 0x111   :  { %v1466_v56 = vadd.f32 %v1465_v53, %v1464_v51  ;;  %1575 = vmatprep.mubr.bf16.mxu1 %v615_v52  ;;  %v589_v62 = vmax.f32 %v493_v55, 0.0 }
 0x112   :  { %v1467_v57 = vpop.f32.mrf.mxu0 }
 0x113   :  { %v496_v58 = vadd.f32 %v1466_v56, %v1882_v59 }
 0x114   :  { %v1468_v60 = vpop.f32.mrf.mxu0 }
 0x115   :  { %v590_v63 = vmax.f32 %v496_v58, 0.0  ;;  %v1469_v0 = vadd.f32 %v1468_v60, %v1467_v57  ;;  %v1519_v58 = vpop.f32.mrf.mxu1 }
 0x116   :  { %v1470_v1 = vpop.f32.mrf.mxu0 }
 0x117   :  { %v616_v2 = vpack.c.bf16 %v590_v63, %v589_v62  ;;  %v501_v5 = vadd.f32 %v1469_v0, %v1882_v59 }
 0x118   :  { %v1471_v3 = vpop.f32.mrf.mxu0 }
 0x119   :  { %v1472_v6 = vadd.f32 %v1471_v3, %v1470_v1  ;;  %1576 = vmatmul.mubr.bf16.gmra.mxu1 %v616_v2  ;;  %v591_v11 = vmax.f32 %v501_v5, 0.0  ;;  %v1505_v1 = vadd.f32 %v1896_v54, %v1894_v47  ;;  %v1508_v2 = vadd.f32 %v1902_v4, %v1900_v61  ;;  %v1521_v5 = vpop.f32.mrf.mxu1 }
 0x11a   :  { %v1473_v7 = vpop.f32.mrf.mxu0  ;;  %v1511_v47 = vadd.f32 %v1908_v17, %v1906_v10  ;;  %v1514_v54 = vadd.f32 %v1513_v30, %v1512_v23 }
 0x11b   :  { %v504_v8 = vadd.f32 %v1472_v6, %v1882_v59 }
 0x11c   :  { %v1474_v9 = vpop.f32.mrf.mxu0 }
 0x11d   :  { %v592_v12 = vmax.f32 %v504_v8, 0.0  ;;  %v1475_v13 = vadd.f32 %v1474_v9, %v1473_v7 }
 0x11e   :  { %v1476_v14 = vpop.f32.mrf.mxu0 }
 0x11f   :  { %v617_v15 = vpack.c.bf16 %v592_v12, %v591_v11  ;;  %v509_v18 = vadd.f32 %v1475_v13, %v1882_v59  ;;  %v549_v12 = vadd.f32 %v1505_v1, %v1882_v59  ;;  %v552_v13 = vadd.f32 %v1508_v2, %v1882_v59 }
 0x120   :  { %v1477_v16 = vpop.f32.mrf.mxu0 }
 0x121   :  { %v1478_v19 = vadd.f32 %v1477_v16, %v1476_v14  ;;  %1579 = vmatprep.mubr.bf16.mxu1 %v617_v15  ;;  %v593_v24 = vmax.f32 %v509_v18, 0.0  ;;  %v1522_v15 = vpop.f32.mrf.mxu1  ;;  %v603_v4 = vmax.f32 %v549_v12, 0.0 }
 0x122   :  { %v1479_v20 = vpop.f32.mrf.mxu0 }
 0x123   :  { %v512_v21 = vadd.f32 %v1478_v19, %v1882_v59  ;;  %v604_v19 = vmax.f32 %v552_v13, 0.0 }
 0x124   :  { %v1480_v22 = vpop.f32.mrf.mxu0 }
 0x125   :  { %v594_v25 = vmax.f32 %v512_v21, 0.0  ;;  %v1481_v26 = vadd.f32 %v1480_v22, %v1479_v20  ;;  %v1517_v20 = vadd.f32 %v1516_v43, %v1515_v36  ;;  %v1520_v21 = vadd.f32 %v1519_v58, %v1518_v50  ;;  %v1524_v22 = vpop.f32.mrf.mxu1 }
 0x126   :  { %v1482_v27 = vpop.f32.mrf.mxu0  ;;  %v623_v17 = vpack.c.bf16 %v604_v19, %v603_v4 }
 0x127   :  { %v618_v28 = vpack.c.bf16 %v594_v25, %v593_v24  ;;  %v517_v31 = vadd.f32 %v1481_v26, %v1882_v59  ;;  %v557_v26 = vadd.f32 %v1511_v47, %v1882_v59  ;;  %v1525_v10 = vpop.f32.mrf.mxu1 }
 0x128   :  { %v1483_v29 = vpop.f32.mrf.mxu0 }
 0x129   :  { %v1484_v32 = vadd.f32 %v1483_v29, %v1482_v27  ;;  %1580 = vmatmul.mubr.bf16.gmra.mxu1 %v618_v28  ;;  %v595_v37 = vmax.f32 %v517_v31, 0.0  ;;  %v560_v27 = vadd.f32 %v1514_v54, %v1882_v59  ;;  %v565_v29 = vadd.f32 %v1517_v20, %v1882_v59 }
 0x12a   :  { %v1485_v33 = vpop.f32.mrf.mxu0  ;;  %v568_v31 = vadd.f32 %v1520_v21, %v1882_v59  ;;  %v605_v23 = vmax.f32 %v557_v26, 0.0  ;;  %v1388_v26 = vld [vmem:[%s2072_s2 + $0x20] sm:$0xff]  }
 0x12b   :  { %v520_v34 = vadd.f32 %v1484_v32, %v1882_v59  ;;  %v606_v30 = vmax.f32 %v560_v27, 0.0  ;;  %v1523_v32 = vadd.f32 %v1522_v15, %v1521_v5  ;;  %v1387_v5 = vld [vmem:[%s2072_s2 + $0x18] sm:$0xff]  }
 0x12c   :  { %v1486_v35 = vpop.f32.mrf.mxu0 }
 0x12d   :  { %v596_v38 = vmax.f32 %v520_v34, 0.0  ;;  %v1487_v39 = vadd.f32 %v1486_v35, %v1485_v33  ;;  %v1526_v33 = vadd.f32 %v1525_v10, %v1524_v22  ;;  %v607_v34 = vmax.f32 %v565_v29, 0.0 }
 0x12e   :  { %v1488_v40 = vpop.f32.mrf.mxu0  ;;  %v608_v35 = vmax.f32 %v568_v31, 0.0  ;;  %v573_v36 = vadd.f32 %v1523_v32, %v1882_v59 }
 0x12f   :  { %v619_v41 = vpack.c.bf16 %v596_v38, %v595_v37  ;;  %v525_v44 = vadd.f32 %v1487_v39, %v1882_v59  ;;  %v576_v37 = vadd.f32 %v1526_v33, %v1882_v59  ;;  %v624_v38 = vpack.c.bf16 %v606_v30, %v605_v23 }
 0x130   :  { %v1489_v42 = vpop.f32.mrf.mxu0  ;;  %v625_v39 = vpack.c.bf16 %v608_v35, %v607_v34  ;;  %v1260_v30 = vunpack.c.h.bf16 %v1388_v26 }
 0x131   :  { %v1490_v45 = vadd.f32 %v1489_v42, %v1488_v40  ;;  %1583 = vmatprep.mubr.bf16.mxu1 %v619_v41  ;;  %v597_v51 = vmax.f32 %v525_v44, 0.0  ;;  %v609_v40 = vmax.f32 %v573_v36, 0.0  ;;  %v610_v41 = vmax.f32 %v576_v37, 0.0  ;;  %v1937_v44 = vld [vmem:[%s2073_s6] ss:$0 sm:$0xff] }
 0x132   :  { %v1491_v46 = vpop.f32.mrf.mxu0 }
 0x133   :  { %v528_v48 = vadd.f32 %v1490_v45, %v1882_v59  ;;  %v626_v42 = vpack.c.bf16 %v610_v41, %v609_v40  ;;  %v1385_v45 = vld [vmem:[%s2072_s2 + $0x8] sm:$0xff]   ;;  %v1391_v41 = vld [vmem:[%s2072_s2 + $0x38] sm:$0xff]  }
 0x134   :  { %v1492_v49 = vpop.f32.mrf.mxu0  ;;  %v1248_v50 = vunpack.c.h.bf16 %v1385_v45 }
 0x135   :  { %v598_v52 = vmax.f32 %v528_v48, 0.0  ;;  %v1493_v53 = vadd.f32 %v1492_v49, %v1491_v46  ;;  %v1247_v49 = vunpack.c.l.bf16 %v1385_v45 }
 0x136   :  { %v1494_v55 = vpop.f32.mrf.mxu0 }
 0x137   :  { %v620_v56 = vpack.c.bf16 %v598_v52, %v597_v51  ;;  %v533_v60 = vadd.f32 %v1493_v53, %v1882_v59 }
 0x138   :  { %v1495_v57 = vpop.f32.mrf.mxu0 }
 0x139   :  { %v1496_v62 = vadd.f32 %v1495_v57, %v1494_v55  ;;  %1584 = vmatmul.mubr.bf16.gmra.mxu1 %v620_v56  ;;  %v599_v6 = vmax.f32 %v533_v60, 0.0 }
 0x13a   :  { %v1497_v63 = vpop.f32.mrf.mxu0 }
 0x13b   :  { %v536_v0 = vadd.f32 %v1496_v62, %v1882_v59 }
 0x13c   :  { %v1498_v3 = vpop.f32.mrf.mxu0 }
 0x13d   :  { %v600_v7 = vmax.f32 %v536_v0, 0.0  ;;  %v1499_v8 = vadd.f32 %v1498_v3, %v1497_v63 }
 0x13e   :  { %v1500_v9 = vpop.f32.mrf.mxu0 }
 0x13f   :  { %v621_v11 = vpack.c.bf16 %v600_v7, %v599_v6  ;;  %v541_v16 = vadd.f32 %v1499_v8, %v1882_v59  ;;  %v1386_v7 = vld [vmem:[%s2072_s2 + $0x10] sm:$0xff]  }
 0x140   :  { %v1501_v14 = vpop.f32.mrf.mxu0 }
 0x141   :  { %v1502_v18 = vadd.f32 %v1501_v14, %v1500_v9  ;;  %1587 = vmatprep.mubr.bf16.mxu1 %v621_v11  ;;  %v601_v24 = vmax.f32 %v541_v16, 0.0  ;;  %v1255_v9 = vunpack.c.l.bf16 %v1387_v5  ;;  %v1256_v11 = vunpack.c.h.bf16 %v1387_v5 }
 0x142   :  { %v1251_v14 = vunpack.c.l.bf16 %v1386_v7  ;;  %v1252_v16 = vunpack.c.h.bf16 %v1386_v7 }
 0x143   :  { %v544_v61 = vadd.f32 %v1502_v18, %v1882_v59  ;;  %v1242_v59 = vld [vmem:[%s2072_s2] sm:$0xff]  }
 0x144   :  { %v1243_v53 = vunpack.c.l.bf16 %v1242_v59  ;;  %v1244_v56 = vunpack.c.h.bf16 %v1242_v59  ;;  %v1272_v59 = vunpack.c.h.bf16 %v1391_v41 }
 0x145   :  { %v602_v25 = vmax.f32 %v544_v61, 0.0 }
 0x147   :  { %v622_v28 = vpack.c.bf16 %v602_v25, %v601_v24  ;;  %v1389_v24 = vld [vmem:[%s2072_s2 + $0x28] sm:$0xff]  }
 0x148   :  { %v1264_v29 = vunpack.c.h.bf16 %v1389_v24 }
 0x149   :  { %1588 = vmatmul.mubr.bf16.gmra.mxu1 %v622_v28  ;;  %v1263_v28 = vunpack.c.l.bf16 %v1389_v24 }
 0x14a   :  { %1591 = vmatprep.mubr.bf16.mxu1 %v623_v17  ;;  %v1259_v17 = vunpack.c.l.bf16 %v1388_v26 }
 0x151   :  { %1592 = vmatmul.mubr.bf16.gmra.mxu1 %v624_v38 }
 0x152   :  { %1595 = vmatprep.mubr.bf16.mxu1 %v625_v39 }
 0x159   :  { %1596 = vmatmul.mubr.bf16.gmra.mxu1 %v626_v42 }
 0x1b9   :  { %v1569_v43 = vpop.f32.mrf.mxu1 }
 0x1ba   :  { %v741_v48 = vadd.f32 %v1569_v43, %v1937_v44  ;;  %v1390_v43 = vld [vmem:[%s2072_s2 + $0x30] sm:$0xff]  }
 0x1bb   :  { %v732_v46 = vpop.f32.mrf.mxu1 }
 0x1bc   :  { %v733_v52 = vadd.f32 %v1937_v44, %v732_v46  ;;  %v925_v58 = vadd.f32 %v1247_v49, %v741_v48  ;;  %v1271_v46 = vunpack.c.l.bf16 %v1391_v41 }
 0x1bd   :  { %v1570_v51 = vpop.f32.mrf.mxu1 }
 0x1be   :  { %v744_v55 = vadd.f32 %v1570_v51, %v1937_v44  ;;  %v923_v63 = vadd.f32 %v1243_v53, %v733_v52  ;;  %v1268_v52 = vunpack.c.h.bf16 %v1390_v43 }
 0x1bf   :  { %v735_v57 = vpop.f32.mrf.mxu1 }
 0x1c0   :  { %v926_v60 = vadd.f32 %v1248_v50, %v744_v55  ;;  %v736_v62 = vadd.f32 %v1937_v44, %v735_v57  ;;  %v1267_v50 = vunpack.c.l.bf16 %v1390_v43 }
 0x1c2   :  { %v1313_v0 = vpack.c.bf16 %v926_v60, %v925_v58  ;;  %v924_v1 = vadd.f32 %v1244_v56, %v736_v62 }
 0x1c4   :  { %1400 = vst [vmem:[%s2074_s7 + $0x8] sm:$0xff] %v1313_v0   ;;  %v1308_v2 = vpack.c.bf16 %v924_v1, %v923_v63  ;;  %v1393_v1 = vld [vmem:[%s2072_s2 + $0x48] sm:$0xff]  }
 0x1c5   :  { %v1280_v7 = vunpack.c.h.bf16 %v1393_v1 }
 0x1c6   :  { %1309 = vst [vmem:[%s2074_s7] sm:$0xff] %v1308_v2  }
 0x1c9   :  { %v1573_v3 = vpop.f32.mrf.mxu1 }
 0x1ca   :  { %v757_v8 = vadd.f32 %v1573_v3, %v1937_v44  ;;  %v1392_v3 = vld [vmem:[%s2072_s2 + $0x40] sm:$0xff]  }
 0x1cb   :  { %v748_v6 = vpop.f32.mrf.mxu1 }
 0x1cc   :  { %v749_v13 = vadd.f32 %v1937_v44, %v748_v6  ;;  %v929_v47 = vadd.f32 %v1255_v9, %v757_v8  ;;  %v1279_v6 = vunpack.c.l.bf16 %v1393_v1 }
 0x1cd   :  { %v1574_v12 = vpop.f32.mrf.mxu1 }
 0x1ce   :  { %v760_v15 = vadd.f32 %v1574_v12, %v1937_v44  ;;  %v927_v4 = vadd.f32 %v1251_v14, %v749_v13  ;;  %v1276_v13 = vunpack.c.h.bf16 %v1392_v3 }
 0x1cf   :  { %v751_v18 = vpop.f32.mrf.mxu1 }
 0x1d0   :  { %v930_v54 = vadd.f32 %v1256_v11, %v760_v15  ;;  %v752_v61 = vadd.f32 %v1937_v44, %v751_v18  ;;  %v1275_v11 = vunpack.c.l.bf16 %v1392_v3 }
 0x1d2   :  { %v1323_v19 = vpack.c.bf16 %v930_v54, %v929_v47  ;;  %v928_v20 = vadd.f32 %v1252_v16, %v752_v61 }
 0x1d4   :  { %1402 = vst [vmem:[%s2074_s7 + $0x18] sm:$0xff] %v1323_v19   ;;  %v1318_v21 = vpack.c.bf16 %v928_v20, %v927_v4  ;;  %v1395_v20 = vld [vmem:[%s2072_s2 + $0x58] sm:$0xff]  }
 0x1d5   :  { %v1288_v26 = vunpack.c.h.bf16 %v1395_v20 }
 0x1d6   :  { %1401 = vst [vmem:[%s2074_s7 + $0x10] sm:$0xff] %v1318_v21  }
 0x1d9   :  { %v1577_v22 = vpop.f32.mrf.mxu1 }
 0x1da   :  { %v773_v27 = vadd.f32 %v1577_v22, %v1937_v44  ;;  %v1394_v22 = vld [vmem:[%s2072_s2 + $0x50] sm:$0xff]  }
 0x1db   :  { %v764_v25 = vpop.f32.mrf.mxu1 }
 0x1dc   :  { %v765_v10 = vadd.f32 %v1937_v44, %v764_v25  ;;  %v933_v33 = vadd.f32 %v1263_v28, %v773_v27  ;;  %v1287_v25 = vunpack.c.l.bf16 %v1395_v20 }
 0x1dd   :  { %v1578_v31 = vpop.f32.mrf.mxu1 }
 0x1de   :  { %v776_v23 = vadd.f32 %v1578_v31, %v1937_v44  ;;  %v931_v36 = vadd.f32 %v1259_v17, %v765_v10  ;;  %v1284_v10 = vunpack.c.h.bf16 %v1394_v22 }
 0x1df   :  { %v767_v32 = vpop.f32.mrf.mxu1 }
 0x1e0   :  { %v934_v34 = vadd.f32 %v1264_v29, %v776_v23  ;;  %v768_v35 = vadd.f32 %v1937_v44, %v767_v32  ;;  %v1283_v29 = vunpack.c.l.bf16 %v1394_v22 }
 0x1e2   :  { %v1333_v37 = vpack.c.bf16 %v934_v34, %v933_v33  ;;  %v932_v38 = vadd.f32 %v1260_v30, %v768_v35  ;;  %v1397_v34 = vld [vmem:[%s2072_s2 + $0x68] sm:$0xff]  }
 0x1e3   :  { %v1296_v43 = vunpack.c.h.bf16 %v1397_v34 }
 0x1e4   :  { %1404 = vst [vmem:[%s2074_s7 + $0x28] sm:$0xff] %v1333_v37   ;;  %v1328_v39 = vpack.c.bf16 %v932_v38, %v931_v36 }
 0x1e6   :  { %1403 = vst [vmem:[%s2074_s7 + $0x20] sm:$0xff] %v1328_v39   ;;  %v1396_v39 = vld [vmem:[%s2072_s2 + $0x60] sm:$0xff]  }
 0x1e9   :  { %v1581_v40 = vpop.f32.mrf.mxu1 }
 0x1ea   :  { %v789_v45 = vadd.f32 %v1581_v40, %v1937_v44 }
 0x1eb   :  { %v780_v42 = vpop.f32.mrf.mxu1 }
 0x1ec   :  { %v781_v49 = vadd.f32 %v1937_v44, %v780_v42  ;;  %v937_v55 = vadd.f32 %v1271_v46, %v789_v45  ;;  %v1295_v42 = vunpack.c.l.bf16 %v1397_v34 }
 0x1ed   :  { %v1582_v48 = vpop.f32.mrf.mxu1 }
 0x1ee   :  { %v792_v51 = vadd.f32 %v1582_v48, %v1937_v44  ;;  %v935_v58 = vadd.f32 %v1267_v50, %v781_v49  ;;  %v1292_v49 = vunpack.c.h.bf16 %v1396_v39 }
 0x1ef   :  { %v783_v53 = vpop.f32.mrf.mxu1 }
 0x1f0   :  { %v938_v56 = vadd.f32 %v1272_v59, %v792_v51  ;;  %v784_v57 = vadd.f32 %v1937_v44, %v783_v53  ;;  %v1291_v59 = vunpack.c.l.bf16 %v1396_v39 }
 0x1f2   :  { %v1343_v60 = vpack.c.bf16 %v938_v56, %v937_v55  ;;  %v936_v62 = vadd.f32 %v1268_v52, %v784_v57  ;;  %v1399_v56 = vld [vmem:[%s2072_s2 + $0x78] sm:$0xff]  }
 0x1f3   :  { %v1304_v3 = vunpack.c.h.bf16 %v1399_v56 }
 0x1f4   :  { %1406 = vst [vmem:[%s2074_s7 + $0x38] sm:$0xff] %v1343_v60   ;;  %v1338_v63 = vpack.c.bf16 %v936_v62, %v935_v58 }
 0x1f6   :  { %1405 = vst [vmem:[%s2074_s7 + $0x30] sm:$0xff] %v1338_v63   ;;  %v1398_v63 = vld [vmem:[%s2072_s2 + $0x70] sm:$0xff]  }
 0x1f9   :  { %v1585_v0 = vpop.f32.mrf.mxu1 }
 0x1fa   :  { %v805_v5 = vadd.f32 %v1585_v0, %v1937_v44 }
 0x1fb   :  { %v796_v2 = vpop.f32.mrf.mxu1 }
 0x1fc   :  { %v797_v9 = vadd.f32 %v1937_v44, %v796_v2  ;;  %v941_v15 = vadd.f32 %v1279_v6, %v805_v5  ;;  %v1303_v2 = vunpack.c.l.bf16 %v1399_v56 }
 0x1fd   :  { %v1586_v8 = vpop.f32.mrf.mxu1 }
 0x1fe   :  { %v808_v12 = vadd.f32 %v1586_v8, %v1937_v44  ;;  %v939_v47 = vadd.f32 %v1275_v11, %v797_v9  ;;  %v1300_v9 = vunpack.c.h.bf16 %v1398_v63 }
 0x1ff   :  { %v799_v14 = vpop.f32.mrf.mxu1 }
 0x200   :  { %v942_v16 = vadd.f32 %v1280_v7, %v808_v12  ;;  %v800_v18 = vadd.f32 %v1937_v44, %v799_v14  ;;  %v1299_v7 = vunpack.c.l.bf16 %v1398_v63 }
 0x202   :  { %v1353_v54 = vpack.c.bf16 %v942_v16, %v941_v15  ;;  %v940_v61 = vadd.f32 %v1276_v13, %v800_v18 }
 0x204   :  { %1408 = vst [vmem:[%s2074_s7 + $0x48] sm:$0xff] %v1353_v54   ;;  %v1348_v4 = vpack.c.bf16 %v940_v61, %v939_v47 }
 0x206   :  { %1407 = vst [vmem:[%s2074_s7 + $0x40] sm:$0xff] %v1348_v4  }
 0x209   :  { %v1589_v19 = vpop.f32.mrf.mxu1 }
 0x20a   :  { %v821_v24 = vadd.f32 %v1589_v19, %v1937_v44 }
 0x20b   :  { %v812_v21 = vpop.f32.mrf.mxu1 }
 0x20c   :  { %v813_v28 = vadd.f32 %v1937_v44, %v812_v21  ;;  %v945_v23 = vadd.f32 %v1287_v25, %v821_v24 }
 0x20d   :  { %v1590_v27 = vpop.f32.mrf.mxu1 }
 0x20e   :  { %v824_v31 = vadd.f32 %v1590_v27, %v1937_v44  ;;  %v943_v35 = vadd.f32 %v1283_v29, %v813_v28 }
 0x20f   :  { %v815_v17 = vpop.f32.mrf.mxu1 }
 0x210   :  { %v946_v30 = vadd.f32 %v1288_v26, %v824_v31  ;;  %v816_v32 = vadd.f32 %v1937_v44, %v815_v17 }
 0x211   :  { %v1593_v33 = vpop.f32.mrf.mxu1 }
 0x212   :  { %v1363_v36 = vpack.c.bf16 %v946_v30, %v945_v23  ;;  %v944_v37 = vadd.f32 %v1284_v10, %v816_v32  ;;  %v837_v41 = vadd.f32 %v1593_v33, %v1937_v44 }
 0x213   :  { %v828_v38 = vpop.f32.mrf.mxu1 }
 0x214   :  { %1410 = vst [vmem:[%s2074_s7 + $0x58] sm:$0xff] %v1363_v36   ;;  %v1358_v40 = vpack.c.bf16 %v944_v37, %v943_v35  ;;  %v829_v46 = vadd.f32 %v1937_v44, %v828_v38  ;;  %v949_v51 = vadd.f32 %v1295_v42, %v837_v41 }
 0x215   :  { %v1594_v45 = vpop.f32.mrf.mxu1 }
 0x216   :  { %1409 = vst [vmem:[%s2074_s7 + $0x50] sm:$0xff] %v1358_v40   ;;  %v840_v48 = vadd.f32 %v1594_v45, %v1937_v44  ;;  %v947_v57 = vadd.f32 %v1291_v59, %v829_v46 }
 0x217   :  { %v831_v50 = vpop.f32.mrf.mxu1 }
 0x218   :  { %v950_v52 = vadd.f32 %v1296_v43, %v840_v48  ;;  %v832_v53 = vadd.f32 %v1937_v44, %v831_v50 }
 0x219   :  { %v1597_v55 = vpop.f32.mrf.mxu1 }
 0x21a   :  { %v1373_v58 = vpack.c.bf16 %v950_v52, %v949_v51  ;;  %v948_v60 = vadd.f32 %v1292_v49, %v832_v53  ;;  %v853_v1 = vadd.f32 %v1597_v55, %v1937_v44 }
 0x21b   :  { %v844_v62 = vpop.f32.mrf.mxu1 }
 0x21c   :  { %1412 = vst [vmem:[%s2074_s7 + $0x68] sm:$0xff] %v1373_v58   ;;  %v1368_v0 = vpack.c.bf16 %v948_v60, %v947_v57  ;;  %v845_v6 = vadd.f32 %v1937_v44, %v844_v62  ;;  %v953_v12 = vadd.f32 %v1303_v2, %v853_v1 }
 0x21d   :  { %v1598_v5 = vpop.f32.mrf.mxu1 }
 0x21e   :  { %1411 = vst [vmem:[%s2074_s7 + $0x60] sm:$0xff] %v1368_v0   ;;  %v856_v8 = vadd.f32 %v1598_v5, %v1937_v44  ;;  %v951_v15 = vadd.f32 %v1299_v7, %v845_v6 }
 0x21f   :  { %v847_v11 = vpop.f32.mrf.mxu1 }
 0x220   :  { %v954_v13 = vadd.f32 %v1304_v3, %v856_v8  ;;  %v848_v14 = vadd.f32 %v1937_v44, %v847_v11 }
 0x222   :  { %v1383_v16 = vpack.c.bf16 %v954_v13, %v953_v12  ;;  %v952_v18 = vadd.f32 %v1300_v9, %v848_v14 }
 0x224   :  { %1414 = vst [vmem:[%s2074_s7 + $0x78] sm:$0xff] %v1383_v16   ;;  %v1378_v47 = vpack.c.bf16 %v952_v18, %v951_v15 }
 0x226   :  { %1413 = vst [vmem:[%s2074_s7 + $0x70] sm:$0xff] %v1378_v47  }

// kernel: merge_module_forward.12
= control target key start
LH: loop header
LB: loop body
LE: loop exit
PB: predicated region body
PF: predicated region fallthrough
CT: control target
= control target key end

     0   :  { %s1491_s15 = smov 0   ;;  %s1493_s16 = smov 0   ;;  %s1683_s0 = inlined_call_operand.vmem [shape: bf16[4,8,1024], index: 0, kind: input, shape index: {}]   ;;  %s1684_s1 = inlined_call_operand.vmem [shape: bf16[4,8,1024], index: 1, kind: input, shape index: {}]   ;;  %s1685_s2 = inlined_call_operand.vmem [shape: bf16[16,8], index: 2, kind: input, shape index: {}]   ;;  %s1686_s3 = inlined_call_operand.vmem [shape: bf16[4,16,2048], index: 3, kind: output, shape index: {0}]   ;;  %s1687_s4 = inlined_call_operand.vmem [shape: bf16[4,16,2048], index: 4, kind: output, shape index: {1}]  }
   0x1   :  { %s1495_s17 = smov 0  }
   0x2 LB: > { %s27_s18 = sadd.s32 1, %s1459_s16  ;;  %p1287_p0 = scmp.ge.s32.totalorder %s1463_s17, 1  ;;  %s1463_s17 = sphi %s1495_s17, %s15_s17   ;;  %s1459_s16 = sphi %s1493_s16, %s1689_s16   ;;  %s1455_s15 = sphi %s1491_s15, %s1688_s15  }
   0x3   : > { %p29_p1 = scmp.ge.s32.totalorder %s27_s18, 4  ;;  %p202_p2 = scmp.lt.s32.totalorder %s1463_s17, 5 }
   0x5   : > { %s1691_s18 = smov (%p29_p1, %s27_s18), 0  ;;  %p203_p3 = pnand %p1287_p0, %p202_p2 }
   0x6   : > { %p253_p4 = scmp.lt.s32.totalorder (!%p203_p3), %s1455_s15, 3 }
   0x7   : > { %206 = sbr.rel (%p203_p3) target bundleno = 269 (0x10d), region = 32 }
   0xc   : > { %v1465_v0 = vmov 0   ;;  %s1693_s15 = smov (!%p253_p4, %s1455_s15), 3  ;;  %vm327_vm0 = vcmask 1043456   ;;  %v1428_v15 = vld [vmem:[%s1685_s2] sm:$0xff]   ;;  %vm323_vm1 = vcmask 64512  }
   0xd   : > { %384 = vmatprep.mubr.bf16.mxu0 %v1465_v0  ;;  %427 = vmatprep.mubr.bf16.mxu1 %v1465_v0  ;;  %s1363_s19 = sshll.u32 %s1693_s15, 5  ;;  %s1365_s28 = sshll.u32 %s1693_s15, 7 }
   0xe   : > { %s257_s22 = scalar_lea.vmem %s1683_s0, %s1363_s19  ;;  %s1520_s25 = scalar_lea.vmem %s1684_s1, %s1363_s19 }
   0xf   : > { %v294_v1 = vld [vmem:[%s257_s22] sm:$0xff]  ;;  %v295_v2 = vld [vmem:[%s257_s22 + $0x8] sm:$0xff]  ;;  %v296_v3 = vld [vmem:[%s257_s22 + $0x10] sm:$0xff]  ;;  %s1567_s5 = scalar_lea.vmem %s1686_s3, %s1365_s28  ;;  %s1628_s8 = scalar_lea.vmem %s1687_s4, %s1365_s28 }
  0x10   : > { %v1298_v4 = vcombine.high %v294_v1, %v294_v1  ;;  %v1300_v5 = vcombine.high %v295_v2, %v295_v2  ;;  %v1297_v6 = vcombine.low %v294_v1, %v294_v1  ;;  %v1299_v7 = vcombine.low %v295_v2, %v295_v2  ;;  %v297_v8 = vld [vmem:[%s257_s22 + $0x18] sm:$0xff]  ;;  %v708_v16 = vld [vmem:[%s1520_s25] sm:$0xff]  ;;  %v709_v17 = vld [vmem:[%s1520_s25 + $0x8] sm:$0xff] }
  0x11   : > { %v1302_v9 = vcombine.high %v296_v3, %v296_v3  ;;  %v1304_v10 = vcombine.high %v297_v8, %v297_v8  ;;  %v1301_v11 = vcombine.low %v296_v3, %v296_v3  ;;  %v1303_v12 = vcombine.low %v297_v8, %v297_v8  ;;  %v710_v24 = vld [vmem:[%s1520_s25 + $0x10] sm:$0xff]  ;;  %v711_v25 = vld [vmem:[%s1520_s25 + $0x18] sm:$0xff] }
  0x12   : > { %1305 = vmatprep.subr.msk.bf16.mxu0 %vm327_vm0, %v1298_v4  ;;  %1307 = vmatprep.subr.msk.bf16.mxu1 %vm327_vm0, %v1300_v5  ;;  %v329_v13 = vsel %vm327_vm0, %v1297_v6, 0  ;;  %v335_v14 = vsel %vm327_vm0, %v1299_v7, 0  ;;  %v1330_v20 = vcombine.high %v708_v16, %v708_v16  ;;  %v1332_v21 = vcombine.high %v709_v17, %v709_v17 }
  0x13   : > { %367 = vmatpush1.bf16.msra.mxu0 %v329_v13  ;;  %410 = vmatpush1.bf16.msra.mxu1 %v335_v14  ;;  %v341_v18 = vsel %vm327_vm0, %v1301_v11, 0  ;;  %v347_v19 = vsel %vm327_vm0, %v1303_v12, 0  ;;  %v1329_v22 = vcombine.low %v708_v16, %v708_v16  ;;  %v1331_v23 = vcombine.low %v709_v17, %v709_v17 }
  0x14   : > { %1309 = vmatprep.subr.msk.bf16.mxu0 %vm327_vm0, %v1302_v9  ;;  %1311 = vmatprep.subr.msk.bf16.mxu1 %vm327_vm0, %v1304_v10  ;;  %v1334_v28 = vcombine.high %v710_v24, %v710_v24  ;;  %v1336_v29 = vcombine.high %v711_v25, %v711_v25  ;;  %v1333_v30 = vcombine.low %v710_v24, %v710_v24 }
  0x15   : > { %v733_v26 = vsel %vm327_vm0, %v1329_v22, 0  ;;  %v739_v27 = vsel %vm327_vm0, %v1331_v23, 0  ;;  %v1335_v31 = vcombine.low %v711_v25, %v711_v25 }
  0x16   : > { %1306 = vmatmul.mubr.msk.bf16.vlgmr.msra.gmra.mxu0 %vm323_vm1, %v1428_v15  ;;  %1308 = vmatmul.mubr.msk.bf16.vlgmr.msra.gmra.mxu1 %vm323_vm1, %v1428_v15  ;;  %v745_v32 = vsel %vm327_vm0, %v1333_v30, 0 }
  0x17   : > { %453 = vmatpush1.bf16.msra.mxu0 %v341_v18  ;;  %496 = vmatpush1.bf16.msra.mxu1 %v347_v19  ;;  %v751_v33 = vsel %vm327_vm0, %v1335_v31, 0 }
  0x18   : > { %470 = vmatprep.mubr.bf16.mxu0 %v1465_v0  ;;  %513 = vmatprep.mubr.bf16.mxu1 %v1465_v0 }
  0x19   : > { %1337 = vmatprep.subr.msk.bf16.mxu0 %vm327_vm0, %v1330_v20  ;;  %1339 = vmatprep.subr.msk.bf16.mxu1 %vm327_vm0, %v1332_v21 }
  0x1e   : > { %1310 = vmatmul.mubr.msk.bf16.vlgmr.msra.gmra.mxu0 %vm323_vm1, %v1428_v15  ;;  %1312 = vmatmul.mubr.msk.bf16.vlgmr.msra.gmra.mxu1 %vm323_vm1, %v1428_v15 }
  0x1f   : > { %771 = vmatpush1.bf16.msra.mxu0 %v733_v26  ;;  %814 = vmatpush1.bf16.msra.mxu1 %v739_v27 }
  0x20   : > { %788 = vmatprep.mubr.bf16.mxu0 %v1465_v0  ;;  %831 = vmatprep.mubr.bf16.mxu1 %v1465_v0 }
  0x21   : > { %1341 = vmatprep.subr.msk.bf16.mxu0 %vm327_vm0, %v1334_v28  ;;  %1343 = vmatprep.subr.msk.bf16.mxu1 %vm327_vm0, %v1336_v29 }
  0x26   : > { %1338 = vmatmul.mubr.msk.bf16.vlgmr.msra.gmra.mxu0 %vm323_vm1, %v1428_v15  ;;  %1340 = vmatmul.mubr.msk.bf16.vlgmr.msra.gmra.mxu1 %vm323_vm1, %v1428_v15 }
  0x27   : > { %857 = vmatpush1.bf16.msra.mxu0 %v745_v32  ;;  %900 = vmatpush1.bf16.msra.mxu1 %v751_v33 }
  0x28   : > { %874 = vmatprep.mubr.bf16.mxu0 %v1465_v0  ;;  %917 = vmatprep.mubr.bf16.mxu1 %v1465_v0 }
  0x2e   : > { %1342 = vmatmul.mubr.msk.bf16.vlgmr.msra.gmra.mxu0 %vm323_vm1, %v1428_v15  ;;  %1344 = vmatmul.mubr.msk.bf16.vlgmr.msra.gmra.mxu1 %vm323_vm1, %v1428_v15 }
  0xd6   : > { %v386_v34 = vpop.f32.mrf.mxu0  ;;  %v429_v35 = vpop.f32.mrf.mxu1 }
  0xd8   : > { %v388_v36 = vpop.f32.mrf.mxu0  ;;  %v431_v37 = vpop.f32.mrf.mxu1 }
  0xd9   : > { %v524_v38 = vsub.f32 %v388_v36, %v386_v34  ;;  %v534_v39 = vsub.f32 %v429_v35, %v388_v36  ;;  %v544_v40 = vsub.f32 %v431_v37, %v429_v35 }
  0xda   : > { %v390_v41 = vpop.f32.mrf.mxu0  ;;  %v433_v42 = vpop.f32.mrf.mxu1 }
  0xdb   : > { %v526_v43 = vmul.f32 0.46666667, %v524_v38  ;;  %v530_v44 = vmul.f32 0.93333334, %v524_v38  ;;  %v536_v45 = vmul.f32 0.4, %v534_v39 }
  0xdc   : > { %v540_v46 = vmul.f32 0.8666667, %v534_v39  ;;  %v546_v47 = vmul.f32 0.33333334, %v544_v40  ;;  %v550_v48 = vmul.f32 0.8, %v544_v40  ;;  %v392_v49 = vpop.f32.mrf.mxu0  ;;  %v1560_v50 = vpop.f32.mrf.mxu1 }
  0xdd   : > { %v528_v51 = vadd.f32 %v526_v43, %v386_v34  ;;  %v532_v52 = vadd.f32 %v530_v44, %v386_v34  ;;  %v538_v53 = vadd.f32 %v536_v45, %v388_v36  ;;  %v525_v54 = vsub.f32 %v392_v49, %v390_v41 }
  0xde   : > { %v542_v55 = vadd.f32 %v540_v46, %v388_v36  ;;  %v548_v56 = vadd.f32 %v546_v47, %v429_v35  ;;  %v552_v57 = vadd.f32 %v550_v48, %v429_v35  ;;  %v535_v58 = vsub.f32 %v433_v42, %v392_v49  ;;  %v472_v59 = vpop.f32.mrf.mxu0  ;;  %v1569_v60 = vpop.f32.mrf.mxu1 }
  0xdf   : > { %v1367_v61 = vpack.c.bf16 %v528_v51, %v386_v34  ;;  %v1368_v62 = vpack.c.bf16 %v538_v53, %v532_v52  ;;  %v527_v63 = vmul.f32 0.46666667, %v525_v54  ;;  %v531_v0 = vmul.f32 0.93333334, %v525_v54 }
  0xe0   : > { %v1369_v1 = vpack.c.bf16 %v548_v56, %v542_v55  ;;  %v537_v2 = vmul.f32 0.4, %v535_v58  ;;  %v541_v3 = vmul.f32 0.8666667, %v535_v58  ;;  %v545_v4 = vsub.f32 %v1560_v50, %v433_v42  ;;  %v474_v5 = vpop.f32.mrf.mxu0  ;;  %v517_v6 = vpop.f32.mrf.mxu1 }
  0xe1   : > { %692 = vst [vmem:[%s1567_s5] sm:$0xff] %v1367_v61  ;;  %693 = vst [vmem:[%s1567_s5 + $0x8] sm:$0xff] %v1368_v62  ;;  %v529_v7 = vadd.f32 %v527_v63, %v390_v41  ;;  %v533_v8 = vadd.f32 %v531_v0, %v390_v41  ;;  %v554_v9 = vsub.f32 %v472_v59, %v431_v37 }
  0xe2   : > { %v564_v10 = vsub.f32 %v474_v5, %v472_v59  ;;  %694 = vst [vmem:[%s1567_s5 + $0x10] sm:$0xff] %v1369_v1  ;;  %v539_v11 = vadd.f32 %v537_v2, %v392_v49  ;;  %v543_v12 = vadd.f32 %v541_v3, %v392_v49  ;;  %v547_v13 = vmul.f32 0.33333334, %v545_v4  ;;  %v476_v15 = vpop.f32.mrf.mxu0  ;;  %v1575_v16 = vpop.f32.mrf.mxu1 }
  0xe3   : > { %v551_v14 = vmul.f32 0.8, %v545_v4  ;;  %v1375_v17 = vpack.c.bf16 %v529_v7, %v390_v41  ;;  %v556_v18 = vmul.f32 0.26666668, %v554_v9  ;;  %v560_v19 = vmul.f32 0.73333335, %v554_v9 }
  0xe4   : > { %v566_v20 = vmul.f32 0.2, %v564_v10  ;;  %v1376_v21 = vpack.c.bf16 %v539_v11, %v533_v8  ;;  %v549_v22 = vadd.f32 %v547_v13, %v433_v42  ;;  %v570_v24 = vmul.f32 0.6666667, %v564_v10  ;;  %v478_v25 = vpop.f32.mrf.mxu0  ;;  %v521_v26 = vpop.f32.mrf.mxu1 }
  0xe5   : > { %v553_v23 = vadd.f32 %v551_v14, %v433_v42  ;;  %700 = vst [vmem:[%s1567_s5 + $0x40] sm:$0xff] %v1375_v17  ;;  %v558_v27 = vadd.f32 %v556_v18, %v431_v37  ;;  %v562_v28 = vadd.f32 %v560_v19, %v431_v37  ;;  %v574_v30 = vsub.f32 %v1569_v60, %v474_v5 }
  0xe6   : > { %v568_v29 = vadd.f32 %v566_v20, %v472_v59  ;;  %701 = vst [vmem:[%s1567_s5 + $0x48] sm:$0xff] %v1376_v21  ;;  %v1377_v31 = vpack.c.bf16 %v549_v22, %v543_v12  ;;  %v572_v32 = vadd.f32 %v570_v24, %v472_v59  ;;  %v584_v33 = vsub.f32 %v517_v6, %v1569_v60  ;;  %v1582_v35 = vpop.f32.mrf.mxu0  ;;  %v1584_v36 = vpop.f32.mrf.mxu1 }
  0xe7   : > { %v555_v34 = vsub.f32 %v476_v15, %v1560_v50  ;;  %v1370_v38 = vpack.c.bf16 %v558_v27, %v552_v57  ;;  %v576_v39 = vmul.f32 0.13333334, %v574_v30  ;;  %v580_v40 = vmul.f32 0.6, %v574_v30 }
  0xe8   : > { %v1371_v37 = vpack.c.bf16 %v568_v29, %v562_v28  ;;  %702 = vst [vmem:[%s1567_s5 + $0x50] sm:$0xff] %v1377_v31  ;;  %v586_v41 = vmul.f32 0.06666667, %v584_v33  ;;  %v590_v42 = vmul.f32 0.53333336, %v584_v33  ;;  %v594_v43 = vadd.f32 %v584_v33, %v1569_v60  ;;  %v792_v45 = vpop.f32.mrf.mxu0  ;;  %v1590_v51 = vpop.f32.mrf.mxu1 }
  0xe9   : > { %v557_v44 = vmul.f32 0.26666668, %v555_v34  ;;  %695 = vst [vmem:[%s1567_s5 + $0x18] sm:$0xff] %v1370_v38  ;;  %v578_v46 = vadd.f32 %v576_v39, %v474_v5  ;;  %v582_v47 = vadd.f32 %v580_v40, %v474_v5  ;;  %v561_v48 = vmul.f32 0.73333335, %v555_v34 }
  0xea   : > { %696 = vst [vmem:[%s1567_s5 + $0x20] sm:$0xff] %v1371_v37  ;;  %v565_v49 = vsub.f32 %v478_v25, %v476_v15  ;;  %v588_v52 = vadd.f32 %v586_v41, %v1569_v60  ;;  %v592_v53 = vadd.f32 %v590_v42, %v1569_v60  ;;  %v575_v55 = vsub.f32 %v1575_v16, %v478_v25  ;;  %v1596_v56 = vpop.f32.mrf.mxu0  ;;  %v1603_v6 = vpop.f32.mrf.mxu1 }
  0xeb   : > { %v559_v54 = vadd.f32 %v557_v44, %v1560_v50  ;;  %v1372_v57 = vpack.c.bf16 %v578_v46, %v572_v32  ;;  %v563_v58 = vadd.f32 %v561_v48, %v1560_v50  ;;  %v585_v5 = vsub.f32 %v521_v26, %v1575_v16 }
  0xec   : > { %v567_v59 = vmul.f32 0.2, %v565_v49  ;;  %v571_v61 = vmul.f32 0.6666667, %v565_v49  ;;  %v1373_v62 = vpack.c.bf16 %v588_v52, %v582_v47  ;;  %v1374_v63 = vpack.c.bf16 %v594_v43, %v592_v53  ;;  %v1599_v2 = vpop.f32.mrf.mxu0  ;;  %v1618_v24 = vpop.f32.mrf.mxu1 }
  0xed   : > { %v1378_v0 = vpack.c.bf16 %v559_v54, %v553_v23  ;;  %v577_v1 = vmul.f32 0.13333334, %v575_v55  ;;  %697 = vst [vmem:[%s1567_s5 + $0x28] sm:$0xff] %v1372_v57  ;;  %v581_v4 = vmul.f32 0.6, %v575_v55  ;;  %v928_v7 = vsub.f32 %v792_v45, %v1582_v35 }
  0xee   : > { %v569_v60 = vadd.f32 %v567_v59, %v476_v15  ;;  %v573_v3 = vadd.f32 %v571_v61, %v476_v15  ;;  %698 = vst [vmem:[%s1567_s5 + $0x30] sm:$0xff] %v1373_v62  ;;  %699 = vst [vmem:[%s1567_s5 + $0x38] sm:$0xff] %v1374_v63  ;;  %v938_v8 = vsub.f32 %v1584_v36, %v792_v45  ;;  %v1612_v10 = vpop.f32.mrf.mxu0  ;;  %v587_v13 = vmul.f32 0.06666667, %v585_v5  ;;  %v919_v42 = vpop.f32.mrf.mxu1 }
  0xef   : > { %703 = vst [vmem:[%s1567_s5 + $0x58] sm:$0xff] %v1378_v0  ;;  %v579_v50 = vadd.f32 %v577_v1, %v478_v25  ;;  %v948_v9 = vsub.f32 %v1590_v51, %v1584_v36  ;;  %v583_v11 = vadd.f32 %v581_v4, %v478_v25  ;;  %v591_v14 = vmul.f32 0.53333336, %v585_v5 }
  0xf0   : > { %v1379_v12 = vpack.c.bf16 %v569_v60, %v563_v58  ;;  %v595_v17 = vadd.f32 %v585_v5, %v1575_v16  ;;  %v930_v18 = vmul.f32 0.46666667, %v928_v7  ;;  %v934_v19 = vmul.f32 0.93333334, %v928_v7  ;;  %v878_v29 = vpop.f32.mrf.mxu0  ;;  %v921_v63 = vpop.f32.mrf.mxu1 }
  0xf1   : > { %v1380_v15 = vpack.c.bf16 %v579_v50, %v573_v3  ;;  %v589_v20 = vadd.f32 %v587_v13, %v1575_v16  ;;  %v593_v21 = vadd.f32 %v591_v14, %v1575_v16  ;;  %v940_v22 = vmul.f32 0.4, %v938_v8 }
  0xf2   : > { %704 = vst [vmem:[%s1567_s5 + $0x60] sm:$0xff] %v1379_v12  ;;  %v944_v23 = vmul.f32 0.8666667, %v938_v8  ;;  %v932_v25 = vadd.f32 %v930_v18, %v1582_v35  ;;  %v936_v26 = vadd.f32 %v934_v19, %v1582_v35  ;;  %v950_v27 = vmul.f32 0.33333334, %v948_v9  ;;  %v880_v46 = vpop.f32.mrf.mxu0  ;;  %v923_v14 = vpop.f32.mrf.mxu1 }
  0xf3   : > { %705 = vst [vmem:[%s1567_s5 + $0x68] sm:$0xff] %v1380_v15  ;;  %v954_v28 = vmul.f32 0.8, %v948_v9  ;;  %v1381_v16 = vpack.c.bf16 %v589_v20, %v583_v11  ;;  %v1382_v30 = vpack.c.bf16 %v595_v17, %v593_v21  ;;  %v942_v31 = vadd.f32 %v940_v22, %v792_v45 }
  0xf4   : > { %v946_v32 = vadd.f32 %v944_v23, %v792_v45  ;;  %v1383_v33 = vpack.c.bf16 %v932_v25, %v1582_v35  ;;  %v952_v34 = vadd.f32 %v950_v27, %v1584_v36  ;;  %v929_v39 = vsub.f32 %v1599_v2, %v1596_v56  ;;  %v882_v4 = vpop.f32.mrf.mxu0 }
  0xf5   : > { %v956_v38 = vadd.f32 %v954_v28, %v1584_v36  ;;  %706 = vst [vmem:[%s1567_s5 + $0x70] sm:$0xff] %v1381_v16  ;;  %707 = vst [vmem:[%s1567_s5 + $0x78] sm:$0xff] %v1382_v30  ;;  %v1384_v40 = vpack.c.bf16 %v942_v31, %v936_v26  ;;  %v939_v37 = vsub.f32 %v1603_v6, %v1599_v2  ;;  %v925_v31 = vpop.f32.mrf.mxu1 }
  0xf6   : > { %v949_v41 = vsub.f32 %v1618_v24, %v1603_v6  ;;  %v958_v35 = vsub.f32 %v1612_v10, %v1590_v51  ;;  %1096 = vst [vmem:[%s1628_s8] sm:$0xff] %v1383_v33  ;;  %v1385_v43 = vpack.c.bf16 %v952_v34, %v946_v32  ;;  %v931_v36 = vmul.f32 0.46666667, %v929_v39 }
  0xf7   : > { %v935_v44 = vmul.f32 0.93333334, %v929_v39  ;;  %v968_v45 = vsub.f32 %v878_v29, %v1612_v10  ;;  %1097 = vst [vmem:[%s1628_s8 + $0x8] sm:$0xff] %v1384_v40  ;;  %v941_v47 = vmul.f32 0.4, %v939_v37  ;;  %v978_v52 = vsub.f32 %v919_v42, %v878_v29 }
  0xf8   : > { %v945_v48 = vmul.f32 0.8666667, %v939_v37  ;;  %v951_v49 = vmul.f32 0.33333334, %v949_v41  ;;  %1098 = vst [vmem:[%s1628_s8 + $0x10] sm:$0xff] %v1385_v43  ;;  %v933_v53 = vadd.f32 %v931_v36, %v1596_v56  ;;  %v959_v13 = vsub.f32 %v880_v46, %v1618_v24 }
  0xf9   : > { %v937_v54 = vadd.f32 %v935_v44, %v1596_v56  ;;  %v955_v55 = vmul.f32 0.8, %v949_v41  ;;  %v960_v57 = vmul.f32 0.26666668, %v958_v35  ;;  %v943_v58 = vadd.f32 %v941_v47, %v1599_v2 }
  0xfa   : > { %v947_v59 = vadd.f32 %v945_v48, %v1599_v2  ;;  %v953_v61 = vadd.f32 %v951_v49, %v1603_v6  ;;  %v964_v62 = vmul.f32 0.73333335, %v958_v35  ;;  %v1391_v0 = vpack.c.bf16 %v933_v53, %v1596_v56 }
  0xfb   : > { %v957_v1 = vadd.f32 %v955_v55, %v1603_v6  ;;  %v962_v60 = vadd.f32 %v960_v57, %v1590_v51  ;;  %v970_v3 = vmul.f32 0.2, %v968_v45  ;;  %v1392_v5 = vpack.c.bf16 %v943_v58, %v937_v54 }
  0xfc   : > { %v1393_v50 = vpack.c.bf16 %v953_v61, %v947_v59  ;;  %v966_v7 = vadd.f32 %v964_v62, %v1590_v51  ;;  %v974_v2 = vmul.f32 0.6666667, %v968_v45  ;;  %1104 = vst [vmem:[%s1628_s8 + $0x40] sm:$0xff] %v1391_v0  ;;  %v980_v11 = vmul.f32 0.13333334, %v978_v52 }
  0xfd   : > { %v1386_v8 = vpack.c.bf16 %v962_v60, %v956_v38  ;;  %v972_v9 = vadd.f32 %v970_v3, %v1612_v10  ;;  %v984_v12 = vmul.f32 0.6, %v978_v52  ;;  %1105 = vst [vmem:[%s1628_s8 + $0x48] sm:$0xff] %v1392_v5  ;;  %v988_v6 = vsub.f32 %v921_v63, %v919_v42 }
  0xfe   : > { %1106 = vst [vmem:[%s1628_s8 + $0x50] sm:$0xff] %v1393_v50  ;;  %v976_v56 = vadd.f32 %v974_v2, %v1612_v10  ;;  %v969_v15 = vsub.f32 %v882_v4, %v880_v46  ;;  %v982_v17 = vadd.f32 %v980_v11, %v878_v29  ;;  %v979_v19 = vsub.f32 %v923_v14, %v882_v4 }
  0xff   : > { %1099 = vst [vmem:[%s1628_s8 + $0x18] sm:$0xff] %v1386_v8  ;;  %v986_v51 = vadd.f32 %v984_v12, %v878_v29  ;;  %v1387_v18 = vpack.c.bf16 %v972_v9, %v966_v7  ;;  %v990_v20 = vmul.f32 0.06666667, %v988_v6  ;;  %v994_v21 = vmul.f32 0.53333336, %v988_v6 }
 0x100   : > { %v998_v22 = vadd.f32 %v988_v6, %v919_v42  ;;  %v961_v23 = vmul.f32 0.26666668, %v959_v13  ;;  %v1388_v25 = vpack.c.bf16 %v982_v17, %v976_v56  ;;  %v965_v26 = vmul.f32 0.73333335, %v959_v13 }
 0x101   : > { %1100 = vst [vmem:[%s1628_s8 + $0x20] sm:$0xff] %v1387_v18  ;;  %v971_v27 = vmul.f32 0.2, %v969_v15  ;;  %v975_v10 = vmul.f32 0.6666667, %v969_v15  ;;  %v992_v28 = vadd.f32 %v990_v20, %v919_v42  ;;  %v996_v16 = vadd.f32 %v994_v21, %v919_v42 }
 0x102   : > { %v963_v30 = vadd.f32 %v961_v23, %v1618_v24  ;;  %v981_v29 = vmul.f32 0.13333334, %v979_v19  ;;  %1101 = vst [vmem:[%s1628_s8 + $0x28] sm:$0xff] %v1388_v25  ;;  %v967_v32 = vadd.f32 %v965_v26, %v1618_v24  ;;  %v985_v38 = vmul.f32 0.6, %v979_v19 }
 0x103   : > { %v973_v33 = vadd.f32 %v971_v27, %v880_v46  ;;  %v977_v34 = vadd.f32 %v975_v10, %v880_v46  ;;  %v1389_v39 = vpack.c.bf16 %v992_v28, %v986_v51  ;;  %v1390_v40 = vpack.c.bf16 %v998_v22, %v996_v16 }
 0x104   : > { %v1394_v37 = vpack.c.bf16 %v963_v30, %v957_v1  ;;  %v983_v41 = vadd.f32 %v981_v29, %v882_v4  ;;  %v989_v42 = vsub.f32 %v925_v31, %v923_v14  ;;  %v987_v36 = vadd.f32 %v985_v38, %v882_v4 }
 0x105   : > { %v1395_v35 = vpack.c.bf16 %v973_v33, %v967_v32  ;;  %1102 = vst [vmem:[%s1628_s8 + $0x30] sm:$0xff] %v1389_v39  ;;  %1103 = vst [vmem:[%s1628_s8 + $0x38] sm:$0xff] %v1390_v40 }
 0x106   : > { %1107 = vst [vmem:[%s1628_s8 + $0x58] sm:$0xff] %v1394_v37  ;;  %v1396_v43 = vpack.c.bf16 %v983_v41, %v977_v34  ;;  %v991_v44 = vmul.f32 0.06666667, %v989_v42  ;;  %v995_v24 = vmul.f32 0.53333336, %v989_v42  ;;  %v999_v47 = vadd.f32 %v989_v42, %v923_v14 }
 0x107   : > { %1108 = vst [vmem:[%s1628_s8 + $0x60] sm:$0xff] %v1395_v35 }
 0x108   : > { %1109 = vst [vmem:[%s1628_s8 + $0x68] sm:$0xff] %v1396_v43  ;;  %v993_v45 = vadd.f32 %v991_v44, %v923_v14  ;;  %v997_v46 = vadd.f32 %v995_v24, %v923_v14 }
 0x10a   : > { %v1397_v48 = vpack.c.bf16 %v993_v45, %v987_v36  ;;  %v1398_v49 = vpack.c.bf16 %v999_v47, %v997_v46 }
 0x10c   : > { %1110 = vst [vmem:[%s1628_s8 + $0x70] sm:$0xff] %v1397_v48  ;;  %1111 = vst [vmem:[%s1628_s8 + $0x78] sm:$0xff] %v1398_v49 }
 0x10d PF: > { %s15_s17 = sadd.s32 1, %s1463_s17   ;;  %s1688_s15 = smov %s1459_s16 }
 0x10e   : > { %p12_p5 = scmp.ge.s32.totalorder %s15_s17, 6   ;;  %s1689_s16 = smov %s1691_s18 }
 0x110   :  { %14 = sbr.rel (!%p12_p5) target bundleno = 2 (0x2), region = 80 }

// kernel: merge_module_forward.13
= control target key start
LH: loop header
LB: loop body
LE: loop exit
PB: predicated region body
PF: predicated region fallthrough
CT: control target
= control target key end

     0   :  { %s3178_s30 = smov 0   ;;  %s3690_s0 = inlined_call_operand.vmem [shape: bf16[1024,128], index: 0, kind: input, shape index: {}]   ;;  %s3691_s1 = inlined_call_operand.vmem [shape: bf16[1024,128], index: 1, kind: input, shape index: {}]   ;;  %s3692_s2 = inlined_call_operand.vmem [shape: bf16[1024,128], index: 2, kind: input, shape index: {}]   ;;  %s3693_s3 = inlined_call_operand.vmem [shape: bf16[256,128], index: 3, kind: input, shape index: {}]   ;;  %s3694_s4 = inlined_call_operand.vmem [shape: f32[1,128], index: 4, kind: input, shape index: {}]   ;;  %s3695_s5 = inlined_call_operand.vmem [shape: bf16[128,128], index: 5, kind: input, shape index: {}]   ;;  %s3696_s6 = inlined_call_operand.vmem [shape: f32[1,128], index: 6, kind: input, shape index: {}]   ;;  %s3697_s7 = inlined_call_operand.vmem [shape: bf16[128,128], index: 7, kind: input, shape index: {}]   ;;  %s3698_s8 = inlined_call_operand.vmem [shape: f32[1,128], index: 8, kind: input, shape index: {}]   ;;  %s3699_s9 = inlined_call_operand.vmem [shape: f32[1024,128], index: 9, kind: output, shape index: {}]  }
   0x1 LB: > { %s2501_s10 = sadd.s32 4294967295, %s3125_s30   ;;  %p2505_p0 = scmp.ge.s32.totalorder %s3125_s30, 1  ;;  %s3125_s30 = sphi %s3178_s30, %s19_s30  }
   0x2   : > { %p310_p1 = scmp.lt.s32.totalorder %s3125_s30, 3 }
   0x4   : > { %p311_p2 = pnand %p2505_p0, %p310_p1 }
   0x5   : > { %s2506_s13 = sshll.u32 (!%p311_p2), %s2501_s10, 6 }
   0x6   : > { %314 = sbr.rel (%p311_p2) target bundleno = 935 (0x3a7), region = 56  ;;  %p357_p3 = scmp.lt.s32.totalorder (!%p311_p2), %s2506_s13, 127 }
   0xb   : > { %v3023_v0 = vld [vmem:[%s3693_s3 + $0x38] sm:$0xff]   ;;  %v3127_v1 = vmov 0   ;;  %v3024_v2 = vld [vmem:[%s3693_s3 + $0x30] sm:$0xff]   ;;  %v3025_v3 = vld [vmem:[%s3693_s3 + $0x28] sm:$0xff]   ;;  %s3701_s13 = smov (!%p357_p3, %s2506_s13), 127 }
   0xc   : > { %1028 = vmatprep.subr.bf16.mxu0 %v3127_v1  ;;  %v3026_v4 = vld [vmem:[%s3693_s3 + $0x20] sm:$0xff]   ;;  %s3201_s20 = sshll.u32 %s3701_s13, 2  ;;  %v3027_v5 = vld [vmem:[%s3693_s3 + $0x18] sm:$0xff]   ;;  %v3028_v7 = vld [vmem:[%s3693_s3 + $0x10] sm:$0xff]  }
   0xd   : > { %1029 = vmatpush1.bf16.msra.mxu0 %v3023_v0  ;;  %s3207_s23 = scalar_lea.vmem %s3691_s1, %s3201_s20  ;;  %s3217_s28 = scalar_lea.vmem %s3690_s0, %s3201_s20  ;;  %v3029_v8 = vld [vmem:[%s3693_s3 + $0x8] sm:$0xff]   ;;  %v3030_v9 = vld [vmem:[%s3693_s3] sm:$0xff]   ;;  %v3031_v10 = vld [vmem:[%s3693_s3 + $0x78] sm:$0xff]  }
   0xe   : > { %1030 = vmatprep.subr.bf16.mxu0 %v3127_v1  ;;  %v3039_v6 = vld [vmem:[%s3207_s23] sm:$0xff]   ;;  %v3032_v11 = vld [vmem:[%s3693_s3 + $0x70] sm:$0xff]   ;;  %v3033_v12 = vld [vmem:[%s3693_s3 + $0x68] sm:$0xff]  }
   0xf   : > { %1060 = vmatprep.mubr.bf16.mxu0 %v3039_v6  ;;  %v3034_v13 = vld [vmem:[%s3693_s3 + $0x60] sm:$0xff]   ;;  %v3035_v14 = vld [vmem:[%s3693_s3 + $0x58] sm:$0xff]   ;;  %v3036_v15 = vld [vmem:[%s3693_s3 + $0x50] sm:$0xff]  }
  0x10   : > { %v3037_v16 = vld [vmem:[%s3693_s3 + $0x48] sm:$0xff]   ;;  %v3038_v17 = vld [vmem:[%s3693_s3 + $0x40] sm:$0xff]   ;;  %v3043_v21 = vld [vmem:[%s3207_s23 + $0x10] sm:$0xff]  }
  0x11   : > { %1031 = vmatpush1.bf16.msra.mxu0 %v3024_v2  ;;  %v3040_v18 = vld [vmem:[%s3217_s28] sm:$0xff]   ;;  %v3041_v19 = vld [vmem:[%s3207_s23 + $0x8] sm:$0xff]   ;;  %v3044_v22 = vld [vmem:[%s3217_s28 + $0x10] sm:$0xff]  }
  0x12   : > { %1032 = vmatprep.subr.bf16.mxu0 %v3127_v1  ;;  %v3042_v20 = vld [vmem:[%s3217_s28 + $0x8] sm:$0xff]   ;;  %v3045_v23 = vld [vmem:[%s3207_s23 + $0x18] sm:$0xff]   ;;  %v3047_v25 = vld [vmem:[%s3207_s23 + $0x20] sm:$0xff]  }
  0x13   : > { %v3046_v24 = vld [vmem:[%s3217_s28 + $0x18] sm:$0xff]   ;;  %v3048_v26 = vld [vmem:[%s3217_s28 + $0x20] sm:$0xff]   ;;  %v3049_v27 = vld [vmem:[%s3207_s23 + $0x28] sm:$0xff]  }
  0x14   : > { %v3050_v28 = vld [vmem:[%s3217_s28 + $0x28] sm:$0xff]   ;;  %v3051_v29 = vld [vmem:[%s3207_s23 + $0x30] sm:$0xff]   ;;  %v3053_v31 = vld [vmem:[%s3207_s23 + $0x38] sm:$0xff]  }
  0x15   : > { %1033 = vmatpush1.bf16.msra.mxu0 %v3025_v3  ;;  %v3052_v30 = vld [vmem:[%s3217_s28 + $0x30] sm:$0xff]   ;;  %v3085_v32 = vld [vmem:[%s3695_s5 + $0x38] sm:$0xff]   ;;  %v3055_v35 = vld [vmem:[%s3207_s23 + $0x40] sm:$0xff]  }
  0x16   : > { %1034 = vmatprep.subr.bf16.mxu0 %v3127_v1  ;;  %v3087_v33 = vld [vmem:[%s3695_s5 + $0x30] sm:$0xff]   ;;  %2854 = vmatprep.subr.bf16.mxu1 %v3085_v32  ;;  %v3054_v34 = vld [vmem:[%s3217_s28 + $0x38] sm:$0xff]   ;;  %v3089_v36 = vld [vmem:[%s3695_s5 + $0x28] sm:$0xff]  }
  0x17   : > { %2855 = vmatpush3.bf16.msra.mxu1 %v3085_v32  ;;  %v3091_v37 = vld [vmem:[%s3695_s5 + $0x20] sm:$0xff]   ;;  %v3057_v39 = vld [vmem:[%s3207_s23 + $0x48] sm:$0xff]   ;;  %v3093_v40 = vld [vmem:[%s3695_s5 + $0x18] sm:$0xff]  }
  0x18   : > { %2856 = vmatprep.subr.bf16.mxu1 %v3087_v33  ;;  %v3056_v38 = vld [vmem:[%s3217_s28 + $0x40] sm:$0xff]   ;;  %v3058_v41 = vld [vmem:[%s3217_s28 + $0x48] sm:$0xff]   ;;  %v3059_v42 = vld [vmem:[%s3207_s23 + $0x50] sm:$0xff]  }
  0x19   : > { %1035 = vmatpush1.bf16.msra.mxu0 %v3026_v4  ;;  %v3095_v43 = vld [vmem:[%s3695_s5 + $0x10] sm:$0xff]   ;;  %v3097_v44 = vld [vmem:[%s3695_s5 + $0x8] sm:$0xff]   ;;  %v3061_v46 = vld [vmem:[%s3207_s23 + $0x58] sm:$0xff]  }
  0x1a   : > { %1036 = vmatprep.subr.bf16.mxu0 %v3127_v1  ;;  %v3060_v45 = vld [vmem:[%s3217_s28 + $0x50] sm:$0xff]   ;;  %v3099_v47 = vld [vmem:[%s3695_s5] sm:$0xff]   ;;  %v3062_v48 = vld [vmem:[%s3217_s28 + $0x58] sm:$0xff]  }
  0x1b   : > { %2857 = vmatpush3.bf16.msra.mxu1 %v3087_v33  ;;  %v3063_v49 = vld [vmem:[%s3207_s23 + $0x60] sm:$0xff]   ;;  %v3065_v51 = vld [vmem:[%s3207_s23 + $0x68] sm:$0xff]   ;;  %v3067_v53 = vld [vmem:[%s3207_s23 + $0x70] sm:$0xff]  }
  0x1c   : > { %2858 = vmatprep.subr.bf16.mxu1 %v3089_v36  ;;  %v3064_v50 = vld [vmem:[%s3217_s28 + $0x60] sm:$0xff]   ;;  %v3066_v52 = vld [vmem:[%s3217_s28 + $0x68] sm:$0xff]   ;;  %v3068_v54 = vld [vmem:[%s3217_s28 + $0x70] sm:$0xff]  }
  0x1d   : > { %1037 = vmatpush1.bf16.msra.mxu0 %v3027_v5  ;;  %v3069_v55 = vld [vmem:[%s3207_s23 + $0x78] sm:$0xff]   ;;  %v3071_v57 = vld [vmem:[%s3207_s23 + $0x80] sm:$0xff]   ;;  %v3073_v59 = vld [vmem:[%s3207_s23 + $0x88] sm:$0xff]  }
  0x1e   : > { %1038 = vmatprep.subr.bf16.mxu0 %v3127_v1  ;;  %v3070_v56 = vld [vmem:[%s3217_s28 + $0x78] sm:$0xff]   ;;  %v3072_v58 = vld [vmem:[%s3217_s28 + $0x80] sm:$0xff]   ;;  %v3074_v60 = vld [vmem:[%s3217_s28 + $0x88] sm:$0xff]  }
  0x1f   : > { %2859 = vmatpush3.bf16.msra.mxu1 %v3089_v36  ;;  %v3075_v61 = vld [vmem:[%s3207_s23 + $0x90] sm:$0xff]   ;;  %v3077_v63 = vld [vmem:[%s3207_s23 + $0x98] sm:$0xff]   ;;  %v3080_v2 = vld [vmem:[%s3217_s28 + $0xa0] sm:$0xff]  }
  0x20   : > { %2860 = vmatprep.subr.bf16.mxu1 %v3091_v37  ;;  %v3076_v62 = vld [vmem:[%s3217_s28 + $0x90] sm:$0xff]   ;;  %v3078_v0 = vld [vmem:[%s3217_s28 + $0x98] sm:$0xff]   ;;  %v3081_v3 = vld [vmem:[%s3207_s23 + $0xa8] sm:$0xff]  }
  0x21   : > { %1039 = vmatpush1.bf16.msra.mxu0 %v3028_v7  ;;  %v3082_v4 = vld [vmem:[%s3217_s28 + $0xa8] sm:$0xff]   ;;  %v3083_v5 = vld [vmem:[%s3207_s23 + $0xb0] sm:$0xff]   ;;  %v3086_v7 = vld [vmem:[%s3207_s23 + $0xb8] sm:$0xff]  }
  0x22   : > { %1040 = vmatprep.subr.bf16.mxu0 %v3127_v1  ;;  %v3084_v6 = vld [vmem:[%s3217_s28 + $0xb0] sm:$0xff]  }
  0x23   : > { %2861 = vmatpush3.bf16.msra.mxu1 %v3091_v37 }
  0x24   : > { %2862 = vmatprep.subr.bf16.mxu1 %v3093_v40 }
  0x25   : > { %1041 = vmatpush1.bf16.msra.mxu0 %v3029_v8  ;;  %v3088_v8 = vld [vmem:[%s3217_s28 + $0xb8] sm:$0xff]  }
  0x26   : > { %1042 = vmatprep.subr.bf16.mxu0 %v3127_v1 }
  0x27   : > { %2863 = vmatpush3.bf16.msra.mxu1 %v3093_v40 }
  0x28   : > { %2864 = vmatprep.subr.bf16.mxu1 %v3095_v43 }
  0x29   : > { %1043 = vmatpush1.bf16.msra.mxu0 %v3030_v9  ;;  %v3090_v9 = vld [vmem:[%s3207_s23 + $0xc0] sm:$0xff]  }
  0x2a   : > { %1044 = vmatprep.subr.bf16.mxu0 %v3127_v1 }
  0x2b   : > { %2865 = vmatpush3.bf16.msra.mxu1 %v3095_v43 }
  0x2c   : > { %2866 = vmatprep.subr.bf16.mxu1 %v3097_v44 }
  0x2d   : > { %1045 = vmatpush2.bf16.msra.mxu0 %v3031_v10  ;;  %v3092_v10 = vld [vmem:[%s3217_s28 + $0xc0] sm:$0xff]  }
  0x2e   : > { %1046 = vmatprep.subr.bf16.mxu0 %v3127_v1 }
  0x2f   : > { %2867 = vmatpush3.bf16.msra.mxu1 %v3097_v44 }
  0x30   : > { %2868 = vmatprep.subr.bf16.mxu1 %v3099_v47 }
  0x31   : > { %1047 = vmatpush2.bf16.msra.mxu0 %v3032_v11  ;;  %v3094_v11 = vld [vmem:[%s3207_s23 + $0xc8] sm:$0xff]  }
  0x32   : > { %1048 = vmatprep.subr.bf16.mxu0 %v3127_v1 }
  0x33   : > { %2869 = vmatpush3.bf16.msra.mxu1 %v3099_v47 }
  0x35   : > { %1049 = vmatpush2.bf16.msra.mxu0 %v3033_v12  ;;  %v3329_v12 = vld [vmem:[%s3694_s4] ss:$0 sm:$0xff] }
  0x36   : > { %1050 = vmatprep.subr.bf16.mxu0 %v3127_v1 }
  0x39   : > { %1051 = vmatpush2.bf16.msra.mxu0 %v3034_v13 }
  0x3a   : > { %1052 = vmatprep.subr.bf16.mxu0 %v3127_v1 }
  0x3d   : > { %1053 = vmatpush2.bf16.msra.mxu0 %v3035_v14 }
  0x3e   : > { %1054 = vmatprep.subr.bf16.mxu0 %v3127_v1 }
  0x41   : > { %1055 = vmatpush2.bf16.msra.mxu0 %v3036_v15 }
  0x42   : > { %1056 = vmatprep.subr.bf16.mxu0 %v3127_v1 }
  0x45   : > { %1057 = vmatpush2.bf16.msra.mxu0 %v3037_v16 }
  0x46   : > { %1058 = vmatprep.subr.bf16.mxu0 %v3127_v1  ;;  %v3079_v1 = vld [vmem:[%s3207_s23 + $0xa0] sm:$0xff]  }
  0x49   : > { %1059 = vmatpush2.bf16.msra.mxu0 %v3038_v17  ;;  %v3096_v17 = vld [vmem:[%s3217_s28 + $0xc8] sm:$0xff]  }
  0x4c   : > { %1061 = vmatmul.mubr.bf16.vlgmr.msra.gmra.mxu0 %v3040_v18 }
  0x4d   : > { %1068 = vmatprep.mubr.bf16.mxu0 %v3041_v19  ;;  %v3098_v19 = vld [vmem:[%s3207_s23 + $0xd0] sm:$0xff]  }
  0x54   : > { %1069 = vmatmul.mubr.bf16.gmra.mxu0 %v3042_v20 }
  0x55   : > { %1076 = vmatprep.mubr.bf16.mxu0 %v3043_v21 }
  0x5c   : > { %1077 = vmatmul.mubr.bf16.gmra.mxu0 %v3044_v22 }
  0x5d   : > { %1084 = vmatprep.mubr.bf16.mxu0 %v3045_v23 }
  0x64   : > { %1085 = vmatmul.mubr.bf16.gmra.mxu0 %v3046_v24 }
  0x65   : > { %1092 = vmatprep.mubr.bf16.mxu0 %v3047_v25 }
  0x6c   : > { %1093 = vmatmul.mubr.bf16.gmra.mxu0 %v3048_v26 }
  0x6d   : > { %1100 = vmatprep.mubr.bf16.mxu0 %v3049_v27 }
  0x74   : > { %1101 = vmatmul.mubr.bf16.gmra.mxu0 %v3050_v28  ;;  %v3100_v28 = vld [vmem:[%s3217_s28 + $0xd0] sm:$0xff]  }
  0x75   : > { %1108 = vmatprep.mubr.bf16.mxu0 %v3051_v29 }
  0x7c   : > { %1109 = vmatmul.mubr.bf16.gmra.mxu0 %v3052_v30  ;;  %v3101_v30 = vld [vmem:[%s3207_s23 + $0xd8] sm:$0xff]  }
  0x7d   : > { %1116 = vmatprep.mubr.bf16.mxu0 %v3053_v31 }
  0x84   : > { %1117 = vmatmul.mubr.bf16.gmra.mxu0 %v3054_v34 }
  0x85   : > { %1124 = vmatprep.mubr.bf16.mxu0 %v3055_v35 }
  0x8c   : > { %1125 = vmatmul.mubr.bf16.gmra.mxu0 %v3056_v38 }
  0x8d   : > { %1132 = vmatprep.mubr.bf16.mxu0 %v3057_v39  ;;  %v3102_v39 = vld [vmem:[%s3217_s28 + $0xd8] sm:$0xff]  }
  0x94   : > { %1133 = vmatmul.mubr.bf16.gmra.mxu0 %v3058_v41  ;;  %v3103_v41 = vld [vmem:[%s3207_s23 + $0xe0] sm:$0xff]  }
  0x95   : > { %1140 = vmatprep.mubr.bf16.mxu0 %v3059_v42 }
  0x9c   : > { %1141 = vmatmul.mubr.bf16.gmra.mxu0 %v3060_v45 }
  0x9d   : > { %1148 = vmatprep.mubr.bf16.mxu0 %v3061_v46 }
  0xa4   : > { %1149 = vmatmul.mubr.bf16.gmra.mxu0 %v3062_v48 }
  0xa5   : > { %1156 = vmatprep.mubr.bf16.mxu0 %v3063_v49 }
  0xac   : > { %1157 = vmatmul.mubr.bf16.gmra.mxu0 %v3064_v50  ;;  %v3104_v50 = vld [vmem:[%s3217_s28 + $0xe0] sm:$0xff]  }
  0xad   : > { %1164 = vmatprep.mubr.bf16.mxu0 %v3065_v51 }
  0xb4   : > { %1165 = vmatmul.mubr.bf16.gmra.mxu0 %v3066_v52  ;;  %v3105_v52 = vld [vmem:[%s3207_s23 + $0xe8] sm:$0xff]  }
  0xb5   : > { %1172 = vmatprep.mubr.bf16.mxu0 %v3067_v53 }
  0xbc   : > { %1173 = vmatmul.mubr.bf16.gmra.mxu0 %v3068_v54 }
  0xbd   : > { %1180 = vmatprep.mubr.bf16.mxu0 %v3069_v55 }
  0xc4   : > { %1181 = vmatmul.mubr.bf16.gmra.mxu0 %v3070_v56 }
  0xc5   : > { %1188 = vmatprep.mubr.bf16.mxu0 %v3071_v57 }
  0xcc   : > { %1189 = vmatmul.mubr.bf16.gmra.mxu0 %v3072_v58 }
  0xcd   : > { %1196 = vmatprep.mubr.bf16.mxu0 %v3073_v59 }
  0xd4   : > { %1197 = vmatmul.mubr.bf16.gmra.mxu0 %v3074_v60 }
  0xd5   : > { %1204 = vmatprep.mubr.bf16.mxu0 %v3075_v61  ;;  %v3106_v61 = vld [vmem:[%s3217_s28 + $0xe8] sm:$0xff]  }
  0xdc   : > { %1205 = vmatmul.mubr.bf16.gmra.mxu0 %v3076_v62 }
  0xdd   : > { %1212 = vmatprep.mubr.bf16.mxu0 %v3077_v63  ;;  %v3107_v63 = vld [vmem:[%s3207_s23 + $0xf0] sm:$0xff]  }
  0xe4   : > { %1213 = vmatmul.mubr.bf16.gmra.mxu0 %v3078_v0 }
  0xe5   : > { %1220 = vmatprep.mubr.bf16.mxu0 %v3079_v1 }
  0xec   : > { %1221 = vmatmul.mubr.bf16.gmra.mxu0 %v3080_v2 }
  0xed   : > { %1228 = vmatprep.mubr.bf16.mxu0 %v3081_v3 }
  0xf4   : > { %1229 = vmatmul.mubr.bf16.gmra.mxu0 %v3082_v4 }
  0xf5   : > { %1236 = vmatprep.mubr.bf16.mxu0 %v3083_v5 }
  0xfc   : > { %1237 = vmatmul.mubr.bf16.gmra.mxu0 %v3084_v6 }
  0xfd   : > { %1244 = vmatprep.mubr.bf16.mxu0 %v3086_v7 }
 0x104   : > { %1245 = vmatmul.mubr.bf16.gmra.mxu0 %v3088_v8  ;;  %v3108_v8 = vld [vmem:[%s3217_s28 + $0xf0] sm:$0xff]  }
 0x105   : > { %1252 = vmatprep.mubr.bf16.mxu0 %v3090_v9 }
 0x10c   : > { %v1062_v13 = vpop.f32.mrf.mxu0  ;;  %1253 = vmatmul.mubr.bf16.gmra.mxu0 %v3092_v10  ;;  %v3109_v10 = vld [vmem:[%s3207_s23 + $0xf8] sm:$0xff]   ;;  %s3440_s23 = scalar_lea.vmem %s3692_s2, %s3201_s20  ;;  %s2513_s20 = sshll.u32 %s3701_s13, 3 }
 0x10d   : > { %1260 = vmatprep.mubr.bf16.mxu0 %v3094_v11  ;;  %v1063_v15 = vadd.f32 %v3329_v12, %v1062_v13  ;;  %s3557_s25 = scalar_lea.vmem %s3699_s9, %s2513_s20 }
 0x10e   : > { %v1064_v14 = vpop.f32.mrf.mxu0 }
 0x10f   : > { %v1317_v21 = vmax.f32 %v1063_v15, 0.0 }
 0x110   : > { %v1065_v16 = vpop.f32.mrf.mxu0 }
 0x111   : > { %v1066_v18 = vadd.f32 %v3329_v12, %v1065_v16 }
 0x112   : > { %v1067_v20 = vpop.f32.mrf.mxu0 }
 0x113   : > { %v1318_v22 = vmax.f32 %v1066_v18, 0.0  ;;  %v3110_v20 = vld [vmem:[%s3217_s28 + $0xf8] sm:$0xff]  }
 0x114   : > { %v1070_v23 = vpop.f32.mrf.mxu0  ;;  %1261 = vmatmul.mubr.bf16.gmra.mxu0 %v3096_v17 }
 0x115   : > { %v1381_v24 = vpack.c.bf16 %v1318_v22, %v1317_v21  ;;  %1268 = vmatprep.mubr.bf16.mxu0 %v3098_v19  ;;  %v1071_v26 = vadd.f32 %v3329_v12, %v1070_v23 }
 0x116   : > { %v1072_v25 = vpop.f32.mrf.mxu0 }
 0x117   : > { %2870 = vmatprep.mubr.bf16.mxu1 %v1381_v24  ;;  %v1319_v32 = vmax.f32 %v1071_v26, 0.0 }
 0x118   : > { %v1073_v27 = vpop.f32.mrf.mxu0 }
 0x119   : > { %v1074_v29 = vadd.f32 %v3329_v12, %v1073_v27 }
 0x11a   : > { %v1075_v31 = vpop.f32.mrf.mxu0 }
 0x11b   : > { %v1320_v33 = vmax.f32 %v1074_v29, 0.0 }
 0x11c   : > { %v1078_v34 = vpop.f32.mrf.mxu0  ;;  %1269 = vmatmul.mubr.bf16.gmra.mxu0 %v3100_v28 }
 0x11d   : > { %v1382_v35 = vpack.c.bf16 %v1320_v33, %v1319_v32  ;;  %1276 = vmatprep.mubr.bf16.mxu0 %v3101_v30  ;;  %v1079_v37 = vadd.f32 %v3329_v12, %v1078_v34 }
 0x11e   : > { %v1080_v36 = vpop.f32.mrf.mxu0 }
 0x11f   : > { %2871 = vmatmul.mubr.bf16.vlgmr.msra.gmra.mxu1 %v1382_v35  ;;  %v1321_v43 = vmax.f32 %v1079_v37, 0.0 }
 0x120   : > { %v1081_v38 = vpop.f32.mrf.mxu0 }
 0x121   : > { %v1082_v40 = vadd.f32 %v3329_v12, %v1081_v38 }
 0x122   : > { %v1083_v42 = vpop.f32.mrf.mxu0 }
 0x123   : > { %v1322_v44 = vmax.f32 %v1082_v40, 0.0 }
 0x124   : > { %v1086_v45 = vpop.f32.mrf.mxu0  ;;  %1277 = vmatmul.mubr.bf16.gmra.mxu0 %v3102_v39 }
 0x125   : > { %v1383_v46 = vpack.c.bf16 %v1322_v44, %v1321_v43  ;;  %1284 = vmatprep.mubr.bf16.mxu0 %v3103_v41  ;;  %v1087_v48 = vadd.f32 %v3329_v12, %v1086_v45 }
 0x126   : > { %v1088_v47 = vpop.f32.mrf.mxu0 }
 0x127   : > { %2874 = vmatprep.mubr.bf16.mxu1 %v1383_v46  ;;  %v1323_v54 = vmax.f32 %v1087_v48, 0.0 }
 0x128   : > { %v1089_v49 = vpop.f32.mrf.mxu0 }
 0x129   : > { %v1090_v51 = vadd.f32 %v3329_v12, %v1089_v49 }
 0x12a   : > { %v1091_v53 = vpop.f32.mrf.mxu0 }
 0x12b   : > { %v1324_v55 = vmax.f32 %v1090_v51, 0.0 }
 0x12c   : > { %v1094_v56 = vpop.f32.mrf.mxu0  ;;  %1285 = vmatmul.mubr.bf16.gmra.mxu0 %v3104_v50 }
 0x12d   : > { %v1384_v57 = vpack.c.bf16 %v1324_v55, %v1323_v54  ;;  %1292 = vmatprep.mubr.bf16.mxu0 %v3105_v52  ;;  %v1095_v59 = vadd.f32 %v3329_v12, %v1094_v56 }
 0x12e   : > { %v1096_v58 = vpop.f32.mrf.mxu0 }
 0x12f   : > { %2875 = vmatmul.mubr.bf16.gmra.mxu1 %v1384_v57  ;;  %v1325_v1 = vmax.f32 %v1095_v59, 0.0 }
 0x130   : > { %v1097_v60 = vpop.f32.mrf.mxu0 }
 0x131   : > { %v1098_v62 = vadd.f32 %v3329_v12, %v1097_v60 }
 0x132   : > { %v1099_v0 = vpop.f32.mrf.mxu0 }
 0x133   : > { %v1326_v2 = vmax.f32 %v1098_v62, 0.0 }
 0x134   : > { %v1102_v3 = vpop.f32.mrf.mxu0  ;;  %1293 = vmatmul.mubr.bf16.gmra.mxu0 %v3106_v61 }
 0x135   : > { %v1385_v4 = vpack.c.bf16 %v1326_v2, %v1325_v1  ;;  %1300 = vmatprep.mubr.bf16.mxu0 %v3107_v63  ;;  %v1103_v6 = vadd.f32 %v3329_v12, %v1102_v3  ;;  %v3111_v2 = vld [vmem:[%s3697_s7 + $0x38] sm:$0xff]  }
 0x136   : > { %v1104_v5 = vpop.f32.mrf.mxu0  ;;  %2934 = vmatprep.subr.bf16.mxu1 %v3111_v2 }
 0x137   : > { %2878 = vmatprep.mubr.bf16.mxu1 %v1385_v4  ;;  %v1327_v13 = vmax.f32 %v1103_v6, 0.0  ;;  %2935 = vmatpush3.bf16.msra.mxu1 %v3111_v2 }
 0x138   : > { %v1105_v7 = vpop.f32.mrf.mxu0 }
 0x139   : > { %v1106_v9 = vadd.f32 %v3329_v12, %v1105_v7 }
 0x13a   : > { %v1107_v11 = vpop.f32.mrf.mxu0 }
 0x13b   : > { %v1328_v14 = vmax.f32 %v1106_v9, 0.0 }
 0x13c   : > { %v1110_v15 = vpop.f32.mrf.mxu0  ;;  %1301 = vmatmul.mubr.bf16.gmra.mxu0 %v3108_v8 }
 0x13d   : > { %v1386_v16 = vpack.c.bf16 %v1328_v14, %v1327_v13  ;;  %1308 = vmatprep.mubr.bf16.mxu0 %v3109_v10  ;;  %v1111_v18 = vadd.f32 %v3329_v12, %v1110_v15 }
 0x13e   : > { %v1112_v17 = vpop.f32.mrf.mxu0 }
 0x13f   : > { %2879 = vmatmul.mubr.bf16.gmra.mxu1 %v1386_v16  ;;  %v1329_v23 = vmax.f32 %v1111_v18, 0.0 }
 0x140   : > { %v1113_v19 = vpop.f32.mrf.mxu0 }
 0x141   : > { %v1114_v21 = vadd.f32 %v3329_v12, %v1113_v19 }
 0x142   : > { %v1115_v22 = vpop.f32.mrf.mxu0 }
 0x143   : > { %v1330_v24 = vmax.f32 %v1114_v21, 0.0  ;;  %v3112_v21 = vld [vmem:[%s3697_s7 + $0x30] sm:$0xff]  }
 0x144   : > { %v1118_v25 = vpop.f32.mrf.mxu0  ;;  %1309 = vmatmul.mubr.bf16.gmra.mxu0 %v3110_v20  ;;  %2936 = vmatprep.subr.bf16.mxu1 %v3112_v21 }
 0x145   : > { %v1387_v26 = vpack.c.bf16 %v1330_v24, %v1329_v23  ;;  %v1119_v28 = vadd.f32 %v3329_v12, %v1118_v25  ;;  %2937 = vmatpush3.bf16.msra.mxu1 %v3112_v21 }
 0x146   : > { %v1120_v27 = vpop.f32.mrf.mxu0 }
 0x147   : > { %2882 = vmatprep.mubr.bf16.mxu1 %v1387_v26  ;;  %v1331_v32 = vmax.f32 %v1119_v28, 0.0 }
 0x148   : > { %v1121_v29 = vpop.f32.mrf.mxu0 }
 0x149   : > { %v1122_v30 = vadd.f32 %v3329_v12, %v1121_v29  ;;  %v3113_v29 = vld [vmem:[%s3697_s7 + $0x28] sm:$0xff]  }
 0x14a   : > { %v1123_v31 = vpop.f32.mrf.mxu0  ;;  %2938 = vmatprep.subr.bf16.mxu1 %v3113_v29 }
 0x14b   : > { %v1332_v33 = vmax.f32 %v1122_v30, 0.0  ;;  %2939 = vmatpush3.bf16.msra.mxu1 %v3113_v29 }
 0x14c   : > { %v1126_v34 = vpop.f32.mrf.mxu0 }
 0x14d   : > { %v1388_v35 = vpack.c.bf16 %v1332_v33, %v1331_v32  ;;  %v1127_v37 = vadd.f32 %v3329_v12, %v1126_v34  ;;  %v3114_v34 = vld [vmem:[%s3697_s7 + $0x20] sm:$0xff]  }
 0x14e   : > { %v1128_v36 = vpop.f32.mrf.mxu0  ;;  %2940 = vmatprep.subr.bf16.mxu1 %v3114_v34 }
 0x14f   : > { %2883 = vmatmul.mubr.bf16.gmra.mxu1 %v1388_v35  ;;  %v1333_v41 = vmax.f32 %v1127_v37, 0.0 }
 0x150   : > { %v1129_v38 = vpop.f32.mrf.mxu0  ;;  %2941 = vmatpush3.bf16.msra.mxu1 %v3114_v34 }
 0x151   : > { %v1130_v39 = vadd.f32 %v3329_v12, %v1129_v38 }
 0x152   : > { %v1131_v40 = vpop.f32.mrf.mxu0 }
 0x153   : > { %v1334_v42 = vmax.f32 %v1130_v39, 0.0  ;;  %v3115_v40 = vld [vmem:[%s3697_s7 + $0x18] sm:$0xff]  }
 0x154   : > { %v1134_v43 = vpop.f32.mrf.mxu0  ;;  %2942 = vmatprep.subr.bf16.mxu1 %v3115_v40 }
 0x155   : > { %v1389_v44 = vpack.c.bf16 %v1334_v42, %v1333_v41  ;;  %v1135_v46 = vadd.f32 %v3329_v12, %v1134_v43  ;;  %2943 = vmatpush3.bf16.msra.mxu1 %v3115_v40 }
 0x156   : > { %v1136_v45 = vpop.f32.mrf.mxu0 }
 0x157   : > { %2886 = vmatprep.mubr.bf16.mxu1 %v1389_v44  ;;  %v1335_v50 = vmax.f32 %v1135_v46, 0.0  ;;  %v3116_v45 = vld [vmem:[%s3697_s7 + $0x10] sm:$0xff]  }
 0x158   : > { %v1137_v47 = vpop.f32.mrf.mxu0  ;;  %2944 = vmatprep.subr.bf16.mxu1 %v3116_v45 }
 0x159   : > { %v1138_v48 = vadd.f32 %v3329_v12, %v1137_v47  ;;  %2945 = vmatpush3.bf16.msra.mxu1 %v3116_v45 }
 0x15a   : > { %v1139_v49 = vpop.f32.mrf.mxu0 }
 0x15b   : > { %v1336_v51 = vmax.f32 %v1138_v48, 0.0 }
 0x15c   : > { %v1142_v52 = vpop.f32.mrf.mxu0 }
 0x15d   : > { %v1390_v53 = vpack.c.bf16 %v1336_v51, %v1335_v50  ;;  %v1143_v55 = vadd.f32 %v3329_v12, %v1142_v52  ;;  %v3117_v51 = vld [vmem:[%s3697_s7 + $0x8] sm:$0xff]  }
 0x15e   : > { %v1144_v54 = vpop.f32.mrf.mxu0  ;;  %2946 = vmatprep.subr.bf16.mxu1 %v3117_v51 }
 0x15f   : > { %2887 = vmatmul.mubr.bf16.gmra.mxu1 %v1390_v53  ;;  %v1337_v59 = vmax.f32 %v1143_v55, 0.0 }
 0x160   : > { %v1145_v56 = vpop.f32.mrf.mxu0  ;;  %2947 = vmatpush3.bf16.msra.mxu1 %v3117_v51 }
 0x161   : > { %v1146_v57 = vadd.f32 %v3329_v12, %v1145_v56  ;;  %v3118_v56 = vld [vmem:[%s3697_s7] sm:$0xff]  }
 0x162   : > { %v1147_v58 = vpop.f32.mrf.mxu0  ;;  %2948 = vmatprep.subr.bf16.mxu1 %v3118_v56 }
 0x163   : > { %v1338_v60 = vmax.f32 %v1146_v57, 0.0 }
 0x164   : > { %v1150_v61 = vpop.f32.mrf.mxu0  ;;  %2949 = vmatpush3.bf16.msra.mxu1 %v3118_v56 }
 0x165   : > { %v1391_v62 = vpack.c.bf16 %v1338_v60, %v1337_v59  ;;  %v1151_v0 = vadd.f32 %v3329_v12, %v1150_v61 }
 0x166   : > { %v1152_v63 = vpop.f32.mrf.mxu0 }
 0x167   : > { %2890 = vmatprep.mubr.bf16.mxu1 %v1391_v62  ;;  %v1339_v5 = vmax.f32 %v1151_v0, 0.0 }
 0x168   : > { %v1153_v1 = vpop.f32.mrf.mxu0 }
 0x169   : > { %v1154_v3 = vadd.f32 %v3329_v12, %v1153_v1 }
 0x16a   : > { %v1155_v4 = vpop.f32.mrf.mxu0 }
 0x16b   : > { %v1340_v6 = vmax.f32 %v1154_v3, 0.0 }
 0x16c   : > { %v1158_v7 = vpop.f32.mrf.mxu0 }
 0x16d   : > { %v1392_v8 = vpack.c.bf16 %v1340_v6, %v1339_v5  ;;  %v1159_v10 = vadd.f32 %v3329_v12, %v1158_v7 }
 0x16e   : > { %v1160_v9 = vpop.f32.mrf.mxu0 }
 0x16f   : > { %2891 = vmatmul.mubr.bf16.gmra.mxu1 %v1392_v8  ;;  %v1341_v15 = vmax.f32 %v1159_v10, 0.0 }
 0x170   : > { %v1161_v11 = vpop.f32.mrf.mxu0 }
 0x171   : > { %v1162_v13 = vadd.f32 %v3329_v12, %v1161_v11 }
 0x172   : > { %v1163_v14 = vpop.f32.mrf.mxu0 }
 0x173   : > { %v1342_v16 = vmax.f32 %v1162_v13, 0.0 }
 0x174   : > { %v1166_v17 = vpop.f32.mrf.mxu0 }
 0x175   : > { %v1393_v18 = vpack.c.bf16 %v1342_v16, %v1341_v15  ;;  %v1167_v20 = vadd.f32 %v3329_v12, %v1166_v17 }
 0x176   : > { %v1168_v19 = vpop.f32.mrf.mxu0 }
 0x177   : > { %2894 = vmatprep.mubr.bf16.mxu1 %v1393_v18  ;;  %v1343_v25 = vmax.f32 %v1167_v20, 0.0 }
 0x178   : > { %v1169_v22 = vpop.f32.mrf.mxu0 }
 0x179   : > { %v1170_v23 = vadd.f32 %v3329_v12, %v1169_v22 }
 0x17a   : > { %v1171_v24 = vpop.f32.mrf.mxu0 }
 0x17b   : > { %v1344_v26 = vmax.f32 %v1170_v23, 0.0 }
 0x17c   : > { %v1174_v27 = vpop.f32.mrf.mxu0 }
 0x17d   : > { %v1394_v28 = vpack.c.bf16 %v1344_v26, %v1343_v25  ;;  %v1175_v31 = vadd.f32 %v3329_v12, %v1174_v27 }
 0x17e   : > { %v1176_v30 = vpop.f32.mrf.mxu0 }
 0x17f   : > { %2895 = vmatmul.mubr.bf16.gmra.mxu1 %v1394_v28  ;;  %v1345_v36 = vmax.f32 %v1175_v31, 0.0 }
 0x180   : > { %v1177_v32 = vpop.f32.mrf.mxu0 }
 0x181   : > { %v1178_v33 = vadd.f32 %v3329_v12, %v1177_v32 }
 0x182   : > { %v1179_v35 = vpop.f32.mrf.mxu0 }
 0x183   : > { %v1346_v37 = vmax.f32 %v1178_v33, 0.0 }
 0x184   : > { %v1182_v38 = vpop.f32.mrf.mxu0 }
 0x185   : > { %v1395_v39 = vpack.c.bf16 %v1346_v37, %v1345_v36  ;;  %v1183_v42 = vadd.f32 %v3329_v12, %v1182_v38 }
 0x186   : > { %v1184_v41 = vpop.f32.mrf.mxu0 }
 0x187   : > { %2898 = vmatprep.mubr.bf16.mxu1 %v1395_v39  ;;  %v1347_v47 = vmax.f32 %v1183_v42, 0.0 }
 0x188   : > { %v1185_v43 = vpop.f32.mrf.mxu0 }
 0x189   : > { %v1186_v44 = vadd.f32 %v3329_v12, %v1185_v43 }
 0x18a   : > { %v1187_v46 = vpop.f32.mrf.mxu0 }
 0x18b   : > { %v1348_v48 = vmax.f32 %v1186_v44, 0.0 }
 0x18c   : > { %v1190_v49 = vpop.f32.mrf.mxu0 }
 0x18d   : > { %v1396_v50 = vpack.c.bf16 %v1348_v48, %v1347_v47  ;;  %v1191_v53 = vadd.f32 %v3329_v12, %v1190_v49 }
 0x18e   : > { %v1192_v52 = vpop.f32.mrf.mxu0 }
 0x18f   : > { %2899 = vmatmul.mubr.bf16.gmra.mxu1 %v1396_v50  ;;  %v1349_v58 = vmax.f32 %v1191_v53, 0.0 }
 0x190   : > { %v1193_v54 = vpop.f32.mrf.mxu0 }
 0x191   : > { %v1194_v55 = vadd.f32 %v3329_v12, %v1193_v54 }
 0x192   : > { %v1195_v57 = vpop.f32.mrf.mxu0 }
 0x193   : > { %v1350_v59 = vmax.f32 %v1194_v55, 0.0 }
 0x194   : > { %v1198_v60 = vpop.f32.mrf.mxu0 }
 0x195   : > { %v1397_v61 = vpack.c.bf16 %v1350_v59, %v1349_v58  ;;  %v1199_v63 = vadd.f32 %v3329_v12, %v1198_v60 }
 0x196   : > { %v1200_v62 = vpop.f32.mrf.mxu0 }
 0x197   : > { %2902 = vmatprep.mubr.bf16.mxu1 %v1397_v61  ;;  %v1351_v3 = vmax.f32 %v1199_v63, 0.0 }
 0x198   : > { %v1201_v0 = vpop.f32.mrf.mxu0 }
 0x199   : > { %v1202_v1 = vadd.f32 %v3329_v12, %v1201_v0 }
 0x19a   : > { %v1203_v2 = vpop.f32.mrf.mxu0 }
 0x19b   : > { %v1352_v4 = vmax.f32 %v1202_v1, 0.0 }
 0x19c   : > { %v1206_v5 = vpop.f32.mrf.mxu0 }
 0x19d   : > { %v1398_v6 = vpack.c.bf16 %v1352_v4, %v1351_v3  ;;  %v1207_v8 = vadd.f32 %v3329_v12, %v1206_v5 }
 0x19e   : > { %v1208_v7 = vpop.f32.mrf.mxu0 }
 0x19f   : > { %2903 = vmatmul.mubr.bf16.gmra.mxu1 %v1398_v6  ;;  %v1353_v13 = vmax.f32 %v1207_v8, 0.0 }
 0x1a0   : > { %v1209_v9 = vpop.f32.mrf.mxu0 }
 0x1a1   : > { %v1210_v10 = vadd.f32 %v3329_v12, %v1209_v9 }
 0x1a2   : > { %v1211_v11 = vpop.f32.mrf.mxu0 }
 0x1a3   : > { %v1354_v14 = vmax.f32 %v1210_v10, 0.0 }
 0x1a4   : > { %v1214_v15 = vpop.f32.mrf.mxu0 }
 0x1a5   : > { %v1399_v16 = vpack.c.bf16 %v1354_v14, %v1353_v13  ;;  %v1215_v18 = vadd.f32 %v3329_v12, %v1214_v15 }
 0x1a6   : > { %v1216_v17 = vpop.f32.mrf.mxu0 }
 0x1a7   : > { %2906 = vmatprep.mubr.bf16.mxu1 %v1399_v16  ;;  %v1355_v22 = vmax.f32 %v1215_v18, 0.0 }
 0x1a8   : > { %v1217_v19 = vpop.f32.mrf.mxu0 }
 0x1a9   : > { %v1218_v20 = vadd.f32 %v3329_v12, %v1217_v19 }
 0x1aa   : > { %v1219_v21 = vpop.f32.mrf.mxu0 }
 0x1ab   : > { %v1356_v23 = vmax.f32 %v1218_v20, 0.0 }
 0x1ac   : > { %v1222_v24 = vpop.f32.mrf.mxu0 }
 0x1ad   : > { %v1400_v25 = vpack.c.bf16 %v1356_v23, %v1355_v22  ;;  %v1223_v27 = vadd.f32 %v3329_v12, %v1222_v24 }
 0x1ae   : > { %v1224_v26 = vpop.f32.mrf.mxu0 }
 0x1af   : > { %2907 = vmatmul.mubr.bf16.gmra.mxu1 %v1400_v25  ;;  %v1357_v31 = vmax.f32 %v1223_v27, 0.0 }
 0x1b0   : > { %v1225_v28 = vpop.f32.mrf.mxu0 }
 0x1b1   : > { %v1226_v29 = vadd.f32 %v3329_v12, %v1225_v28 }
 0x1b2   : > { %v1227_v30 = vpop.f32.mrf.mxu0 }
 0x1b3   : > { %v1358_v32 = vmax.f32 %v1226_v29, 0.0 }
 0x1b4   : > { %v1230_v33 = vpop.f32.mrf.mxu0 }
 0x1b5   : > { %v1401_v34 = vpack.c.bf16 %v1358_v32, %v1357_v31  ;;  %v1231_v36 = vadd.f32 %v3329_v12, %v1230_v33 }
 0x1b6   : > { %v1232_v35 = vpop.f32.mrf.mxu0 }
 0x1b7   : > { %2910 = vmatprep.mubr.bf16.mxu1 %v1401_v34  ;;  %v1359_v40 = vmax.f32 %v1231_v36, 0.0 }
 0x1b8   : > { %v1233_v37 = vpop.f32.mrf.mxu0 }
 0x1b9   : > { %v1234_v38 = vadd.f32 %v3329_v12, %v1233_v37 }
 0x1ba   : > { %v1235_v39 = vpop.f32.mrf.mxu0 }
 0x1bb   : > { %v1360_v41 = vmax.f32 %v1234_v38, 0.0 }
 0x1bc   : > { %v1238_v42 = vpop.f32.mrf.mxu0 }
 0x1bd   : > { %v1402_v43 = vpack.c.bf16 %v1360_v41, %v1359_v40  ;;  %v1239_v45 = vadd.f32 %v3329_v12, %v1238_v42 }
 0x1be   : > { %v1240_v44 = vpop.f32.mrf.mxu0 }
 0x1bf   : > { %2911 = vmatmul.mubr.bf16.gmra.mxu1 %v1402_v43  ;;  %v1361_v49 = vmax.f32 %v1239_v45, 0.0 }
 0x1c0   : > { %v1241_v46 = vpop.f32.mrf.mxu0 }
 0x1c1   : > { %v1242_v47 = vadd.f32 %v3329_v12, %v1241_v46 }
 0x1c2   : > { %v1243_v48 = vpop.f32.mrf.mxu0 }
 0x1c3   : > { %v1362_v50 = vmax.f32 %v1242_v47, 0.0 }
 0x1c4   : > { %v1246_v51 = vpop.f32.mrf.mxu0 }
 0x1c5   : > { %v1403_v52 = vpack.c.bf16 %v1362_v50, %v1361_v49  ;;  %v1247_v54 = vadd.f32 %v3329_v12, %v1246_v51 }
 0x1c6   : > { %v1248_v53 = vpop.f32.mrf.mxu0 }
 0x1c7   : > { %2914 = vmatprep.mubr.bf16.mxu1 %v1403_v52  ;;  %v1363_v58 = vmax.f32 %v1247_v54, 0.0 }
 0x1c8   : > { %v1249_v55 = vpop.f32.mrf.mxu0 }
 0x1c9   : > { %v1250_v56 = vadd.f32 %v3329_v12, %v1249_v55 }
 0x1ca   : > { %v1251_v57 = vpop.f32.mrf.mxu0 }
 0x1cb   : > { %v1364_v59 = vmax.f32 %v1250_v56, 0.0 }
 0x1cc   : > { %v1254_v60 = vpop.f32.mrf.mxu0 }
 0x1cd   : > { %v1404_v61 = vpack.c.bf16 %v1364_v59, %v1363_v58  ;;  %v1255_v63 = vadd.f32 %v3329_v12, %v1254_v60 }
 0x1ce   : > { %v1256_v62 = vpop.f32.mrf.mxu0 }
 0x1cf   : > { %2915 = vmatmul.mubr.bf16.gmra.mxu1 %v1404_v61  ;;  %v1365_v3 = vmax.f32 %v1255_v63, 0.0 }
 0x1d0   : > { %v1257_v0 = vpop.f32.mrf.mxu0 }
 0x1d1   : > { %v1258_v1 = vadd.f32 %v3329_v12, %v1257_v0 }
 0x1d2   : > { %v1259_v2 = vpop.f32.mrf.mxu0 }
 0x1d3   : > { %v1366_v4 = vmax.f32 %v1258_v1, 0.0 }
 0x1d4   : > { %v1262_v5 = vpop.f32.mrf.mxu0 }
 0x1d5   : > { %v1405_v6 = vpack.c.bf16 %v1366_v4, %v1365_v3  ;;  %v1263_v8 = vadd.f32 %v3329_v12, %v1262_v5 }
 0x1d6   : > { %v1264_v7 = vpop.f32.mrf.mxu0 }
 0x1d7   : > { %2918 = vmatprep.mubr.bf16.mxu1 %v1405_v6  ;;  %v1367_v13 = vmax.f32 %v1263_v8, 0.0  ;;  %v3445_v6 = vld [vmem:[%s3696_s6] ss:$0 sm:$0xff] }
 0x1d8   : > { %v1265_v9 = vpop.f32.mrf.mxu0  ;;  %v2616_v7 = vld [vmem:[%s3440_s23] sm:$0xff]  }
 0x1d9   : > { %v1266_v10 = vadd.f32 %v3329_v12, %v1265_v9 }
 0x1da   : > { %v1267_v11 = vpop.f32.mrf.mxu0 }
 0x1db   : > { %v1368_v14 = vmax.f32 %v1266_v10, 0.0  ;;  %v2618_v11 = vunpack.c.h.bf16 %v2616_v7 }
 0x1dc   : > { %v1270_v15 = vpop.f32.mrf.mxu0 }
 0x1dd   : > { %v1406_v16 = vpack.c.bf16 %v1368_v14, %v1367_v13  ;;  %v1271_v18 = vadd.f32 %v3329_v12, %v1270_v15 }
 0x1de   : > { %v1272_v17 = vpop.f32.mrf.mxu0 }
 0x1df   : > { %2919 = vmatmul.mubr.bf16.gmra.mxu1 %v1406_v16  ;;  %v1369_v22 = vmax.f32 %v1271_v18, 0.0  ;;  %v3422_v25 = vpop.f32.mrf.mxu1  ;;  %v2617_v16 = vunpack.c.l.bf16 %v2616_v7 }
 0x1e0   : > { %v1273_v19 = vpop.f32.mrf.mxu0 }
 0x1e1   : > { %v1274_v20 = vadd.f32 %v3329_v12, %v1273_v19  ;;  %v1518_v30 = vpop.f32.mrf.mxu1 }
 0x1e2   : > { %v1275_v21 = vpop.f32.mrf.mxu0  ;;  %v1519_v15 = vadd.f32 %v3445_v6, %v1518_v30 }
 0x1e3   : > { %v1370_v23 = vmax.f32 %v1274_v20, 0.0  ;;  %v2873_v36 = vpop.f32.mrf.mxu1 }
 0x1e4   : > { %v1278_v24 = vpop.f32.mrf.mxu0 }
 0x1e5   : > { %v1407_v26 = vpack.c.bf16 %v1370_v23, %v1369_v22  ;;  %v1279_v28 = vadd.f32 %v3329_v12, %v1278_v24  ;;  %v1521_v41 = vpop.f32.mrf.mxu1  ;;  %v2743_v24 = vld [vmem:[%s3440_s23 + $0x8] sm:$0xff]  }
 0x1e6   : > { %v1280_v27 = vpop.f32.mrf.mxu0  ;;  %v1522_v10 = vadd.f32 %v3445_v6, %v1521_v41 }
 0x1e7   : > { %2922 = vmatprep.mubr.bf16.mxu1 %v1407_v26  ;;  %v1371_v33 = vmax.f32 %v1279_v28, 0.0  ;;  %v1901_v26 = vadd.f32 %v2617_v16, %v1519_v15  ;;  %v1530_v27 = vadd.f32 %v2873_v36, %v3445_v6  ;;  %v2622_v28 = vunpack.c.h.bf16 %v2743_v24 }
 0x1e8   : > { %v1281_v29 = vpop.f32.mrf.mxu0  ;;  %v1902_v20 = vadd.f32 %v2618_v11, %v1522_v10 }
 0x1e9   : > { %v1282_v31 = vadd.f32 %v3329_v12, %v1281_v29  ;;  %v2744_v29 = vld [vmem:[%s3440_s23 + $0x10] sm:$0xff]   ;;  %v1904_v36 = vadd.f32 %v2622_v28, %v1530_v27 }
 0x1ea   : > { %v1283_v32 = vpop.f32.mrf.mxu0 }
 0x1eb   : > { %v1372_v34 = vmax.f32 %v1282_v31, 0.0 }
 0x1ec   : > { %v1286_v35 = vpop.f32.mrf.mxu0 }
 0x1ed   : > { %v1408_v37 = vpack.c.bf16 %v1372_v34, %v1371_v33  ;;  %v1287_v39 = vadd.f32 %v3329_v12, %v1286_v35  ;;  %v2626_v33 = vunpack.c.h.bf16 %v2744_v29  ;;  %v1965_v34 = vpack.c.bf16 %v1902_v20, %v1901_v26 }
 0x1ee   : > { %v1288_v38 = vpop.f32.mrf.mxu0  ;;  %v2621_v35 = vunpack.c.l.bf16 %v2743_v24 }
 0x1ef   : > { %2923 = vmatmul.mubr.bf16.gmra.mxu1 %v1408_v37  ;;  %v1373_v44 = vmax.f32 %v1287_v39, 0.0  ;;  %v3428_v45 = vpop.f32.mrf.mxu1  ;;  %v2625_v39 = vunpack.c.l.bf16 %v2744_v29 }
 0x1f0   : > { %v1289_v40 = vpop.f32.mrf.mxu0 }
 0x1f1   : > { %v1290_v42 = vadd.f32 %v3329_v12, %v1289_v40  ;;  %v1534_v50 = vpop.f32.mrf.mxu1 }
 0x1f2   : > { %v1291_v43 = vpop.f32.mrf.mxu0  ;;  %v1535_v38 = vadd.f32 %v3445_v6, %v1534_v50  ;;  %v1543_v50 = vadd.f32 %v3428_v45, %v3445_v6 }
 0x1f3   : > { %v1374_v46 = vmax.f32 %v1290_v42, 0.0  ;;  %v2877_v55 = vpop.f32.mrf.mxu1  ;;  %v2745_v43 = vld [vmem:[%s3440_s23 + $0x18] sm:$0xff]  }
 0x1f4   : > { %v1294_v47 = vpop.f32.mrf.mxu0 }
 0x1f5   : > { %v1409_v48 = vpack.c.bf16 %v1374_v46, %v1373_v44  ;;  %v1295_v51 = vadd.f32 %v3329_v12, %v1294_v47  ;;  %v1537_v61 = vpop.f32.mrf.mxu1  ;;  %v1905_v44 = vadd.f32 %v2625_v39, %v1535_v38  ;;  %v1546_v47 = vadd.f32 %v2877_v55, %v3445_v6 }
 0x1f6   : > { %v1296_v49 = vpop.f32.mrf.mxu0  ;;  %v1538_v30 = vadd.f32 %v3445_v6, %v1537_v61  ;;  %v2747_v61 = vld [vmem:[%s3440_s23 + $0x28] sm:$0xff]  }
 0x1f7   : > { %2926 = vmatprep.mubr.bf16.mxu1 %v1409_v48  ;;  %v1375_v56 = vmax.f32 %v1295_v51, 0.0  ;;  %v2630_v48 = vunpack.c.h.bf16 %v2745_v43 }
 0x1f8   : > { %v1297_v52 = vpop.f32.mrf.mxu0  ;;  %v1906_v40 = vadd.f32 %v2626_v33, %v1538_v30 }
 0x1f9   : > { %v1298_v53 = vadd.f32 %v3329_v12, %v1297_v52 }
 0x1fa   : > { %v1299_v54 = vpop.f32.mrf.mxu0  ;;  %v1967_v52 = vpack.c.bf16 %v1906_v40, %v1905_v44 }
 0x1fb   : > { %v1376_v57 = vmax.f32 %v1298_v53, 0.0  ;;  %v2629_v53 = vunpack.c.l.bf16 %v2745_v43 }
 0x1fc   : > { %v1302_v58 = vpop.f32.mrf.mxu0 }
 0x1fd   : > { %v1410_v59 = vpack.c.bf16 %v1376_v57, %v1375_v56  ;;  %v1303_v62 = vadd.f32 %v3329_v12, %v1302_v58  ;;  %v1908_v58 = vadd.f32 %v2630_v48, %v1546_v47 }
 0x1fe   : > { %v1304_v60 = vpop.f32.mrf.mxu0 }
 0x1ff   : > { %2927 = vmatmul.mubr.bf16.gmra.mxu1 %v1410_v59  ;;  %v3433_v0 = vpop.f32.mrf.mxu1  ;;  %v1377_v3 = vmax.f32 %v1303_v62, 0.0  ;;  %v1907_v59 = vadd.f32 %v2629_v53, %v1543_v50 }
 0x200   : > { %v1305_v63 = vpop.f32.mrf.mxu0  ;;  %v1559_v7 = vadd.f32 %v3433_v0, %v3445_v6  ;;  %v2750_v0 = vld [vmem:[%s3440_s23 + $0x40] sm:$0xff]  }
 0x201   : > { %v1306_v1 = vadd.f32 %v3329_v12, %v1305_v63  ;;  %v1550_v9 = vpop.f32.mrf.mxu1  ;;  %v2650_v26 = vunpack.c.h.bf16 %v2750_v0 }
 0x202   : > { %v1307_v2 = vpop.f32.mrf.mxu0  ;;  %v1551_v56 = vadd.f32 %v3445_v6, %v1550_v9 }
 0x203   : > { %v1378_v4 = vmax.f32 %v1306_v1, 0.0  ;;  %v2881_v18 = vpop.f32.mrf.mxu1  ;;  %v2638_v1 = vunpack.c.h.bf16 %v2747_v61  ;;  %v2748_v2 = vld [vmem:[%s3440_s23 + $0x30] sm:$0xff]  }
 0x204   : > { %v1310_v5 = vpop.f32.mrf.mxu0  ;;  %v1562_v63 = vadd.f32 %v2881_v18, %v3445_v6  ;;  %v2641_v11 = vunpack.c.l.bf16 %v2748_v2  ;;  %v2749_v18 = vld [vmem:[%s3440_s23 + $0x38] sm:$0xff]  }
 0x205   : > { %v1411_v8 = vpack.c.bf16 %v1378_v4, %v1377_v3  ;;  %v1311_v14 = vadd.f32 %v3329_v12, %v1310_v5  ;;  %v1553_v31 = vpop.f32.mrf.mxu1  ;;  %v1968_v3 = vpack.c.bf16 %v1908_v58, %v1907_v59  ;;  %v2642_v4 = vunpack.c.h.bf16 %v2748_v2 }
 0x206   : > { %v1312_v13 = vpop.f32.mrf.mxu0  ;;  %v1554_v49 = vadd.f32 %v3445_v6, %v1553_v31  ;;  %v2645_v29 = vunpack.c.l.bf16 %v2749_v18 }
 0x207   : > { %2930 = vmatprep.mubr.bf16.mxu1 %v1411_v8  ;;  %v1379_v22 = vmax.f32 %v1311_v14, 0.0  ;;  %v2637_v8 = vunpack.c.l.bf16 %v2747_v61  ;;  %v1912_v13 = vadd.f32 %v2638_v1, %v1562_v63 }
 0x208   : > { %v1313_v17 = vpop.f32.mrf.mxu0 }
 0x209   : > { %v1314_v19 = vadd.f32 %v3329_v12, %v1313_v17  ;;  %v1527_v12 = vadd.f32 %v3422_v25, %v3445_v6  ;;  %v2746_v25 = vld [vmem:[%s3440_s23 + $0x20] sm:$0xff]   ;;  %v1911_v16 = vadd.f32 %v2637_v8, %v1559_v7 }
 0x20a   : > { %v1315_v21 = vpop.f32.mrf.mxu0  ;;  %v2634_v51 = vunpack.c.h.bf16 %v2746_v25  ;;  %v2633_v57 = vunpack.c.l.bf16 %v2746_v25  ;;  %v2753_v25 = vld [vmem:[%s3440_s23 + $0x58] sm:$0xff]  }
 0x20b   : > { %v1380_v23 = vmax.f32 %v1314_v19, 0.0  ;;  %v1903_v41 = vadd.f32 %v2621_v35, %v1527_v12  ;;  %v2646_v21 = vunpack.c.h.bf16 %v2749_v18  ;;  %v2751_v12 = vld [vmem:[%s3440_s23 + $0x48] sm:$0xff]   ;;  %v2662_v53 = vunpack.c.h.bf16 %v2753_v25 }
 0x20c   : > { %v1910_v55 = vadd.f32 %v2634_v51, %v1554_v49  ;;  %v1909_v62 = vadd.f32 %v2633_v57, %v1551_v56  ;;  %v2654_v39 = vunpack.c.h.bf16 %v2751_v12 }
 0x20d   : > { %v1412_v32 = vpack.c.bf16 %v1380_v23, %v1379_v22  ;;  %v1966_v46 = vpack.c.bf16 %v1904_v36, %v1903_v41  ;;  %v1970_v23 = vpack.c.bf16 %v1912_v13, %v1911_v16  ;;  %v2653_v41 = vunpack.c.l.bf16 %v2751_v12 }
 0x20e   : > { %v1969_v5 = vpack.c.bf16 %v1910_v55, %v1909_v62  ;;  %v2661_v55 = vunpack.c.l.bf16 %v2753_v25 }
 0x20f   : > { %v2884_v37 = vpop.f32.mrf.mxu1  ;;  %2931 = vmatmul.mubr.bf16.gmra.mxu1 %v1412_v32  ;;  %v2649_v32 = vunpack.c.l.bf16 %v2750_v0 }
 0x210   : > { %2950 = vmatprep.mubr.bf16.mxu1 %v1965_v34  ;;  %v1575_v28 = vadd.f32 %v2884_v37, %v3445_v6 }
 0x211   : > { %v1566_v42 = vpop.f32.mrf.mxu1 }
 0x212   : > { %v1567_v10 = vadd.f32 %v3445_v6, %v1566_v42  ;;  %v1915_v34 = vadd.f32 %v2645_v29, %v1575_v28 }
 0x213   : > { %v2885_v54 = vpop.f32.mrf.mxu1 }
 0x214   : > { %v1913_v19 = vadd.f32 %v2641_v11, %v1567_v10  ;;  %v1578_v20 = vadd.f32 %v2885_v54, %v3445_v6 }
 0x215   : > { %v1569_v60 = vpop.f32.mrf.mxu1 }
 0x216   : > { %v1570_v45 = vadd.f32 %v3445_v6, %v1569_v60  ;;  %v1916_v30 = vadd.f32 %v2646_v21, %v1578_v20 }
 0x217   : > { %2951 = vmatmul.mubr.bf16.vlgmr.msra.gmra.mxu1 %v1966_v46  ;;  %v2752_v46 = vld [vmem:[%s3440_s23 + $0x50] sm:$0xff]  }
 0x218   : > { %2954 = vmatprep.mubr.bf16.mxu1 %v1967_v52  ;;  %v1914_v15 = vadd.f32 %v2642_v4, %v1570_v45  ;;  %v1972_v36 = vpack.c.bf16 %v1916_v30, %v1915_v34  ;;  %v2657_v51 = vunpack.c.l.bf16 %v2752_v46  ;;  %v2658_v52 = vunpack.c.h.bf16 %v2752_v46  ;;  %v2754_v45 = vld [vmem:[%s3440_s23 + $0x60] sm:$0xff]   ;;  %v2755_v4 = vld [vmem:[%s3440_s23 + $0x68] sm:$0xff]  }
 0x219   : > { %v2670_v7 = vunpack.c.h.bf16 %v2755_v4  ;;  %v2666_v11 = vunpack.c.h.bf16 %v2754_v45  ;;  %v2759_v46 = vld [vmem:[%s3440_s23 + $0x88] sm:$0xff]  }
 0x21a   : > { %v1971_v27 = vpack.c.bf16 %v1914_v15, %v1913_v19 }
 0x21f   : > { %v2888_v9 = vpop.f32.mrf.mxu1  ;;  %2955 = vmatmul.mubr.bf16.gmra.mxu1 %v1968_v3 }
 0x220   : > { %2958 = vmatprep.mubr.bf16.mxu1 %v1969_v5  ;;  %v1591_v37 = vadd.f32 %v2888_v9, %v3445_v6  ;;  %v2665_v9 = vunpack.c.l.bf16 %v2754_v45 }
 0x221   : > { %v1582_v14 = vpop.f32.mrf.mxu1 }
 0x222   : > { %v1583_v31 = vadd.f32 %v3445_v6, %v1582_v14  ;;  %v1919_v47 = vadd.f32 %v2653_v41, %v1591_v37  ;;  %v2669_v14 = vunpack.c.l.bf16 %v2755_v4 }
 0x223   : > { %v2889_v17 = vpop.f32.mrf.mxu1 }
 0x224   : > { %v1917_v35 = vadd.f32 %v2649_v32, %v1583_v31  ;;  %v1594_v38 = vadd.f32 %v2889_v17, %v3445_v6 }
 0x225   : > { %v1585_v22 = vpop.f32.mrf.mxu1 }
 0x226   : > { %v1586_v24 = vadd.f32 %v3445_v6, %v1585_v22  ;;  %v1920_v43 = vadd.f32 %v2654_v39, %v1594_v38 }
 0x227   : > { %2959 = vmatmul.mubr.bf16.gmra.mxu1 %v1970_v23 }
 0x228   : > { %2962 = vmatprep.mubr.bf16.mxu1 %v1971_v27  ;;  %v1918_v33 = vadd.f32 %v2650_v26, %v1586_v24  ;;  %v1974_v56 = vpack.c.bf16 %v1920_v43, %v1919_v47  ;;  %v2756_v24 = vld [vmem:[%s3440_s23 + $0x70] sm:$0xff]   ;;  %v2757_v26 = vld [vmem:[%s3440_s23 + $0x78] sm:$0xff]  }
 0x229   : > { %v2678_v28 = vunpack.c.h.bf16 %v2757_v26  ;;  %v2673_v31 = vunpack.c.l.bf16 %v2756_v24  ;;  %v2674_v30 = vunpack.c.h.bf16 %v2756_v24  ;;  %v2677_v34 = vunpack.c.l.bf16 %v2757_v26 }
 0x22a   : > { %v1973_v40 = vpack.c.bf16 %v1918_v33, %v1917_v35 }
 0x22f   : > { %v2892_v42 = vpop.f32.mrf.mxu1  ;;  %2963 = vmatmul.mubr.bf16.gmra.mxu1 %v1972_v36 }
 0x230   : > { %2966 = vmatprep.mubr.bf16.mxu1 %v1973_v40  ;;  %v1607_v58 = vadd.f32 %v2892_v42, %v3445_v6 }
 0x231   : > { %v1598_v44 = vpop.f32.mrf.mxu1 }
 0x232   : > { %v1599_v49 = vadd.f32 %v3445_v6, %v1598_v44  ;;  %v1923_v63 = vadd.f32 %v2661_v55, %v1607_v58  ;;  %v2758_v44 = vld [vmem:[%s3440_s23 + $0x80] sm:$0xff]  }
 0x233   : > { %v2893_v48 = vpop.f32.mrf.mxu1 }
 0x234   : > { %v1610_v50 = vadd.f32 %v2893_v48, %v3445_v6  ;;  %v1921_v59 = vadd.f32 %v2657_v51, %v1599_v49  ;;  %v2686_v48 = vunpack.c.h.bf16 %v2759_v46  ;;  %v2681_v49 = vunpack.c.l.bf16 %v2758_v44 }
 0x235   : > { %v1601_v54 = vpop.f32.mrf.mxu1 }
 0x236   : > { %v1602_v57 = vadd.f32 %v3445_v6, %v1601_v54  ;;  %v1924_v61 = vadd.f32 %v2662_v53, %v1610_v50  ;;  %v2685_v53 = vunpack.c.l.bf16 %v2759_v46 }
 0x237   : > { %2967 = vmatmul.mubr.bf16.gmra.mxu1 %v1974_v56 }
 0x238   : > { %v1922_v60 = vadd.f32 %v2658_v52, %v1602_v57  ;;  %v1976_v1 = vpack.c.bf16 %v1924_v61, %v1923_v63  ;;  %v2682_v52 = vunpack.c.h.bf16 %v2758_v44 }
 0x23a   : > { %v1975_v62 = vpack.c.bf16 %v1922_v60, %v1921_v59 }
 0x23c   : > { %2970 = vmatprep.mubr.bf16.mxu1 %v1975_v62 }
 0x23f   : > { %v2896_v2 = vpop.f32.mrf.mxu1  ;;  %2971 = vmatmul.mubr.bf16.gmra.mxu1 %v1976_v1  ;;  %v2760_v1 = vld [vmem:[%s3440_s23 + $0x90] sm:$0xff]  }
 0x240   : > { %v1623_v13 = vadd.f32 %v2896_v2, %v3445_v6  ;;  %v2761_v2 = vld [vmem:[%s3440_s23 + $0x98] sm:$0xff]  }
 0x241   : > { %v1614_v3 = vpop.f32.mrf.mxu1  ;;  %v2694_v45 = vunpack.c.h.bf16 %v2761_v2 }
 0x242   : > { %v1615_v8 = vadd.f32 %v3445_v6, %v1614_v3  ;;  %v1927_v20 = vadd.f32 %v2669_v14, %v1623_v13 }
 0x243   : > { %v2897_v5 = vpop.f32.mrf.mxu1 }
 0x244   : > { %v1626_v10 = vadd.f32 %v2897_v5, %v3445_v6  ;;  %v1925_v18 = vadd.f32 %v2665_v9, %v1615_v8  ;;  %v2689_v5 = vunpack.c.l.bf16 %v2760_v1  ;;  %v2690_v8 = vunpack.c.h.bf16 %v2760_v1 }
 0x245   : > { %v1617_v15 = vpop.f32.mrf.mxu1 }
 0x246   : > { %v1618_v16 = vadd.f32 %v3445_v6, %v1617_v15  ;;  %v1928_v17 = vadd.f32 %v2670_v7, %v1626_v10  ;;  %v2693_v10 = vunpack.c.l.bf16 %v2761_v2 }
 0x248   : > { %v1926_v19 = vadd.f32 %v2666_v11, %v1618_v16  ;;  %v1978_v0 = vpack.c.bf16 %v1928_v17, %v1927_v20 }
 0x24a   : > { %v1977_v21 = vpack.c.bf16 %v1926_v19, %v1925_v18 }
 0x24c   : > { %2974 = vmatprep.mubr.bf16.mxu1 %v1977_v21 }
 0x24d   : > { %2975 = vmatmul.mubr.bf16.gmra.mxu1 %v1978_v0  ;;  %v2762_v0 = vld [vmem:[%s3440_s23 + $0xa0] sm:$0xff]  }
 0x24f   : > { %v2900_v22 = vpop.f32.mrf.mxu1 }
 0x250   : > { %v1639_v33 = vadd.f32 %v2900_v22, %v3445_v6  ;;  %v2763_v22 = vld [vmem:[%s3440_s23 + $0xa8] sm:$0xff]  }
 0x251   : > { %v1630_v23 = vpop.f32.mrf.mxu1  ;;  %v2702_v24 = vunpack.c.h.bf16 %v2763_v22 }
 0x252   : > { %v1631_v29 = vadd.f32 %v3445_v6, %v1630_v23  ;;  %v1931_v40 = vadd.f32 %v2677_v34, %v1639_v33 }
 0x253   : > { %v2901_v27 = vpop.f32.mrf.mxu1 }
 0x254   : > { %v1642_v32 = vadd.f32 %v2901_v27, %v3445_v6  ;;  %v1929_v39 = vadd.f32 %v2673_v31, %v1631_v29  ;;  %v2697_v27 = vunpack.c.l.bf16 %v2762_v0  ;;  %v2698_v29 = vunpack.c.h.bf16 %v2762_v0 }
 0x255   : > { %v1633_v12 = vpop.f32.mrf.mxu1 }
 0x256   : > { %v1634_v35 = vadd.f32 %v3445_v6, %v1633_v12  ;;  %v1932_v38 = vadd.f32 %v2678_v28, %v1642_v32  ;;  %v2701_v32 = vunpack.c.l.bf16 %v2763_v22 }
 0x258   : > { %v1930_v36 = vadd.f32 %v2674_v30, %v1634_v35  ;;  %v1980_v41 = vpack.c.bf16 %v1932_v38, %v1931_v40 }
 0x25a   : > { %v1979_v37 = vpack.c.bf16 %v1930_v36, %v1929_v39 }
 0x25c   : > { %2978 = vmatprep.mubr.bf16.mxu1 %v1979_v37 }
 0x25d   : > { %2979 = vmatmul.mubr.bf16.gmra.mxu1 %v1980_v41  ;;  %v2764_v41 = vld [vmem:[%s3440_s23 + $0xb0] sm:$0xff]  }
 0x25f   : > { %v2904_v42 = vpop.f32.mrf.mxu1 }
 0x260   : > { %v1655_v50 = vadd.f32 %v2904_v42, %v3445_v6  ;;  %v2765_v42 = vld [vmem:[%s3440_s23 + $0xb8] sm:$0xff]  }
 0x261   : > { %v1646_v43 = vpop.f32.mrf.mxu1  ;;  %v2710_v44 = vunpack.c.h.bf16 %v2765_v42 }
 0x262   : > { %v1647_v25 = vadd.f32 %v3445_v6, %v1646_v43  ;;  %v1935_v59 = vadd.f32 %v2685_v53, %v1655_v50 }
 0x263   : > { %v2905_v47 = vpop.f32.mrf.mxu1 }
 0x264   : > { %v1658_v51 = vadd.f32 %v2905_v47, %v3445_v6  ;;  %v1933_v58 = vadd.f32 %v2681_v49, %v1647_v25  ;;  %v2705_v47 = vunpack.c.l.bf16 %v2764_v41  ;;  %v2706_v25 = vunpack.c.h.bf16 %v2764_v41 }
 0x265   : > { %v1649_v54 = vpop.f32.mrf.mxu1 }
 0x266   : > { %v1650_v56 = vadd.f32 %v3445_v6, %v1649_v54  ;;  %v1936_v57 = vadd.f32 %v2686_v48, %v1658_v51  ;;  %v2709_v51 = vunpack.c.l.bf16 %v2765_v42 }
 0x268   : > { %v1934_v55 = vadd.f32 %v2682_v52, %v1650_v56  ;;  %v1982_v61 = vpack.c.bf16 %v1936_v57, %v1935_v59 }
 0x26a   : > { %v1981_v60 = vpack.c.bf16 %v1934_v55, %v1933_v58 }
 0x26c   : > { %2982 = vmatprep.mubr.bf16.mxu1 %v1981_v60 }
 0x26d   : > { %2983 = vmatmul.mubr.bf16.gmra.mxu1 %v1982_v61  ;;  %v2766_v61 = vld [vmem:[%s3440_s23 + $0xc0] sm:$0xff]  }
 0x26f   : > { %v2908_v62 = vpop.f32.mrf.mxu1 }
 0x270   : > { %v1671_v9 = vadd.f32 %v2908_v62, %v3445_v6  ;;  %v2767_v62 = vld [vmem:[%s3440_s23 + $0xc8] sm:$0xff]  }
 0x271   : > { %v1662_v63 = vpop.f32.mrf.mxu1  ;;  %v2718_v1 = vunpack.c.h.bf16 %v2767_v62 }
 0x272   : > { %v1663_v4 = vadd.f32 %v3445_v6, %v1662_v63  ;;  %v1939_v17 = vadd.f32 %v2693_v10, %v1671_v9 }
 0x273   : > { %v2909_v3 = vpop.f32.mrf.mxu1 }
 0x274   : > { %v1674_v7 = vadd.f32 %v2909_v3, %v3445_v6  ;;  %v1937_v15 = vadd.f32 %v2689_v5, %v1663_v4  ;;  %v2713_v3 = vunpack.c.l.bf16 %v2766_v61  ;;  %v2714_v4 = vunpack.c.h.bf16 %v2766_v61 }
 0x275   : > { %v1665_v11 = vpop.f32.mrf.mxu1 }
 0x276   : > { %v1666_v13 = vadd.f32 %v3445_v6, %v1665_v11  ;;  %v1940_v14 = vadd.f32 %v2694_v45, %v1674_v7  ;;  %v2717_v7 = vunpack.c.l.bf16 %v2767_v62 }
 0x278   : > { %v1938_v16 = vadd.f32 %v2690_v8, %v1666_v13  ;;  %v1984_v19 = vpack.c.bf16 %v1940_v14, %v1939_v17 }
 0x27a   : > { %v1983_v18 = vpack.c.bf16 %v1938_v16, %v1937_v15 }
 0x27c   : > { %2986 = vmatprep.mubr.bf16.mxu1 %v1983_v18 }
 0x27d   : > { %2987 = vmatmul.mubr.bf16.gmra.mxu1 %v1984_v19  ;;  %v2768_v19 = vld [vmem:[%s3440_s23 + $0xd0] sm:$0xff]  }
 0x27f   : > { %v2912_v20 = vpop.f32.mrf.mxu1 }
 0x280   : > { %v1687_v31 = vadd.f32 %v2912_v20, %v3445_v6  ;;  %v2769_v20 = vld [vmem:[%s3440_s23 + $0xd8] sm:$0xff]  }
 0x281   : > { %v1678_v21 = vpop.f32.mrf.mxu1  ;;  %v2726_v0 = vunpack.c.h.bf16 %v2769_v20 }
 0x282   : > { %v1679_v26 = vadd.f32 %v3445_v6, %v1678_v21  ;;  %v1943_v38 = vadd.f32 %v2701_v32, %v1687_v31 }
 0x283   : > { %v2913_v23 = vpop.f32.mrf.mxu1 }
 0x284   : > { %v1690_v28 = vadd.f32 %v2913_v23, %v3445_v6  ;;  %v1941_v12 = vadd.f32 %v2697_v27, %v1679_v26  ;;  %v2721_v23 = vunpack.c.l.bf16 %v2768_v19  ;;  %v2722_v26 = vunpack.c.h.bf16 %v2768_v19 }
 0x285   : > { %v1681_v30 = vpop.f32.mrf.mxu1 }
 0x286   : > { %v1682_v33 = vadd.f32 %v3445_v6, %v1681_v30  ;;  %v1944_v34 = vadd.f32 %v2702_v24, %v1690_v28  ;;  %v2725_v28 = vunpack.c.l.bf16 %v2769_v20 }
 0x288   : > { %v1942_v35 = vadd.f32 %v2698_v29, %v1682_v33  ;;  %v1986_v36 = vpack.c.bf16 %v1944_v34, %v1943_v38 }
 0x28a   : > { %v1985_v39 = vpack.c.bf16 %v1942_v35, %v1941_v12 }
 0x28c   : > { %2990 = vmatprep.mubr.bf16.mxu1 %v1985_v39 }
 0x28d   : > { %2991 = vmatmul.mubr.bf16.gmra.mxu1 %v1986_v36  ;;  %v2770_v36 = vld [vmem:[%s3440_s23 + $0xe0] sm:$0xff]  }
 0x28f   : > { %v2916_v40 = vpop.f32.mrf.mxu1 }
 0x290   : > { %v1703_v49 = vadd.f32 %v2916_v40, %v3445_v6  ;;  %v2771_v40 = vld [vmem:[%s3440_s23 + $0xe8] sm:$0xff]  }
 0x291   : > { %v1694_v37 = vpop.f32.mrf.mxu1  ;;  %v2734_v41 = vunpack.c.h.bf16 %v2771_v40 }
 0x292   : > { %v1695_v46 = vadd.f32 %v3445_v6, %v1694_v37  ;;  %v1947_v57 = vadd.f32 %v2709_v51, %v1703_v49 }
 0x293   : > { %v2917_v43 = vpop.f32.mrf.mxu1 }
 0x294   : > { %v1706_v48 = vadd.f32 %v2917_v43, %v3445_v6  ;;  %v1945_v54 = vadd.f32 %v2705_v47, %v1695_v46  ;;  %v2729_v43 = vunpack.c.l.bf16 %v2770_v36  ;;  %v2730_v46 = vunpack.c.h.bf16 %v2770_v36 }
 0x295   : > { %v1697_v52 = vpop.f32.mrf.mxu1 }
 0x296   : > { %v1698_v50 = vadd.f32 %v3445_v6, %v1697_v52  ;;  %v1948_v53 = vadd.f32 %v2710_v44, %v1706_v48  ;;  %v2733_v48 = vunpack.c.l.bf16 %v2771_v40 }
 0x298   : > { %v1946_v56 = vadd.f32 %v2706_v25, %v1698_v50  ;;  %v1988_v55 = vpack.c.bf16 %v1948_v53, %v1947_v57 }
 0x29a   : > { %v1987_v58 = vpack.c.bf16 %v1946_v56, %v1945_v54 }
 0x29c   : > { %2994 = vmatprep.mubr.bf16.mxu1 %v1987_v58 }
 0x29d   : > { %2995 = vmatmul.mubr.bf16.gmra.mxu1 %v1988_v55  ;;  %v2772_v55 = vld [vmem:[%s3440_s23 + $0xf0] sm:$0xff]  }
 0x29f   : > { %v2920_v59 = vpop.f32.mrf.mxu1 }
 0x2a0   : > { %v1719_v5 = vadd.f32 %v2920_v59, %v3445_v6  ;;  %v2773_v59 = vld [vmem:[%s3440_s23 + $0xf8] sm:$0xff]  }
 0x2a1   : > { %v1710_v60 = vpop.f32.mrf.mxu1  ;;  %v2742_v61 = vunpack.c.h.bf16 %v2773_v59 }
 0x2a2   : > { %v1711_v2 = vadd.f32 %v3445_v6, %v1710_v60  ;;  %v1951_v14 = vadd.f32 %v2717_v7, %v1719_v5  ;;  %v3551_v5 = vld [vmem:[%s3698_s8] ss:$0 sm:$0xff] }
 0x2a3   : > { %v2921_v63 = vpop.f32.mrf.mxu1 }
 0x2a4   : > { %v1722_v45 = vadd.f32 %v2921_v63, %v3445_v6  ;;  %v1949_v11 = vadd.f32 %v2713_v3, %v1711_v2  ;;  %v2737_v63 = vunpack.c.l.bf16 %v2772_v55  ;;  %v2738_v2 = vunpack.c.h.bf16 %v2772_v55 }
 0x2a5   : > { %v1713_v8 = vpop.f32.mrf.mxu1 }
 0x2a6   : > { %v1714_v9 = vadd.f32 %v3445_v6, %v1713_v8  ;;  %v1952_v10 = vadd.f32 %v2718_v1, %v1722_v45  ;;  %v2741_v45 = vunpack.c.l.bf16 %v2773_v59 }
 0x2a8   : > { %v1950_v13 = vadd.f32 %v2714_v4, %v1714_v9  ;;  %v1990_v16 = vpack.c.bf16 %v1952_v10, %v1951_v14 }
 0x2aa   : > { %v1989_v15 = vpack.c.bf16 %v1950_v13, %v1949_v11 }
 0x2ac   : > { %2998 = vmatprep.mubr.bf16.mxu1 %v1989_v15 }
 0x2ad   : > { %2999 = vmatmul.mubr.bf16.gmra.mxu1 %v1990_v16 }
 0x2af   : > { %v2924_v17 = vpop.f32.mrf.mxu1 }
 0x2b0   : > { %v1735_v27 = vadd.f32 %v2924_v17, %v3445_v6 }
 0x2b1   : > { %v1726_v18 = vpop.f32.mrf.mxu1 }
 0x2b2   : > { %v1727_v22 = vadd.f32 %v3445_v6, %v1726_v18  ;;  %v1955_v34 = vadd.f32 %v2725_v28, %v1735_v27 }
 0x2b3   : > { %v2925_v21 = vpop.f32.mrf.mxu1 }
 0x2b4   : > { %v1738_v24 = vadd.f32 %v2925_v21, %v3445_v6  ;;  %v1953_v30 = vadd.f32 %v2721_v23, %v1727_v22 }
 0x2b5   : > { %v1729_v29 = vpop.f32.mrf.mxu1 }
 0x2b6   : > { %v1730_v31 = vadd.f32 %v3445_v6, %v1729_v29  ;;  %v1956_v32 = vadd.f32 %v2726_v0, %v1738_v24 }
 0x2b8   : > { %v1954_v33 = vadd.f32 %v2722_v26, %v1730_v31  ;;  %v1992_v35 = vpack.c.bf16 %v1956_v32, %v1955_v34 }
 0x2ba   : > { %v1991_v12 = vpack.c.bf16 %v1954_v33, %v1953_v30 }
 0x2bc   : > { %3002 = vmatprep.mubr.bf16.mxu1 %v1991_v12 }
 0x2bd   : > { %3003 = vmatmul.mubr.bf16.gmra.mxu1 %v1992_v35 }
 0x2bf   : > { %v2928_v38 = vpop.f32.mrf.mxu1 }
 0x2c0   : > { %v1751_v47 = vadd.f32 %v2928_v38, %v3445_v6 }
 0x2c1   : > { %v1742_v39 = vpop.f32.mrf.mxu1 }
 0x2c2   : > { %v1743_v42 = vadd.f32 %v3445_v6, %v1742_v39  ;;  %v1959_v53 = vadd.f32 %v2733_v48, %v1751_v47 }
 0x2c3   : > { %v2929_v37 = vpop.f32.mrf.mxu1 }
 0x2c4   : > { %v1754_v44 = vadd.f32 %v2929_v37, %v3445_v6  ;;  %v1957_v52 = vadd.f32 %v2729_v43, %v1743_v42 }
 0x2c5   : > { %v1745_v25 = vpop.f32.mrf.mxu1 }
 0x2c6   : > { %v1746_v49 = vadd.f32 %v3445_v6, %v1745_v25  ;;  %v1960_v51 = vadd.f32 %v2734_v41, %v1754_v44 }
 0x2c8   : > { %v1958_v50 = vadd.f32 %v2730_v46, %v1746_v49  ;;  %v1994_v56 = vpack.c.bf16 %v1960_v51, %v1959_v53 }
 0x2ca   : > { %v1993_v54 = vpack.c.bf16 %v1958_v50, %v1957_v52 }
 0x2cc   : > { %3006 = vmatprep.mubr.bf16.mxu1 %v1993_v54 }
 0x2cd   : > { %3007 = vmatmul.mubr.bf16.gmra.mxu1 %v1994_v56 }
 0x2cf   : > { %v2932_v57 = vpop.f32.mrf.mxu1 }
 0x2d0   : > { %v1767_v3 = vadd.f32 %v2932_v57, %v3445_v6 }
 0x2d1   : > { %v1758_v58 = vpop.f32.mrf.mxu1 }
 0x2d2   : > { %v1759_v62 = vadd.f32 %v3445_v6, %v1758_v58  ;;  %v1963_v14 = vadd.f32 %v2741_v45, %v1767_v3 }
 0x2d3   : > { %v2933_v60 = vpop.f32.mrf.mxu1 }
 0x2d4   : > { %v1770_v1 = vadd.f32 %v2933_v60, %v3445_v6  ;;  %v1961_v10 = vadd.f32 %v2737_v63, %v1759_v62 }
 0x2d5   : > { %v1761_v4 = vpop.f32.mrf.mxu1 }
 0x2d6   : > { %v1762_v7 = vadd.f32 %v3445_v6, %v1761_v4  ;;  %v1964_v8 = vadd.f32 %v2742_v61, %v1770_v1 }
 0x2d7   : > { %v2952_v9 = vpop.f32.mrf.mxu1 }
 0x2d8   : > { %v1962_v11 = vadd.f32 %v2738_v2, %v1762_v7  ;;  %v2111_v13 = vadd.f32 %v2952_v9, %v3551_v5  ;;  %v1996_v17 = vpack.c.bf16 %v1964_v8, %v1963_v14 }
 0x2d9   : > { %v2102_v15 = vpop.f32.mrf.mxu1 }
 0x2da   : > { %2359 = vst [vmem:[%s3557_s25 + $0x10] sm:$0xff] %v2111_v13  ;;  %v2103_v6 = vadd.f32 %v3551_v5, %v2102_v15  ;;  %v1995_v16 = vpack.c.bf16 %v1962_v11, %v1961_v10 }
 0x2db   : > { %v2953_v18 = vpop.f32.mrf.mxu1 }
 0x2dc   : > { %2357 = vst [vmem:[%s3557_s25] sm:$0xff] %v2103_v6  ;;  %v2114_v19 = vadd.f32 %v2953_v18, %v3551_v5  ;;  %3010 = vmatprep.mubr.bf16.mxu1 %v1995_v16 }
 0x2dd   : > { %v2105_v20 = vpop.f32.mrf.mxu1  ;;  %3011 = vmatmul.mubr.bf16.gmra.mxu1 %v1996_v17 }
 0x2de   : > { %2360 = vst [vmem:[%s3557_s25 + $0x18] sm:$0xff] %v2114_v19  ;;  %v2106_v21 = vadd.f32 %v3551_v5, %v2105_v20 }
 0x2df   : > { %v2956_v0 = vpop.f32.mrf.mxu1 }
 0x2e0   : > { %2358 = vst [vmem:[%s3557_s25 + $0x8] sm:$0xff] %v2106_v21  ;;  %v2127_v22 = vadd.f32 %v2956_v0, %v3551_v5 }
 0x2e1   : > { %v2118_v23 = vpop.f32.mrf.mxu1 }
 0x2e2   : > { %2363 = vst [vmem:[%s3557_s25 + $0x30] sm:$0xff] %v2127_v22  ;;  %v2119_v24 = vadd.f32 %v3551_v5, %v2118_v23 }
 0x2e3   : > { %v2957_v26 = vpop.f32.mrf.mxu1 }
 0x2e4   : > { %2361 = vst [vmem:[%s3557_s25 + $0x20] sm:$0xff] %v2119_v24  ;;  %v2130_v27 = vadd.f32 %v2957_v26, %v3551_v5 }
 0x2e5   : > { %v2121_v28 = vpop.f32.mrf.mxu1 }
 0x2e6   : > { %2364 = vst [vmem:[%s3557_s25 + $0x38] sm:$0xff] %v2130_v27  ;;  %v2122_v29 = vadd.f32 %v3551_v5, %v2121_v28 }
 0x2e7   : > { %v2960_v31 = vpop.f32.mrf.mxu1 }
 0x2e8   : > { %2362 = vst [vmem:[%s3557_s25 + $0x28] sm:$0xff] %v2122_v29  ;;  %v2143_v32 = vadd.f32 %v2960_v31, %v3551_v5 }
 0x2e9   : > { %v2134_v30 = vpop.f32.mrf.mxu1 }
 0x2ea   : > { %2367 = vst [vmem:[%s3557_s25 + $0x50] sm:$0xff] %v2143_v32  ;;  %v2135_v33 = vadd.f32 %v3551_v5, %v2134_v30 }
 0x2eb   : > { %v2961_v34 = vpop.f32.mrf.mxu1 }
 0x2ec   : > { %2365 = vst [vmem:[%s3557_s25 + $0x40] sm:$0xff] %v2135_v33  ;;  %v2146_v12 = vadd.f32 %v2961_v34, %v3551_v5 }
 0x2ed   : > { %v2137_v35 = vpop.f32.mrf.mxu1 }
 0x2ee   : > { %2368 = vst [vmem:[%s3557_s25 + $0x58] sm:$0xff] %v2146_v12  ;;  %v2138_v38 = vadd.f32 %v3551_v5, %v2137_v35 }
 0x2ef   : > { %v2964_v39 = vpop.f32.mrf.mxu1 }
 0x2f0   : > { %2366 = vst [vmem:[%s3557_s25 + $0x48] sm:$0xff] %v2138_v38  ;;  %v2159_v36 = vadd.f32 %v2964_v39, %v3551_v5 }
 0x2f1   : > { %v2150_v40 = vpop.f32.mrf.mxu1 }
 0x2f2   : > { %2371 = vst [vmem:[%s3557_s25 + $0x70] sm:$0xff] %v2159_v36  ;;  %v2151_v37 = vadd.f32 %v3551_v5, %v2150_v40 }
 0x2f3   : > { %v2965_v41 = vpop.f32.mrf.mxu1 }
 0x2f4   : > { %2369 = vst [vmem:[%s3557_s25 + $0x60] sm:$0xff] %v2151_v37  ;;  %v2162_v42 = vadd.f32 %v2965_v41, %v3551_v5 }
 0x2f5   : > { %v2153_v43 = vpop.f32.mrf.mxu1 }
 0x2f6   : > { %2372 = vst [vmem:[%s3557_s25 + $0x78] sm:$0xff] %v2162_v42  ;;  %v2154_v44 = vadd.f32 %v3551_v5, %v2153_v43 }
 0x2f7   : > { %v2968_v46 = vpop.f32.mrf.mxu1 }
 0x2f8   : > { %2370 = vst [vmem:[%s3557_s25 + $0x68] sm:$0xff] %v2154_v44  ;;  %v2175_v47 = vadd.f32 %v2968_v46, %v3551_v5 }
 0x2f9   : > { %v2166_v48 = vpop.f32.mrf.mxu1 }
 0x2fa   : > { %2375 = vst [vmem:[%s3557_s25 + $0x90] sm:$0xff] %v2175_v47  ;;  %v2167_v25 = vadd.f32 %v3551_v5, %v2166_v48 }
 0x2fb   : > { %v2969_v49 = vpop.f32.mrf.mxu1 }
 0x2fc   : > { %2373 = vst [vmem:[%s3557_s25 + $0x80] sm:$0xff] %v2167_v25  ;;  %v2178_v51 = vadd.f32 %v2969_v49, %v3551_v5 }
 0x2fd   : > { %v2169_v52 = vpop.f32.mrf.mxu1 }
 0x2fe   : > { %2376 = vst [vmem:[%s3557_s25 + $0x98] sm:$0xff] %v2178_v51  ;;  %v2170_v50 = vadd.f32 %v3551_v5, %v2169_v52 }
 0x2ff   : > { %v2972_v53 = vpop.f32.mrf.mxu1 }
 0x300   : > { %2374 = vst [vmem:[%s3557_s25 + $0x88] sm:$0xff] %v2170_v50  ;;  %v2191_v54 = vadd.f32 %v2972_v53, %v3551_v5 }
 0x301   : > { %v2182_v56 = vpop.f32.mrf.mxu1 }
 0x302   : > { %2379 = vst [vmem:[%s3557_s25 + $0xb0] sm:$0xff] %v2191_v54  ;;  %v2183_v57 = vadd.f32 %v3551_v5, %v2182_v56 }
 0x303   : > { %v2973_v58 = vpop.f32.mrf.mxu1 }
 0x304   : > { %2377 = vst [vmem:[%s3557_s25 + $0xa0] sm:$0xff] %v2183_v57  ;;  %v2194_v55 = vadd.f32 %v2973_v58, %v3551_v5 }
 0x305   : > { %v2185_v59 = vpop.f32.mrf.mxu1 }
 0x306   : > { %2380 = vst [vmem:[%s3557_s25 + $0xb8] sm:$0xff] %v2194_v55  ;;  %v2186_v60 = vadd.f32 %v3551_v5, %v2185_v59 }
 0x308   : > { %2378 = vst [vmem:[%s3557_s25 + $0xa8] sm:$0xff] %v2186_v60 }
 0x30d   : > { %v2976_v61 = vpop.f32.mrf.mxu1 }
 0x30e   : > { %v2207_v62 = vadd.f32 %v2976_v61, %v3551_v5 }
 0x30f   : > { %v2198_v63 = vpop.f32.mrf.mxu1 }
 0x310   : > { %2383 = vst [vmem:[%s3557_s25 + $0xd0] sm:$0xff] %v2207_v62  ;;  %v2199_v1 = vadd.f32 %v3551_v5, %v2198_v63 }
 0x311   : > { %v2977_v2 = vpop.f32.mrf.mxu1 }
 0x312   : > { %2381 = vst [vmem:[%s3557_s25 + $0xc0] sm:$0xff] %v2199_v1  ;;  %v2210_v3 = vadd.f32 %v2977_v2, %v3551_v5 }
 0x313   : > { %v2201_v45 = vpop.f32.mrf.mxu1 }
 0x314   : > { %2384 = vst [vmem:[%s3557_s25 + $0xd8] sm:$0xff] %v2210_v3  ;;  %v2202_v4 = vadd.f32 %v3551_v5, %v2201_v45 }
 0x316   : > { %2382 = vst [vmem:[%s3557_s25 + $0xc8] sm:$0xff] %v2202_v4 }
 0x31d   : > { %v2980_v7 = vpop.f32.mrf.mxu1 }
 0x31e   : > { %v2223_v8 = vadd.f32 %v2980_v7, %v3551_v5 }
 0x31f   : > { %v2214_v9 = vpop.f32.mrf.mxu1 }
 0x320   : > { %2387 = vst [vmem:[%s3557_s25 + $0xf0] sm:$0xff] %v2223_v8  ;;  %v2215_v10 = vadd.f32 %v3551_v5, %v2214_v9 }
 0x321   : > { %v2981_v11 = vpop.f32.mrf.mxu1 }
 0x322   : > { %2385 = vst [vmem:[%s3557_s25 + $0xe0] sm:$0xff] %v2215_v10  ;;  %v2226_v13 = vadd.f32 %v2981_v11, %v3551_v5 }
 0x323   : > { %v2217_v14 = vpop.f32.mrf.mxu1 }
 0x324   : > { %2388 = vst [vmem:[%s3557_s25 + $0xf8] sm:$0xff] %v2226_v13  ;;  %v2218_v15 = vadd.f32 %v3551_v5, %v2217_v14 }
 0x326   : > { %2386 = vst [vmem:[%s3557_s25 + $0xe8] sm:$0xff] %v2218_v15 }
 0x32d   : > { %v2984_v6 = vpop.f32.mrf.mxu1 }
 0x32e   : > { %v2239_v16 = vadd.f32 %v2984_v6, %v3551_v5 }
 0x32f   : > { %v2230_v17 = vpop.f32.mrf.mxu1 }
 0x330   : > { %2391 = vst [vmem:[%s3557_s25 + $0x110] sm:$0xff] %v2239_v16  ;;  %v2231_v18 = vadd.f32 %v3551_v5, %v2230_v17 }
 0x331   : > { %v2985_v19 = vpop.f32.mrf.mxu1 }
 0x332   : > { %2389 = vst [vmem:[%s3557_s25 + $0x100] sm:$0xff] %v2231_v18  ;;  %v2242_v20 = vadd.f32 %v2985_v19, %v3551_v5 }
 0x333   : > { %v2233_v21 = vpop.f32.mrf.mxu1 }
 0x334   : > { %2392 = vst [vmem:[%s3557_s25 + $0x118] sm:$0xff] %v2242_v20  ;;  %v2234_v0 = vadd.f32 %v3551_v5, %v2233_v21 }
 0x336   : > { %2390 = vst [vmem:[%s3557_s25 + $0x108] sm:$0xff] %v2234_v0 }
 0x33d   : > { %v2988_v22 = vpop.f32.mrf.mxu1 }
 0x33e   : > { %v2255_v23 = vadd.f32 %v2988_v22, %v3551_v5 }
 0x33f   : > { %v2246_v24 = vpop.f32.mrf.mxu1 }
 0x340   : > { %2395 = vst [vmem:[%s3557_s25 + $0x130] sm:$0xff] %v2255_v23  ;;  %v2247_v26 = vadd.f32 %v3551_v5, %v2246_v24 }
 0x341   : > { %v2989_v27 = vpop.f32.mrf.mxu1 }
 0x342   : > { %2393 = vst [vmem:[%s3557_s25 + $0x120] sm:$0xff] %v2247_v26  ;;  %v2258_v28 = vadd.f32 %v2989_v27, %v3551_v5 }
 0x343   : > { %v2249_v29 = vpop.f32.mrf.mxu1 }
 0x344   : > { %2396 = vst [vmem:[%s3557_s25 + $0x138] sm:$0xff] %v2258_v28  ;;  %v2250_v31 = vadd.f32 %v3551_v5, %v2249_v29 }
 0x346   : > { %2394 = vst [vmem:[%s3557_s25 + $0x128] sm:$0xff] %v2250_v31 }
 0x34d   : > { %v2992_v32 = vpop.f32.mrf.mxu1 }
 0x34e   : > { %v2271_v30 = vadd.f32 %v2992_v32, %v3551_v5 }
 0x34f   : > { %v2262_v33 = vpop.f32.mrf.mxu1 }
 0x350   : > { %2399 = vst [vmem:[%s3557_s25 + $0x150] sm:$0xff] %v2271_v30  ;;  %v2263_v34 = vadd.f32 %v3551_v5, %v2262_v33 }
 0x351   : > { %v2993_v12 = vpop.f32.mrf.mxu1 }
 0x352   : > { %2397 = vst [vmem:[%s3557_s25 + $0x140] sm:$0xff] %v2263_v34  ;;  %v2274_v35 = vadd.f32 %v2993_v12, %v3551_v5 }
 0x353   : > { %v2265_v38 = vpop.f32.mrf.mxu1 }
 0x354   : > { %2400 = vst [vmem:[%s3557_s25 + $0x158] sm:$0xff] %v2274_v35  ;;  %v2266_v39 = vadd.f32 %v3551_v5, %v2265_v38 }
 0x356   : > { %2398 = vst [vmem:[%s3557_s25 + $0x148] sm:$0xff] %v2266_v39 }
 0x35d   : > { %v2996_v36 = vpop.f32.mrf.mxu1 }
 0x35e   : > { %v2287_v40 = vadd.f32 %v2996_v36, %v3551_v5 }
 0x35f   : > { %v2278_v37 = vpop.f32.mrf.mxu1 }
 0x360   : > { %2403 = vst [vmem:[%s3557_s25 + $0x170] sm:$0xff] %v2287_v40  ;;  %v2279_v41 = vadd.f32 %v3551_v5, %v2278_v37 }
 0x361   : > { %v2997_v42 = vpop.f32.mrf.mxu1 }
 0x362   : > { %2401 = vst [vmem:[%s3557_s25 + $0x160] sm:$0xff] %v2279_v41  ;;  %v2290_v43 = vadd.f32 %v2997_v42, %v3551_v5 }
 0x363   : > { %v2281_v44 = vpop.f32.mrf.mxu1 }
 0x364   : > { %2404 = vst [vmem:[%s3557_s25 + $0x178] sm:$0xff] %v2290_v43  ;;  %v2282_v46 = vadd.f32 %v3551_v5, %v2281_v44 }
 0x366   : > { %2402 = vst [vmem:[%s3557_s25 + $0x168] sm:$0xff] %v2282_v46 }
 0x36d   : > { %v3000_v47 = vpop.f32.mrf.mxu1 }
 0x36e   : > { %v2303_v48 = vadd.f32 %v3000_v47, %v3551_v5 }
 0x36f   : > { %v2294_v25 = vpop.f32.mrf.mxu1 }
 0x370   : > { %2407 = vst [vmem:[%s3557_s25 + $0x190] sm:$0xff] %v2303_v48  ;;  %v2295_v49 = vadd.f32 %v3551_v5, %v2294_v25 }
 0x371   : > { %v3001_v51 = vpop.f32.mrf.mxu1 }
 0x372   : > { %2405 = vst [vmem:[%s3557_s25 + $0x180] sm:$0xff] %v2295_v49  ;;  %v2306_v52 = vadd.f32 %v3001_v51, %v3551_v5 }
 0x373   : > { %v2297_v50 = vpop.f32.mrf.mxu1 }
 0x374   : > { %2408 = vst [vmem:[%s3557_s25 + $0x198] sm:$0xff] %v2306_v52  ;;  %v2298_v53 = vadd.f32 %v3551_v5, %v2297_v50 }
 0x376   : > { %2406 = vst [vmem:[%s3557_s25 + $0x188] sm:$0xff] %v2298_v53 }
 0x37d   : > { %v3004_v54 = vpop.f32.mrf.mxu1 }
 0x37e   : > { %v2319_v56 = vadd.f32 %v3004_v54, %v3551_v5 }
 0x37f   : > { %v2310_v57 = vpop.f32.mrf.mxu1 }
 0x380   : > { %2411 = vst [vmem:[%s3557_s25 + $0x1b0] sm:$0xff] %v2319_v56  ;;  %v2311_v58 = vadd.f32 %v3551_v5, %v2310_v57 }
 0x381   : > { %v3005_v55 = vpop.f32.mrf.mxu1 }
 0x382   : > { %2409 = vst [vmem:[%s3557_s25 + $0x1a0] sm:$0xff] %v2311_v58  ;;  %v2322_v59 = vadd.f32 %v3005_v55, %v3551_v5 }
 0x383   : > { %v2313_v60 = vpop.f32.mrf.mxu1 }
 0x384   : > { %2412 = vst [vmem:[%s3557_s25 + $0x1b8] sm:$0xff] %v2322_v59  ;;  %v2314_v61 = vadd.f32 %v3551_v5, %v2313_v60 }
 0x386   : > { %2410 = vst [vmem:[%s3557_s25 + $0x1a8] sm:$0xff] %v2314_v61 }
 0x38d   : > { %v3008_v62 = vpop.f32.mrf.mxu1 }
 0x38e   : > { %v2335_v63 = vadd.f32 %v3008_v62, %v3551_v5 }
 0x38f   : > { %v2326_v1 = vpop.f32.mrf.mxu1 }
 0x390   : > { %2415 = vst [vmem:[%s3557_s25 + $0x1d0] sm:$0xff] %v2335_v63  ;;  %v2327_v2 = vadd.f32 %v3551_v5, %v2326_v1 }
 0x391   : > { %v3009_v3 = vpop.f32.mrf.mxu1 }
 0x392   : > { %2413 = vst [vmem:[%s3557_s25 + $0x1c0] sm:$0xff] %v2327_v2  ;;  %v2338_v45 = vadd.f32 %v3009_v3, %v3551_v5 }
 0x393   : > { %v2329_v4 = vpop.f32.mrf.mxu1 }
 0x394   : > { %2416 = vst [vmem:[%s3557_s25 + $0x1d8] sm:$0xff] %v2338_v45  ;;  %v2330_v7 = vadd.f32 %v3551_v5, %v2329_v4 }
 0x396   : > { %2414 = vst [vmem:[%s3557_s25 + $0x1c8] sm:$0xff] %v2330_v7 }
 0x39d   : > { %v3012_v8 = vpop.f32.mrf.mxu1 }
 0x39e   : > { %v2351_v9 = vadd.f32 %v3012_v8, %v3551_v5 }
 0x39f   : > { %v2342_v10 = vpop.f32.mrf.mxu1 }
 0x3a0   : > { %2419 = vst [vmem:[%s3557_s25 + $0x1f0] sm:$0xff] %v2351_v9  ;;  %v2343_v11 = vadd.f32 %v3551_v5, %v2342_v10 }
 0x3a1   : > { %v3013_v13 = vpop.f32.mrf.mxu1 }
 0x3a2   : > { %2417 = vst [vmem:[%s3557_s25 + $0x1e0] sm:$0xff] %v2343_v11  ;;  %v2354_v14 = vadd.f32 %v3013_v13, %v3551_v5 }
 0x3a3   : > { %v2345_v15 = vpop.f32.mrf.mxu1 }
 0x3a4   : > { %2420 = vst [vmem:[%s3557_s25 + $0x1f8] sm:$0xff] %v2354_v14  ;;  %v2346_v6 = vadd.f32 %v3551_v5, %v2345_v15 }
 0x3a6   : > { %2418 = vst [vmem:[%s3557_s25 + $0x1e8] sm:$0xff] %v2346_v6 }
 0x3a7 PF: > { %s19_s30 = sadd.s32 1, %s3125_s30  }
 0x3a8   : > { %p16_p4 = scmp.ge.s32.totalorder %s19_s30, 4  }
 0x3aa   :  { %18 = sbr.rel (!%p16_p4) target bundleno = 1 (0x1), region = 92 }

</bundles_post_ra>
